<compile_context>
chip_gen: v7x
topology: tpu7x:2x2x1
jax: 0.10.0
libtpu: 0.0.40
codegen_flags: <defaults>
</compile_context>

<pallas_src>
import numpy as np
import jax
import jax.numpy as jnp
from jax.experimental import pallas as pl
from jax.experimental.pallas import tpu as pltpu


# ----------------------------------------------------------------------------
# Host-side folding of a Conv2d into (S, B, bias) matmul form.
# ----------------------------------------------------------------------------
def _fold_conv(w, b, hin, win, stride, pad):
    """w: (Cout, Cin, K, K) PyTorch layout.  Returns S (T,Hout,Hin),
    B (T, Win*Cin, Wout*Cout), bias_row (1, Wout*Cout) or None, hout, wout."""
    cout, cin, kk, _ = w.shape
    hout = (hin + 2 * pad - kk) // stride + 1
    wout = (win + 2 * pad - kk) // stride + 1
    s_list, b_list = [], []
    for kh in range(kk):
        s_mat = np.zeros((hout, hin), np.float32)
        for oh in range(hout):
            r = stride * oh + kh - pad
            if 0 <= r < hin:
                s_mat[oh, r] = 1.0
        if not s_mat.any():
            continue  # this kh tap only ever reads zero padding
        b_mat = np.zeros((win, cin, wout, cout), np.float32)
        for ow in range(wout):
            for kw in range(kk):
                c = stride * ow + kw - pad
                if 0 <= c < win:
                    b_mat[c, :, ow, :] = w[:, :, kh, kw].T  # (Cin, Cout)
        s_list.append(s_mat)
        b_list.append(b_mat.reshape(win * cin, wout * cout))
    S = np.stack(s_list, 0)
    B = np.stack(b_list, 0)
    bias_row = None
    if b is not None:
        bias_row = np.tile(np.asarray(b, np.float32), wout).reshape(1, wout * cout)
    return S, B, bias_row, hout, wout


def build_discriminator_params(key, image_size=16, conv_dim=64, c_dim=5,
                               repeat_num=4):
    """Deterministic init of Discriminator2 params + folding into matmul form."""
    assert image_size % (2 ** repeat_num) == 0

    trunk_cfg = [(3, conv_dim)]
    curr = conv_dim
    for _ in range(1, repeat_num):
        trunk_cfg.append((curr, curr * 2))
        curr *= 2
    ksz = image_size // (2 ** repeat_num)

    # Raw PyTorch-layout weights (Cout, Cin, K, K), kaiming-uniform-ish init.
    raw_trunk = []
    for (ci, co) in trunk_cfg:
        key, wk, bk = jax.random.split(key, 3)
        bound = 1.0 / np.sqrt(ci * 16)
        w = np.asarray(jax.random.uniform(wk, (co, ci, 4, 4), jnp.float32,
                                          -bound, bound))
        b = np.asarray(jax.random.uniform(bk, (co,), jnp.float32,
                                          -bound, bound))
        raw_trunk.append((w, b))
    key, k1, k2 = jax.random.split(key, 3)
    b1 = 1.0 / np.sqrt(curr * 9)
    w_src = np.asarray(jax.random.uniform(k1, (1, curr, 3, 3), jnp.float32,
                                          -b1, b1))
    b2 = 1.0 / np.sqrt(curr * ksz * ksz)
    w_cls = np.asarray(jax.random.uniform(k2, (c_dim, curr, ksz, ksz),
                                          jnp.float32, -b2, b2))

    folded, skip_s = [], []
    hh = ww = image_size
    # main trunk: Conv2d(k=4, s=2, p=1) + LeakyReLU, bias=True
    for (w, b) in raw_trunk:
        S, B, bias, hh, ww = _fold_conv(w, b, hh, ww, stride=2, pad=1)
        folded.append((jnp.asarray(S), jnp.asarray(B), jnp.asarray(bias)))
        skip_s.append(False)
    # conv1 (k=3, s=1, p=1, no bias) and conv2 (k=ksz, s=1, p=0, no bias),
    # both applied to the trunk output h.
    for (w, st, pd) in ((w_src, 1, 1), (w_cls, 1, 0)):
        S, B, _, _, _ = _fold_conv(w, None, hh, ww, stride=st, pad=pd)
        folded.append((jnp.asarray(S), jnp.asarray(B), None))
        skip_s.append(S.shape[0] == 1 and S.shape[1] == S.shape[2] and
                      bool(np.array_equal(S[0],
                                          np.eye(S.shape[1], dtype=np.float32))))

    meta = dict(src_spatial=(hh, ww), cls_dim=c_dim, skip_s=tuple(skip_s))
    raw = dict(trunk=raw_trunk, conv_src=w_src, conv_cls=w_cls)
    return folded, meta, raw


# ----------------------------------------------------------------------------
# The fused Pallas kernel: whole Discriminator2 forward for one image.
# ----------------------------------------------------------------------------
def _make_disc_kernel(has_bias, skip_s):
    n_layers = len(has_bias)

    def _conv(a, s_ref, b_ref, bias_ref, skip, leaky):
        n_taps = b_ref.shape[0]
        acc = None
        for t in range(n_taps):
            if skip:                                  # S is a 1x1 identity
                g = a
            else:                                     # row gather as matmul
                g = jnp.dot(s_ref[t], a, preferred_element_type=jnp.float32)
            z = jnp.dot(g, b_ref[t], preferred_element_type=jnp.float32)
            acc = z if acc is None else acc + z
        if bias_ref is not None:
            acc = acc + bias_ref[...]
        if leaky:
            acc = jnp.maximum(acc, 0.01 * acc)        # LeakyReLU(0.01)
        return acc

    def kernel(*refs):
        pos = 0
        x_ref = refs[pos]; pos += 1
        layers = []
        for li in range(n_layers):
            s_ref, b_ref = refs[pos], refs[pos + 1]
            pos += 2
            bias_ref = None
            if has_bias[li]:
                bias_ref = refs[pos]
                pos += 1
            layers.append((s_ref, b_ref, bias_ref, skip_s[li]))
        out_src_ref, out_cls_ref = refs[pos], refs[pos + 1]

        a = x_ref[0]                                   # (H, W*3) f32
        for (s_ref, b_ref, bias_ref, skip) in layers[:-2]:
            a = _conv(a, s_ref, b_ref, bias_ref, skip, leaky=True)
        h = a                                          # trunk output
        s_ref, b_ref, bias_ref, skip = layers[-2]
        out_src_ref[0] = _conv(h, s_ref, b_ref, bias_ref, skip,
                               leaky=False).astype(out_src_ref.dtype)
        s_ref, b_ref, bias_ref, skip = layers[-1]
        out_cls_ref[0] = _conv(h, s_ref, b_ref, bias_ref, skip,
                               leaky=False).astype(out_cls_ref.dtype)

    return kernel


def discriminator2_forward(x_nchw, folded, meta):
    n, c, h, w = x_nchw.shape
    # Lane-dense (H, W*C) layout; this is the only wrapper-side layout op and
    # touches only the tiny network input.
    x = jnp.transpose(x_nchw, (0, 2, 3, 1)).reshape(n, h, w * c)
    x = x.astype(jnp.float32)

    src_h, src_w = meta["src_spatial"]
    c_dim = meta["cls_dim"]
    skip_s = meta["skip_s"]
    has_bias = tuple(b is not None for (_, _, b) in folded)

    inputs = [x]
    in_specs = [pl.BlockSpec((1, h, w * c), lambda i: (i, 0, 0))]
    for (S, B, bias) in folded:
        inputs += [S, B]
        in_specs += [pl.BlockSpec(S.shape, lambda i: (0, 0, 0)),
                     pl.BlockSpec(B.shape, lambda i: (0, 0, 0))]
        if bias is not None:
            inputs.append(bias)
            in_specs.append(pl.BlockSpec(bias.shape, lambda i: (0, 0)))

    out_shape = (jax.ShapeDtypeStruct((n, src_h, src_w), jnp.float32),
                 jax.ShapeDtypeStruct((n, 1, c_dim), jnp.float32))
    out_specs = (pl.BlockSpec((1, src_h, src_w), lambda i: (i, 0, 0)),
                 pl.BlockSpec((1, 1, c_dim), lambda i: (i, 0, 0)))

    out_src, out_cls = pl.pallas_call(
        _make_disc_kernel(has_bias, skip_s),
        grid=(n,),
        in_specs=in_specs,
        out_specs=out_specs,
        out_shape=out_shape,
        compiler_params=pltpu.CompilerParams(
            dimension_semantics=("parallel",),
            vmem_limit_bytes=48 * 1024 * 1024),
    )(*inputs)

    out_src = out_src.reshape(n, 1, src_h, src_w)   # conv1 has Cout=1
    out_cls = out_cls.reshape(n, c_dim)             # matches .view(N, c_dim)
    return out_src, out_cls


# ----------------------------------------------------------------------------
# Plain-XLA reference of the same module (for a self-check).
# ----------------------------------------------------------------------------
def reference_forward(x, raw):
    dn = ("NCHW", "OIHW", "NCHW")
    hp = jax.lax.Precision.HIGHEST
    h = x
    for (w, b) in raw["trunk"]:
        h = jax.lax.conv_general_dilated(h, jnp.asarray(w), (2, 2),
                                         ((1, 1), (1, 1)),
                                         dimension_numbers=dn, precision=hp)
        h = h + jnp.asarray(b).reshape(1, -1, 1, 1)
        h = jnp.where(h > 0, h, 0.01 * h)
    src = jax.lax.conv_general_dilated(h, jnp.asarray(raw["conv_src"]), (1, 1),
                                       ((1, 1), (1, 1)),
                                       dimension_numbers=dn, precision=hp)
    cls = jax.lax.conv_general_dilated(h, jnp.asarray(raw["conv_cls"]), (1, 1),
                                       ((0, 0), (0, 0)),
                                       dimension_numbers=dn, precision=hp)
    return src, cls.reshape(cls.shape[0], cls.shape[1])


if __name__ == "__main__":
    key = jax.random.PRNGKey(0)
    kx, kp = jax.random.split(key)

    BATCH, IMAGE_SIZE, CONV_DIM, C_DIM, REPEAT_NUM = 2, 16, 64, 5, 4
    folded, meta, raw = build_discriminator_params(
        kp, image_size=IMAGE_SIZE, conv_dim=CONV_DIM, c_dim=C_DIM,
        repeat_num=REPEAT_NUM)

    x = jax.random.normal(kx, (BATCH, 3, IMAGE_SIZE, IMAGE_SIZE), jnp.float32)

    fwd = jax.jit(lambda xx, pp: discriminator2_forward(xx, pp, meta))
    out_src, out_cls = fwd(x, folded)
    jax.block_until_ready((out_src, out_cls))

    assert out_src.shape == (BATCH, 1, 1, 1), out_src.shape
    assert out_cls.shape == (BATCH, C_DIM), out_cls.shape

    ref_src, ref_cls = reference_forward(x, raw)
    err_src = float(jnp.max(jnp.abs(out_src - ref_src)))
    err_cls = float(jnp.max(jnp.abs(out_cls - ref_cls)))
    assert err_src < 2e-3 and err_cls < 2e-3, (err_src, err_cls)

    print("KERNEL_OK")
</pallas_src>

<mosaic_0001>
module attributes {stable_mosaic.version = 11 : i64} {
  func.func @kernel(%arg0: i32, %arg1: memref<1x16x48xf32, #tpu.memory_space<vmem>>, %arg2: memref<4x8x16xf32, #tpu.memory_space<vmem>>, %arg3: memref<4x48x512xf32, #tpu.memory_space<vmem>>, %arg4: memref<1x512xf32, #tpu.memory_space<vmem>>, %arg5: memref<4x4x8xf32, #tpu.memory_space<vmem>>, %arg6: memref<4x512x512xf32, #tpu.memory_space<vmem>>, %arg7: memref<1x512xf32, #tpu.memory_space<vmem>>, %arg8: memref<4x2x4xf32, #tpu.memory_space<vmem>>, %arg9: memref<4x512x512xf32, #tpu.memory_space<vmem>>, %arg10: memref<1x512xf32, #tpu.memory_space<vmem>>, %arg11: memref<2x1x2xf32, #tpu.memory_space<vmem>>, %arg12: memref<2x512x512xf32, #tpu.memory_space<vmem>>, %arg13: memref<1x512xf32, #tpu.memory_space<vmem>>, %arg14: memref<1x1x1xf32, #tpu.memory_space<vmem>>, %arg15: memref<1x512x1xf32, #tpu.memory_space<vmem>>, %arg16: memref<1x1x1xf32, #tpu.memory_space<vmem>>, %arg17: memref<1x512x5xf32, #tpu.memory_space<vmem>>, %arg18: memref<1x1x1xf32, #tpu.memory_space<vmem>>, %arg19: memref<1x1x5xf32, #tpu.memory_space<vmem>>) attributes {dimension_semantics = [#tpu.dimension_semantics<parallel>], iteration_bounds = array<i64: 2>, scalar_prefetch = 0 : i64, scratch_operands = 0 : i64, tpu.core_type = #tpu.core_type<tc>, window_params = [{transform_indices = @transform_0, window_bounds = array<i64: 1, 16, 48>}, {pipeline_mode = #tpu.pipeline_mode<synchronous>, transform_indices = @transform_1, window_bounds = array<i64: 4, 8, 16>}, {pipeline_mode = #tpu.pipeline_mode<synchronous>, transform_indices = @transform_2, window_bounds = array<i64: 4, 48, 512>}, {pipeline_mode = #tpu.pipeline_mode<synchronous>, transform_indices = @transform_3, window_bounds = array<i64: 1, 512>}, {pipeline_mode = #tpu.pipeline_mode<synchronous>, transform_indices = @transform_4, window_bounds = array<i64: 4, 4, 8>}, {pipeline_mode = #tpu.pipeline_mode<synchronous>, transform_indices = @transform_5, window_bounds = array<i64: 4, 512, 512>}, {pipeline_mode = #tpu.pipeline_mode<synchronous>, transform_indices = @transform_6, window_bounds = array<i64: 1, 512>}, {pipeline_mode = #tpu.pipeline_mode<synchronous>, transform_indices = @transform_7, window_bounds = array<i64: 4, 2, 4>}, {pipeline_mode = #tpu.pipeline_mode<synchronous>, transform_indices = @transform_8, window_bounds = array<i64: 4, 512, 512>}, {pipeline_mode = #tpu.pipeline_mode<synchronous>, transform_indices = @transform_9, window_bounds = array<i64: 1, 512>}, {pipeline_mode = #tpu.pipeline_mode<synchronous>, transform_indices = @transform_10, window_bounds = array<i64: 2, 1, 2>}, {pipeline_mode = #tpu.pipeline_mode<synchronous>, transform_indices = @transform_11, window_bounds = array<i64: 2, 512, 512>}, {pipeline_mode = #tpu.pipeline_mode<synchronous>, transform_indices = @transform_12, window_bounds = array<i64: 1, 512>}, {pipeline_mode = #tpu.pipeline_mode<synchronous>, transform_indices = @transform_13, window_bounds = array<i64: 1, 1, 1>}, {pipeline_mode = #tpu.pipeline_mode<synchronous>, transform_indices = @transform_14, window_bounds = array<i64: 1, 512, 1>}, {pipeline_mode = #tpu.pipeline_mode<synchronous>, transform_indices = @transform_15, window_bounds = array<i64: 1, 1, 1>}, {pipeline_mode = #tpu.pipeline_mode<synchronous>, transform_indices = @transform_16, window_bounds = array<i64: 1, 512, 5>}, {transform_indices = @transform_17, window_bounds = array<i64: 1, 1, 1>}, {transform_indices = @transform_18, window_bounds = array<i64: 1, 1, 5>}]} {
    %c0 = arith.constant 0 : index
    %c0_0 = arith.constant 0 : index
    %c0_1 = arith.constant 0 : index
    %0 = vector.load %arg1[%c0, %c0_0, %c0_1] : memref<1x16x48xf32, #tpu.memory_space<vmem>>, vector<1x16x48xf32>
    %1 = vector.shape_cast %0 : vector<1x16x48xf32> to vector<16x48xf32>
    %c0_2 = arith.constant 0 : index
    %c0_3 = arith.constant 0 : index
    %c0_4 = arith.constant 0 : index
    %2 = vector.load %arg2[%c0_2, %c0_3, %c0_4] : memref<4x8x16xf32, #tpu.memory_space<vmem>>, vector<1x8x16xf32>
    %3 = vector.shape_cast %2 : vector<1x8x16xf32> to vector<8x16xf32>
    %cst = arith.constant dense<0.000000e+00> : vector<8x48xf32>
    %4 = tpu.matmul %3, %1, %cst {dimension_numbers = #tpu.dot_dimension_numbers<[1], [0], [0], [1], [0, 0, 1, 1], [], []>} : vector<8x16xf32>, vector<16x48xf32>, vector<8x48xf32> -> vector<8x48xf32>
    %c0_5 = arith.constant 0 : index
    %c0_6 = arith.constant 0 : index
    %c0_7 = arith.constant 0 : index
    %5 = vector.load %arg3[%c0_5, %c0_6, %c0_7] : memref<4x48x512xf32, #tpu.memory_space<vmem>>, vector<1x48x512xf32>
    %6 = vector.shape_cast %5 : vector<1x48x512xf32> to vector<48x512xf32>
    %cst_8 = arith.constant dense<0.000000e+00> : vector<8x512xf32>
    %7 = tpu.matmul %4, %6, %cst_8 {dimension_numbers = #tpu.dot_dimension_numbers<[1], [0], [0], [1], [0, 0, 1, 1], [], []>} : vector<8x48xf32>, vector<48x512xf32>, vector<8x512xf32> -> vector<8x512xf32>
    %c1 = arith.constant 1 : index
    %c0_9 = arith.constant 0 : index
    %c0_10 = arith.constant 0 : index
    %8 = vector.load %arg2[%c1, %c0_9, %c0_10] : memref<4x8x16xf32, #tpu.memory_space<vmem>>, vector<1x8x16xf32>
    %9 = vector.shape_cast %8 : vector<1x8x16xf32> to vector<8x16xf32>
    %cst_11 = arith.constant dense<0.000000e+00> : vector<8x48xf32>
    %10 = tpu.matmul %9, %1, %cst_11 {dimension_numbers = #tpu.dot_dimension_numbers<[1], [0], [0], [1], [0, 0, 1, 1], [], []>} : vector<8x16xf32>, vector<16x48xf32>, vector<8x48xf32> -> vector<8x48xf32>
    %c1_12 = arith.constant 1 : index
    %c0_13 = arith.constant 0 : index
    %c0_14 = arith.constant 0 : index
    %11 = vector.load %arg3[%c1_12, %c0_13, %c0_14] : memref<4x48x512xf32, #tpu.memory_space<vmem>>, vector<1x48x512xf32>
    %12 = vector.shape_cast %11 : vector<1x48x512xf32> to vector<48x512xf32>
    %cst_15 = arith.constant dense<0.000000e+00> : vector<8x512xf32>
    %13 = tpu.matmul %10, %12, %cst_15 {dimension_numbers = #tpu.dot_dimension_numbers<[1], [0], [0], [1], [0, 0, 1, 1], [], []>} : vector<8x48xf32>, vector<48x512xf32>, vector<8x512xf32> -> vector<8x512xf32>
    %14 = arith.addf %7, %13 : vector<8x512xf32>
    %c2 = arith.constant 2 : index
    %c0_16 = arith.constant 0 : index
    %c0_17 = arith.constant 0 : index
    %15 = vector.load %arg2[%c2, %c0_16, %c0_17] : memref<4x8x16xf32, #tpu.memory_space<vmem>>, vector<1x8x16xf32>
    %16 = vector.shape_cast %15 : vector<1x8x16xf32> to vector<8x16xf32>
    %cst_18 = arith.constant dense<0.000000e+00> : vector<8x48xf32>
    %17 = tpu.matmul %16, %1, %cst_18 {dimension_numbers = #tpu.dot_dimension_numbers<[1], [0], [0], [1], [0, 0, 1, 1], [], []>} : vector<8x16xf32>, vector<16x48xf32>, vector<8x48xf32> -> vector<8x48xf32>
    %c2_19 = arith.constant 2 : index
    %c0_20 = arith.constant 0 : index
    %c0_21 = arith.constant 0 : index
    %18 = vector.load %arg3[%c2_19, %c0_20, %c0_21] : memref<4x48x512xf32, #tpu.memory_space<vmem>>, vector<1x48x512xf32>
    %19 = vector.shape_cast %18 : vector<1x48x512xf32> to vector<48x512xf32>
    %cst_22 = arith.constant dense<0.000000e+00> : vector<8x512xf32>
    %20 = tpu.matmul %17, %19, %cst_22 {dimension_numbers = #tpu.dot_dimension_numbers<[1], [0], [0], [1], [0, 0, 1, 1], [], []>} : vector<8x48xf32>, vector<48x512xf32>, vector<8x512xf32> -> vector<8x512xf32>
    %21 = arith.addf %14, %20 : vector<8x512xf32>
    %c3 = arith.constant 3 : index
    %c0_23 = arith.constant 0 : index
    %c0_24 = arith.constant 0 : index
    %22 = vector.load %arg2[%c3, %c0_23, %c0_24] : memref<4x8x16xf32, #tpu.memory_space<vmem>>, vector<1x8x16xf32>
    %23 = vector.shape_cast %22 : vector<1x8x16xf32> to vector<8x16xf32>
    %cst_25 = arith.constant dense<0.000000e+00> : vector<8x48xf32>
    %24 = tpu.matmul %23, %1, %cst_25 {dimension_numbers = #tpu.dot_dimension_numbers<[1], [0], [0], [1], [0, 0, 1, 1], [], []>} : vector<8x16xf32>, vector<16x48xf32>, vector<8x48xf32> -> vector<8x48xf32>
    %c3_26 = arith.constant 3 : index
    %c0_27 = arith.constant 0 : index
    %c0_28 = arith.constant 0 : index
    %25 = vector.load %arg3[%c3_26, %c0_27, %c0_28] : memref<4x48x512xf32, #tpu.memory_space<vmem>>, vector<1x48x512xf32>
    %26 = vector.shape_cast %25 : vector<1x48x512xf32> to vector<48x512xf32>
    %cst_29 = arith.constant dense<0.000000e+00> : vector<8x512xf32>
    %27 = tpu.matmul %24, %26, %cst_29 {dimension_numbers = #tpu.dot_dimension_numbers<[1], [0], [0], [1], [0, 0, 1, 1], [], []>} : vector<8x48xf32>, vector<48x512xf32>, vector<8x512xf32> -> vector<8x512xf32>
    %28 = arith.addf %21, %27 : vector<8x512xf32>
    %c0_30 = arith.constant 0 : index
    %c0_31 = arith.constant 0 : index
    %29 = vector.load %arg4[%c0_30, %c0_31] : memref<1x512xf32, #tpu.memory_space<vmem>>, vector<1x512xf32>
    %30 = vector.broadcast %29 : vector<1x512xf32> to vector<8x512xf32>
    %31 = arith.addf %28, %30 : vector<8x512xf32>
    %cst_32 = arith.constant 0.00999999977 : f32
    %32 = vector.broadcast %cst_32 : f32 to vector<8x512xf32>
    %33 = arith.mulf %32, %31 : vector<8x512xf32>
    %34 = arith.maximumf %31, %33 : vector<8x512xf32>
    %c0_33 = arith.constant 0 : index
    %c0_34 = arith.constant 0 : index
    %c0_35 = arith.constant 0 : index
    %35 = vector.load %arg5[%c0_33, %c0_34, %c0_35] : memref<4x4x8xf32, #tpu.memory_space<vmem>>, vector<1x4x8xf32>
    %36 = vector.shape_cast %35 : vector<1x4x8xf32> to vector<4x8xf32>
    %cst_36 = arith.constant dense<0.000000e+00> : vector<4x512xf32>
    %37 = tpu.matmul %36, %34, %cst_36 {dimension_numbers = #tpu.dot_dimension_numbers<[1], [0], [0], [1], [0, 0, 1, 1], [], []>} : vector<4x8xf32>, vector<8x512xf32>, vector<4x512xf32> -> vector<4x512xf32>
    %c0_37 = arith.constant 0 : index
    %c0_38 = arith.constant 0 : index
    %c0_39 = arith.constant 0 : index
    %38 = vector.load %arg6[%c0_37, %c0_38, %c0_39] : memref<4x512x512xf32, #tpu.memory_space<vmem>>, vector<1x512x512xf32>
    %39 = vector.shape_cast %38 : vector<1x512x512xf32> to vector<512x512xf32>
    %cst_40 = arith.constant dense<0.000000e+00> : vector<4x512xf32>
    %40 = tpu.matmul %37, %39, %cst_40 {dimension_numbers = #tpu.dot_dimension_numbers<[1], [0], [0], [1], [0, 0, 1, 1], [], []>} : vector<4x512xf32>, vector<512x512xf32>, vector<4x512xf32> -> vector<4x512xf32>
    %c1_41 = arith.constant 1 : index
    %c0_42 = arith.constant 0 : index
    %c0_43 = arith.constant 0 : index
    %41 = vector.load %arg5[%c1_41, %c0_42, %c0_43] : memref<4x4x8xf32, #tpu.memory_space<vmem>>, vector<1x4x8xf32>
    %42 = vector.shape_cast %41 : vector<1x4x8xf32> to vector<4x8xf32>
    %cst_44 = arith.constant dense<0.000000e+00> : vector<4x512xf32>
    %43 = tpu.matmul %42, %34, %cst_44 {dimension_numbers = #tpu.dot_dimension_numbers<[1], [0], [0], [1], [0, 0, 1, 1], [], []>} : vector<4x8xf32>, vector<8x512xf32>, vector<4x512xf32> -> vector<4x512xf32>
    %c1_45 = arith.constant 1 : index
    %c0_46 = arith.constant 0 : index
    %c0_47 = arith.constant 0 : index
    %44 = vector.load %arg6[%c1_45, %c0_46, %c0_47] : memref<4x512x512xf32, #tpu.memory_space<vmem>>, vector<1x512x512xf32>
    %45 = vector.shape_cast %44 : vector<1x512x512xf32> to vector<512x512xf32>
    %cst_48 = arith.constant dense<0.000000e+00> : vector<4x512xf32>
    %46 = tpu.matmul %43, %45, %cst_48 {dimension_numbers = #tpu.dot_dimension_numbers<[1], [0], [0], [1], [0, 0, 1, 1], [], []>} : vector<4x512xf32>, vector<512x512xf32>, vector<4x512xf32> -> vector<4x512xf32>
    %47 = arith.addf %40, %46 : vector<4x512xf32>
    %c2_49 = arith.constant 2 : index
    %c0_50 = arith.constant 0 : index
    %c0_51 = arith.constant 0 : index
    %48 = vector.load %arg5[%c2_49, %c0_50, %c0_51] : memref<4x4x8xf32, #tpu.memory_space<vmem>>, vector<1x4x8xf32>
    %49 = vector.shape_cast %48 : vector<1x4x8xf32> to vector<4x8xf32>
    %cst_52 = arith.constant dense<0.000000e+00> : vector<4x512xf32>
    %50 = tpu.matmul %49, %34, %cst_52 {dimension_numbers = #tpu.dot_dimension_numbers<[1], [0], [0], [1], [0, 0, 1, 1], [], []>} : vector<4x8xf32>, vector<8x512xf32>, vector<4x512xf32> -> vector<4x512xf32>
    %c2_53 = arith.constant 2 : index
    %c0_54 = arith.constant 0 : index
    %c0_55 = arith.constant 0 : index
    %51 = vector.load %arg6[%c2_53, %c0_54, %c0_55] : memref<4x512x512xf32, #tpu.memory_space<vmem>>, vector<1x512x512xf32>
    %52 = vector.shape_cast %51 : vector<1x512x512xf32> to vector<512x512xf32>
    %cst_56 = arith.constant dense<0.000000e+00> : vector<4x512xf32>
    %53 = tpu.matmul %50, %52, %cst_56 {dimension_numbers = #tpu.dot_dimension_numbers<[1], [0], [0], [1], [0, 0, 1, 1], [], []>} : vector<4x512xf32>, vector<512x512xf32>, vector<4x512xf32> -> vector<4x512xf32>
    %54 = arith.addf %47, %53 : vector<4x512xf32>
    %c3_57 = arith.constant 3 : index
    %c0_58 = arith.constant 0 : index
    %c0_59 = arith.constant 0 : index
    %55 = vector.load %arg5[%c3_57, %c0_58, %c0_59] : memref<4x4x8xf32, #tpu.memory_space<vmem>>, vector<1x4x8xf32>
    %56 = vector.shape_cast %55 : vector<1x4x8xf32> to vector<4x8xf32>
    %cst_60 = arith.constant dense<0.000000e+00> : vector<4x512xf32>
    %57 = tpu.matmul %56, %34, %cst_60 {dimension_numbers = #tpu.dot_dimension_numbers<[1], [0], [0], [1], [0, 0, 1, 1], [], []>} : vector<4x8xf32>, vector<8x512xf32>, vector<4x512xf32> -> vector<4x512xf32>
    %c3_61 = arith.constant 3 : index
    %c0_62 = arith.constant 0 : index
    %c0_63 = arith.constant 0 : index
    %58 = vector.load %arg6[%c3_61, %c0_62, %c0_63] : memref<4x512x512xf32, #tpu.memory_space<vmem>>, vector<1x512x512xf32>
    %59 = vector.shape_cast %58 : vector<1x512x512xf32> to vector<512x512xf32>
    %cst_64 = arith.constant dense<0.000000e+00> : vector<4x512xf32>
    %60 = tpu.matmul %57, %59, %cst_64 {dimension_numbers = #tpu.dot_dimension_numbers<[1], [0], [0], [1], [0, 0, 1, 1], [], []>} : vector<4x512xf32>, vector<512x512xf32>, vector<4x512xf32> -> vector<4x512xf32>
    %61 = arith.addf %54, %60 : vector<4x512xf32>
    %c0_65 = arith.constant 0 : index
    %c0_66 = arith.constant 0 : index
    %62 = vector.load %arg7[%c0_65, %c0_66] : memref<1x512xf32, #tpu.memory_space<vmem>>, vector<1x512xf32>
    %63 = vector.broadcast %62 : vector<1x512xf32> to vector<4x512xf32>
    %64 = arith.addf %61, %63 : vector<4x512xf32>
    %cst_67 = arith.constant 0.00999999977 : f32
    %65 = vector.broadcast %cst_67 : f32 to vector<4x512xf32>
    %66 = arith.mulf %65, %64 : vector<4x512xf32>
    %67 = arith.maximumf %64, %66 : vector<4x512xf32>
    %c0_68 = arith.constant 0 : index
    %c0_69 = arith.constant 0 : index
    %c0_70 = arith.constant 0 : index
    %68 = vector.load %arg8[%c0_68, %c0_69, %c0_70] : memref<4x2x4xf32, #tpu.memory_space<vmem>>, vector<1x2x4xf32>
    %69 = vector.shape_cast %68 : vector<1x2x4xf32> to vector<2x4xf32>
    %cst_71 = arith.constant dense<0.000000e+00> : vector<2x512xf32>
    %70 = tpu.matmul %69, %67, %cst_71 {dimension_numbers = #tpu.dot_dimension_numbers<[1], [0], [0], [1], [0, 0, 1, 1], [], []>} : vector<2x4xf32>, vector<4x512xf32>, vector<2x512xf32> -> vector<2x512xf32>
    %c0_72 = arith.constant 0 : index
    %c0_73 = arith.constant 0 : index
    %c0_74 = arith.constant 0 : index
    %71 = vector.load %arg9[%c0_72, %c0_73, %c0_74] : memref<4x512x512xf32, #tpu.memory_space<vmem>>, vector<1x512x512xf32>
    %72 = vector.shape_cast %71 : vector<1x512x512xf32> to vector<512x512xf32>
    %cst_75 = arith.constant dense<0.000000e+00> : vector<2x512xf32>
    %73 = tpu.matmul %70, %72, %cst_75 {dimension_numbers = #tpu.dot_dimension_numbers<[1], [0], [0], [1], [0, 0, 1, 1], [], []>} : vector<2x512xf32>, vector<512x512xf32>, vector<2x512xf32> -> vector<2x512xf32>
    %c1_76 = arith.constant 1 : index
    %c0_77 = arith.constant 0 : index
    %c0_78 = arith.constant 0 : index
    %74 = vector.load %arg8[%c1_76, %c0_77, %c0_78] : memref<4x2x4xf32, #tpu.memory_space<vmem>>, vector<1x2x4xf32>
    %75 = vector.shape_cast %74 : vector<1x2x4xf32> to vector<2x4xf32>
    %cst_79 = arith.constant dense<0.000000e+00> : vector<2x512xf32>
    %76 = tpu.matmul %75, %67, %cst_79 {dimension_numbers = #tpu.dot_dimension_numbers<[1], [0], [0], [1], [0, 0, 1, 1], [], []>} : vector<2x4xf32>, vector<4x512xf32>, vector<2x512xf32> -> vector<2x512xf32>
    %c1_80 = arith.constant 1 : index
    %c0_81 = arith.constant 0 : index
    %c0_82 = arith.constant 0 : index
    %77 = vector.load %arg9[%c1_80, %c0_81, %c0_82] : memref<4x512x512xf32, #tpu.memory_space<vmem>>, vector<1x512x512xf32>
    %78 = vector.shape_cast %77 : vector<1x512x512xf32> to vector<512x512xf32>
    %cst_83 = arith.constant dense<0.000000e+00> : vector<2x512xf32>
    %79 = tpu.matmul %76, %78, %cst_83 {dimension_numbers = #tpu.dot_dimension_numbers<[1], [0], [0], [1], [0, 0, 1, 1], [], []>} : vector<2x512xf32>, vector<512x512xf32>, vector<2x512xf32> -> vector<2x512xf32>
    %80 = arith.addf %73, %79 : vector<2x512xf32>
    %c2_84 = arith.constant 2 : index
    %c0_85 = arith.constant 0 : index
    %c0_86 = arith.constant 0 : index
    %81 = vector.load %arg8[%c2_84, %c0_85, %c0_86] : memref<4x2x4xf32, #tpu.memory_space<vmem>>, vector<1x2x4xf32>
    %82 = vector.shape_cast %81 : vector<1x2x4xf32> to vector<2x4xf32>
    %cst_87 = arith.constant dense<0.000000e+00> : vector<2x512xf32>
    %83 = tpu.matmul %82, %67, %cst_87 {dimension_numbers = #tpu.dot_dimension_numbers<[1], [0], [0], [1], [0, 0, 1, 1], [], []>} : vector<2x4xf32>, vector<4x512xf32>, vector<2x512xf32> -> vector<2x512xf32>
    %c2_88 = arith.constant 2 : index
    %c0_89 = arith.constant 0 : index
    %c0_90 = arith.constant 0 : index
    %84 = vector.load %arg9[%c2_88, %c0_89, %c0_90] : memref<4x512x512xf32, #tpu.memory_space<vmem>>, vector<1x512x512xf32>
    %85 = vector.shape_cast %84 : vector<1x512x512xf32> to vector<512x512xf32>
    %cst_91 = arith.constant dense<0.000000e+00> : vector<2x512xf32>
    %86 = tpu.matmul %83, %85, %cst_91 {dimension_numbers = #tpu.dot_dimension_numbers<[1], [0], [0], [1], [0, 0, 1, 1], [], []>} : vector<2x512xf32>, vector<512x512xf32>, vector<2x512xf32> -> vector<2x512xf32>
    %87 = arith.addf %80, %86 : vector<2x512xf32>
    %c3_92 = arith.constant 3 : index
    %c0_93 = arith.constant 0 : index
    %c0_94 = arith.constant 0 : index
    %88 = vector.load %arg8[%c3_92, %c0_93, %c0_94] : memref<4x2x4xf32, #tpu.memory_space<vmem>>, vector<1x2x4xf32>
    %89 = vector.shape_cast %88 : vector<1x2x4xf32> to vector<2x4xf32>
    %cst_95 = arith.constant dense<0.000000e+00> : vector<2x512xf32>
    %90 = tpu.matmul %89, %67, %cst_95 {dimension_numbers = #tpu.dot_dimension_numbers<[1], [0], [0], [1], [0, 0, 1, 1], [], []>} : vector<2x4xf32>, vector<4x512xf32>, vector<2x512xf32> -> vector<2x512xf32>
    %c3_96 = arith.constant 3 : index
    %c0_97 = arith.constant 0 : index
    %c0_98 = arith.constant 0 : index
    %91 = vector.load %arg9[%c3_96, %c0_97, %c0_98] : memref<4x512x512xf32, #tpu.memory_space<vmem>>, vector<1x512x512xf32>
    %92 = vector.shape_cast %91 : vector<1x512x512xf32> to vector<512x512xf32>
    %cst_99 = arith.constant dense<0.000000e+00> : vector<2x512xf32>
    %93 = tpu.matmul %90, %92, %cst_99 {dimension_numbers = #tpu.dot_dimension_numbers<[1], [0], [0], [1], [0, 0, 1, 1], [], []>} : vector<2x512xf32>, vector<512x512xf32>, vector<2x512xf32> -> vector<2x512xf32>
    %94 = arith.addf %87, %93 : vector<2x512xf32>
    %c0_100 = arith.constant 0 : index
    %c0_101 = arith.constant 0 : index
    %95 = vector.load %arg10[%c0_100, %c0_101] : memref<1x512xf32, #tpu.memory_space<vmem>>, vector<1x512xf32>
    %96 = vector.broadcast %95 : vector<1x512xf32> to vector<2x512xf32>
    %97 = arith.addf %94, %96 : vector<2x512xf32>
    %cst_102 = arith.constant 0.00999999977 : f32
    %98 = vector.broadcast %cst_102 : f32 to vector<2x512xf32>
    %99 = arith.mulf %98, %97 : vector<2x512xf32>
    %100 = arith.maximumf %97, %99 : vector<2x512xf32>
    %c0_103 = arith.constant 0 : index
    %c0_104 = arith.constant 0 : index
    %c0_105 = arith.constant 0 : index
    %101 = vector.load %arg11[%c0_103, %c0_104, %c0_105] : memref<2x1x2xf32, #tpu.memory_space<vmem>>, vector<1x1x2xf32>
    %102 = vector.shape_cast %101 : vector<1x1x2xf32> to vector<1x2xf32>
    %cst_106 = arith.constant dense<0.000000e+00> : vector<1x512xf32>
    %103 = tpu.matmul %102, %100, %cst_106 {dimension_numbers = #tpu.dot_dimension_numbers<[1], [0], [0], [1], [0, 0, 1, 1], [], []>} : vector<1x2xf32>, vector<2x512xf32>, vector<1x512xf32> -> vector<1x512xf32>
    %c0_107 = arith.constant 0 : index
    %c0_108 = arith.constant 0 : index
    %c0_109 = arith.constant 0 : index
    %104 = vector.load %arg12[%c0_107, %c0_108, %c0_109] : memref<2x512x512xf32, #tpu.memory_space<vmem>>, vector<1x512x512xf32>
    %105 = vector.shape_cast %104 : vector<1x512x512xf32> to vector<512x512xf32>
    %cst_110 = arith.constant dense<0.000000e+00> : vector<1x512xf32>
    %106 = tpu.matmul %103, %105, %cst_110 {dimension_numbers = #tpu.dot_dimension_numbers<[1], [0], [0], [1], [0, 0, 1, 1], [], []>} : vector<1x512xf32>, vector<512x512xf32>, vector<1x512xf32> -> vector<1x512xf32>
    %c1_111 = arith.constant 1 : index
    %c0_112 = arith.constant 0 : index
    %c0_113 = arith.constant 0 : index
    %107 = vector.load %arg11[%c1_111, %c0_112, %c0_113] : memref<2x1x2xf32, #tpu.memory_space<vmem>>, vector<1x1x2xf32>
    %108 = vector.shape_cast %107 : vector<1x1x2xf32> to vector<1x2xf32>
    %cst_114 = arith.constant dense<0.000000e+00> : vector<1x512xf32>
    %109 = tpu.matmul %108, %100, %cst_114 {dimension_numbers = #tpu.dot_dimension_numbers<[1], [0], [0], [1], [0, 0, 1, 1], [], []>} : vector<1x2xf32>, vector<2x512xf32>, vector<1x512xf32> -> vector<1x512xf32>
    %c1_115 = arith.constant 1 : index
    %c0_116 = arith.constant 0 : index
    %c0_117 = arith.constant 0 : index
    %110 = vector.load %arg12[%c1_115, %c0_116, %c0_117] : memref<2x512x512xf32, #tpu.memory_space<vmem>>, vector<1x512x512xf32>
    %111 = vector.shape_cast %110 : vector<1x512x512xf32> to vector<512x512xf32>
    %cst_118 = arith.constant dense<0.000000e+00> : vector<1x512xf32>
    %112 = tpu.matmul %109, %111, %cst_118 {dimension_numbers = #tpu.dot_dimension_numbers<[1], [0], [0], [1], [0, 0, 1, 1], [], []>} : vector<1x512xf32>, vector<512x512xf32>, vector<1x512xf32> -> vector<1x512xf32>
    %113 = arith.addf %106, %112 : vector<1x512xf32>
    %c0_119 = arith.constant 0 : index
    %c0_120 = arith.constant 0 : index
    %114 = vector.load %arg13[%c0_119, %c0_120] : memref<1x512xf32, #tpu.memory_space<vmem>>, vector<1x512xf32>
    %115 = arith.addf %113, %114 : vector<1x512xf32>
    %cst_121 = arith.constant 0.00999999977 : f32
    %116 = vector.broadcast %cst_121 : f32 to vector<1x512xf32>
    %117 = arith.mulf %116, %115 : vector<1x512xf32>
    %118 = arith.maximumf %115, %117 : vector<1x512xf32>
    %c0_122 = arith.constant 0 : index
    %c0_123 = arith.constant 0 : index
    %c0_124 = arith.constant 0 : index
    %119 = vector.load %arg15[%c0_122, %c0_123, %c0_124] : memref<1x512x1xf32, #tpu.memory_space<vmem>>, vector<1x512x1xf32>
    %120 = vector.shape_cast %119 : vector<1x512x1xf32> to vector<512x1xf32>
    %cst_125 = arith.constant dense<0.000000e+00> : vector<1x1xf32>
    %121 = tpu.matmul %118, %120, %cst_125 {dimension_numbers = #tpu.dot_dimension_numbers<[1], [0], [0], [1], [0, 0, 1, 1], [], []>} : vector<1x512xf32>, vector<512x1xf32>, vector<1x1xf32> -> vector<1x1xf32>
    %c0_126 = arith.constant 0 : index
    %c0_127 = arith.constant 0 : index
    %c0_128 = arith.constant 0 : index
    %122 = vector.load %arg18[%c0_126, %c0_127, %c0_128] : memref<1x1x1xf32, #tpu.memory_space<vmem>>, vector<1x1x1xf32>
    %123 = vector.shape_cast %122 : vector<1x1x1xf32> to vector<1x1xf32>
    %124 = vector.shape_cast %121 : vector<1x1xf32> to vector<1x1x1xf32>
    tpu.vector_store %arg18[%c0_126, %c0_127, %c0_128], %124 {strides = array<i32>} : memref<1x1x1xf32, #tpu.memory_space<vmem>>, vector<1x1x1xf32>,
    %c0_129 = arith.constant 0 : index
    %c0_130 = arith.constant 0 : index
    %c0_131 = arith.constant 0 : index
    %125 = vector.load %arg17[%c0_129, %c0_130, %c0_131] : memref<1x512x5xf32, #tpu.memory_space<vmem>>, vector<1x512x5xf32>
    %126 = vector.shape_cast %125 : vector<1x512x5xf32> to vector<512x5xf32>
    %cst_132 = arith.constant dense<0.000000e+00> : vector<1x5xf32>
    %127 = tpu.matmul %118, %126, %cst_132 {dimension_numbers = #tpu.dot_dimension_numbers<[1], [0], [0], [1], [0, 0, 1, 1], [], []>} : vector<1x512xf32>, vector<512x5xf32>, vector<1x5xf32> -> vector<1x5xf32>
    %c0_133 = arith.constant 0 : index
    %c0_134 = arith.constant 0 : index
    %c0_135 = arith.constant 0 : index
    %128 = vector.load %arg19[%c0_133, %c0_134, %c0_135] : memref<1x1x5xf32, #tpu.memory_space<vmem>>, vector<1x1x5xf32>
    %129 = vector.shape_cast %128 : vector<1x1x5xf32> to vector<1x5xf32>
    %130 = vector.shape_cast %127 : vector<1x5xf32> to vector<1x1x5xf32>
    tpu.vector_store %arg19[%c0_133, %c0_134, %c0_135], %130 {strides = array<i32>} : memref<1x1x5xf32, #tpu.memory_space<vmem>>, vector<1x1x5xf32>,
    return
  }
  func.func @transform_0(%arg0: i32) -> (i32, i32, i32) {
    %c0_i32 = arith.constant 0 : i32
    %c0_i32_0 = arith.constant 0 : i32
    %c0_i32_1 = arith.constant 0 : i32
    return %arg0, %c0_i32, %c0_i32_0 : i32, i32, i32
  }
  func.func @transform_1(%arg0: i32) -> (i32, i32, i32) {
    %c0_i32 = arith.constant 0 : i32
    %c0_i32_0 = arith.constant 0 : i32
    %c0_i32_1 = arith.constant 0 : i32
    %c0_i32_2 = arith.constant 0 : i32
    return %c0_i32, %c0_i32_0, %c0_i32_1 : i32, i32, i32
  }
  func.func @transform_2(%arg0: i32) -> (i32, i32, i32) {
    %c0_i32 = arith.constant 0 : i32
    %c0_i32_0 = arith.constant 0 : i32
    %c0_i32_1 = arith.constant 0 : i32
    %c0_i32_2 = arith.constant 0 : i32
    return %c0_i32, %c0_i32_0, %c0_i32_1 : i32, i32, i32
  }
  func.func @transform_3(%arg0: i32) -> (i32, i32) {
    %c0_i32 = arith.constant 0 : i32
    %c0_i32_0 = arith.constant 0 : i32
    %c0_i32_1 = arith.constant 0 : i32
    return %c0_i32, %c0_i32_0 : i32, i32
  }
  func.func @transform_4(%arg0: i32) -> (i32, i32, i32) {
    %c0_i32 = arith.constant 0 : i32
    %c0_i32_0 = arith.constant 0 : i32
    %c0_i32_1 = arith.constant 0 : i32
    %c0_i32_2 = arith.constant 0 : i32
    return %c0_i32, %c0_i32_0, %c0_i32_1 : i32, i32, i32
  }
  func.func @transform_5(%arg0: i32) -> (i32, i32, i32) {
    %c0_i32 = arith.constant 0 : i32
    %c0_i32_0 = arith.constant 0 : i32
    %c0_i32_1 = arith.constant 0 : i32
    %c0_i32_2 = arith.constant 0 : i32
    return %c0_i32, %c0_i32_0, %c0_i32_1 : i32, i32, i32
  }
  func.func @transform_6(%arg0: i32) -> (i32, i32) {
    %c0_i32 = arith.constant 0 : i32
    %c0_i32_0 = arith.constant 0 : i32
    %c0_i32_1 = arith.constant 0 : i32
    return %c0_i32, %c0_i32_0 : i32, i32
  }
  func.func @transform_7(%arg0: i32) -> (i32, i32, i32) {
    %c0_i32 = arith.constant 0 : i32
    %c0_i32_0 = arith.constant 0 : i32
    %c0_i32_1 = arith.constant 0 : i32
    %c0_i32_2 = arith.constant 0 : i32
    return %c0_i32, %c0_i32_0, %c0_i32_1 : i32, i32, i32
  }
  func.func @transform_8(%arg0: i32) -> (i32, i32, i32) {
    %c0_i32 = arith.constant 0 : i32
    %c0_i32_0 = arith.constant 0 : i32
    %c0_i32_1 = arith.constant 0 : i32
    %c0_i32_2 = arith.constant 0 : i32
    return %c0_i32, %c0_i32_0, %c0_i32_1 : i32, i32, i32
  }
  func.func @transform_9(%arg0: i32) -> (i32, i32) {
    %c0_i32 = arith.constant 0 : i32
    %c0_i32_0 = arith.constant 0 : i32
    %c0_i32_1 = arith.constant 0 : i32
    return %c0_i32, %c0_i32_0 : i32, i32
  }
  func.func @transform_10(%arg0: i32) -> (i32, i32, i32) {
    %c0_i32 = arith.constant 0 : i32
    %c0_i32_0 = arith.constant 0 : i32
    %c0_i32_1 = arith.constant 0 : i32
    %c0_i32_2 = arith.constant 0 : i32
    return %c0_i32, %c0_i32_0, %c0_i32_1 : i32, i32, i32
  }
  func.func @transform_11(%arg0: i32) -> (i32, i32, i32) {
    %c0_i32 = arith.constant 0 : i32
    %c0_i32_0 = arith.constant 0 : i32
    %c0_i32_1 = arith.constant 0 : i32
    %c0_i32_2 = arith.constant 0 : i32
    return %c0_i32, %c0_i32_0, %c0_i32_1 : i32, i32, i32
  }
  func.func @transform_12(%arg0: i32) -> (i32, i32) {
    %c0_i32 = arith.constant 0 : i32
    %c0_i32_0 = arith.constant 0 : i32
    %c0_i32_1 = arith.constant 0 : i32
    return %c0_i32, %c0_i32_0 : i32, i32
  }
  func.func @transform_13(%arg0: i32) -> (i32, i32, i32) {
    %c0_i32 = arith.constant 0 : i32
    %c0_i32_0 = arith.constant 0 : i32
    %c0_i32_1 = arith.constant 0 : i32
    %c0_i32_2 = arith.constant 0 : i32
    return %c0_i32, %c0_i32_0, %c0_i32_1 : i32, i32, i32
  }
  func.func @transform_14(%arg0: i32) -> (i32, i32, i32) {
    %c0_i32 = arith.constant 0 : i32
    %c0_i32_0 = arith.constant 0 : i32
    %c0_i32_1 = arith.constant 0 : i32
    %c0_i32_2 = arith.constant 0 : i32
    return %c0_i32, %c0_i32_0, %c0_i32_1 : i32, i32, i32
  }
  func.func @transform_15(%arg0: i32) -> (i32, i32, i32) {
    %c0_i32 = arith.constant 0 : i32
    %c0_i32_0 = arith.constant 0 : i32
    %c0_i32_1 = arith.constant 0 : i32
    %c0_i32_2 = arith.constant 0 : i32
    return %c0_i32, %c0_i32_0, %c0_i32_1 : i32, i32, i32
  }
  func.func @transform_16(%arg0: i32) -> (i32, i32, i32) {
    %c0_i32 = arith.constant 0 : i32
    %c0_i32_0 = arith.constant 0 : i32
    %c0_i32_1 = arith.constant 0 : i32
    %c0_i32_2 = arith.constant 0 : i32
    return %c0_i32, %c0_i32_0, %c0_i32_1 : i32, i32, i32
  }
  func.func @transform_17(%arg0: i32) -> (i32, i32, i32) {
    %c0_i32 = arith.constant 0 : i32
    %c0_i32_0 = arith.constant 0 : i32
    %c0_i32_1 = arith.constant 0 : i32
    return %arg0, %c0_i32, %c0_i32_0 : i32, i32, i32
  }
  func.func @transform_18(%arg0: i32) -> (i32, i32, i32) {
    %c0_i32 = arith.constant 0 : i32
    %c0_i32_0 = arith.constant 0 : i32
    %c0_i32_1 = arith.constant 0 : i32
    return %arg0, %c0_i32, %c0_i32_0 : i32, i32, i32
  }
}

</mosaic_0001>

<bundles_post_ra>
// kernel: _lambda_.1
= control target key start
LH: loop header
LB: loop body
LE: loop exit
PB: predicated region body
PF: predicated region fallthrough
CT: control target
= control target key end

     0   :  { %s14335_s0 = inlined_call_operand.vmem [shape: f32[2,16,48], index: 0, kind: input, shape index: {}]   ;;  %s14336_s1 = inlined_call_operand.hbm [shape: f32[4,8,16], index: 1, kind: input, shape index: {}]   ;;  %s14337_s2 = inlined_call_operand.hbm [shape: f32[4,48,512], index: 2, kind: input, shape index: {}]   ;;  %s14338_s3 = inlined_call_operand.hbm [shape: f32[1,512], index: 3, kind: input, shape index: {}]   ;;  %s14339_s4 = inlined_call_operand.hbm [shape: f32[4,4,8], index: 4, kind: input, shape index: {}]   ;;  %s14340_s5 = inlined_call_operand.hbm [shape: f32[4,512,512], index: 5, kind: input, shape index: {}]   ;;  %s14341_s6 = inlined_call_operand.hbm [shape: f32[1,512], index: 6, kind: input, shape index: {}]   ;;  %s14342_s7 = inlined_call_operand.hbm [shape: f32[4,2,4], index: 7, kind: input, shape index: {}]   ;;  %s14343_s8 = inlined_call_operand.hbm [shape: f32[4,512,512], index: 8, kind: input, shape index: {}]   ;;  %s14344_s9 = inlined_call_operand.hbm [shape: f32[1,512], index: 9, kind: input, shape index: {}]   ;;  %s14345_s10 = inlined_call_operand.hbm [shape: f32[2,1,2], index: 10, kind: input, shape index: {}]   ;;  %s14346_s11 = inlined_call_operand.hbm [shape: f32[2,512,512], index: 11, kind: input, shape index: {}]   ;;  %s14347_s12 = inlined_call_operand.hbm [shape: f32[1,512], index: 12, kind: input, shape index: {}]   ;;  %s14348_s13 = inlined_call_operand.<no memory space> [shape: f32[1,1,1], index: 13, kind: input, shape index: {}]   ;;  %s14349_s14 = inlined_call_operand.vmem [shape: f32[1,512,1], index: 14, kind: input, shape index: {}]   ;;  %s14350_s16 = inlined_call_operand.vmem [shape: f32[1,512,5], index: 16, kind: input, shape index: {}]   ;;  %s14351_s17 = inlined_call_operand.vmem [shape: f32[2,1,1], index: 17, kind: output, shape index: {0}]   ;;  %s14352_s18 = inlined_call_operand.hbm [shape: f32[2,1,5], index: 18, kind: output, shape index: {1}]   ;;  %s14353_s15 = inlined_call_operand.<no memory space> [shape: f32[1,1,1], index: 15, kind: input, shape index: {}]  }
   0x1   :  { %14373 = sst [smem:[#allocation40_spill]] %s14335_s0 }
   0x2   :  { %14374 = sst [smem:[#allocation41_spill]] %s14336_s1 }
   0x3   :  { %14375 = sst [smem:[#allocation42_spill]] %s14337_s2 }
   0x4   :  { %14376 = sst [smem:[#allocation43_spill]] %s14339_s4 }
   0x5   :  { %14377 = sst [smem:[#allocation44_spill]] %s14341_s6 }
   0x6   :  { %14378 = sst [smem:[#allocation45_spill]] %s14343_s8 }
   0x7   :  { %14379 = sst [smem:[#allocation46_spill]] %s14351_s17 }
   0x8   :  { %14380 = sst [smem:[#allocation47_spill]] %s14352_s18 }
   0x9   :  { %28 = vsyncpa [#allocation5], 0 }
   0xa   :  { %29 = vsyncpa [#allocation8], 0 }
   0xb   :  { %30 = vsyncpa [#allocation11], 0 }
   0xc   :  { %31 = vsyncpa [#allocation14], 0 }
   0xd   :  { %32 = vsyncpa [#allocation17], 0 }
   0xe   :  { %33 = vsyncpa [#allocation20], 0 }
   0xf   :  { %34 = vsyncpa [#allocation23], 0 }
  0x10   :  { %35 = vsyncpa [#allocation6], 0 }
  0x11   :  { %37 = vsyncpa [#allocation6 + $0x1], 0  ;;  %s13286_s13 = smov 0   ;;  %s13288_s27 = smov 0  }
  0x12   :  { %s13290_s28 = smov 0   ;;  %s13292_s29 = smov 0  }
  0x13 LB: > { %14381 = sst [smem:[#allocation33_spill]] %s13152_s13  ;;  %s13307_s15 = sadd.s32 4294967295, %s13164_s29   ;;  %s13164_s29 = sphi %s13292_s29, %s14425_s29   ;;  %s13160_s28 = sphi %s13290_s28, %s14427_s28   ;;  %s13156_s27 = sphi %s13288_s27, %s14429_s27   ;;  %s13152_s13 = sphi %s13286_s13, %s14428_s13  }
  0x14   : > { %14382 = sst [smem:[#allocation34_spill]] %s13160_s28  ;;  %s9420_s30 = sadd.s32 4294967294, %s13164_s29  }
  0x15   : > { %14383 = sst [smem:[#allocation35_spill]] %s13164_s29  ;;  %s13311_s0 = sadd.s32 1, %s13164_s29  }
  0x16   : > { %14384 = sst [smem:[#allocation36_spill]] %s13311_s0  ;;  %s438_s19 = sadd.s32 1, %s13160_s28 }
  0x17   : > { %s435_s1 = ssub.s32 %s13164_s29, %s13311_s0  ;;  %p448_p0 = scmp.ne.s32.totalorder %s13160_s28, %s13156_s27 }
  0x18   : > { %p436_p1 = scmp.eq.s32.totalorder %s435_s1, 0  ;;  %p449_p2 = scmp.eq.s32.totalorder %s13307_s15, 1 }
  0x19   : > { %p454_p3 = scmp.ne.s32.totalorder %s13156_s27, %s13152_s13  ;;  %p455_p4 = scmp.eq.s32.totalorder %s9420_s30, 1 }
  0x1a   : > { %s13322_s20 = scalar_select %p436_p1, %s13160_s28, %s438_s19  }
  0x1b   : > { %p13324_p5 = por %p449_p2, %p448_p0  ;;  %p13328_p6 = por %p455_p4, %p454_p3 }
  0x1c   : > { %14385 = sst [smem:[#allocation37_spill]] %s13322_s20  ;;  %p9421_p7 = scmp.ge.s32.totalorder %s13164_s29, 1 }
  0x1d   : > { %s14386_s21 = scalar_select %p13324_p5, 1, 0 }
  0x1e   : > { %s14388_s22 = scalar_select %p13328_p6, 1, 0 }
  0x1f   : > { %14387 = sst [smem:[#allocation38_spill]] %s14386_s21  ;;  %p462_p8 = scmp.lt.s32.totalorder %s13164_s29, 3 }
  0x20   : > { %14389 = sst [smem:[#allocation39_spill]] %s14388_s22  ;;  %p14361_p9 = scmp.eq.s32.totalorder %s13307_s15, 0 }
  0x21   : > { %p13335_p10 = pnand %p9421_p7, %p462_p8  ;;  %s13166_s23 = smov [#allocation7]  }
  0x22   : > { %s487_s24 = sshll.u32 %s13166_s23, 4  ;;  %s13167_s26 = smov [#allocation10]   ;;  %s488_s24 = int_to_ptr.vmem [resolvable:$true] %s487_s24 }
  0x23   : > { %s14390_s2 = scalar_select %p13335_p10, 1, 0 }
  0x24   : > { %p12616_p11 = pneg %p13335_p10  ;;  %s511_s30 = sshll.u32 %s13167_s26, 4  ;;  %s13347_s30 = int_to_ptr.vmem [resolvable:$true] %s511_s30 }
  0x25   : > { %s14392_s20 = sld [smem:[#allocation42_spill]] }
  0x26   : > { %p13343_p12 = pnand %p14361_p9, %p12616_p11 }
  0x28   : > { %p13357_p0 = pneg %p13343_p12 }
  0x2b   : > { %s12738_s28 = scalar_lea.hbm %s14392_s20, 12288 }
  0x2c   : > { %p12739_p13 = scmp.ne.s32.totalorder %s14392_s20, %s12738_s28  ;;  %p12745_p3 = scmp.lt.u32.totalorder %s12738_s28, %s14392_s20 }
  0x2e   : > { %p12741_p1 = pnand %p13357_p0, %p12739_p13 }
  0x30   : > { %p12742_p2 = pneg %p12741_p1 }
  0x32   : > { %p12747_p4 = pnand %p12745_p3, %p12742_p2 }
  0x34   : > { %12750 = shalt.err (!%p12747_p4)
}
  0x35   : > { %s12751_s19 = scalar_lea.vmem %s488_s24, 12288  ;;  %p12759_p9 = scmp.lt.s32.totalorder %s488_s24, %s488_s24 }
  0x36   : > { %p12752_p7 = scmp.ne.s32.totalorder %s488_s24, %s12751_s19  ;;  %p12760_p6 = scmp.lt.s32.totalorder %s12751_s19, %s12751_s19 }
  0x38   : > { %p12754_p8 = pnand %p12752_p7, %p13357_p0  ;;  %p12761_p5 = por %p12760_p6, %p12759_p9 }
  0x3a   : > { %p12755_p11 = pneg %p12754_p8 }
  0x3c   : > { %p12762_p10 = pnand %p12761_p5, %p12755_p11 }
  0x3e   : > { %12765 = shalt.err (!%p12762_p10)
}
  0x3f   : > { %s14368_s0 = smov 512   ;;  %s14370_s22 = smov 32  }
  0x40   : > { %12622 = dma.hbm_to_vmem [thread:$0]  (!%p13343_p12), %s14392_s20, 12288, %s488_s24, [#allocation8], %s14368_s0, %s14368_s0, %s14370_s22  }
  0x41   : > { %s14394_s4 = sld [smem:[#allocation43_spill]] }
  0x47   : > { %s12766_s29 = scalar_lea.hbm %s14394_s4, 256 }
  0x48   : > { %p12767_p5 = scmp.ne.s32.totalorder %s14394_s4, %s12766_s29  ;;  %p12773_p10 = scmp.lt.u32.totalorder %s12766_s29, %s14394_s4 }
  0x4a   : > { %p12769_p6 = pnand %p12767_p5, %p13357_p0 }
  0x4c   : > { %p12770_p9 = pneg %p12769_p6 }
  0x4e   : > { %p12775_p13 = pnand %p12773_p10, %p12770_p9 }
  0x50   : > { %12778 = shalt.err (!%p12775_p13)
}
  0x51   : > { %s12779_s24 = scalar_lea.vmem %s13347_s30, 256  ;;  %p12787_p4 = scmp.lt.s32.totalorder %s13347_s30, %s13347_s30 }
  0x52   : > { %p12780_p1 = scmp.ne.s32.totalorder %s13347_s30, %s12779_s24  ;;  %p12788_p7 = scmp.lt.s32.totalorder %s12779_s24, %s12779_s24 }
  0x54   : > { %p12782_p2 = pnand %p12780_p1, %p13357_p0  ;;  %p12789_p8 = por %p12788_p7, %p12787_p4 }
  0x56   : > { %p12783_p3 = pneg %p12782_p2 }
  0x58   : > { %p12790_p11 = pnand %p12789_p8, %p12783_p3 }
  0x5a   : > { %12793 = shalt.err (!%p12790_p11)
}
  0x5b   : > { %s13170_s18 = smov 64   ;;  %s13171_s17 = smov 4  }
  0x5c   : > { %12628 = dma.hbm_to_vmem [thread:$0]  (!%p13343_p12), %s14394_s4, 256, %s13347_s30, [#allocation11], %s13170_s18, %s13170_s18, %s13171_s17  }
  0x5d   : > { %s13172_s13 = smov [#allocation13]   ;;  %s13173_s1 = smov [#allocation16]  }
  0x5e   : > { %s538_s28 = sshll.u32 %s13172_s13, 4  ;;  %s561_s26 = sshll.u32 %s13173_s1, 4  ;;  %s539_s28 = int_to_ptr.vmem [resolvable:$true] %s538_s28  ;;  %s13399_s26 = int_to_ptr.vmem [resolvable:$true] %s561_s26 }
  0x5f   : > { %s14395_s6 = sld [smem:[#allocation44_spill]] }
  0x65   : > { %s12794_s0 = scalar_lea.hbm %s14395_s6, 64 }
  0x66   : > { %p12795_p5 = scmp.ne.s32.totalorder %s14395_s6, %s12794_s0  ;;  %p12801_p10 = scmp.lt.u32.totalorder %s12794_s0, %s14395_s6 }
  0x68   : > { %p12797_p6 = pnand %p12795_p5, %p13357_p0 }
  0x6a   : > { %p12798_p9 = pneg %p12797_p6 }
  0x6c   : > { %p12803_p13 = pnand %p12801_p10, %p12798_p9 }
  0x6e   : > { %12806 = shalt.err (!%p12803_p13)
}
  0x6f   : > { %s12807_s18 = scalar_lea.vmem %s539_s28, 64  ;;  %p12815_p4 = scmp.lt.s32.totalorder %s539_s28, %s539_s28 }
  0x70   : > { %p12808_p1 = scmp.ne.s32.totalorder %s539_s28, %s12807_s18  ;;  %p12816_p7 = scmp.lt.s32.totalorder %s12807_s18, %s12807_s18 }
  0x72   : > { %p12810_p2 = pnand %p12808_p1, %p13357_p0  ;;  %p12817_p8 = por %p12816_p7, %p12815_p4 }
  0x74   : > { %p12811_p3 = pneg %p12810_p2 }
  0x76   : > { %p12818_p11 = pnand %p12817_p8, %p12811_p3 }
  0x78   : > { %12821 = shalt.err (!%p12818_p11)
}
  0x79   : > { %12634 = dma.hbm_to_vmem [thread:$0]  (!%p13343_p12), %s14395_s6, 64, %s539_s28, [#allocation14]  }
  0x7a   : > { %s14396_s8 = sld [smem:[#allocation45_spill]] }
  0x80   : > { %s12822_s21 = scalar_lea.hbm %s14396_s8, 131072 }
  0x81   : > { %p12823_p5 = scmp.ne.s32.totalorder %s14396_s8, %s12822_s21  ;;  %p12829_p10 = scmp.lt.u32.totalorder %s12822_s21, %s14396_s8 }
  0x83   : > { %p12825_p6 = pnand %p12823_p5, %p13357_p0 }
  0x85   : > { %p12826_p9 = pneg %p12825_p6 }
  0x87   : > { %p12831_p13 = pnand %p12829_p10, %p12826_p9 }
  0x89   : > { %12834 = shalt.err (!%p12831_p13)
}
  0x8a   : > { %s12835_s28 = scalar_lea.vmem %s13399_s26, 131072  ;;  %p12843_p4 = scmp.lt.s32.totalorder %s13399_s26, %s13399_s26 }
  0x8b   : > { %p12836_p1 = scmp.ne.s32.totalorder %s13399_s26, %s12835_s28  ;;  %p12844_p7 = scmp.lt.s32.totalorder %s12835_s28, %s12835_s28 }
  0x8d   : > { %p12838_p2 = pnand %p12836_p1, %p13357_p0  ;;  %p12845_p8 = por %p12844_p7, %p12843_p4 }
  0x8f   : > { %p12839_p3 = pneg %p12838_p2 }
  0x91   : > { %p12846_p11 = pnand %p12845_p8, %p12839_p3 }
  0x93   : > { %12849 = shalt.err (!%p12846_p11)
}
  0x94   : > { %s14397_s29 = smov 32   ;;  %s14398_s30 = smov 512  }
  0x95   : > { %12640 = dma.hbm_to_vmem [thread:$0]  (!%p13343_p12), %s14396_s8, 131072, %s13399_s26, [#allocation17], %s14398_s30, %s14398_s30, %s14397_s29  }
  0x96   : > { %s13174_s22 = smov [#allocation19]   ;;  %s12850_s13 = scalar_lea.hbm %s14345_s10, 32 }
  0x97   : > { %s585_s0 = sshll.u32 %s13174_s22, 4  ;;  %p12851_p5 = scmp.ne.s32.totalorder %s14345_s10, %s12850_s13  ;;  %s586_s0 = int_to_ptr.vmem [resolvable:$true] %s585_s0 }
  0x98   : > { %p12857_p10 = scmp.lt.u32.totalorder %s12850_s13, %s14345_s10 }
  0x99   : > { %p12853_p6 = pnand %p12851_p5, %p13357_p0 }
  0x9b   : > { %p12854_p9 = pneg %p12853_p6 }
  0x9d   : > { %p12859_p13 = pnand %p12857_p10, %p12854_p9 }
  0x9f   : > { %12862 = shalt.err (!%p12859_p13)
}
  0xa0   : > { %s12863_s26 = scalar_lea.vmem %s586_s0, 32  ;;  %p12871_p4 = scmp.lt.s32.totalorder %s586_s0, %s586_s0 }
  0xa1   : > { %p12864_p1 = scmp.ne.s32.totalorder %s586_s0, %s12863_s26  ;;  %p12872_p7 = scmp.lt.s32.totalorder %s12863_s26, %s12863_s26 }
  0xa3   : > { %p12866_p2 = pnand %p12864_p1, %p13357_p0  ;;  %p12873_p8 = por %p12872_p7, %p12871_p4 }
  0xa5   : > { %p12867_p3 = pneg %p12866_p2 }
  0xa7   : > { %p12874_p11 = pnand %p12873_p8, %p12867_p3 }
  0xa9   : > { %12877 = shalt.err (!%p12874_p11)
}
  0xaa   : > { %s13175_s18 = smov 16   ;;  %s13176_s20 = smov 1  }
  0xab   : > { %12646 = dma.hbm_to_vmem [thread:$0]  (!%p13343_p12), %s14345_s10, 32, %s586_s0, [#allocation20], %s13175_s18, %s13175_s18, %s13176_s20  }
  0xac   : > { %s13177_s21 = smov [#allocation4]   ;;  %s14399_s24 = sld [smem:[#allocation41_spill]] }
  0xad   : > { %s474_s13 = sshll.u32 %s13177_s21, 4  ;;  %s475_s13 = int_to_ptr.vmem [resolvable:$true] %s474_s13 }
  0xb2   : > { %s12878_s28 = scalar_lea.hbm %s14399_s24, 512 }
  0xb3   : > { %p12879_p5 = scmp.ne.s32.totalorder %s14399_s24, %s12878_s28  ;;  %p12885_p10 = scmp.lt.u32.totalorder %s12878_s28, %s14399_s24 }
  0xb5   : > { %p12881_p6 = pnand %p12879_p5, %p13357_p0 }
  0xb7   : > { %p12882_p9 = pneg %p12881_p6 }
  0xb9   : > { %p12887_p13 = pnand %p12885_p10, %p12882_p9 }
  0xbb   : > { %12890 = shalt.err (!%p12887_p13)
}
  0xbc   : > { %s12891_s0 = scalar_lea.vmem %s475_s13, 512  ;;  %p12899_p4 = scmp.lt.s32.totalorder %s475_s13, %s475_s13 }
  0xbd   : > { %p12892_p1 = scmp.ne.s32.totalorder %s475_s13, %s12891_s0  ;;  %p12900_p7 = scmp.lt.s32.totalorder %s12891_s0, %s12891_s0 }
  0xbf   : > { %p12894_p2 = pnand %p12892_p1, %p13357_p0  ;;  %p12901_p8 = por %p12900_p7, %p12899_p4 }
  0xc1   : > { %p12895_p3 = pneg %p12894_p2 }
  0xc3   : > { %p12902_p11 = pnand %p12901_p8, %p12895_p3 }
  0xc5   : > { %12905 = shalt.err (!%p12902_p11)
}
  0xc6   : > { %s13178_s4 = smov 128   ;;  %s13179_s18 = smov 8  }
  0xc7   : > { %12619 = dma.hbm_to_vmem [thread:$0]  (!%p13343_p12), %s14399_s24, 512, %s475_s13, [#allocation5], %s13178_s4, %s13178_s4, %s13179_s18  }
  0xc8   : > { %s13180_s20 = smov [#allocation9]   ;;  %s13181_s17 = smov [#allocation12]  }
  0xc9   : > { %s501_s22 = sshll.u32 %s13180_s20, 4  ;;  %s524_s21 = sshll.u32 %s13181_s17, 4  ;;  %s502_s22 = int_to_ptr.vmem [resolvable:$true] %s501_s22  ;;  %s13481_s21 = int_to_ptr.vmem [resolvable:$true] %s524_s21 }
  0xca   : > { %s12906_s28 = scalar_lea.hbm %s14338_s3, 64 }
  0xcb   : > { %p12907_p5 = scmp.ne.s32.totalorder %s14338_s3, %s12906_s28  ;;  %p12913_p10 = scmp.lt.u32.totalorder %s12906_s28, %s14338_s3 }
  0xcd   : > { %p12909_p6 = pnand %p12907_p5, %p13357_p0 }
  0xcf   : > { %p12910_p9 = pneg %p12909_p6 }
  0xd1   : > { %p12915_p13 = pnand %p12913_p10, %p12910_p9 }
  0xd3   : > { %12918 = shalt.err (!%p12915_p13)
}
  0xd4   : > { %s12919_s4 = scalar_lea.vmem %s502_s22, 64  ;;  %p12927_p4 = scmp.lt.s32.totalorder %s502_s22, %s502_s22 }
  0xd5   : > { %p12920_p1 = scmp.ne.s32.totalorder %s502_s22, %s12919_s4  ;;  %p12928_p7 = scmp.lt.s32.totalorder %s12919_s4, %s12919_s4 }
  0xd7   : > { %p12922_p2 = pnand %p12920_p1, %p13357_p0  ;;  %p12929_p8 = por %p12928_p7, %p12927_p4 }
  0xd9   : > { %p12923_p3 = pneg %p12922_p2 }
  0xdb   : > { %p12930_p11 = pnand %p12929_p8, %p12923_p3 }
  0xdd   : > { %12933 = shalt.err (!%p12930_p11)
}
  0xde   : > { %12625 = dma.hbm_to_vmem [thread:$0]  (!%p13343_p12), %s14338_s3, 64, %s502_s22, [#allocation8]  }
  0xdf   : > { %s12934_s1 = scalar_lea.hbm %s14340_s5, 131072 }
  0xe0   : > { %p12935_p5 = scmp.ne.s32.totalorder %s14340_s5, %s12934_s1  ;;  %p12941_p10 = scmp.lt.u32.totalorder %s12934_s1, %s14340_s5 }
  0xe2   : > { %p12937_p6 = pnand %p12935_p5, %p13357_p0 }
  0xe4   : > { %p12938_p9 = pneg %p12937_p6 }
  0xe6   : > { %p12943_p13 = pnand %p12941_p10, %p12938_p9 }
  0xe8   : > { %12946 = shalt.err (!%p12943_p13)
}
  0xe9   : > { %s12947_s22 = scalar_lea.vmem %s13481_s21, 131072  ;;  %p12955_p4 = scmp.lt.s32.totalorder %s13481_s21, %s13481_s21 }
  0xea   : > { %p12948_p1 = scmp.ne.s32.totalorder %s13481_s21, %s12947_s22  ;;  %p12956_p7 = scmp.lt.s32.totalorder %s12947_s22, %s12947_s22 }
  0xec   : > { %p12950_p2 = pnand %p12948_p1, %p13357_p0  ;;  %p12957_p8 = por %p12956_p7, %p12955_p4 }
  0xee   : > { %p12951_p3 = pneg %p12950_p2 }
  0xf0   : > { %p12958_p11 = pnand %p12957_p8, %p12951_p3 }
  0xf2   : > { %12961 = shalt.err (!%p12958_p11)
}
  0xf3   : > { %12631 = dma.hbm_to_vmem [thread:$0]  (!%p13343_p12), %s14340_s5, 131072, %s13481_s21, [#allocation11], %s14398_s30, %s14398_s30, %s14397_s29  }
  0xf4   : > { %s13182_s4 = smov [#allocation15]   ;;  %s13183_s8 = smov [#allocation18]  }
  0xf5   : > { %s548_s18 = sshll.u32 %s13182_s4, 4  ;;  %s575_s20 = sshll.u32 %s13183_s8, 4  ;;  %s549_s18 = int_to_ptr.vmem [resolvable:$true] %s548_s18  ;;  %s576_s20 = int_to_ptr.vmem [resolvable:$true] %s575_s20 }
  0xf6   : > { %s12962_s19 = scalar_lea.hbm %s14342_s7, 128 }
  0xf7   : > { %p12963_p5 = scmp.ne.s32.totalorder %s14342_s7, %s12962_s19  ;;  %p12969_p10 = scmp.lt.u32.totalorder %s12962_s19, %s14342_s7 }
  0xf9   : > { %p12965_p6 = pnand %p12963_p5, %p13357_p0 }
  0xfb   : > { %p12966_p9 = pneg %p12965_p6 }
  0xfd   : > { %p12971_p13 = pnand %p12969_p10, %p12966_p9 }
  0xff   : > { %12974 = shalt.err (!%p12971_p13)
}
 0x100   : > { %s12975_s21 = scalar_lea.vmem %s549_s18, 128  ;;  %p12983_p4 = scmp.lt.s32.totalorder %s549_s18, %s549_s18 }
 0x101   : > { %p12976_p1 = scmp.ne.s32.totalorder %s549_s18, %s12975_s21  ;;  %p12984_p7 = scmp.lt.s32.totalorder %s12975_s21, %s12975_s21 }
 0x103   : > { %p12978_p2 = pnand %p12976_p1, %p13357_p0  ;;  %p12985_p8 = por %p12984_p7, %p12983_p4 }
 0x105   : > { %p12979_p3 = pneg %p12978_p2 }
 0x107   : > { %p12986_p11 = pnand %p12985_p8, %p12979_p3 }
 0x109   : > { %12989 = shalt.err (!%p12986_p11)
}
 0x10a   : > { %s13184_s6 = smov 2   ;;  %s12990_s1 = scalar_lea.hbm %s14344_s9, 64 }
 0x10b   : > { %12637 = dma.hbm_to_vmem [thread:$0]  (!%p13343_p12), %s14342_s7, 128, %s549_s18, [#allocation14], %s14397_s29, %s14397_s29, %s13184_s6  }
 0x10c   : > { %p12991_p5 = scmp.ne.s32.totalorder %s14344_s9, %s12990_s1  ;;  %p12997_p10 = scmp.lt.u32.totalorder %s12990_s1, %s14344_s9 }
 0x10e   : > { %p12993_p6 = pnand %p12991_p5, %p13357_p0 }
 0x110   : > { %p12994_p9 = pneg %p12993_p6 }
 0x112   : > { %p12999_p13 = pnand %p12997_p10, %p12994_p9 }
 0x114   : > { %13002 = shalt.err (!%p12999_p13)
}
 0x115   : > { %s13003_s22 = scalar_lea.vmem %s576_s20, 64  ;;  %p13011_p4 = scmp.lt.s32.totalorder %s576_s20, %s576_s20 }
 0x116   : > { %p13004_p1 = scmp.ne.s32.totalorder %s576_s20, %s13003_s22  ;;  %p13012_p7 = scmp.lt.s32.totalorder %s13003_s22, %s13003_s22 }
 0x118   : > { %p13006_p2 = pnand %p13004_p1, %p13357_p0  ;;  %p13013_p8 = por %p13012_p7, %p13011_p4 }
 0x11a   : > { %p13007_p3 = pneg %p13006_p2 }
 0x11c   : > { %p13014_p11 = pnand %p13013_p8, %p13007_p3 }
 0x11e   : > { %13017 = shalt.err (!%p13014_p11)
}
 0x11f   : > { %12643 = dma.hbm_to_vmem [thread:$0]  (!%p13343_p12), %s14344_s9, 64, %s576_s20, [#allocation17]  }
 0x120   : > { %s13185_s6 = smov [#allocation21]   ;;  %s13186_s4 = smov [#allocation22]  }
 0x121   : > { %s598_s13 = sshll.u32 %s13185_s6, 4  ;;  %s612_s8 = sshll.u32 %s13186_s4, 4  ;;  %s599_s13 = int_to_ptr.vmem [resolvable:$true] %s598_s13  ;;  %s613_s8 = int_to_ptr.vmem [resolvable:$true] %s612_s8 }
 0x122   : > { %s13018_s19 = scalar_lea.hbm %s14346_s11, 65536 }
 0x123   : > { %p13019_p5 = scmp.ne.s32.totalorder %s14346_s11, %s13018_s19  ;;  %p13025_p10 = scmp.lt.u32.totalorder %s13018_s19, %s14346_s11 }
 0x125   : > { %p13021_p6 = pnand %p13019_p5, %p13357_p0 }
 0x127   : > { %p13022_p9 = pneg %p13021_p6 }
 0x129   : > { %p13027_p13 = pnand %p13025_p10, %p13022_p9 }
 0x12b   : > { %13030 = shalt.err (!%p13027_p13)
}
 0x12c   : > { %s13031_s20 = scalar_lea.vmem %s599_s13, 65536  ;;  %p13039_p4 = scmp.lt.s32.totalorder %s599_s13, %s599_s13 }
 0x12d   : > { %p13032_p1 = scmp.ne.s32.totalorder %s599_s13, %s13031_s20  ;;  %p13040_p7 = scmp.lt.s32.totalorder %s13031_s20, %s13031_s20 }
 0x12f   : > { %p13034_p2 = pnand %p13032_p1, %p13357_p0  ;;  %p13041_p8 = por %p13040_p7, %p13039_p4 }
 0x131   : > { %p13035_p3 = pneg %p13034_p2 }
 0x133   : > { %p13042_p11 = pnand %p13041_p8, %p13035_p3 }
 0x135   : > { %13045 = shalt.err (!%p13042_p11)
}
 0x136   : > { %12649 = dma.hbm_to_vmem [thread:$0]  (!%p13343_p12), %s14346_s11, 65536, %s599_s13, [#allocation20], %s14398_s30, %s14398_s30, %s14397_s29  }
 0x137   : > { %s13046_s17 = scalar_lea.hbm %s14347_s12, 64 }
 0x138   : > { %p13047_p5 = scmp.ne.s32.totalorder %s14347_s12, %s13046_s17  ;;  %p13053_p10 = scmp.lt.u32.totalorder %s13046_s17, %s14347_s12 }
 0x13a   : > { %p13049_p6 = pnand %p13047_p5, %p13357_p0 }
 0x13c   : > { %p13050_p9 = pneg %p13049_p6 }
 0x13e   : > { %p13055_p13 = pnand %p13053_p10, %p13050_p9 }
 0x140   : > { %13058 = shalt.err (!%p13055_p13)
}
 0x141   : > { %s13059_s0 = scalar_lea.vmem %s613_s8, 64  ;;  %p13067_p4 = scmp.lt.s32.totalorder %s613_s8, %s613_s8 }
 0x142   : > { %p13060_p1 = scmp.ne.s32.totalorder %s613_s8, %s13059_s0  ;;  %p13068_p7 = scmp.lt.s32.totalorder %s13059_s0, %s13059_s0 }
 0x144   : > { %p13062_p2 = pnand %p13060_p1, %p13357_p0  ;;  %p13069_p8 = por %p13068_p7, %p13067_p4 }
 0x146   : > { %p13063_p3 = pneg %p13062_p2 }
 0x148   : > { %p13070_p11 = pnand %p13069_p8, %p13063_p3 }
 0x14a   : > { %13073 = shalt.err (!%p13070_p11)
}
 0x14b   : > { %12652 = dma.hbm_to_vmem [thread:$0]  (!%p13343_p12), %s14347_s12, 64, %s613_s8, [#allocation23]  }
 0x14c   : > { %p14400_p5 = scmp.ne.s32.totalorder %s14390_s2, 0 }
 0x14d   : > { %p14401_p6 = scmp.eq.s32.totalorder (!%p14400_p5), %s13307_s15, 0 }
 0x14e   : > { %645 = sbr.rel (%p14400_p5) target bundleno = 4536 (0x11b8), region = 88 }
 0x155   : > { %13119 = dma.done.wait (%p14401_p6), [#allocation5], 512   ;;  %p14402_p0 = pmov %p14401_p6 }
 0x157   : > { %13121 = vsyncadd (%p14402_p0), [#allocation5], 4294966784  ;;  %p14403_p9 = pmov %p14402_p0 }
 0x158   : > { %p14404_p10 = pmov %p14402_p0 }
 0x159   : > { %13123 = dma.done.wait (%p14403_p9), [#allocation8], 12352  }
 0x15a   : > { %13125 = vsyncadd (%p14404_p10), [#allocation8], 4294954944  ;;  %p14405_p13 = pmov %p14402_p0 }
 0x15b   : > { %p14406_p12 = pmov %p14402_p0 }
 0x15c   : > { %13127 = dma.done.wait (%p14405_p13), [#allocation11], 131328  }
 0x15d   : > { %13129 = vsyncadd (%p14406_p12), [#allocation11], 4294835968  ;;  %p14407_p1 = pmov %p14402_p0 }
 0x15e   : > { %p14408_p2 = pmov %p14402_p0 }
 0x15f   : > { %13131 = dma.done.wait (%p14407_p1), [#allocation14], 192  }
 0x160   : > { %13133 = vsyncadd (%p14408_p2), [#allocation14], 4294967104  ;;  %p14409_p3 = pmov %p14402_p0 }
 0x161   : > { %p14410_p4 = pmov %p14402_p0 }
 0x162   : > { %13135 = dma.done.wait (%p14409_p3), [#allocation17], 131136  }
 0x163   : > { %13137 = vsyncadd (%p14410_p4), [#allocation17], 4294836160  ;;  %p14411_p7 = pmov %p14402_p0 }
 0x164   : > { %p14412_p8 = pmov %p14402_p0 }
 0x165   : > { %13139 = dma.done.wait (%p14411_p7), [#allocation20], 65568  }
 0x166   : > { %13141 = vsyncadd (%p14412_p8), [#allocation20], 4294901728  ;;  %p14413_p11 = pmov %p14402_p0 }
 0x167   : > { %p14414_p5 = pmov %p14402_p0 }
 0x168   : > { %13143 = dma.done.wait (%p14413_p11), [#allocation23], 64  }
 0x169   : > { %13145 = vsyncadd (%p14414_p5), [#allocation23], 4294967232  ;;  %p745_p6 = scmp.lt.s32.totalorder %s13307_s15, 1  ;;  %v13187_v0 = vmov 0.0|0.0   ;;  %vm13188_vm0 = vmmov 0   ;;  %v13189_v1 = vmov 0.0  }
 0x16a   : > { %9693 = vmatprep.subr.bf16.mxu1 %v13187_v0  ;;  %9673 = vmatprep.mubr.msk.f32.mxu1 %vm13188_vm0, %v13189_v1  ;;  %s14415_s8 = sld [smem:[#allocation40_spill]]  ;;  %v855_v5 = vld [vmem:[#allocation4 + $0x8] sm:$0xff]  ;;  %v755_v6 = vld [vmem:[#allocation4] sm:$0xff]  ;;  %v933_v10 = vld [vmem:[#allocation7 + $0xd8] sm:$0xff]  ;;  %vm756_vm1 = vcmask 130048   ;;  %vm954_vm2 = vcmask 392192  }
 0x16b   : > { %s13639_s2 = scalar_select %p745_p6, %s13307_s15, 1  ;;  %9690 = vmatprep.subr.bf16.mxu0 %v13187_v0  ;;  %9666 = vmatprep.mubr.msk.f32.mxu0 %vm13188_vm0, %v13189_v1  ;;  %v931_v7 = vld [vmem:[#allocation7 + $0xc8] sm:$0xff]  ;;  %v937_v11 = vld [vmem:[#allocation7 + $0xf8] sm:$0xff]  ;;  %v930_v12 = vld [vmem:[#allocation7 + $0xc0] sm:$0xff]  ;;  %vm1778_vm3 = vcmask 64512   ;;  %vm4575_vm4 = vcmask 1043456  }
 0x16c   : > { %v935_v8 = vld [vmem:[#allocation7 + $0xe8] sm:$0xff]  ;;  %v9708_v13 = vpack.c.bf16 %v937_v11, %v933_v10  ;;  %v934_v14 = vld [vmem:[#allocation7 + $0xe0] sm:$0xff]  ;;  %v932_v15 = vld [vmem:[#allocation7 + $0xd0] sm:$0xff]  ;;  %vm4571_vm5 = vcmask 31744   ;;  %vm7381_vm6 = vcmask 1041408   ;;  %vm7377_vm7 = vcmask 15360  }
 0x16d   : > { %s9509_s25 = sshll.u32 %s13639_s2, 4  ;;  %v9696_v9 = vpack.c.bf16 %v935_v8, %v931_v7  ;;  %v936_v16 = vld [vmem:[#allocation7 + $0xf0] sm:$0xff]  ;;  %v9698_v17 = vpack.c.bf16 %v934_v14, %v930_v12  ;;  %v939_v19 = vld [vmem:[#allocation7 + $0x108] sm:$0xff]  ;;  %v941_v21 = vld [vmem:[#allocation7 + $0x118] sm:$0xff]  ;;  %s14416_s1 = sld [smem:[#allocation46_spill]]  ;;  %vm9002_vm8 = vcmask 0  }
 0x16e   : > { %v9710_v18 = vpack.c.bf16 %v936_v16, %v932_v15  ;;  %v943_v20 = vld [vmem:[#allocation7 + $0x128] sm:$0xff]  ;;  %v945_v23 = vld [vmem:[#allocation7 + $0x138] sm:$0xff]  ;;  %v938_v24 = vld [vmem:[#allocation7 + $0x100] sm:$0xff]  ;;  %s743_s28 = sand.u32 1, %s13156_s27   ;;  %s14417_s26 = sld [smem:[#allocation38_spill]]  ;;  %vm9208_vm9 = vcmask 32768  }
 0x16f   : > { %v9700_v22 = vpack.c.bf16 %v943_v20, %v939_v19  ;;  %v942_v25 = vld [vmem:[#allocation7 + $0x120] sm:$0xff]  ;;  %v9712_v26 = vpack.c.bf16 %v945_v23, %v941_v21  ;;  %v940_v27 = vld [vmem:[#allocation7 + $0x110] sm:$0xff]  ;;  %v947_v29 = vld [vmem:[#allocation7 + $0x148] sm:$0xff]  ;;  %s9506_s0 = sshll.u32 %s13307_s15, 4  ;;  %s744_s29 = scalar_lea.vmem [#allocation24], %s743_s28 }
 0x170   : > { %s749_s22 = scalar_lea.vmem %s14415_s8, %s9509_s25  ;;  %v944_v28 = vld [vmem:[#allocation7 + $0x130] sm:$0xff]  ;;  %v9702_v30 = vpack.c.bf16 %v942_v25, %v938_v24  ;;  %v951_v32 = vld [vmem:[#allocation7 + $0x168] sm:$0xff]  ;;  %v949_v33 = vld [vmem:[#allocation7 + $0x158] sm:$0xff]  ;;  %s9229_s30 = sshll.u32 %s744_s29, 4  ;;  %s14295_s30 = int_to_ptr.vmem [resolvable:$true] %s9229_s30 }
 0x171   : > { %v753_v2 = vld [vmem:[%s749_s22] sm:$0xff]  ;;  %v754_v3 = vld [vmem:[%s749_s22 + $0x8] sm:$0xff]  ;;  %v9714_v31 = vpack.c.bf16 %v944_v28, %v940_v27  ;;  %v953_v34 = vld [vmem:[#allocation7 + $0x178] sm:$0xff]  ;;  %v9704_v35 = vpack.c.bf16 %v951_v32, %v947_v29  ;;  %s14418_s13 = sld [smem:[#allocation47_spill]]  ;;  %s9214_s22 = scalar_lea.sflag [#allocation6], %s743_s28 }
 0x172   : > { %v13648_v4 = vpack.c.bf16 %v754_v3, %v753_v2  ;;  %v9716_v36 = vpack.c.bf16 %v953_v34, %v949_v33  ;;  %v946_v37 = vld [vmem:[#allocation7 + $0x140] sm:$0xff]  ;;  %v948_v39 = vld [vmem:[#allocation7 + $0x150] sm:$0xff]  ;;  %v831_v43 = vld [vmem:[#allocation7 + $0x8] sm:$0xff]  ;;  %s13074_s20 = scalar_lea.vmem %s14295_s30, 16  ;;  %s13190_s15 = smov [#allocation24]  }
 0x173   : > { %v950_v38 = vld [vmem:[#allocation7 + $0x160] sm:$0xff]  ;;  %v952_v40 = vld [vmem:[#allocation7 + $0x170] sm:$0xff]  ;;  %v835_v44 = vld [vmem:[#allocation7 + $0x28] sm:$0xff]  ;;  %s752_s19 = scalar_lea.vmem %s14416_s1, %s13639_s2  ;;  %p13075_p0 = scmp.ne.s32.totalorder %s14295_s30, %s13074_s20 }
 0x174   : > { %9695 = vmatpush3.bf16.msra.mxu1 %v13648_v4  ;;  %9692 = vmatpush3.bf16.msra.mxu0 %v13648_v4  ;;  %v9706_v41 = vpack.c.bf16 %v950_v38, %v946_v37  ;;  %v9718_v42 = vpack.c.bf16 %v952_v40, %v948_v39  ;;  %v833_v45 = vld [vmem:[#allocation7 + $0x18] sm:$0xff]  ;;  %v9720_v46 = vpack.c.bf16 %v835_v44, %v831_v43  ;;  %v830_v49 = vld [vmem:[#allocation7] sm:$0xff]  ;;  %v832_v51 = vld [vmem:[#allocation7 + $0x10] sm:$0xff]  ;;  %p14420_p9 = scmp.ne.s32.totalorder %s14417_s26, 0  ;;  %s13078_s18 = sshll.u32 %s13190_s15, 4  ;;  %s13079_s18 = int_to_ptr.vmem [resolvable:$false] %s13078_s18 }
 0x175   : > { %9697 = vmatprep.subr.bf16.mxu0 %v9696_v9  ;;  %9709 = vmatprep.subr.bf16.mxu1 %v9708_v13  ;;  %v837_v47 = vld [vmem:[#allocation7 + $0x38] sm:$0xff]  ;;  %v834_v50 = vld [vmem:[#allocation7 + $0x20] sm:$0xff]  ;;  %v836_v52 = vld [vmem:[#allocation7 + $0x30] sm:$0xff]  ;;  %s13080_s21 = scalar_lea.vmem %s13079_s18, 32  ;;  %p13081_p12 = scmp.lt.s32.totalorder %s14295_s30, %s13079_s18 }
 0x176   : > { %v9732_v48 = vpack.c.bf16 %v837_v47, %v833_v45  ;;  %v839_v53 = vld [vmem:[#allocation7 + $0x48] sm:$0xff]  ;;  %v841_v55 = vld [vmem:[#allocation7 + $0x58] sm:$0xff]  ;;  %v9722_v57 = vpack.c.bf16 %v834_v50, %v830_v49  ;;  %v9734_v58 = vpack.c.bf16 %v836_v52, %v832_v51  ;;  %v838_v59 = vld [vmem:[#allocation7 + $0x40] sm:$0xff]  ;;  %p13076_p10 = pnand %p13075_p0, %p14420_p9  ;;  %p13082_p1 = scmp.lt.s32.totalorder %s13080_s21, %s13074_s20 }
 0x177   : > { %9674 = vmatmul.mubr.msk.f32.vlgmr.msra.gmra.mrb[0].mxu1 %vm756_vm1, %v855_v5  ;;  %9667 = vmatmul.mubr.msk.f32.vlgmr.msra.gmra.mrb[0].mxu0 %vm756_vm1, %v755_v6  ;;  %v843_v54 = vld [vmem:[#allocation7 + $0x68] sm:$0xff]  ;;  %v845_v56 = vld [vmem:[#allocation7 + $0x78] sm:$0xff]  ;;  %v842_v60 = vld [vmem:[#allocation7 + $0x60] sm:$0xff]  ;;  %s14419_s8 = smov %s14418_s13  ;;  %s14293_s2 = scalar_lea.hbm %s14418_s13, %s9506_s0 }
 0x178   : > { %9699 = vmatpush1.bf16.msra.mxu0 %v9698_v17  ;;  %9711 = vmatpush1.bf16.msra.mxu1 %v9710_v18  ;;  %v9724_v61 = vpack.c.bf16 %v843_v54, %v839_v53  ;;  %v9736_v62 = vpack.c.bf16 %v845_v56, %v841_v55  ;;  %v840_v63 = vld [vmem:[#allocation7 + $0x50] sm:$0xff]  ;;  %v847_v3 = vld [vmem:[#allocation7 + $0x88] sm:$0xff]  ;;  %v849_v7 = vld [vmem:[#allocation7 + $0x98] sm:$0xff]  ;;  %v9726_v12 = vpack.c.bf16 %v842_v60, %v838_v59  ;;  %p13077_p13 = pneg %p13076_p10  ;;  %p13083_p2 = por %p13082_p1, %p13081_p12 }
 0x179   : > { %9701 = vmatprep.subr.bf16.mxu0 %v9700_v22  ;;  %9713 = vmatprep.subr.bf16.mxu1 %v9712_v26  ;;  %v844_v2 = vld [vmem:[#allocation7 + $0x70] sm:$0xff]  ;;  %v851_v6 = vld [vmem:[#allocation7 + $0xa8] sm:$0xff]  ;;  %v853_v8 = vld [vmem:[#allocation7 + $0xb8] sm:$0xff] }
 0x17a   : > { %1022 = vmatprep.mubr.f32.mxu0 %v13189_v1  ;;  %1093 = vmatprep.mubr.f32.mxu1 %v13189_v1  ;;  %v9738_v13 = vpack.c.bf16 %v844_v2, %v840_v63  ;;  %v846_v14 = vld [vmem:[#allocation7 + $0x80] sm:$0xff]  ;;  %v9728_v15 = vpack.c.bf16 %v851_v6, %v847_v3  ;;  %v9740_v16 = vpack.c.bf16 %v853_v8, %v849_v7  ;;  %v848_v18 = vld [vmem:[#allocation7 + $0x90] sm:$0xff]  ;;  %v1324_v20 = vld [vmem:[#allocation7 + $0x198] sm:$0xff]  ;;  %p13084_p3 = pnand %p13083_p2, %p13077_p13 }
 0x17b   : > { %v850_v17 = vld [vmem:[#allocation7 + $0xa0] sm:$0xff]  ;;  %v852_v19 = vld [vmem:[#allocation7 + $0xb0] sm:$0xff]  ;;  %v1328_v21 = vld [vmem:[#allocation7 + $0x1b8] sm:$0xff] }
 0x17c   : > { %9703 = vmatpush1.bf16.msra.mxu0 %v9702_v30  ;;  %9715 = vmatpush1.bf16.msra.mxu1 %v9714_v31  ;;  %v9730_v22 = vpack.c.bf16 %v850_v17, %v846_v14  ;;  %v9742_v23 = vpack.c.bf16 %v852_v19, %v848_v18  ;;  %v1322_v24 = vld [vmem:[#allocation7 + $0x188] sm:$0xff]  ;;  %v9759_v25 = vpack.c.bf16 %v1328_v21, %v1324_v20  ;;  %v1323_v27 = vld [vmem:[#allocation7 + $0x190] sm:$0xff]  ;;  %v1332_v29 = vld [vmem:[#allocation7 + $0x1d8] sm:$0xff] }
 0x17d   : > { %9705 = vmatprep.subr.bf16.mxu0 %v9704_v35  ;;  %9717 = vmatprep.subr.bf16.mxu1 %v9716_v36  ;;  %v1326_v26 = vld [vmem:[#allocation7 + $0x1a8] sm:$0xff]  ;;  %v1327_v28 = vld [vmem:[#allocation7 + $0x1b0] sm:$0xff]  ;;  %v1336_v30 = vld [vmem:[#allocation7 + $0x1f8] sm:$0xff] }
 0x17e   : > { %v9747_v31 = vpack.c.bf16 %v1326_v26, %v1322_v24  ;;  %v1321_v32 = vld [vmem:[#allocation7 + $0x180] sm:$0xff]  ;;  %v9761_v34 = vpack.c.bf16 %v1327_v28, %v1323_v27  ;;  %v1330_v35 = vld [vmem:[#allocation7 + $0x1c8] sm:$0xff]  ;;  %v9763_v37 = vpack.c.bf16 %v1336_v30, %v1332_v29  ;;  %v1331_v38 = vld [vmem:[#allocation7 + $0x1d0] sm:$0xff] }
 0x17f   : > { %v1325_v33 = vld [vmem:[#allocation7 + $0x1a0] sm:$0xff]  ;;  %v1334_v36 = vld [vmem:[#allocation7 + $0x1e8] sm:$0xff]  ;;  %v1335_v39 = vld [vmem:[#allocation7 + $0x1f0] sm:$0xff] }
 0x180   : > { %9707 = vmatpush1.bf16.msra.mxu0 %v9706_v41  ;;  %9719 = vmatpush1.bf16.msra.mxu1 %v9718_v42  ;;  %v1340_v40 = vld [vmem:[#allocation7 + $0x218] sm:$0xff]  ;;  %v1246_v42 = vld [vmem:[#allocation4 + $0x10] sm:$0xff]  ;;  %v9749_v43 = vpack.c.bf16 %v1325_v33, %v1321_v32  ;;  %v9751_v44 = vpack.c.bf16 %v1334_v36, %v1330_v35  ;;  %v1329_v45 = vld [vmem:[#allocation7 + $0x1c0] sm:$0xff]  ;;  %v9765_v47 = vpack.c.bf16 %v1335_v39, %v1331_v38 }
 0x181   : > { %9721 = vmatprep.subr.bf16.mxu0 %v9720_v46  ;;  %9733 = vmatprep.subr.bf16.mxu1 %v9732_v48  ;;  %v1344_v41 = vld [vmem:[#allocation7 + $0x238] sm:$0xff]  ;;  %v1333_v46 = vld [vmem:[#allocation7 + $0x1e0] sm:$0xff]  ;;  %v1338_v48 = vld [vmem:[#allocation7 + $0x208] sm:$0xff] }
 0x182   : > { %v1342_v49 = vld [vmem:[#allocation7 + $0x228] sm:$0xff]  ;;  %v9767_v50 = vpack.c.bf16 %v1344_v41, %v1340_v40  ;;  %v1339_v51 = vld [vmem:[#allocation7 + $0x210] sm:$0xff]  ;;  %v9753_v53 = vpack.c.bf16 %v1333_v46, %v1329_v45  ;;  %v1337_v55 = vld [vmem:[#allocation7 + $0x200] sm:$0xff] }
 0x183   : > { %v1343_v52 = vld [vmem:[#allocation7 + $0x230] sm:$0xff]  ;;  %v9755_v54 = vpack.c.bf16 %v1342_v49, %v1338_v48  ;;  %v1341_v56 = vld [vmem:[#allocation7 + $0x220] sm:$0xff]  ;;  %v1571_v59 = vld [vmem:[#allocation7 + $0x248] sm:$0xff] }
 0x184   : > { %v1575_v60 = vld [vmem:[#allocation7 + $0x268] sm:$0xff]  ;;  %v1577_v63 = vld [vmem:[#allocation7 + $0x278] sm:$0xff]  ;;  %v1570_v2 = vld [vmem:[#allocation7 + $0x240] sm:$0xff] }
 0x185   : > { %v1574_v3 = vld [vmem:[#allocation7 + $0x260] sm:$0xff]  ;;  %v1583_v6 = vld [vmem:[#allocation7 + $0x2a8] sm:$0xff]  ;;  %v1585_v14 = vld [vmem:[#allocation7 + $0x2b8] sm:$0xff] }
 0x186   : > { %v9776_v8 = vpack.c.bf16 %v1574_v3, %v1570_v2  ;;  %v1587_v17 = vld [vmem:[#allocation7 + $0x2c8] sm:$0xff]  ;;  %v1495_v19 = vld [vmem:[#allocation4 + $0x18] sm:$0xff]  ;;  %v1584_v24 = vld [vmem:[#allocation7 + $0x2b0] sm:$0xff] }
 0x187   : > { %v1591_v18 = vld [vmem:[#allocation7 + $0x2e8] sm:$0xff]  ;;  %v1593_v27 = vld [vmem:[#allocation7 + $0x2f8] sm:$0xff]  ;;  %v1586_v28 = vld [vmem:[#allocation7 + $0x2c0] sm:$0xff] }
 0x188   : > { %v9782_v26 = vpack.c.bf16 %v1591_v18, %v1587_v17  ;;  %v1590_v29 = vld [vmem:[#allocation7 + $0x2e0] sm:$0xff]  ;;  %v1588_v32 = vld [vmem:[#allocation7 + $0x2d0] sm:$0xff] }
 0x189   : > { %v1592_v33 = vld [vmem:[#allocation7 + $0x2f0] sm:$0xff]  ;;  %v1743_v41 = vld [vmem:[#allocation9] sm:$0xf] }
 0x18a   : > { %v2329_v3 = vld [vmem:[#allocation12 + $0x808] sm:$0xff] }
 0x24a   : > { %v925_v5 = vpop.f32.mrb[0].mxu1  ;;  %v826_v9 = vpop.f32.mrb[0].mxu0 }
 0x24b   : > { %v9675_v10 = vpop.f32.mrb[1].mxu1  ;;  %9452 = vmatmul.mubr.msk.f32.vlgmr.msra.gmra.mrb[2].mxu0 %vm954_vm2, %v925_v5  ;;  %9453 = vmatmul.mubr.msk.f32.vlgmr.msra.gmra.mrb[2].mxu1 %vm954_vm2, %v925_v5  ;;  %v9668_v11 = vpop.f32.mrb[1].mxu0  ;;  %v1579_v5 = vld [vmem:[#allocation7 + $0x288] sm:$0xff] }
 0x24c   : > { %9723 = vmatpush1.bf16.msra.mxu0 %v9722_v57  ;;  %9735 = vmatpush1.bf16.msra.mxu1 %v9734_v58  ;;  %v9769_v57 = vpack.c.bf16 %v1343_v52, %v1339_v51  ;;  %v9757_v58 = vpack.c.bf16 %v1341_v56, %v1337_v55  ;;  %v1576_v10 = vld [vmem:[#allocation7 + $0x270] sm:$0xff]  ;;  %v1581_v11 = vld [vmem:[#allocation7 + $0x298] sm:$0xff] }
 0x24d   : > { %9725 = vmatprep.subr.bf16.mxu0 %v9724_v61  ;;  %9737 = vmatprep.subr.bf16.mxu1 %v9736_v62  ;;  %v9774_v61 = vpack.c.bf16 %v1575_v60, %v1571_v59  ;;  %v1573_v62 = vld [vmem:[#allocation7 + $0x258] sm:$0xff]  ;;  %v9790_v21 = vpack.c.bf16 %v1585_v14, %v1581_v11  ;;  %v2334_v11 = vld [vmem:[#allocation12 + $0x830] sm:$0xff] }
 0x24e   : > { %1167 = vmatprep.mubr.f32.mxu0 %v13189_v1  ;;  %1238 = vmatprep.mubr.f32.mxu1 %v13189_v1  ;;  %v9786_v7 = vpack.c.bf16 %v1577_v63, %v1573_v62  ;;  %v1777_v62 = vld [vmem:[#allocation10] sm:$0xf]  ;;  %v2341_v14 = vld [vmem:[#allocation12 + $0x868] sm:$0xff] }
 0x250   : > { %9727 = vmatpush1.bf16.msra.mxu0 %v9726_v12  ;;  %9739 = vmatpush1.bf16.msra.mxu1 %v9738_v13  ;;  %v9778_v13 = vpack.c.bf16 %v1583_v6, %v1579_v5  ;;  %v2333_v5 = vld [vmem:[#allocation12 + $0x828] sm:$0xff]  ;;  %v2331_v6 = vld [vmem:[#allocation12 + $0x818] sm:$0xff] }
 0x251   : > { %9729 = vmatprep.subr.bf16.mxu0 %v9728_v15  ;;  %9741 = vmatprep.subr.bf16.mxu1 %v9740_v16  ;;  %v1582_v15 = vld [vmem:[#allocation7 + $0x2a0] sm:$0xff] }
 0x254   : > { %9731 = vmatpush1.bf16.msra.mxu0 %v9730_v22  ;;  %9743 = vmatpush1.bf16.msra.mxu1 %v9742_v23  ;;  %v1580_v23 = vld [vmem:[#allocation7 + $0x290] sm:$0xff] }
 0x255   : > { %9744 = vmatprep.subr.bf16.mxu0 %v13187_v0  ;;  %9760 = vmatprep.subr.bf16.mxu1 %v9759_v25  ;;  %v1589_v25 = vld [vmem:[#allocation7 + $0x2d8] sm:$0xff] }
 0x256   : > { %v9794_v30 = vpack.c.bf16 %v1593_v27, %v1589_v25  ;;  %v2342_v25 = vld [vmem:[#allocation12 + $0x870] sm:$0xff]  ;;  %v2349_v27 = vld [vmem:[#allocation12 + $0x8a8] sm:$0xff] }
 0x257   : > { %9454 = vmatmul.mubr.msk.f32.vlgmr.msra.gmra.mrb[2].mxu0 %vm954_vm2, %v826_v9  ;;  %9455 = vmatmul.mubr.msk.f32.vlgmr.msra.gmra.mrb[2].mxu1 %vm954_vm2, %v826_v9  ;;  %v1572_v9 = vld [vmem:[#allocation7 + $0x250] sm:$0xff] }
 0x258   : > { %9746 = vmatpush3.bf16.msra.mxu0 %v13648_v4  ;;  %9680 = vmatprep.mubr.msk.f32.mxu0 %vm13188_vm0, %v13189_v1  ;;  %v9788_v20 = vpack.c.bf16 %v1576_v10, %v1572_v9  ;;  %v2332_v9 = vld [vmem:[#allocation12 + $0x820] sm:$0xff]  ;;  %v2330_v10 = vld [vmem:[#allocation12 + $0x810] sm:$0xff] }
 0x259   : > { %9748 = vmatprep.subr.bf16.mxu0 %v9747_v31  ;;  %9762 = vmatpush1.bf16.msra.mxu1 %v9761_v34  ;;  %v9784_v31 = vpack.c.bf16 %v1590_v29, %v1586_v28  ;;  %v9796_v34 = vpack.c.bf16 %v1592_v33, %v1588_v32  ;;  %v2347_v28 = vld [vmem:[#allocation12 + $0x898] sm:$0xff]  ;;  %v2348_v32 = vld [vmem:[#allocation12 + $0x8a0] sm:$0xff] }
 0x25a   : > { %9764 = vmatprep.subr.bf16.mxu1 %v9763_v37  ;;  %1483 = vmatprep.mubr.f32.mxu1 %v13189_v1  ;;  %v1745_v37 = vlaneseq  ;;  %v2351_v29 = vld [vmem:[#allocation12 + $0x8b8] sm:$0xff] }
 0x25b   : > { %9681 = vmatmul.mubr.msk.f32.vlgmr.msra.gmra.mrb[4].mxu0 %vm756_vm1, %v1246_v42 }
 0x25c   : > { %9750 = vmatpush1.bf16.msra.mxu0 %v9749_v43  ;;  %1412 = vmatprep.mubr.f32.mxu0 %v13189_v1  ;;  %v1746_v38 = vshrl.u32 %v1745_v37, 7  ;;  %v2353_v37 = vld [vmem:[#allocation12 + $0x8c8] sm:$0xff] }
 0x25d   : > { %9752 = vmatprep.subr.bf16.mxu0 %v9751_v44  ;;  %9766 = vmatpush1.bf16.msra.mxu1 %v9765_v47 }
 0x25e   : > { %9768 = vmatprep.subr.bf16.mxu1 %v9767_v50  ;;  %v13682_v39 = vsub.s32 0, %v1746_v38  ;;  %v13684_v40 = vsub.s32 2, %v1746_v38  ;;  %v13686_v42 = vsub.s32 1, %v1746_v38  ;;  %v13688_v43 = vsub.s32 3, %v1746_v38  ;;  %v2357_v38 = vld [vmem:[#allocation12 + $0x8e8] sm:$0xff] }
 0x260   : > { %9754 = vmatpush1.bf16.msra.mxu0 %v9753_v53  ;;  %v1748_v44 = vrot.slane %v1743_v41, %v13682_v39  ;;  %v1756_v45 = vrot.slane %v1743_v41, %v13684_v40  ;;  %v1752_v46 = vrot.slane %v1743_v41, %v13686_v42  ;;  %v1760_v47 = vrot.slane %v1743_v41, %v13688_v43  ;;  %v2355_v41 = vld [vmem:[#allocation12 + $0x8d8] sm:$0xff] }
 0x261   : > { %9756 = vmatprep.subr.bf16.mxu0 %v9755_v54  ;;  %9770 = vmatpush1.bf16.msra.mxu1 %v9769_v57 }
 0x262   : > { %9771 = vmatprep.subr.bf16.mxu1 %v13187_v0  ;;  %v1578_v0 = vld [vmem:[#allocation7 + $0x280] sm:$0xff] }
 0x263   : > { %v9780_v22 = vpack.c.bf16 %v1582_v15, %v1578_v0  ;;  %v2339_v0 = vld [vmem:[#allocation12 + $0x858] sm:$0xff] }
 0x264   : > { %9758 = vmatpush1.bf16.msra.mxu0 %v9757_v58  ;;  %v2343_v15 = vld [vmem:[#allocation12 + $0x878] sm:$0xff] }
 0x265   : > { %9775 = vmatprep.subr.bf16.mxu0 %v9774_v61 }
 0x32e   : > { %v1316_v12 = vpop.f32.mrb[4].mxu0 }
 0x32f   : > { %v9682_v16 = vpop.f32.mrb[5].mxu0  ;;  %9457 = vmatmul.mubr.msk.f32.vlgmr.msra.gmra.mrb[2].mxu0 %vm954_vm2, %v1316_v12  ;;  %9458 = vmatmul.mubr.msk.f32.vlgmr.msra.gmra.mrb[2].mxu1 %vm954_vm2, %v1316_v12  ;;  %v2337_v12 = vld [vmem:[#allocation12 + $0x848] sm:$0xff] }
 0x330   : > { %9773 = vmatpush3.bf16.msra.mxu1 %v13648_v4  ;;  %9687 = vmatprep.mubr.msk.f32.mxu1 %vm13188_vm0, %v13189_v1  ;;  %v9792_v4 = vpack.c.bf16 %v1584_v24, %v1580_v23  ;;  %v2181_v16 = vld [vmem:[#allocation10 + $0x4] sm:$0xf]  ;;  %v9930_v23 = vpack.c.bf16 %v2343_v15, %v2339_v0  ;;  %v2372_v0 = vld [vmem:[#allocation12 + $0x960] sm:$0xff] }
 0x331   : > { %9787 = vmatprep.subr.bf16.mxu1 %v9786_v7  ;;  %9777 = vmatpush1.bf16.msra.mxu0 %v9776_v8  ;;  %v2335_v7 = vld [vmem:[#allocation12 + $0x838] sm:$0xff]  ;;  %v2328_v8 = vld [vmem:[#allocation12 + $0x800] sm:$0xff]  ;;  %v2338_v24 = vld [vmem:[#allocation12 + $0x850] sm:$0xff] }
 0x332   : > { %9779 = vmatprep.subr.bf16.mxu0 %v9778_v13  ;;  %1661 = vmatprep.mubr.f32.mxu0 %v13189_v1  ;;  %v9798_v13 = vpack.c.bf16 %v2333_v5, %v2329_v3  ;;  %v9926_v17 = vpack.c.bf16 %v2335_v7, %v2331_v6  ;;  %v9800_v18 = vpack.c.bf16 %v2332_v9, %v2328_v8  ;;  %v2362_v6 = vld [vmem:[#allocation12 + $0x910] sm:$0xff]  ;;  %v2369_v8 = vld [vmem:[#allocation12 + $0x948] sm:$0xff] }
 0x333   : > { %9688 = vmatmul.mubr.msk.f32.vlgmr.msra.gmra.mrb[4].mxu1 %vm756_vm1, %v1495_v19  ;;  %v9928_v19 = vpack.c.bf16 %v2334_v11, %v2330_v10  ;;  %v2366_v7 = vld [vmem:[#allocation12 + $0x930] sm:$0xff]  ;;  %v2373_v9 = vld [vmem:[#allocation12 + $0x968] sm:$0xff]  ;;  %v2371_v10 = vld [vmem:[#allocation12 + $0x958] sm:$0xff] }
 0x334   : > { %9789 = vmatpush1.bf16.msra.mxu1 %v9788_v20  ;;  %1732 = vmatprep.mubr.f32.mxu1 %v13189_v1  ;;  %v2336_v20 = vld [vmem:[#allocation12 + $0x840] sm:$0xff]  ;;  %v2375_v11 = vld [vmem:[#allocation12 + $0x978] sm:$0xff]  ;;  %v9818_v15 = vpack.c.bf16 %v2373_v9, %v2369_v8 }
 0x335   : > { %9791 = vmatprep.subr.bf16.mxu1 %v9790_v21  ;;  %9781 = vmatpush1.bf16.msra.mxu0 %v9780_v22  ;;  %v2340_v21 = vld [vmem:[#allocation12 + $0x860] sm:$0xff]  ;;  %v9802_v22 = vpack.c.bf16 %v2341_v14, %v2337_v12 }
 0x336   : > { %9783 = vmatprep.subr.bf16.mxu0 %v9782_v26  ;;  %v2345_v26 = vld [vmem:[#allocation12 + $0x888] sm:$0xff]  ;;  %v2368_v14 = vld [vmem:[#allocation12 + $0x940] sm:$0xff] }
 0x337   : > { %v9806_v33 = vpack.c.bf16 %v2349_v27, %v2345_v26  ;;  %v2380_v26 = vld [vmem:[#allocation12 + $0x9a0] sm:$0xff] }
 0x338   : > { %9793 = vmatpush1.bf16.msra.mxu1 %v9792_v4  ;;  %v9804_v4 = vpack.c.bf16 %v2340_v21, %v2336_v20  ;;  %v2381_v20 = vld [vmem:[#allocation12 + $0x9a8] sm:$0xff]  ;;  %v2379_v21 = vld [vmem:[#allocation12 + $0x998] sm:$0xff]  ;;  %v2404_v8 = vld [vmem:[#allocation12 + $0xa60] sm:$0xff] }
 0x339   : > { %9795 = vmatprep.subr.bf16.mxu1 %v9794_v30  ;;  %9785 = vmatpush1.bf16.msra.mxu0 %v9784_v31  ;;  %v9932_v30 = vpack.c.bf16 %v2342_v25, %v2338_v24  ;;  %v2344_v31 = vld [vmem:[#allocation12 + $0x880] sm:$0xff] }
 0x33a   : > { %v2376_v25 = vld [vmem:[#allocation12 + $0x980] sm:$0xff] }
 0x33c   : > { %9797 = vmatpush1.bf16.msra.mxu1 %v9796_v34  ;;  %v9934_v34 = vpack.c.bf16 %v2351_v29, %v2347_v28  ;;  %v2378_v29 = vld [vmem:[#allocation12 + $0x990] sm:$0xff] }
 0x406   : > { %v1565_v35 = vpop.f32.mrb[4].mxu1 }
 0x407   : > { %v9689_v36 = vpop.f32.mrb[5].mxu1  ;;  %9460 = vmatmul.mubr.msk.f32.vlgmr.msra.gmra.mrb[2].mxu0 %vm954_vm2, %v1565_v35  ;;  %9461 = vmatmul.mubr.msk.f32.vlgmr.msra.gmra.mrb[2].mxu1 %vm954_vm2, %v1565_v35  ;;  %v2346_v35 = vld [vmem:[#allocation12 + $0x890] sm:$0xff] }
 0x408   : > { %1846 = vmatprep.mubr.f32.mxu0 %v13189_v1  ;;  %1917 = vmatprep.mubr.f32.mxu1 %v13189_v1  ;;  %v2350_v36 = vld [vmem:[#allocation12 + $0x8b0] sm:$0xff] }
 0x4da   : > { %v1663_v48 = vpop.f32.mrb[2].mxu0  ;;  %v1734_v49 = vpop.f32.mrb[2].mxu1 }
 0x4db   : > { %v1765_v50 = vadd.f32 %v1748_v44, %v1663_v48  ;;  %v1767_v51 = vadd.f32 %v1756_v45, %v1734_v49  ;;  %v1665_v52 = vpop.f32.mrb[3].mxu0  ;;  %v1736_v53 = vpop.f32.mrb[3].mxu1  ;;  %v2359_v44 = vld [vmem:[#allocation12 + $0x8f8] sm:$0xff]  ;;  %v9808_v45 = vpack.c.bf16 %v2348_v32, %v2344_v31  ;;  %v2356_v48 = vld [vmem:[#allocation12 + $0x8e0] sm:$0xff]  ;;  %v9810_v49 = vpack.c.bf16 %v2357_v38, %v2353_v37  ;;  %v2389_v31 = vld [vmem:[#allocation12 + $0x9e8] sm:$0xff] }
 0x4dc   : > { %v1766_v54 = vadd.f32 %v1752_v46, %v1665_v52  ;;  %v1768_v55 = vadd.f32 %v1760_v47, %v1736_v53  ;;  %v9936_v46 = vpack.c.bf16 %v2350_v36, %v2346_v35  ;;  %v2352_v47 = vld [vmem:[#allocation12 + $0x8c0] sm:$0xff]  ;;  %v2358_v52 = vld [vmem:[#allocation12 + $0x8f0] sm:$0xff]  ;;  %v2361_v53 = vld [vmem:[#allocation12 + $0x908] sm:$0xff] }
 0x4dd   : > { %v1769_v56 = vmul.f32 0.01, %v1765_v50  ;;  %v1771_v57 = vmul.f32 0.01, %v1767_v51  ;;  %v2387_v32 = vld [vmem:[#allocation12 + $0x9d8] sm:$0xff]  ;;  %v2384_v36 = vld [vmem:[#allocation12 + $0x9c0] sm:$0xff] }
 0x4de   : > { %v1770_v58 = vmul.f32 0.01, %v1766_v54  ;;  %v1772_v59 = vmul.f32 0.01, %v1768_v55  ;;  %v2388_v37 = vld [vmem:[#allocation12 + $0x9e0] sm:$0xff] }
 0x4df   : > { %v13698_v63 = vmax.f32 %v1765_v50, %v1769_v56  ;;  %v13700_v2 = vmax.f32 %v1767_v51, %v1771_v57  ;;  %v9938_v50 = vpack.c.bf16 %v2359_v44, %v2355_v41  ;;  %v2354_v51 = vld [vmem:[#allocation12 + $0x8d0] sm:$0xff]  ;;  %v2367_v56 = vld [vmem:[#allocation12 + $0x938] sm:$0xff]  ;;  %v9812_v57 = vpack.c.bf16 %v2356_v48, %v2352_v47  ;;  %v2397_v47 = vld [vmem:[#allocation12 + $0xa28] sm:$0xff] }
 0x4e0   : > { %v13694_v60 = vmax.f32 %v1766_v54, %v1770_v58  ;;  %v13696_v61 = vmax.f32 %v1768_v55, %v1772_v59  ;;  %v2365_v54 = vld [vmem:[#allocation12 + $0x928] sm:$0xff]  ;;  %v2363_v55 = vld [vmem:[#allocation12 + $0x918] sm:$0xff]  ;;  %v9940_v58 = vpack.c.bf16 %v2358_v52, %v2354_v51  ;;  %v2360_v59 = vld [vmem:[#allocation12 + $0x900] sm:$0xff] }
 0x4e1   : > { %v9814_v3 = vpack.c.bf16 %v2365_v54, %v2361_v53  ;;  %v9942_v5 = vpack.c.bf16 %v2367_v56, %v2363_v55  ;;  %v2386_v44 = vld [vmem:[#allocation12 + $0x9d0] sm:$0xff]  ;;  %v2395_v48 = vld [vmem:[#allocation12 + $0xa18] sm:$0xff]  ;;  %v2392_v52 = vld [vmem:[#allocation12 + $0xa00] sm:$0xff] }
 0x4e2   : > { %1782 = vmatprep.subr.mxu0 %v13694_v60  ;;  %1853 = vmatprep.subr.mxu1 %v13696_v61  ;;  %v2396_v53 = vld [vmem:[#allocation12 + $0xa20] sm:$0xff]  ;;  %v2394_v56 = vld [vmem:[#allocation12 + $0xa10] sm:$0xff] }
 0x4e3   : > { %1783 = vmatpush1.msra.mxu0 %v13698_v63  ;;  %1854 = vmatpush1.msra.mxu1 %v13700_v2 }
 0x4e4   : > { %9462 = vmatmul.mubr.msk.f32.vlgmr.msra.gmra.mrb[6].mxu0 %vm1778_vm3, %v1777_v62  ;;  %2185 = vmatprep.subr.mxu0 %v13694_v60 }
 0x4e5   : > { %2256 = vmatprep.subr.mxu1 %v13696_v61  ;;  %9463 = vmatmul.mubr.msk.f32.vlgmr.msra.gmra.mrb[6].mxu1 %vm1778_vm3, %v1777_v62  ;;  %v2364_v62 = vld [vmem:[#allocation12 + $0x920] sm:$0xff] }
 0x4e6   : > { %2186 = vmatpush1.msra.mxu0 %v13698_v63  ;;  %2257 = vmatpush1.msra.mxu1 %v13700_v2  ;;  %v9816_v12 = vpack.c.bf16 %v2364_v62, %v2360_v59  ;;  %v2405_v59 = vld [vmem:[#allocation12 + $0xa68] sm:$0xff]  ;;  %v2403_v62 = vld [vmem:[#allocation12 + $0xa58] sm:$0xff] }
 0x4e7   : > { %2249 = vmatprep.mubr.f32.mxu0 %v13189_v1  ;;  %2320 = vmatprep.mubr.f32.mxu1 %v13189_v1 }
 0x4e8   : > { %9464 = vmatmul.mubr.msk.f32.vlgmr.msra.gmra.mrb[8].mxu0 %vm1778_vm3, %v2181_v16  ;;  %9799 = vmatprep.subr.bf16.mxu0 %v9798_v13  ;;  %v9944_v13 = vpack.c.bf16 %v2366_v7, %v2362_v6  ;;  %v2400_v7 = vld [vmem:[#allocation12 + $0xa40] sm:$0xff] }
 0x4e9   : > { %9465 = vmatmul.mubr.msk.f32.vlgmr.msra.gmra.mrb[8].mxu1 %vm1778_vm3, %v2181_v16  ;;  %9927 = vmatprep.subr.bf16.mxu1 %v9926_v17  ;;  %v9946_v16 = vpack.c.bf16 %v2375_v11, %v2371_v10  ;;  %v2370_v17 = vld [vmem:[#allocation12 + $0x950] sm:$0xff] }
 0x4ea   : > { %9801 = vmatpush1.bf16.msra.mxu0 %v9800_v18  ;;  %9929 = vmatpush1.bf16.msra.mxu1 %v9928_v19  ;;  %v2374_v18 = vld [vmem:[#allocation12 + $0x970] sm:$0xff]  ;;  %v2377_v19 = vld [vmem:[#allocation12 + $0x988] sm:$0xff] }
 0x4eb   : > { %9803 = vmatprep.subr.bf16.mxu0 %v9802_v22  ;;  %9931 = vmatprep.subr.bf16.mxu1 %v9930_v23  ;;  %v2383_v22 = vld [vmem:[#allocation12 + $0x9b8] sm:$0xff]  ;;  %v9820_v23 = vpack.c.bf16 %v2372_v0, %v2368_v14  ;;  %v9948_v24 = vpack.c.bf16 %v2374_v18, %v2370_v17  ;;  %v9822_v27 = vpack.c.bf16 %v2381_v20, %v2377_v19  ;;  %v2402_v11 = vld [vmem:[#allocation12 + $0xa50] sm:$0xff]  ;;  %v2413_v14 = vld [vmem:[#allocation12 + $0xaa8] sm:$0xff] }
 0x4ec   : > { %v9950_v28 = vpack.c.bf16 %v2383_v22, %v2379_v21  ;;  %v2411_v0 = vld [vmem:[#allocation12 + $0xa98] sm:$0xff]  ;;  %v2408_v18 = vld [vmem:[#allocation12 + $0xa80] sm:$0xff]  ;;  %v2410_v22 = vld [vmem:[#allocation12 + $0xa90] sm:$0xff] }
 0x4ed   : > { %v2412_v19 = vld [vmem:[#allocation12 + $0xaa0] sm:$0xff] }
 0x4ee   : > { %9805 = vmatpush1.bf16.msra.mxu0 %v9804_v4  ;;  %9933 = vmatpush1.bf16.msra.mxu1 %v9932_v30  ;;  %v2382_v4 = vld [vmem:[#allocation12 + $0x9b0] sm:$0xff]  ;;  %v2385_v30 = vld [vmem:[#allocation12 + $0x9c8] sm:$0xff] }
 0x4ef   : > { %9807 = vmatprep.subr.bf16.mxu0 %v9806_v33  ;;  %9935 = vmatprep.subr.bf16.mxu1 %v9934_v34  ;;  %v2391_v33 = vld [vmem:[#allocation12 + $0x9f8] sm:$0xff]  ;;  %v9824_v34 = vpack.c.bf16 %v2380_v26, %v2376_v25  ;;  %v9952_v35 = vpack.c.bf16 %v2382_v4, %v2378_v29  ;;  %v9826_v38 = vpack.c.bf16 %v2389_v31, %v2385_v30  ;;  %v2421_v25 = vld [vmem:[#allocation12 + $0xae8] sm:$0xff]  ;;  %v2416_v4 = vld [vmem:[#allocation12 + $0xac0] sm:$0xff] }
 0x4f0   : > { %v9954_v41 = vpack.c.bf16 %v2391_v33, %v2387_v32  ;;  %v2419_v26 = vld [vmem:[#allocation12 + $0xad8] sm:$0xff]  ;;  %v2420_v30 = vld [vmem:[#allocation12 + $0xae0] sm:$0xff]  ;;  %v2418_v33 = vld [vmem:[#allocation12 + $0xad0] sm:$0xff] }
 0x4f2   : > { %9809 = vmatpush1.bf16.msra.mxu0 %v9808_v45  ;;  %9937 = vmatpush1.bf16.msra.mxu1 %v9936_v46  ;;  %v2390_v45 = vld [vmem:[#allocation12 + $0x9f0] sm:$0xff]  ;;  %v2393_v46 = vld [vmem:[#allocation12 + $0xa08] sm:$0xff] }
 0x4f3   : > { %9811 = vmatprep.subr.bf16.mxu0 %v9810_v49  ;;  %9939 = vmatprep.subr.bf16.mxu1 %v9938_v50  ;;  %v2399_v49 = vld [vmem:[#allocation12 + $0xa38] sm:$0xff]  ;;  %v9828_v50 = vpack.c.bf16 %v2388_v37, %v2384_v36  ;;  %v9956_v51 = vpack.c.bf16 %v2390_v45, %v2386_v44  ;;  %v9830_v54 = vpack.c.bf16 %v2397_v47, %v2393_v46  ;;  %v2429_v36 = vld [vmem:[#allocation12 + $0xb28] sm:$0xff]  ;;  %v2424_v45 = vld [vmem:[#allocation12 + $0xb00] sm:$0xff] }
 0x4f4   : > { %v9958_v55 = vpack.c.bf16 %v2399_v49, %v2395_v48  ;;  %v2427_v37 = vld [vmem:[#allocation12 + $0xb18] sm:$0xff]  ;;  %v2428_v46 = vld [vmem:[#allocation12 + $0xb20] sm:$0xff]  ;;  %v2426_v49 = vld [vmem:[#allocation12 + $0xb10] sm:$0xff] }
 0x4f6   : > { %9813 = vmatpush1.bf16.msra.mxu0 %v9812_v57  ;;  %9941 = vmatpush1.bf16.msra.mxu1 %v9940_v58  ;;  %v2398_v57 = vld [vmem:[#allocation12 + $0xa30] sm:$0xff]  ;;  %v2401_v58 = vld [vmem:[#allocation12 + $0xa48] sm:$0xff] }
 0x4f7   : > { %9815 = vmatprep.subr.bf16.mxu0 %v9814_v3  ;;  %9943 = vmatprep.subr.bf16.mxu1 %v9942_v5  ;;  %v2407_v3 = vld [vmem:[#allocation12 + $0xa78] sm:$0xff]  ;;  %v9832_v5 = vpack.c.bf16 %v2396_v53, %v2392_v52  ;;  %v9960_v6 = vpack.c.bf16 %v2398_v57, %v2394_v56  ;;  %v9834_v9 = vpack.c.bf16 %v2405_v59, %v2401_v58  ;;  %v2437_v52 = vld [vmem:[#allocation12 + $0xb68] sm:$0xff]  ;;  %v2432_v57 = vld [vmem:[#allocation12 + $0xb40] sm:$0xff] }
 0x4f8   : > { %v9962_v10 = vpack.c.bf16 %v2407_v3, %v2403_v62  ;;  %v2435_v53 = vld [vmem:[#allocation12 + $0xb58] sm:$0xff]  ;;  %v2436_v58 = vld [vmem:[#allocation12 + $0xb60] sm:$0xff]  ;;  %v2434_v3 = vld [vmem:[#allocation12 + $0xb50] sm:$0xff] }
 0x4fa   : > { %9817 = vmatpush1.bf16.msra.mxu0 %v9816_v12  ;;  %9945 = vmatpush1.bf16.msra.mxu1 %v9944_v13  ;;  %v2406_v12 = vld [vmem:[#allocation12 + $0xa70] sm:$0xff]  ;;  %v2409_v13 = vld [vmem:[#allocation12 + $0xa88] sm:$0xff] }
 0x4fb   : > { %9819 = vmatprep.subr.bf16.mxu0 %v9818_v15  ;;  %9947 = vmatprep.subr.bf16.mxu1 %v9946_v16  ;;  %v2415_v15 = vld [vmem:[#allocation12 + $0xab8] sm:$0xff]  ;;  %v9836_v16 = vpack.c.bf16 %v2404_v8, %v2400_v7  ;;  %v9964_v17 = vpack.c.bf16 %v2406_v12, %v2402_v11  ;;  %v9838_v20 = vpack.c.bf16 %v2413_v14, %v2409_v13  ;;  %v2445_v7 = vld [vmem:[#allocation12 + $0xba8] sm:$0xff]  ;;  %v2440_v12 = vld [vmem:[#allocation12 + $0xb80] sm:$0xff] }
 0x4fc   : > { %v9966_v21 = vpack.c.bf16 %v2415_v15, %v2411_v0  ;;  %v2443_v8 = vld [vmem:[#allocation12 + $0xb98] sm:$0xff]  ;;  %v2444_v0 = vld [vmem:[#allocation12 + $0xba0] sm:$0xff]  ;;  %v2442_v15 = vld [vmem:[#allocation12 + $0xb90] sm:$0xff] }
 0x4fe   : > { %9821 = vmatpush1.bf16.msra.mxu0 %v9820_v23  ;;  %9949 = vmatpush1.bf16.msra.mxu1 %v9948_v24  ;;  %v2414_v23 = vld [vmem:[#allocation12 + $0xab0] sm:$0xff]  ;;  %v2417_v24 = vld [vmem:[#allocation12 + $0xac8] sm:$0xff] }
 0x4ff   : > { %9823 = vmatprep.subr.bf16.mxu0 %v9822_v27  ;;  %9951 = vmatprep.subr.bf16.mxu1 %v9950_v28  ;;  %v2423_v27 = vld [vmem:[#allocation12 + $0xaf8] sm:$0xff]  ;;  %v9840_v28 = vpack.c.bf16 %v2412_v19, %v2408_v18  ;;  %v9968_v29 = vpack.c.bf16 %v2414_v23, %v2410_v22  ;;  %v9842_v31 = vpack.c.bf16 %v2421_v25, %v2417_v24  ;;  %v2449_v19 = vld [vmem:[#allocation12 + $0xbc8] sm:$0xff]  ;;  %v2448_v24 = vld [vmem:[#allocation12 + $0xbc0] sm:$0xff] }
 0x500   : > { %v9970_v32 = vpack.c.bf16 %v2423_v27, %v2419_v26  ;;  %v2455_v23 = vld [vmem:[#allocation12 + $0xbf8] sm:$0xff]  ;;  %v2452_v25 = vld [vmem:[#allocation12 + $0xbe0] sm:$0xff] }
 0x501   : > { %v9860_v27 = vpack.c.bf16 %v2452_v25, %v2448_v24  ;;  %v2480_v24 = vld [vmem:[#allocation12 + $0xcc0] sm:$0xff] }
 0x502   : > { %9825 = vmatpush1.bf16.msra.mxu0 %v9824_v34  ;;  %9953 = vmatpush1.bf16.msra.mxu1 %v9952_v35  ;;  %v2422_v34 = vld [vmem:[#allocation12 + $0xaf0] sm:$0xff]  ;;  %v2425_v35 = vld [vmem:[#allocation12 + $0xb08] sm:$0xff]  ;;  %v2484_v25 = vld [vmem:[#allocation12 + $0xce0] sm:$0xff] }
 0x503   : > { %9827 = vmatprep.subr.bf16.mxu0 %v9826_v38  ;;  %9955 = vmatprep.subr.bf16.mxu1 %v9954_v41  ;;  %v2431_v38 = vld [vmem:[#allocation12 + $0xb38] sm:$0xff]  ;;  %v9844_v41 = vpack.c.bf16 %v2420_v30, %v2416_v4  ;;  %v9972_v44 = vpack.c.bf16 %v2422_v34, %v2418_v33  ;;  %v9846_v47 = vpack.c.bf16 %v2429_v36, %v2425_v35  ;;  %v2457_v30 = vld [vmem:[#allocation12 + $0xc08] sm:$0xff] }
 0x504   : > { %v9974_v48 = vpack.c.bf16 %v2431_v38, %v2427_v37  ;;  %v2463_v34 = vld [vmem:[#allocation12 + $0xc38] sm:$0xff]  ;;  %v2456_v37 = vld [vmem:[#allocation12 + $0xc00] sm:$0xff] }
 0x505   : > { %v2460_v38 = vld [vmem:[#allocation12 + $0xc20] sm:$0xff] }
 0x506   : > { %9829 = vmatpush1.bf16.msra.mxu0 %v9828_v50  ;;  %9957 = vmatpush1.bf16.msra.mxu1 %v9956_v51  ;;  %v2430_v50 = vld [vmem:[#allocation12 + $0xb30] sm:$0xff]  ;;  %v2433_v51 = vld [vmem:[#allocation12 + $0xb48] sm:$0xff] }
 0x507   : > { %9831 = vmatprep.subr.bf16.mxu0 %v9830_v54  ;;  %9959 = vmatprep.subr.bf16.mxu1 %v9958_v55  ;;  %v2439_v54 = vld [vmem:[#allocation12 + $0xb78] sm:$0xff]  ;;  %v9848_v55 = vpack.c.bf16 %v2428_v46, %v2424_v45  ;;  %v9976_v56 = vpack.c.bf16 %v2430_v50, %v2426_v49  ;;  %v9850_v59 = vpack.c.bf16 %v2437_v52, %v2433_v51  ;;  %v2462_v45 = vld [vmem:[#allocation12 + $0xc30] sm:$0xff]  ;;  %v2465_v46 = vld [vmem:[#allocation12 + $0xc48] sm:$0xff] }
 0x508   : > { %v9978_v62 = vpack.c.bf16 %v2439_v54, %v2435_v53  ;;  %v2467_v49 = vld [vmem:[#allocation12 + $0xc58] sm:$0xff]  ;;  %v9864_v53 = vpack.c.bf16 %v2460_v38, %v2456_v37  ;;  %v2492_v37 = vld [vmem:[#allocation12 + $0xd20] sm:$0xff] }
 0x509   : > { %v2471_v50 = vld [vmem:[#allocation12 + $0xc78] sm:$0xff] }
 0x50a   : > { %9833 = vmatpush1.bf16.msra.mxu0 %v9832_v5  ;;  %9961 = vmatpush1.bf16.msra.mxu1 %v9960_v6  ;;  %v2438_v5 = vld [vmem:[#allocation12 + $0xb70] sm:$0xff]  ;;  %v2441_v6 = vld [vmem:[#allocation12 + $0xb88] sm:$0xff] }
 0x50b   : > { %9835 = vmatprep.subr.bf16.mxu0 %v9834_v9  ;;  %9963 = vmatprep.subr.bf16.mxu1 %v9962_v10  ;;  %v2447_v9 = vld [vmem:[#allocation12 + $0xbb8] sm:$0xff]  ;;  %v9852_v10 = vpack.c.bf16 %v2436_v58, %v2432_v57  ;;  %v9980_v11 = vpack.c.bf16 %v2438_v5, %v2434_v3  ;;  %v9854_v13 = vpack.c.bf16 %v2445_v7, %v2441_v6  ;;  %v2470_v3 = vld [vmem:[#allocation12 + $0xc70] sm:$0xff]  ;;  %v2473_v5 = vld [vmem:[#allocation12 + $0xc88] sm:$0xff] }
 0x50c   : > { %v9982_v14 = vpack.c.bf16 %v2447_v9, %v2443_v8  ;;  %v2477_v7 = vld [vmem:[#allocation12 + $0xca8] sm:$0xff]  ;;  %v2475_v8 = vld [vmem:[#allocation12 + $0xc98] sm:$0xff] }
 0x50d   : > { %v2479_v9 = vld [vmem:[#allocation12 + $0xcb8] sm:$0xff] }
 0x50e   : > { %9837 = vmatpush1.bf16.msra.mxu0 %v9836_v16  ;;  %9965 = vmatpush1.bf16.msra.mxu1 %v9964_v17  ;;  %v2446_v16 = vld [vmem:[#allocation12 + $0xbb0] sm:$0xff]  ;;  %v9856_v17 = vpack.c.bf16 %v2444_v0, %v2440_v12  ;;  %v9870_v0 = vpack.c.bf16 %v2477_v7, %v2473_v5  ;;  %v2509_v5 = vld [vmem:[#allocation12 + $0xda8] sm:$0xff]  ;;  %v2507_v7 = vld [vmem:[#allocation12 + $0xd98] sm:$0xff] }
 0x50f   : > { %9839 = vmatprep.subr.bf16.mxu0 %v9838_v20  ;;  %9967 = vmatprep.subr.bf16.mxu1 %v9966_v21  ;;  %v9984_v18 = vpack.c.bf16 %v2446_v16, %v2442_v15  ;;  %v2453_v20 = vld [vmem:[#allocation12 + $0xbe8] sm:$0xff]  ;;  %v2451_v21 = vld [vmem:[#allocation12 + $0xbd8] sm:$0xff]  ;;  %v9998_v15 = vpack.c.bf16 %v2479_v9, %v2475_v8  ;;  %v2474_v16 = vld [vmem:[#allocation12 + $0xc90] sm:$0xff] }
 0x510   : > { %v9858_v22 = vpack.c.bf16 %v2453_v20, %v2449_v19  ;;  %v9986_v26 = vpack.c.bf16 %v2455_v23, %v2451_v21  ;;  %v2485_v19 = vld [vmem:[#allocation12 + $0xce8] sm:$0xff]  ;;  %v2483_v20 = vld [vmem:[#allocation12 + $0xcd8] sm:$0xff] }
 0x511   : > { %v2487_v21 = vld [vmem:[#allocation12 + $0xcf8] sm:$0xff] }
 0x512   : > { %9841 = vmatpush1.bf16.msra.mxu0 %v9840_v28  ;;  %9969 = vmatpush1.bf16.msra.mxu1 %v9968_v29  ;;  %v2450_v28 = vld [vmem:[#allocation12 + $0xbd0] sm:$0xff]  ;;  %v2511_v8 = vld [vmem:[#allocation12 + $0xdb8] sm:$0xff] }
 0x513   : > { %9843 = vmatprep.subr.bf16.mxu0 %v9842_v31  ;;  %9971 = vmatprep.subr.bf16.mxu1 %v9970_v32  ;;  %v2454_v29 = vld [vmem:[#allocation12 + $0xbf0] sm:$0xff]  ;;  %v2461_v31 = vld [vmem:[#allocation12 + $0xc28] sm:$0xff]  ;;  %v2459_v32 = vld [vmem:[#allocation12 + $0xc18] sm:$0xff] }
 0x514   : > { %v9988_v4 = vpack.c.bf16 %v2454_v29, %v2450_v28  ;;  %v9862_v33 = vpack.c.bf16 %v2461_v31, %v2457_v30  ;;  %v9990_v35 = vpack.c.bf16 %v2463_v34, %v2459_v32  ;;  %v2482_v28 = vld [vmem:[#allocation12 + $0xcd0] sm:$0xff]  ;;  %v2493_v30 = vld [vmem:[#allocation12 + $0xd28] sm:$0xff]  ;;  %v2491_v31 = vld [vmem:[#allocation12 + $0xd18] sm:$0xff] }
 0x515   : > { %v2486_v29 = vld [vmem:[#allocation12 + $0xcf0] sm:$0xff]  ;;  %v2495_v32 = vld [vmem:[#allocation12 + $0xd38] sm:$0xff] }
 0x516   : > { %9845 = vmatpush1.bf16.msra.mxu0 %v9844_v41  ;;  %9973 = vmatpush1.bf16.msra.mxu1 %v9972_v44  ;;  %v2458_v44 = vld [vmem:[#allocation12 + $0xc10] sm:$0xff]  ;;  %v10004_v34 = vpack.c.bf16 %v2486_v29, %v2482_v28  ;;  %v2521_v28 = vld [vmem:[#allocation12 + $0xe08] sm:$0xff] }
 0x517   : > { %9847 = vmatprep.subr.bf16.mxu0 %v9846_v47  ;;  %9975 = vmatprep.subr.bf16.mxu1 %v9974_v48  ;;  %v2469_v48 = vld [vmem:[#allocation12 + $0xc68] sm:$0xff]  ;;  %v9992_v54 = vpack.c.bf16 %v2462_v45, %v2458_v44  ;;  %v10006_v44 = vpack.c.bf16 %v2495_v32, %v2491_v31  ;;  %v2490_v45 = vld [vmem:[#allocation12 + $0xd10] sm:$0xff] }
 0x518   : > { %v9866_v58 = vpack.c.bf16 %v2469_v48, %v2465_v46  ;;  %v2494_v46 = vld [vmem:[#allocation12 + $0xd30] sm:$0xff]  ;;  %v2497_v48 = vld [vmem:[#allocation12 + $0xd48] sm:$0xff] }
 0x519   : > { %v2525_v29 = vld [vmem:[#allocation12 + $0xe28] sm:$0xff] }
 0x51a   : > { %9849 = vmatpush1.bf16.msra.mxu0 %v9848_v55  ;;  %9977 = vmatpush1.bf16.msra.mxu1 %v9976_v56  ;;  %v2464_v55 = vld [vmem:[#allocation12 + $0xc40] sm:$0xff] }
 0x51b   : > { %9851 = vmatprep.subr.bf16.mxu0 %v9850_v59  ;;  %9979 = vmatprep.subr.bf16.mxu1 %v9978_v62  ;;  %v2468_v56 = vld [vmem:[#allocation12 + $0xc60] sm:$0xff]  ;;  %v9994_v59 = vpack.c.bf16 %v2471_v50, %v2467_v49  ;;  %v2466_v62 = vld [vmem:[#allocation12 + $0xc50] sm:$0xff]  ;;  %v2501_v49 = vld [vmem:[#allocation12 + $0xd68] sm:$0xff] }
 0x51c   : > { %v9996_v12 = vpack.c.bf16 %v2470_v3, %v2466_v62  ;;  %v2499_v50 = vld [vmem:[#allocation12 + $0xd58] sm:$0xff]  ;;  %v2502_v62 = vld [vmem:[#allocation12 + $0xd70] sm:$0xff]  ;;  %v2505_v3 = vld [vmem:[#allocation12 + $0xd88] sm:$0xff] }
 0x51e   : > { %9853 = vmatpush1.bf16.msra.mxu0 %v9852_v10  ;;  %9981 = vmatpush1.bf16.msra.mxu1 %v9980_v11  ;;  %v9868_v11 = vpack.c.bf16 %v2468_v56, %v2464_v55  ;;  %v2496_v55 = vld [vmem:[#allocation12 + $0xd40] sm:$0xff] }
 0x51f   : > { %9855 = vmatprep.subr.bf16.mxu0 %v9854_v13  ;;  %9983 = vmatprep.subr.bf16.mxu1 %v9982_v14  ;;  %v2472_v13 = vld [vmem:[#allocation12 + $0xc80] sm:$0xff] }
 0x520   : > { %v2476_v14 = vld [vmem:[#allocation12 + $0xca0] sm:$0xff] }
 0x521   : > { %v2500_v56 = vld [vmem:[#allocation12 + $0xd60] sm:$0xff] }
 0x522   : > { %9857 = vmatpush1.bf16.msra.mxu0 %v9856_v17  ;;  %9985 = vmatpush1.bf16.msra.mxu1 %v9984_v18  ;;  %v2478_v17 = vld [vmem:[#allocation12 + $0xcb0] sm:$0xff]  ;;  %v2481_v18 = vld [vmem:[#allocation12 + $0xcc8] sm:$0xff]  ;;  %v9884_v9 = vpack.c.bf16 %v2500_v56, %v2496_v55 }
 0x523   : > { %9859 = vmatprep.subr.bf16.mxu0 %v9858_v22  ;;  %9987 = vmatprep.subr.bf16.mxu1 %v9986_v26  ;;  %v9872_v22 = vpack.c.bf16 %v2476_v14, %v2472_v13  ;;  %v10000_v23 = vpack.c.bf16 %v2478_v17, %v2474_v16  ;;  %v9874_v26 = vpack.c.bf16 %v2485_v19, %v2481_v18  ;;  %v2513_v16 = vld [vmem:[#allocation12 + $0xdc8] sm:$0xff]  ;;  %v2515_v18 = vld [vmem:[#allocation12 + $0xdd8] sm:$0xff] }
 0x524   : > { %v9886_v13 = vpack.c.bf16 %v2509_v5, %v2505_v3  ;;  %v10014_v14 = vpack.c.bf16 %v2511_v8, %v2507_v7  ;;  %v2517_v17 = vld [vmem:[#allocation12 + $0xde8] sm:$0xff]  ;;  %v2519_v19 = vld [vmem:[#allocation12 + $0xdf8] sm:$0xff] }
 0x525   : > { %v2539_v3 = vld [vmem:[#allocation12 + $0xe98] sm:$0xff] }
 0x526   : > { %9861 = vmatpush1.bf16.msra.mxu0 %v9860_v27  ;;  %9989 = vmatpush1.bf16.msra.mxu1 %v9988_v4  ;;  %v10002_v27 = vpack.c.bf16 %v2487_v21, %v2483_v20  ;;  %v2489_v4 = vld [vmem:[#allocation12 + $0xd08] sm:$0xff]  ;;  %v2543_v5 = vld [vmem:[#allocation12 + $0xeb8] sm:$0xff] }
 0x527   : > { %9863 = vmatprep.subr.bf16.mxu0 %v9862_v33  ;;  %9991 = vmatprep.subr.bf16.mxu1 %v9990_v35  ;;  %v9876_v33 = vpack.c.bf16 %v2484_v25, %v2480_v24  ;;  %v2488_v35 = vld [vmem:[#allocation12 + $0xd00] sm:$0xff]  ;;  %v9878_v38 = vpack.c.bf16 %v2493_v30, %v2489_v4  ;;  %v9890_v24 = vpack.c.bf16 %v2517_v17, %v2513_v16  ;;  %v2523_v4 = vld [vmem:[#allocation12 + $0xe18] sm:$0xff] }
 0x528   : > { %v10018_v25 = vpack.c.bf16 %v2519_v19, %v2515_v18  ;;  %v2527_v30 = vld [vmem:[#allocation12 + $0xe38] sm:$0xff] }
 0x529   : > { %v2547_v16 = vld [vmem:[#allocation12 + $0xed8] sm:$0xff] }
 0x52a   : > { %v2551_v17 = vld [vmem:[#allocation12 + $0xef8] sm:$0xff] }
 0x5b7   : > { %v13716_v36 = vpop.f32.mrb[6].mxu0 }
 0x5b8   : > { %v13718_v41 = vpop.f32.mrb[7].mxu0  ;;  %v13720_v47 = vpop.f32.mrb[6].mxu1 }
 0x5b9   : > { %v13722_v51 = vpop.f32.mrb[7].mxu1 }
 0x5bb   : > { %v2251_v52 = vpop.f32.mrb[8].mxu0 }
 0x5bc   : > { %v2253_v57 = vpop.f32.mrb[9].mxu0  ;;  %v13724_v6 = vpop.f32.mrb[8].mxu1 }
 0x5bd   : > { %2648 = vmatprep.mubr.f32.mxu0 %v2253_v57  ;;  %2790 = vmatprep.mubr.f32.mxu1 %v2253_v57  ;;  %v2324_v10 = vpop.f32.mrb[9].mxu1  ;;  %v9882_v57 = vpack.c.bf16 %v2501_v49, %v2497_v48  ;;  %v2531_v48 = vld [vmem:[#allocation12 + $0xe58] sm:$0xff] }
 0x5be   : > { %2649 = vmatmul.mubr.f32.vlgmr.msra.gmra.mrb[10].mxu0 %v2251_v52  ;;  %2791 = vmatmul.mubr.f32.vlgmr.msra.gmra.mrb[10].mxu1 %v2251_v52  ;;  %v2503_v52 = vld [vmem:[#allocation12 + $0xd78] sm:$0xff] }
 0x5bf   : > { %9865 = vmatpush1.bf16.msra.mxu0 %v9864_v53  ;;  %9993 = vmatpush1.bf16.msra.mxu1 %v9992_v54  ;;  %v9880_v53 = vpack.c.bf16 %v2492_v37, %v2488_v35  ;;  %v10008_v54 = vpack.c.bf16 %v2494_v46, %v2490_v45  ;;  %v9894_v35 = vpack.c.bf16 %v2525_v29, %v2521_v28  ;;  %v2529_v45 = vld [vmem:[#allocation12 + $0xe48] sm:$0xff]  ;;  %v2535_v49 = vld [vmem:[#allocation12 + $0xe78] sm:$0xff] }
 0x5c0   : > { %9867 = vmatprep.subr.bf16.mxu0 %v9866_v58  ;;  %9995 = vmatprep.subr.bf16.mxu1 %v9994_v59  ;;  %v10010_v58 = vpack.c.bf16 %v2503_v52, %v2499_v50  ;;  %v2498_v59 = vld [vmem:[#allocation12 + $0xd50] sm:$0xff]  ;;  %v10022_v37 = vpack.c.bf16 %v2527_v30, %v2523_v4  ;;  %v2533_v46 = vld [vmem:[#allocation12 + $0xe68] sm:$0xff]  ;;  %v10026_v56 = vpack.c.bf16 %v2535_v49, %v2531_v48  ;;  %v2555_v28 = vld [vmem:[#allocation12 + $0xf18] sm:$0xff] }
 0x5c1   : > { %2719 = vmatprep.mubr.f32.mxu0 %v2324_v10  ;;  %2861 = vmatprep.mubr.f32.mxu1 %v2324_v10  ;;  %v10012_v10 = vpack.c.bf16 %v2502_v62, %v2498_v59  ;;  %v9898_v55 = vpack.c.bf16 %v2533_v46, %v2529_v45  ;;  %v2537_v59 = vld [vmem:[#allocation12 + $0xe88] sm:$0xff]  ;;  %v2559_v29 = vld [vmem:[#allocation12 + $0xf38] sm:$0xff] }
 0x5c2   : > { %v2541_v62 = vld [vmem:[#allocation12 + $0xea8] sm:$0xff]  ;;  %v2563_v45 = vld [vmem:[#allocation12 + $0xf58] sm:$0xff] }
 0x5c3   : > { %9869 = vmatpush1.bf16.msra.mxu0 %v9868_v11  ;;  %9997 = vmatpush1.bf16.msra.mxu1 %v9996_v12  ;;  %v2504_v11 = vld [vmem:[#allocation12 + $0xd80] sm:$0xff]  ;;  %v2567_v46 = vld [vmem:[#allocation12 + $0xf78] sm:$0xff] }
 0x5c4   : > { %9871 = vmatprep.subr.bf16.mxu0 %v9870_v0  ;;  %9999 = vmatprep.subr.bf16.mxu1 %v9998_v15  ;;  %v2508_v12 = vld [vmem:[#allocation12 + $0xda0] sm:$0xff]  ;;  %v2506_v0 = vld [vmem:[#allocation12 + $0xd90] sm:$0xff] }
 0x5c5   : > { %v2510_v15 = vld [vmem:[#allocation12 + $0xdb0] sm:$0xff]  ;;  %v9888_v20 = vpack.c.bf16 %v2508_v12, %v2504_v11  ;;  %v9902_v11 = vpack.c.bf16 %v2541_v62, %v2537_v59  ;;  %v10030_v12 = vpack.c.bf16 %v2543_v5, %v2539_v3  ;;  %v2571_v59 = vld [vmem:[#allocation12 + $0xf98] sm:$0xff] }
 0x5c6   : > { %v10016_v21 = vpack.c.bf16 %v2510_v15, %v2506_v0  ;;  %v2545_v0 = vld [vmem:[#allocation12 + $0xec8] sm:$0xff]  ;;  %v2575_v62 = vld [vmem:[#allocation12 + $0xfb8] sm:$0xff] }
 0x5c7   : > { %9873 = vmatpush1.bf16.msra.mxu0 %v9872_v22  ;;  %10001 = vmatpush1.bf16.msra.mxu1 %v10000_v23  ;;  %v2512_v22 = vld [vmem:[#allocation12 + $0xdc0] sm:$0xff]  ;;  %v2549_v15 = vld [vmem:[#allocation12 + $0xee8] sm:$0xff] }
 0x5c8   : > { %9875 = vmatprep.subr.bf16.mxu0 %v9874_v26  ;;  %10003 = vmatprep.subr.bf16.mxu1 %v10002_v27  ;;  %v2516_v23 = vld [vmem:[#allocation12 + $0xde0] sm:$0xff]  ;;  %v2514_v26 = vld [vmem:[#allocation12 + $0xdd0] sm:$0xff] }
 0x5c9   : > { %v2518_v27 = vld [vmem:[#allocation12 + $0xdf0] sm:$0xff]  ;;  %v9892_v31 = vpack.c.bf16 %v2516_v23, %v2512_v22  ;;  %v9906_v22 = vpack.c.bf16 %v2549_v15, %v2545_v0  ;;  %v10034_v23 = vpack.c.bf16 %v2551_v17, %v2547_v16  ;;  %v2579_v0 = vld [vmem:[#allocation12 + $0xfd8] sm:$0xff] }
 0x5ca   : > { %v10020_v32 = vpack.c.bf16 %v2518_v27, %v2514_v26  ;;  %v2553_v26 = vld [vmem:[#allocation12 + $0xf08] sm:$0xff]  ;;  %v2583_v15 = vld [vmem:[#allocation12 + $0xff8] sm:$0xff] }
 0x5cb   : > { %9877 = vmatpush1.bf16.msra.mxu0 %v9876_v33  ;;  %10005 = vmatpush1.bf16.msra.mxu1 %v10004_v34  ;;  %v2520_v33 = vld [vmem:[#allocation12 + $0xe00] sm:$0xff]  ;;  %v2557_v27 = vld [vmem:[#allocation12 + $0xf28] sm:$0xff] }
 0x5cc   : > { %9879 = vmatprep.subr.bf16.mxu0 %v9878_v38  ;;  %10007 = vmatprep.subr.bf16.mxu1 %v10006_v44  ;;  %v2524_v34 = vld [vmem:[#allocation12 + $0xe20] sm:$0xff]  ;;  %v2522_v38 = vld [vmem:[#allocation12 + $0xe10] sm:$0xff] }
 0x5cd   : > { %v2526_v44 = vld [vmem:[#allocation12 + $0xe30] sm:$0xff]  ;;  %v9896_v50 = vpack.c.bf16 %v2524_v34, %v2520_v33  ;;  %v9910_v33 = vpack.c.bf16 %v2557_v27, %v2553_v26  ;;  %v10038_v34 = vpack.c.bf16 %v2559_v29, %v2555_v28  ;;  %v1927_v26 = vld [vmem:[#allocation12 + $0x18] sm:$0xff] }
 0x5ce   : > { %v10024_v52 = vpack.c.bf16 %v2526_v44, %v2522_v38  ;;  %v2561_v38 = vld [vmem:[#allocation12 + $0xf48] sm:$0xff]  ;;  %v1931_v27 = vld [vmem:[#allocation12 + $0x38] sm:$0xff] }
 0x5cf   : > { %9881 = vmatpush1.bf16.msra.mxu0 %v9880_v53  ;;  %10009 = vmatpush1.bf16.msra.mxu1 %v10008_v54  ;;  %v2528_v53 = vld [vmem:[#allocation12 + $0xe40] sm:$0xff]  ;;  %v2565_v44 = vld [vmem:[#allocation12 + $0xf68] sm:$0xff] }
 0x5d0   : > { %9883 = vmatprep.subr.bf16.mxu0 %v9882_v57  ;;  %10011 = vmatprep.subr.bf16.mxu1 %v10010_v58  ;;  %v2532_v54 = vld [vmem:[#allocation12 + $0xe60] sm:$0xff]  ;;  %v2530_v57 = vld [vmem:[#allocation12 + $0xe50] sm:$0xff] }
 0x5d1   : > { %v2534_v58 = vld [vmem:[#allocation12 + $0xe70] sm:$0xff]  ;;  %v9900_v7 = vpack.c.bf16 %v2532_v54, %v2528_v53  ;;  %v9914_v53 = vpack.c.bf16 %v2565_v44, %v2561_v38  ;;  %v10042_v54 = vpack.c.bf16 %v2567_v46, %v2563_v45  ;;  %v1935_v38 = vld [vmem:[#allocation12 + $0x58] sm:$0xff] }
 0x5d2   : > { %v10028_v8 = vpack.c.bf16 %v2534_v58, %v2530_v57  ;;  %v2569_v57 = vld [vmem:[#allocation12 + $0xf88] sm:$0xff]  ;;  %v1939_v44 = vld [vmem:[#allocation12 + $0x78] sm:$0xff] }
 0x5d3   : > { %9885 = vmatpush1.bf16.msra.mxu0 %v9884_v9  ;;  %10013 = vmatpush1.bf16.msra.mxu1 %v10012_v10  ;;  %v2536_v9 = vld [vmem:[#allocation12 + $0xe80] sm:$0xff]  ;;  %v2573_v58 = vld [vmem:[#allocation12 + $0xfa8] sm:$0xff] }
 0x5d4   : > { %9887 = vmatprep.subr.bf16.mxu0 %v9886_v13  ;;  %10015 = vmatprep.subr.bf16.mxu1 %v10014_v14  ;;  %v2540_v10 = vld [vmem:[#allocation12 + $0xea0] sm:$0xff]  ;;  %v2538_v13 = vld [vmem:[#allocation12 + $0xe90] sm:$0xff] }
 0x5d5   : > { %v2542_v14 = vld [vmem:[#allocation12 + $0xeb0] sm:$0xff]  ;;  %v9904_v18 = vpack.c.bf16 %v2540_v10, %v2536_v9  ;;  %v9918_v9 = vpack.c.bf16 %v2573_v58, %v2569_v57  ;;  %v10046_v10 = vpack.c.bf16 %v2575_v62, %v2571_v59  ;;  %v1943_v57 = vld [vmem:[#allocation12 + $0x98] sm:$0xff] }
 0x5d6   : > { %v10032_v19 = vpack.c.bf16 %v2542_v14, %v2538_v13  ;;  %v2577_v13 = vld [vmem:[#allocation12 + $0xfc8] sm:$0xff]  ;;  %v1947_v58 = vld [vmem:[#allocation12 + $0xb8] sm:$0xff] }
 0x5d7   : > { %9889 = vmatpush1.bf16.msra.mxu0 %v9888_v20  ;;  %10017 = vmatpush1.bf16.msra.mxu1 %v10016_v21  ;;  %v2544_v20 = vld [vmem:[#allocation12 + $0xec0] sm:$0xff]  ;;  %v2581_v14 = vld [vmem:[#allocation12 + $0xfe8] sm:$0xff] }
 0x5d8   : > { %9891 = vmatprep.subr.bf16.mxu0 %v9890_v24  ;;  %10019 = vmatprep.subr.bf16.mxu1 %v10018_v25  ;;  %v2548_v21 = vld [vmem:[#allocation12 + $0xee0] sm:$0xff]  ;;  %v2546_v24 = vld [vmem:[#allocation12 + $0xed0] sm:$0xff] }
 0x5d9   : > { %v2550_v25 = vld [vmem:[#allocation12 + $0xef0] sm:$0xff]  ;;  %v9908_v4 = vpack.c.bf16 %v2548_v21, %v2544_v20  ;;  %v9922_v20 = vpack.c.bf16 %v2581_v14, %v2577_v13  ;;  %v10050_v21 = vpack.c.bf16 %v2583_v15, %v2579_v0  ;;  %v1955_v13 = vld [vmem:[#allocation12 + $0xf8] sm:$0xff] }
 0x5da   : > { %v10036_v30 = vpack.c.bf16 %v2550_v25, %v2546_v24  ;;  %v1925_v24 = vld [vmem:[#allocation12 + $0x8] sm:$0xff] }
 0x5db   : > { %9893 = vmatpush1.bf16.msra.mxu0 %v9892_v31  ;;  %10021 = vmatpush1.bf16.msra.mxu1 %v10020_v32  ;;  %v2552_v31 = vld [vmem:[#allocation12 + $0xf00] sm:$0xff]  ;;  %v1929_v25 = vld [vmem:[#allocation12 + $0x28] sm:$0xff] }
 0x5dc   : > { %9895 = vmatprep.subr.bf16.mxu0 %v9894_v35  ;;  %10023 = vmatprep.subr.bf16.mxu1 %v10022_v37  ;;  %v2556_v32 = vld [vmem:[#allocation12 + $0xf20] sm:$0xff]  ;;  %v2554_v35 = vld [vmem:[#allocation12 + $0xf10] sm:$0xff] }
 0x5dd   : > { %v2558_v37 = vld [vmem:[#allocation12 + $0xf30] sm:$0xff]  ;;  %v9912_v48 = vpack.c.bf16 %v2556_v32, %v2552_v31  ;;  %v1924_v31 = vld [vmem:[#allocation12] sm:$0xff] }
 0x5de   : > { %v10040_v49 = vpack.c.bf16 %v2558_v37, %v2554_v35  ;;  %v1928_v32 = vld [vmem:[#allocation12 + $0x20] sm:$0xff]  ;;  %v1933_v35 = vld [vmem:[#allocation12 + $0x48] sm:$0xff] }
 0x5df   : > { %9897 = vmatpush1.bf16.msra.mxu0 %v9896_v50  ;;  %10025 = vmatpush1.bf16.msra.mxu1 %v10024_v52  ;;  %v2560_v50 = vld [vmem:[#allocation12 + $0xf40] sm:$0xff]  ;;  %v1937_v37 = vld [vmem:[#allocation12 + $0x68] sm:$0xff]  ;;  %v10056_v45 = vpack.c.bf16 %v1928_v32, %v1924_v31 }
 0x5e0   : > { %9899 = vmatprep.subr.bf16.mxu0 %v9898_v55  ;;  %10027 = vmatprep.subr.bf16.mxu1 %v10026_v56  ;;  %v2564_v52 = vld [vmem:[#allocation12 + $0xf60] sm:$0xff]  ;;  %v2562_v55 = vld [vmem:[#allocation12 + $0xf50] sm:$0xff]  ;;  %v1965_v31 = vld [vmem:[#allocation12 + $0x148] sm:$0xff] }
 0x5e1   : > { %v2566_v56 = vld [vmem:[#allocation12 + $0xf70] sm:$0xff]  ;;  %v9916_v3 = vpack.c.bf16 %v2564_v52, %v2560_v50  ;;  %v10058_v52 = vpack.c.bf16 %v1937_v37, %v1933_v35  ;;  %v1969_v32 = vld [vmem:[#allocation12 + $0x168] sm:$0xff] }
 0x5e2   : > { %v10044_v5 = vpack.c.bf16 %v2566_v56, %v2562_v55  ;;  %v1934_v50 = vld [vmem:[#allocation12 + $0x50] sm:$0xff]  ;;  %v1941_v55 = vld [vmem:[#allocation12 + $0x88] sm:$0xff] }
 0x5e3   : > { %9901 = vmatpush1.bf16.msra.mxu0 %v9900_v7  ;;  %10029 = vmatpush1.bf16.msra.mxu1 %v10028_v8  ;;  %v2568_v7 = vld [vmem:[#allocation12 + $0xf80] sm:$0xff]  ;;  %v1945_v56 = vld [vmem:[#allocation12 + $0xa8] sm:$0xff] }
 0x5e4   : > { %9903 = vmatprep.subr.bf16.mxu0 %v9902_v11  ;;  %10031 = vmatprep.subr.bf16.mxu1 %v10030_v12  ;;  %v2572_v8 = vld [vmem:[#allocation12 + $0xfa0] sm:$0xff]  ;;  %v2570_v11 = vld [vmem:[#allocation12 + $0xf90] sm:$0xff] }
 0x5e5   : > { %v2574_v12 = vld [vmem:[#allocation12 + $0xfb0] sm:$0xff]  ;;  %v9920_v16 = vpack.c.bf16 %v2572_v8, %v2568_v7  ;;  %v1944_v7 = vld [vmem:[#allocation12 + $0xa0] sm:$0xff] }
 0x5e6   : > { %v10048_v17 = vpack.c.bf16 %v2574_v12, %v2570_v11  ;;  %v1942_v8 = vld [vmem:[#allocation12 + $0x90] sm:$0xff]  ;;  %v1949_v11 = vld [vmem:[#allocation12 + $0xc8] sm:$0xff]  ;;  %v1951_v12 = vld [vmem:[#allocation12 + $0xd8] sm:$0xff] }
 0x5e7   : > { %9905 = vmatpush1.bf16.msra.mxu0 %v9904_v18  ;;  %10033 = vmatpush1.bf16.msra.mxu1 %v10032_v19  ;;  %v2576_v18 = vld [vmem:[#allocation12 + $0xfc0] sm:$0xff] }
 0x5e8   : > { %9907 = vmatprep.subr.bf16.mxu0 %v9906_v22  ;;  %10035 = vmatprep.subr.bf16.mxu1 %v10034_v23  ;;  %v2580_v19 = vld [vmem:[#allocation12 + $0xfe0] sm:$0xff]  ;;  %v2578_v22 = vld [vmem:[#allocation12 + $0xfd0] sm:$0xff] }
 0x5e9   : > { %v2582_v23 = vld [vmem:[#allocation12 + $0xff0] sm:$0xff]  ;;  %v9924_v28 = vpack.c.bf16 %v2580_v19, %v2576_v18  ;;  %v10194_v18 = vpack.c.bf16 %v1955_v13, %v1951_v12  ;;  %v1980_v13 = vld [vmem:[#allocation12 + $0x1c0] sm:$0xff] }
 0x5ea   : > { %v10052_v29 = vpack.c.bf16 %v2582_v23, %v2578_v22  ;;  %v1954_v19 = vld [vmem:[#allocation12 + $0xf0] sm:$0xff]  ;;  %v1959_v22 = vld [vmem:[#allocation12 + $0x118] sm:$0xff] }
 0x5eb   : > { %9909 = vmatpush1.bf16.msra.mxu0 %v9908_v4  ;;  %10037 = vmatpush1.bf16.msra.mxu1 %v10036_v30  ;;  %v10054_v4 = vpack.c.bf16 %v1929_v25, %v1925_v24  ;;  %v10182_v30 = vpack.c.bf16 %v1931_v27, %v1927_v26  ;;  %v1963_v23 = vld [vmem:[#allocation12 + $0x138] sm:$0xff]  ;;  %v1956_v27 = vld [vmem:[#allocation12 + $0x100] sm:$0xff] }
 0x5ec   : > { %9911 = vmatprep.subr.bf16.mxu0 %v9910_v33  ;;  %10039 = vmatprep.subr.bf16.mxu1 %v10038_v34  ;;  %v1926_v33 = vld [vmem:[#allocation12 + $0x10] sm:$0xff] }
 0x5ed   : > { %v1930_v34 = vld [vmem:[#allocation12 + $0x30] sm:$0xff] }
 0x5ee   : > { %v10184_v46 = vpack.c.bf16 %v1930_v34, %v1926_v33  ;;  %v1967_v33 = vld [vmem:[#allocation12 + $0x158] sm:$0xff] }
 0x5ef   : > { %9913 = vmatpush1.bf16.msra.mxu0 %v9912_v48  ;;  %10041 = vmatpush1.bf16.msra.mxu1 %v10040_v49  ;;  %v1932_v48 = vld [vmem:[#allocation12 + $0x40] sm:$0xff]  ;;  %v1971_v34 = vld [vmem:[#allocation12 + $0x178] sm:$0xff] }
 0x5f0   : > { %9915 = vmatprep.subr.bf16.mxu0 %v9914_v53  ;;  %10043 = vmatprep.subr.bf16.mxu1 %v10042_v54  ;;  %v1936_v49 = vld [vmem:[#allocation12 + $0x60] sm:$0xff]  ;;  %v10186_v53 = vpack.c.bf16 %v1939_v44, %v1935_v38  ;;  %v1938_v54 = vld [vmem:[#allocation12 + $0x70] sm:$0xff]  ;;  %v10074_v38 = vpack.c.bf16 %v1969_v32, %v1965_v31 }
 0x5f1   : > { %v10060_v59 = vpack.c.bf16 %v1936_v49, %v1932_v48  ;;  %v10188_v62 = vpack.c.bf16 %v1938_v54, %v1934_v50  ;;  %v1964_v44 = vld [vmem:[#allocation12 + $0x140] sm:$0xff]  ;;  %v10202_v48 = vpack.c.bf16 %v1971_v34, %v1967_v33  ;;  %v1970_v49 = vld [vmem:[#allocation12 + $0x170] sm:$0xff]  ;;  %v1973_v50 = vld [vmem:[#allocation12 + $0x188] sm:$0xff] }
 0x5f2   : > { %v1979_v54 = vld [vmem:[#allocation12 + $0x1b8] sm:$0xff]  ;;  %v1996_v34 = vld [vmem:[#allocation12 + $0x240] sm:$0xff] }
 0x5f3   : > { %9917 = vmatpush1.bf16.msra.mxu0 %v9916_v3  ;;  %10045 = vmatpush1.bf16.msra.mxu1 %v10044_v5  ;;  %v10062_v3 = vpack.c.bf16 %v1945_v56, %v1941_v55  ;;  %v1940_v5 = vld [vmem:[#allocation12 + $0x80] sm:$0xff] }
 0x5f4   : > { %9919 = vmatprep.subr.bf16.mxu0 %v9918_v9  ;;  %10047 = vmatprep.subr.bf16.mxu1 %v10046_v10  ;;  %v10190_v9 = vpack.c.bf16 %v1947_v58, %v1943_v57  ;;  %v1946_v10 = vld [vmem:[#allocation12 + $0xb0] sm:$0xff]  ;;  %v10064_v14 = vpack.c.bf16 %v1944_v7, %v1940_v5  ;;  %v1972_v58 = vld [vmem:[#allocation12 + $0x180] sm:$0xff]  ;;  %v1981_v7 = vld [vmem:[#allocation12 + $0x1c8] sm:$0xff] }
 0x5f5   : > { %v10192_v0 = vpack.c.bf16 %v1946_v10, %v1942_v8  ;;  %v1978_v5 = vld [vmem:[#allocation12 + $0x1b0] sm:$0xff]  ;;  %v1985_v8 = vld [vmem:[#allocation12 + $0x1e8] sm:$0xff]  ;;  %v1987_v10 = vld [vmem:[#allocation12 + $0x1f8] sm:$0xff] }
 0x5f6   : > { %v10082_v12 = vpack.c.bf16 %v1985_v8, %v1981_v7 }
 0x5f7   : > { %9921 = vmatpush1.bf16.msra.mxu0 %v9920_v16  ;;  %10049 = vmatpush1.bf16.msra.mxu1 %v10048_v17  ;;  %v1952_v16 = vld [vmem:[#allocation12 + $0xe0] sm:$0xff]  ;;  %v1950_v17 = vld [vmem:[#allocation12 + $0xd0] sm:$0xff] }
 0x5f8   : > { %9923 = vmatprep.subr.bf16.mxu0 %v9922_v20  ;;  %10051 = vmatprep.subr.bf16.mxu1 %v10050_v21  ;;  %v1957_v20 = vld [vmem:[#allocation12 + $0x108] sm:$0xff]  ;;  %v10196_v25 = vpack.c.bf16 %v1954_v19, %v1950_v17  ;;  %v1995_v19 = vld [vmem:[#allocation12 + $0x238] sm:$0xff] }
 0x5f9   : > { %v1961_v21 = vld [vmem:[#allocation12 + $0x128] sm:$0xff] }
 0x5fa   : > { %v10070_v26 = vpack.c.bf16 %v1961_v21, %v1957_v20  ;;  %v1993_v17 = vld [vmem:[#allocation12 + $0x228] sm:$0xff] }
 0x5fb   : > { %9925 = vmatpush1.bf16.msra.mxu0 %v9924_v28  ;;  %10053 = vmatpush1.bf16.msra.mxu1 %v10052_v29  ;;  %v1960_v28 = vld [vmem:[#allocation12 + $0x120] sm:$0xff]  ;;  %v1958_v29 = vld [vmem:[#allocation12 + $0x110] sm:$0xff] }
 0x5fc   : > { %10055 = vmatprep.subr.bf16.mxu0 %v10054_v4  ;;  %10183 = vmatprep.subr.bf16.mxu1 %v10182_v30  ;;  %v10198_v4 = vpack.c.bf16 %v1963_v23, %v1959_v22  ;;  %v1962_v30 = vld [vmem:[#allocation12 + $0x130] sm:$0xff]  ;;  %v10072_v35 = vpack.c.bf16 %v1960_v28, %v1956_v27  ;;  %v1988_v23 = vld [vmem:[#allocation12 + $0x200] sm:$0xff]  ;;  %v1997_v28 = vld [vmem:[#allocation12 + $0x248] sm:$0xff] }
 0x5fd   : > { %v10200_v37 = vpack.c.bf16 %v1962_v30, %v1958_v29  ;;  %v1994_v27 = vld [vmem:[#allocation12 + $0x230] sm:$0xff]  ;;  %v2001_v29 = vld [vmem:[#allocation12 + $0x268] sm:$0xff]  ;;  %v2003_v30 = vld [vmem:[#allocation12 + $0x278] sm:$0xff] }
 0x5fe   : > { %2720 = vmatmul.mubr.f32.vlgmr.msra.gmra.mrb[10].mxu0 %v13724_v6  ;;  %2862 = vmatmul.mubr.f32.vlgmr.msra.gmra.mrb[10].mxu1 %v13724_v6  ;;  %v1953_v6 = vld [vmem:[#allocation12 + $0xe8] sm:$0xff]  ;;  %v10090_v33 = vpack.c.bf16 %v2001_v29, %v1997_v28 }
 0x5ff   : > { %10057 = vmatpush1.bf16.msra.mxu0 %v10056_v45  ;;  %2932 = vmatprep.mubr.f32.mxu0 %v13718_v41  ;;  %v10066_v15 = vpack.c.bf16 %v1953_v6, %v1949_v11  ;;  %v1968_v45 = vld [vmem:[#allocation12 + $0x160] sm:$0xff] }
 0x600   : > { %10185 = vmatpush1.bf16.msra.mxu1 %v10184_v46  ;;  %3074 = vmatprep.mubr.f32.mxu1 %v13718_v41  ;;  %v1948_v41 = vld [vmem:[#allocation12 + $0xc0] sm:$0xff]  ;;  %v1966_v46 = vld [vmem:[#allocation12 + $0x150] sm:$0xff]  ;;  %v10076_v55 = vpack.c.bf16 %v1968_v45, %v1964_v44  ;;  %v2005_v45 = vld [vmem:[#allocation12 + $0x288] sm:$0xff] }
 0x601   : > { %10059 = vmatprep.subr.bf16.mxu0 %v10058_v52  ;;  %10187 = vmatprep.subr.bf16.mxu1 %v10186_v53  ;;  %v10068_v24 = vpack.c.bf16 %v1952_v16, %v1948_v41  ;;  %v1977_v52 = vld [vmem:[#allocation12 + $0x1a8] sm:$0xff]  ;;  %v1975_v53 = vld [vmem:[#allocation12 + $0x198] sm:$0xff]  ;;  %v10204_v56 = vpack.c.bf16 %v1970_v49, %v1966_v46  ;;  %v1986_v41 = vld [vmem:[#allocation12 + $0x1f0] sm:$0xff] }
 0x602   : > { %v10078_v57 = vpack.c.bf16 %v1977_v52, %v1973_v50  ;;  %v1989_v16 = vld [vmem:[#allocation12 + $0x208] sm:$0xff]  ;;  %v2002_v44 = vld [vmem:[#allocation12 + $0x270] sm:$0xff]  ;;  %v2011_v49 = vld [vmem:[#allocation12 + $0x2b8] sm:$0xff] }
 0x603   : > { %10061 = vmatpush1.bf16.msra.mxu0 %v10060_v59  ;;  %v1976_v59 = vld [vmem:[#allocation12 + $0x1a0] sm:$0xff]  ;;  %v10086_v22 = vpack.c.bf16 %v1993_v17, %v1989_v16  ;;  %v2009_v46 = vld [vmem:[#allocation12 + $0x2a8] sm:$0xff] }
 0x604   : > { %10189 = vmatpush1.bf16.msra.mxu1 %v10188_v62  ;;  %10063 = vmatprep.subr.bf16.mxu0 %v10062_v3  ;;  %v1974_v62 = vld [vmem:[#allocation12 + $0x190] sm:$0xff]  ;;  %v10206_v3 = vpack.c.bf16 %v1979_v54, %v1975_v53  ;;  %v10080_v11 = vpack.c.bf16 %v1976_v59, %v1972_v58  ;;  %v10094_v53 = vpack.c.bf16 %v2009_v46, %v2005_v45  ;;  %v2004_v54 = vld [vmem:[#allocation12 + $0x280] sm:$0xff]  ;;  %v2013_v59 = vld [vmem:[#allocation12 + $0x2c8] sm:$0xff] }
 0x605   : > { %10191 = vmatprep.subr.bf16.mxu1 %v10190_v9  ;;  %v1983_v9 = vld [vmem:[#allocation12 + $0x1d8] sm:$0xff]  ;;  %v10208_v6 = vpack.c.bf16 %v1978_v5, %v1974_v62  ;;  %v2010_v58 = vld [vmem:[#allocation12 + $0x2b0] sm:$0xff]  ;;  %v2017_v62 = vld [vmem:[#allocation12 + $0x2e8] sm:$0xff] }
 0x606   : > { %v2019_v5 = vld [vmem:[#allocation12 + $0x2f8] sm:$0xff] }
 0x607   : > { %10065 = vmatpush1.bf16.msra.mxu0 %v10064_v14  ;;  %v1984_v14 = vld [vmem:[#allocation12 + $0x1e0] sm:$0xff] }
 0x608   : > { %10193 = vmatpush1.bf16.msra.mxu1 %v10192_v0  ;;  %10067 = vmatprep.subr.bf16.mxu0 %v10066_v15  ;;  %v1982_v0 = vld [vmem:[#allocation12 + $0x1d0] sm:$0xff]  ;;  %v10210_v15 = vpack.c.bf16 %v1987_v10, %v1983_v9  ;;  %v10084_v20 = vpack.c.bf16 %v1984_v14, %v1980_v13  ;;  %v10098_v9 = vpack.c.bf16 %v2017_v62, %v2013_v59  ;;  %v2012_v10 = vld [vmem:[#allocation12 + $0x2c0] sm:$0xff]  ;;  %v2021_v14 = vld [vmem:[#allocation12 + $0x308] sm:$0xff] }
 0x609   : > { %10195 = vmatprep.subr.bf16.mxu1 %v10194_v18  ;;  %v1991_v18 = vld [vmem:[#allocation12 + $0x218] sm:$0xff]  ;;  %v10212_v21 = vpack.c.bf16 %v1986_v41, %v1982_v0  ;;  %v2018_v13 = vld [vmem:[#allocation12 + $0x2f0] sm:$0xff]  ;;  %v2025_v0 = vld [vmem:[#allocation12 + $0x328] sm:$0xff] }
 0x60a   : > { %v2027_v41 = vld [vmem:[#allocation12 + $0x338] sm:$0xff] }
 0x60b   : > { %10069 = vmatpush1.bf16.msra.mxu0 %v10068_v24  ;;  %v1992_v24 = vld [vmem:[#allocation12 + $0x220] sm:$0xff] }
 0x60c   : > { %10197 = vmatpush1.bf16.msra.mxu1 %v10196_v25  ;;  %10071 = vmatprep.subr.bf16.mxu0 %v10070_v26  ;;  %v1990_v25 = vld [vmem:[#allocation12 + $0x210] sm:$0xff]  ;;  %v10214_v26 = vpack.c.bf16 %v1995_v19, %v1991_v18  ;;  %v10088_v31 = vpack.c.bf16 %v1992_v24, %v1988_v23  ;;  %v10102_v18 = vpack.c.bf16 %v2025_v0, %v2021_v14  ;;  %v2020_v19 = vld [vmem:[#allocation12 + $0x300] sm:$0xff]  ;;  %v2029_v24 = vld [vmem:[#allocation12 + $0x348] sm:$0xff] }
 0x60d   : > { %10199 = vmatprep.subr.bf16.mxu1 %v10198_v4  ;;  %v1999_v4 = vld [vmem:[#allocation12 + $0x258] sm:$0xff]  ;;  %v10216_v32 = vpack.c.bf16 %v1994_v27, %v1990_v25  ;;  %v2026_v23 = vld [vmem:[#allocation12 + $0x330] sm:$0xff]  ;;  %v2033_v25 = vld [vmem:[#allocation12 + $0x368] sm:$0xff] }
 0x60e   : > { %v2035_v27 = vld [vmem:[#allocation12 + $0x378] sm:$0xff] }
 0x60f   : > { %10073 = vmatpush1.bf16.msra.mxu0 %v10072_v35  ;;  %v2000_v35 = vld [vmem:[#allocation12 + $0x260] sm:$0xff] }
 0x610   : > { %10201 = vmatpush1.bf16.msra.mxu1 %v10200_v37  ;;  %10075 = vmatprep.subr.bf16.mxu0 %v10074_v38  ;;  %v1998_v37 = vld [vmem:[#allocation12 + $0x250] sm:$0xff]  ;;  %v10218_v38 = vpack.c.bf16 %v2003_v30, %v1999_v4  ;;  %v10092_v50 = vpack.c.bf16 %v2000_v35, %v1996_v34  ;;  %v10106_v4 = vpack.c.bf16 %v2033_v25, %v2029_v24  ;;  %v2028_v30 = vld [vmem:[#allocation12 + $0x340] sm:$0xff]  ;;  %v2037_v35 = vld [vmem:[#allocation12 + $0x388] sm:$0xff] }
 0x611   : > { %10203 = vmatprep.subr.bf16.mxu1 %v10202_v48  ;;  %v2007_v48 = vld [vmem:[#allocation12 + $0x298] sm:$0xff]  ;;  %v10220_v52 = vpack.c.bf16 %v2002_v44, %v1998_v37  ;;  %v2034_v34 = vld [vmem:[#allocation12 + $0x370] sm:$0xff]  ;;  %v2041_v37 = vld [vmem:[#allocation12 + $0x3a8] sm:$0xff] }
 0x612   : > { %v2043_v44 = vld [vmem:[#allocation12 + $0x3b8] sm:$0xff] }
 0x613   : > { %10077 = vmatpush1.bf16.msra.mxu0 %v10076_v55  ;;  %v2008_v55 = vld [vmem:[#allocation12 + $0x2a0] sm:$0xff]  ;;  %v2067_v24 = vld [vmem:[#allocation12 + $0x478] sm:$0xff] }
 0x614   : > { %10205 = vmatpush1.bf16.msra.mxu1 %v10204_v56  ;;  %10079 = vmatprep.subr.bf16.mxu0 %v10078_v57  ;;  %v2006_v56 = vld [vmem:[#allocation12 + $0x290] sm:$0xff]  ;;  %v10222_v57 = vpack.c.bf16 %v2011_v49, %v2007_v48  ;;  %v10096_v7 = vpack.c.bf16 %v2008_v55, %v2004_v54  ;;  %v10110_v48 = vpack.c.bf16 %v2041_v37, %v2037_v35  ;;  %v2036_v49 = vld [vmem:[#allocation12 + $0x380] sm:$0xff]  ;;  %v2045_v55 = vld [vmem:[#allocation12 + $0x3c8] sm:$0xff] }
 0x615   : > { %10207 = vmatprep.subr.bf16.mxu1 %v10206_v3  ;;  %v2015_v3 = vld [vmem:[#allocation12 + $0x2d8] sm:$0xff]  ;;  %v10224_v8 = vpack.c.bf16 %v2010_v58, %v2006_v56  ;;  %v2042_v54 = vld [vmem:[#allocation12 + $0x3b0] sm:$0xff]  ;;  %v2049_v56 = vld [vmem:[#allocation12 + $0x3e8] sm:$0xff] }
 0x616   : > { %v2051_v58 = vld [vmem:[#allocation12 + $0x3f8] sm:$0xff] }
 0x617   : > { %10081 = vmatpush1.bf16.msra.mxu0 %v10080_v11  ;;  %v2016_v11 = vld [vmem:[#allocation12 + $0x2e0] sm:$0xff] }
 0x618   : > { %10209 = vmatpush1.bf16.msra.mxu1 %v10208_v6  ;;  %10083 = vmatprep.subr.bf16.mxu0 %v10082_v12  ;;  %v2014_v6 = vld [vmem:[#allocation12 + $0x2d0] sm:$0xff]  ;;  %v10226_v12 = vpack.c.bf16 %v2019_v5, %v2015_v3  ;;  %v10100_v16 = vpack.c.bf16 %v2016_v11, %v2012_v10  ;;  %v10114_v3 = vpack.c.bf16 %v2049_v56, %v2045_v55  ;;  %v2044_v5 = vld [vmem:[#allocation12 + $0x3c0] sm:$0xff]  ;;  %v2053_v11 = vld [vmem:[#allocation12 + $0x408] sm:$0xff] }
 0x619   : > { %10211 = vmatprep.subr.bf16.mxu1 %v10210_v15  ;;  %v2023_v15 = vld [vmem:[#allocation12 + $0x318] sm:$0xff]  ;;  %v10228_v17 = vpack.c.bf16 %v2018_v13, %v2014_v6  ;;  %v2050_v10 = vld [vmem:[#allocation12 + $0x3f0] sm:$0xff]  ;;  %v2057_v6 = vld [vmem:[#allocation12 + $0x428] sm:$0xff] }
 0x61a   : > { %v2059_v13 = vld [vmem:[#allocation12 + $0x438] sm:$0xff] }
 0x61b   : > { %10085 = vmatpush1.bf16.msra.mxu0 %v10084_v20  ;;  %v2024_v20 = vld [vmem:[#allocation12 + $0x320] sm:$0xff] }
 0x61c   : > { %10213 = vmatpush1.bf16.msra.mxu1 %v10212_v21  ;;  %10087 = vmatprep.subr.bf16.mxu0 %v10086_v22  ;;  %v2022_v21 = vld [vmem:[#allocation12 + $0x310] sm:$0xff]  ;;  %v10230_v22 = vpack.c.bf16 %v2027_v41, %v2023_v15  ;;  %v10104_v28 = vpack.c.bf16 %v2024_v20, %v2020_v19  ;;  %v10118_v15 = vpack.c.bf16 %v2057_v6, %v2053_v11  ;;  %v2052_v41 = vld [vmem:[#allocation12 + $0x400] sm:$0xff]  ;;  %v2061_v20 = vld [vmem:[#allocation12 + $0x448] sm:$0xff] }
 0x61d   : > { %10215 = vmatprep.subr.bf16.mxu1 %v10214_v26  ;;  %v2031_v26 = vld [vmem:[#allocation12 + $0x358] sm:$0xff]  ;;  %v10232_v29 = vpack.c.bf16 %v2026_v23, %v2022_v21  ;;  %v2058_v19 = vld [vmem:[#allocation12 + $0x430] sm:$0xff]  ;;  %v2065_v21 = vld [vmem:[#allocation12 + $0x468] sm:$0xff] }
 0x61e   : > { %v2063_v23 = vld [vmem:[#allocation12 + $0x458] sm:$0xff]  ;;  %v2084_v6 = vld [vmem:[#allocation12 + $0x500] sm:$0xff] }
 0x61f   : > { %10089 = vmatpush1.bf16.msra.mxu0 %v10088_v31  ;;  %v2032_v31 = vld [vmem:[#allocation12 + $0x360] sm:$0xff] }
 0x620   : > { %10217 = vmatpush1.bf16.msra.mxu1 %v10216_v32  ;;  %10091 = vmatprep.subr.bf16.mxu0 %v10090_v33  ;;  %v2030_v32 = vld [vmem:[#allocation12 + $0x350] sm:$0xff]  ;;  %v10234_v33 = vpack.c.bf16 %v2035_v27, %v2031_v26  ;;  %v10108_v45 = vpack.c.bf16 %v2032_v31, %v2028_v30  ;;  %v2060_v26 = vld [vmem:[#allocation12 + $0x440] sm:$0xff]  ;;  %v2069_v30 = vld [vmem:[#allocation12 + $0x488] sm:$0xff] }
 0x621   : > { %10219 = vmatprep.subr.bf16.mxu1 %v10218_v38  ;;  %v2039_v38 = vld [vmem:[#allocation12 + $0x398] sm:$0xff]  ;;  %v10236_v46 = vpack.c.bf16 %v2034_v34, %v2030_v32  ;;  %v2064_v27 = vld [vmem:[#allocation12 + $0x460] sm:$0xff]  ;;  %v2073_v31 = vld [vmem:[#allocation12 + $0x4a8] sm:$0xff]  ;;  %v10250_v32 = vpack.c.bf16 %v2067_v24, %v2063_v23 }
 0x622   : > { %v2075_v34 = vld [vmem:[#allocation12 + $0x4b8] sm:$0xff]  ;;  %v10124_v35 = vpack.c.bf16 %v2064_v27, %v2060_v26  ;;  %v2094_v23 = vld [vmem:[#allocation12 + $0x550] sm:$0xff]  ;;  %v2101_v26 = vld [vmem:[#allocation12 + $0x588] sm:$0xff] }
 0x623   : > { %10093 = vmatpush1.bf16.msra.mxu0 %v10092_v50  ;;  %v2040_v50 = vld [vmem:[#allocation12 + $0x3a0] sm:$0xff]  ;;  %v2105_v27 = vld [vmem:[#allocation12 + $0x5a8] sm:$0xff] }
 0x624   : > { %10221 = vmatpush1.bf16.msra.mxu1 %v10220_v52  ;;  %10095 = vmatprep.subr.bf16.mxu0 %v10094_v53  ;;  %v2038_v52 = vld [vmem:[#allocation12 + $0x390] sm:$0xff]  ;;  %v10238_v53 = vpack.c.bf16 %v2043_v44, %v2039_v38  ;;  %v10112_v59 = vpack.c.bf16 %v2040_v50, %v2036_v49  ;;  %v10126_v38 = vpack.c.bf16 %v2073_v31, %v2069_v30  ;;  %v2068_v44 = vld [vmem:[#allocation12 + $0x480] sm:$0xff]  ;;  %v2077_v50 = vld [vmem:[#allocation12 + $0x4c8] sm:$0xff] }
 0x625   : > { %10223 = vmatprep.subr.bf16.mxu1 %v10222_v57  ;;  %v2047_v57 = vld [vmem:[#allocation12 + $0x3d8] sm:$0xff]  ;;  %v10240_v62 = vpack.c.bf16 %v2042_v54, %v2038_v52  ;;  %v2074_v49 = vld [vmem:[#allocation12 + $0x4b0] sm:$0xff]  ;;  %v2081_v52 = vld [vmem:[#allocation12 + $0x4e8] sm:$0xff]  ;;  %v10142_v31 = vpack.c.bf16 %v2105_v27, %v2101_v26 }
 0x626   : > { %v10130_v56 = vpack.c.bf16 %v2081_v52, %v2077_v50  ;;  %v2108_v52 = vld [vmem:[#allocation12 + $0x5c0] sm:$0xff] }
 0x627   : > { %10097 = vmatpush1.bf16.msra.mxu0 %v10096_v7  ;;  %v2048_v7 = vld [vmem:[#allocation12 + $0x3e0] sm:$0xff] }
 0x628   : > { %10225 = vmatpush1.bf16.msra.mxu1 %v10224_v8  ;;  %10099 = vmatprep.subr.bf16.mxu0 %v10098_v9  ;;  %v2046_v8 = vld [vmem:[#allocation12 + $0x3d0] sm:$0xff]  ;;  %v10242_v9 = vpack.c.bf16 %v2051_v58, %v2047_v57  ;;  %v10116_v14 = vpack.c.bf16 %v2048_v7, %v2044_v5  ;;  %v2076_v57 = vld [vmem:[#allocation12 + $0x4c0] sm:$0xff]  ;;  %v2089_v5 = vld [vmem:[#allocation12 + $0x528] sm:$0xff] }
 0x629   : > { %10227 = vmatprep.subr.bf16.mxu1 %v10226_v12  ;;  %v2055_v12 = vld [vmem:[#allocation12 + $0x418] sm:$0xff]  ;;  %v10244_v0 = vpack.c.bf16 %v2050_v10, %v2046_v8  ;;  %v2080_v58 = vld [vmem:[#allocation12 + $0x4e0] sm:$0xff] }
 0x62a   : > { %v2087_v7 = vld [vmem:[#allocation12 + $0x518] sm:$0xff]  ;;  %v2132_v27 = vld [vmem:[#allocation12 + $0x680] sm:$0xff] }
 0x62b   : > { %10101 = vmatpush1.bf16.msra.mxu0 %v10100_v16  ;;  %v2056_v16 = vld [vmem:[#allocation12 + $0x420] sm:$0xff]  ;;  %v2091_v8 = vld [vmem:[#allocation12 + $0x538] sm:$0xff] }
 0x62c   : > { %10229 = vmatpush1.bf16.msra.mxu1 %v10228_v17  ;;  %10103 = vmatprep.subr.bf16.mxu0 %v10102_v18  ;;  %v10246_v17 = vpack.c.bf16 %v2059_v13, %v2055_v12  ;;  %v2054_v18 = vld [vmem:[#allocation12 + $0x410] sm:$0xff]  ;;  %v2088_v12 = vld [vmem:[#allocation12 + $0x520] sm:$0xff] }
 0x62d   : > { %10231 = vmatprep.subr.bf16.mxu1 %v10230_v22  ;;  %v10120_v22 = vpack.c.bf16 %v2056_v16, %v2052_v41  ;;  %v10248_v25 = vpack.c.bf16 %v2058_v19, %v2054_v18  ;;  %v2086_v13 = vld [vmem:[#allocation12 + $0x510] sm:$0xff]  ;;  %v2097_v41 = vld [vmem:[#allocation12 + $0x568] sm:$0xff]  ;;  %v2095_v16 = vld [vmem:[#allocation12 + $0x558] sm:$0xff]  ;;  %v10136_v18 = vpack.c.bf16 %v2088_v12, %v2084_v6 }
 0x62e   : > { %v2129_v6 = vld [vmem:[#allocation12 + $0x668] sm:$0xff]  ;;  %v2127_v12 = vld [vmem:[#allocation12 + $0x658] sm:$0xff] }
 0x62f   : > { %10105 = vmatpush1.bf16.msra.mxu0 %v10104_v28  ;;  %v2062_v28 = vld [vmem:[#allocation12 + $0x450] sm:$0xff] }
 0x630   : > { %10233 = vmatpush1.bf16.msra.mxu1 %v10232_v29  ;;  %10107 = vmatprep.subr.bf16.mxu0 %v10106_v4  ;;  %v10122_v29 = vpack.c.bf16 %v2065_v21, %v2061_v20  ;;  %v2066_v4 = vld [vmem:[#allocation12 + $0x470] sm:$0xff]  ;;  %v2092_v21 = vld [vmem:[#allocation12 + $0x540] sm:$0xff] }
 0x631   : > { %10235 = vmatprep.subr.bf16.mxu1 %v10234_v33  ;;  %v2071_v33 = vld [vmem:[#allocation12 + $0x498] sm:$0xff]  ;;  %v10252_v37 = vpack.c.bf16 %v2066_v4, %v2062_v28 }
 0x632   : > { %v2103_v28 = vld [vmem:[#allocation12 + $0x598] sm:$0xff] }
 0x633   : > { %10109 = vmatpush1.bf16.msra.mxu0 %v10108_v45  ;;  %v2072_v45 = vld [vmem:[#allocation12 + $0x4a0] sm:$0xff] }
 0x634   : > { %10237 = vmatpush1.bf16.msra.mxu1 %v10236_v46  ;;  %10111 = vmatprep.subr.bf16.mxu0 %v10110_v48  ;;  %v2070_v46 = vld [vmem:[#allocation12 + $0x490] sm:$0xff]  ;;  %v10254_v48 = vpack.c.bf16 %v2075_v34, %v2071_v33  ;;  %v10128_v54 = vpack.c.bf16 %v2072_v45, %v2068_v44  ;;  %v2104_v33 = vld [vmem:[#allocation12 + $0x5a0] sm:$0xff]  ;;  %v2113_v44 = vld [vmem:[#allocation12 + $0x5e8] sm:$0xff] }
 0x635   : > { %10239 = vmatprep.subr.bf16.mxu1 %v10238_v53  ;;  %v2079_v53 = vld [vmem:[#allocation12 + $0x4d8] sm:$0xff]  ;;  %v10256_v55 = vpack.c.bf16 %v2074_v49, %v2070_v46  ;;  %v2102_v34 = vld [vmem:[#allocation12 + $0x590] sm:$0xff] }
 0x636   : > { %v2111_v45 = vld [vmem:[#allocation12 + $0x5d8] sm:$0xff] }
 0x637   : > { %10113 = vmatpush1.bf16.msra.mxu0 %v10112_v59  ;;  %v2078_v59 = vld [vmem:[#allocation12 + $0x4d0] sm:$0xff]  ;;  %v2115_v46 = vld [vmem:[#allocation12 + $0x5f8] sm:$0xff] }
 0x638   : > { %10241 = vmatpush1.bf16.msra.mxu1 %v10240_v62  ;;  %10115 = vmatprep.subr.bf16.mxu0 %v10114_v3  ;;  %v2085_v3 = vld [vmem:[#allocation12 + $0x508] sm:$0xff] }
 0x639   : > { %10243 = vmatprep.subr.bf16.mxu1 %v10242_v9  ;;  %v10132_v9 = vpack.c.bf16 %v2080_v58, %v2076_v57  ;;  %v10134_v11 = vpack.c.bf16 %v2089_v5, %v2085_v3  ;;  %v2121_v57 = vld [vmem:[#allocation12 + $0x628] sm:$0xff]  ;;  %v2119_v58 = vld [vmem:[#allocation12 + $0x618] sm:$0xff]  ;;  %v2116_v5 = vld [vmem:[#allocation12 + $0x600] sm:$0xff] }
 0x63b   : > { %10117 = vmatpush1.bf16.msra.mxu0 %v10116_v14  ;;  %v10262_v14 = vpack.c.bf16 %v2091_v8, %v2087_v7  ;;  %v2120_v7 = vld [vmem:[#allocation12 + $0x620] sm:$0xff]  ;;  %v2118_v8 = vld [vmem:[#allocation12 + $0x610] sm:$0xff] }
 0x63c   : > { %10245 = vmatpush1.bf16.msra.mxu1 %v10244_v0  ;;  %10119 = vmatprep.subr.bf16.mxu0 %v10118_v15  ;;  %v2090_v0 = vld [vmem:[#allocation12 + $0x530] sm:$0xff]  ;;  %v2093_v15 = vld [vmem:[#allocation12 + $0x548] sm:$0xff] }
 0x63d   : > { %10247 = vmatprep.subr.bf16.mxu1 %v10246_v17  ;;  %v2099_v17 = vld [vmem:[#allocation12 + $0x578] sm:$0xff]  ;;  %v10264_v19 = vpack.c.bf16 %v2090_v0, %v2086_v13  ;;  %v10138_v20 = vpack.c.bf16 %v2097_v41, %v2093_v15  ;;  %v2124_v41 = vld [vmem:[#allocation12 + $0x640] sm:$0xff] }
 0x63e   : > { %2933 = vmatmul.mubr.f32.vlgmr.msra.gmra.mrb[10].mxu0 %v13716_v36  ;;  %v10266_v24 = vpack.c.bf16 %v2099_v17, %v2095_v16  ;;  %v2131_v13 = vld [vmem:[#allocation12 + $0x678] sm:$0xff]  ;;  %v2128_v16 = vld [vmem:[#allocation12 + $0x660] sm:$0xff]  ;;  %v2126_v17 = vld [vmem:[#allocation12 + $0x650] sm:$0xff] }
 0x63f   : > { %3075 = vmatmul.mubr.f32.vlgmr.msra.gmra.mrb[10].mxu1 %v13716_v36  ;;  %10121 = vmatpush1.bf16.msra.mxu0 %v10120_v22  ;;  %v2083_v36 = vld [vmem:[#allocation12 + $0x4f8] sm:$0xff]  ;;  %v2096_v22 = vld [vmem:[#allocation12 + $0x560] sm:$0xff] }
 0x640   : > { %3003 = vmatprep.mubr.f32.mxu0 %v13722_v51  ;;  %10249 = vmatpush1.bf16.msra.mxu1 %v10248_v25  ;;  %v10258_v62 = vpack.c.bf16 %v2083_v36, %v2079_v53  ;;  %v2098_v25 = vld [vmem:[#allocation12 + $0x570] sm:$0xff]  ;;  %v10140_v4 = vpack.c.bf16 %v2096_v22, %v2092_v21  ;;  %v2112_v53 = vld [vmem:[#allocation12 + $0x5e0] sm:$0xff]  ;;  %v2137_v21 = vld [vmem:[#allocation12 + $0x6a8] sm:$0xff] }
 0x641   : > { %3145 = vmatprep.mubr.f32.mxu1 %v13722_v51  ;;  %10123 = vmatprep.subr.bf16.mxu0 %v10122_v29  ;;  %v2082_v51 = vld [vmem:[#allocation12 + $0x4f0] sm:$0xff]  ;;  %v2107_v29 = vld [vmem:[#allocation12 + $0x5b8] sm:$0xff]  ;;  %v10268_v30 = vpack.c.bf16 %v2098_v25, %v2094_v23 }
 0x642   : > { %10251 = vmatprep.subr.bf16.mxu1 %v10250_v32  ;;  %v10260_v10 = vpack.c.bf16 %v2082_v51, %v2078_v59  ;;  %v2100_v32 = vld [vmem:[#allocation12 + $0x580] sm:$0xff]  ;;  %v2110_v36 = vld [vmem:[#allocation12 + $0x5d0] sm:$0xff]  ;;  %v2123_v59 = vld [vmem:[#allocation12 + $0x638] sm:$0xff] }
 0x643   : > { %10125 = vmatpush1.bf16.msra.mxu0 %v10124_v35  ;;  %v10270_v35 = vpack.c.bf16 %v2107_v29, %v2103_v28  ;;  %v2135_v22 = vld [vmem:[#allocation12 + $0x698] sm:$0xff]  ;;  %v2136_v28 = vld [vmem:[#allocation12 + $0x6a0] sm:$0xff]  ;;  %v2134_v29 = vld [vmem:[#allocation12 + $0x690] sm:$0xff] }
 0x644   : > { %10253 = vmatpush1.bf16.msra.mxu1 %v10252_v37  ;;  %10127 = vmatprep.subr.bf16.mxu0 %v10126_v38  ;;  %v2106_v37 = vld [vmem:[#allocation12 + $0x5b0] sm:$0xff]  ;;  %v2109_v38 = vld [vmem:[#allocation12 + $0x5c8] sm:$0xff]  ;;  %v2139_v23 = vld [vmem:[#allocation12 + $0x6b8] sm:$0xff] }
 0x645   : > { %10255 = vmatprep.subr.bf16.mxu1 %v10254_v48  ;;  %v10144_v48 = vpack.c.bf16 %v2104_v33, %v2100_v32  ;;  %v10272_v49 = vpack.c.bf16 %v2106_v37, %v2102_v34  ;;  %v10146_v50 = vpack.c.bf16 %v2113_v44, %v2109_v38  ;;  %v2145_v32 = vld [vmem:[#allocation12 + $0x6e8] sm:$0xff]  ;;  %v2143_v33 = vld [vmem:[#allocation12 + $0x6d8] sm:$0xff]  ;;  %v2140_v44 = vld [vmem:[#allocation12 + $0x6c0] sm:$0xff] }
 0x646   : > { %v2147_v34 = vld [vmem:[#allocation12 + $0x6f8] sm:$0xff] }
 0x647   : > { %10129 = vmatpush1.bf16.msra.mxu0 %v10128_v54  ;;  %v10274_v54 = vpack.c.bf16 %v2115_v46, %v2111_v45  ;;  %v2144_v45 = vld [vmem:[#allocation12 + $0x6e0] sm:$0xff]  ;;  %v2142_v46 = vld [vmem:[#allocation12 + $0x6d0] sm:$0xff] }
 0x648   : > { %10257 = vmatpush1.bf16.msra.mxu1 %v10256_v55  ;;  %10131 = vmatprep.subr.bf16.mxu0 %v10130_v56  ;;  %v2114_v55 = vld [vmem:[#allocation12 + $0x5f0] sm:$0xff]  ;;  %v2117_v56 = vld [vmem:[#allocation12 + $0x608] sm:$0xff] }
 0x649   : > { %10259 = vmatprep.subr.bf16.mxu1 %v10258_v62  ;;  %v10148_v62 = vpack.c.bf16 %v2112_v53, %v2108_v52  ;;  %v10276_v51 = vpack.c.bf16 %v2114_v55, %v2110_v36  ;;  %v10150_v3 = vpack.c.bf16 %v2121_v57, %v2117_v56  ;;  %v2153_v52 = vld [vmem:[#allocation12 + $0x728] sm:$0xff]  ;;  %v2151_v53 = vld [vmem:[#allocation12 + $0x718] sm:$0xff]  ;;  %v2148_v57 = vld [vmem:[#allocation12 + $0x700] sm:$0xff] }
 0x64a   : > { %v2155_v36 = vld [vmem:[#allocation12 + $0x738] sm:$0xff] }
 0x64b   : > { %10133 = vmatpush1.bf16.msra.mxu0 %v10132_v9  ;;  %v10278_v9 = vpack.c.bf16 %v2123_v59, %v2119_v58  ;;  %v2152_v58 = vld [vmem:[#allocation12 + $0x720] sm:$0xff]  ;;  %v2150_v59 = vld [vmem:[#allocation12 + $0x710] sm:$0xff] }
 0x64c   : > { %10261 = vmatpush1.bf16.msra.mxu1 %v10260_v10  ;;  %10135 = vmatprep.subr.bf16.mxu0 %v10134_v11  ;;  %v2122_v10 = vld [vmem:[#allocation12 + $0x630] sm:$0xff]  ;;  %v2125_v11 = vld [vmem:[#allocation12 + $0x648] sm:$0xff] }
 0x64d   : > { %10263 = vmatprep.subr.bf16.mxu1 %v10262_v14  ;;  %v10152_v14 = vpack.c.bf16 %v2120_v7, %v2116_v5  ;;  %v10280_v0 = vpack.c.bf16 %v2122_v10, %v2118_v8  ;;  %v10154_v15 = vpack.c.bf16 %v2129_v6, %v2125_v11  ;;  %v2161_v5 = vld [vmem:[#allocation12 + $0x768] sm:$0xff]  ;;  %v2159_v7 = vld [vmem:[#allocation12 + $0x758] sm:$0xff]  ;;  %v2156_v6 = vld [vmem:[#allocation12 + $0x740] sm:$0xff] }
 0x64e   : > { %v2163_v8 = vld [vmem:[#allocation12 + $0x778] sm:$0xff] }
 0x64f   : > { %10137 = vmatpush1.bf16.msra.mxu0 %v10136_v18  ;;  %v10282_v18 = vpack.c.bf16 %v2131_v13, %v2127_v12  ;;  %v2160_v12 = vld [vmem:[#allocation12 + $0x760] sm:$0xff]  ;;  %v2158_v13 = vld [vmem:[#allocation12 + $0x750] sm:$0xff] }
 0x650   : > { %10265 = vmatpush1.bf16.msra.mxu1 %v10264_v19  ;;  %10139 = vmatprep.subr.bf16.mxu0 %v10138_v20  ;;  %v2130_v19 = vld [vmem:[#allocation12 + $0x670] sm:$0xff]  ;;  %v2133_v20 = vld [vmem:[#allocation12 + $0x688] sm:$0xff] }
 0x651   : > { %10267 = vmatprep.subr.bf16.mxu1 %v10266_v24  ;;  %v10156_v24 = vpack.c.bf16 %v2128_v16, %v2124_v41  ;;  %v10284_v25 = vpack.c.bf16 %v2130_v19, %v2126_v17  ;;  %v10158_v26 = vpack.c.bf16 %v2137_v21, %v2133_v20  ;;  %v2169_v41 = vld [vmem:[#allocation12 + $0x7a8] sm:$0xff]  ;;  %v2167_v16 = vld [vmem:[#allocation12 + $0x798] sm:$0xff]  ;;  %v2164_v21 = vld [vmem:[#allocation12 + $0x780] sm:$0xff] }
 0x652   : > { %v2171_v17 = vld [vmem:[#allocation12 + $0x7b8] sm:$0xff] }
 0x653   : > { %10141 = vmatpush1.bf16.msra.mxu0 %v10140_v4  ;;  %v10286_v4 = vpack.c.bf16 %v2139_v23, %v2135_v22  ;;  %v2168_v22 = vld [vmem:[#allocation12 + $0x7a0] sm:$0xff]  ;;  %v2166_v23 = vld [vmem:[#allocation12 + $0x790] sm:$0xff] }
 0x654   : > { %10269 = vmatpush1.bf16.msra.mxu1 %v10268_v30  ;;  %10143 = vmatprep.subr.bf16.mxu0 %v10142_v31  ;;  %v2138_v30 = vld [vmem:[#allocation12 + $0x6b0] sm:$0xff]  ;;  %v2141_v31 = vld [vmem:[#allocation12 + $0x6c8] sm:$0xff] }
 0x655   : > { %10271 = vmatprep.subr.bf16.mxu1 %v10270_v35  ;;  %v10160_v35 = vpack.c.bf16 %v2136_v28, %v2132_v27  ;;  %v10288_v37 = vpack.c.bf16 %v2138_v30, %v2134_v29  ;;  %v10162_v38 = vpack.c.bf16 %v2145_v32, %v2141_v31  ;;  %v2177_v27 = vld [vmem:[#allocation12 + $0x7e8] sm:$0xff]  ;;  %v2175_v28 = vld [vmem:[#allocation12 + $0x7d8] sm:$0xff]  ;;  %v2172_v32 = vld [vmem:[#allocation12 + $0x7c0] sm:$0xff] }
 0x656   : > { %v2179_v29 = vld [vmem:[#allocation12 + $0x7f8] sm:$0xff] }
 0x657   : > { %10145 = vmatpush1.bf16.msra.mxu0 %v10144_v48  ;;  %v10290_v48 = vpack.c.bf16 %v2147_v34, %v2143_v33  ;;  %v2176_v33 = vld [vmem:[#allocation12 + $0x7e0] sm:$0xff]  ;;  %v10306_v34 = vpack.c.bf16 %v2179_v29, %v2175_v28  ;;  %v3326_v29 = vld [vmem:[#allocation12 + $0x10d0] sm:$0xff] }
 0x658   : > { %10273 = vmatpush1.bf16.msra.mxu1 %v10272_v49  ;;  %10147 = vmatprep.subr.bf16.mxu0 %v10146_v50  ;;  %v2146_v49 = vld [vmem:[#allocation12 + $0x6f0] sm:$0xff]  ;;  %v2149_v50 = vld [vmem:[#allocation12 + $0x708] sm:$0xff]  ;;  %v3328_v28 = vld [vmem:[#allocation12 + $0x10e0] sm:$0xff] }
 0x659   : > { %10275 = vmatprep.subr.bf16.mxu1 %v10274_v54  ;;  %v10164_v54 = vpack.c.bf16 %v2144_v45, %v2140_v44  ;;  %v10292_v55 = vpack.c.bf16 %v2146_v49, %v2142_v46  ;;  %v10166_v56 = vpack.c.bf16 %v2153_v52, %v2149_v50  ;;  %v3301_v45 = vld [vmem:[#allocation12 + $0x1008] sm:$0xff]  ;;  %v3307_v49 = vld [vmem:[#allocation12 + $0x1038] sm:$0xff]  ;;  %v3300_v50 = vld [vmem:[#allocation12 + $0x1000] sm:$0xff] }
 0x65a   : > { %v3305_v46 = vld [vmem:[#allocation12 + $0x1028] sm:$0xff]  ;;  %v3304_v52 = vld [vmem:[#allocation12 + $0x1020] sm:$0xff] }
 0x65b   : > { %10149 = vmatpush1.bf16.msra.mxu0 %v10148_v62  ;;  %v10294_v62 = vpack.c.bf16 %v2155_v36, %v2151_v53  ;;  %v3302_v53 = vld [vmem:[#allocation12 + $0x1010] sm:$0xff]  ;;  %v10310_v36 = vpack.c.bf16 %v3305_v46, %v3301_v45  ;;  %v3336_v45 = vld [vmem:[#allocation12 + $0x1120] sm:$0xff] }
 0x65c   : > { %10277 = vmatpush1.bf16.msra.mxu1 %v10276_v51  ;;  %10151 = vmatprep.subr.bf16.mxu0 %v10150_v3  ;;  %v2154_v51 = vld [vmem:[#allocation12 + $0x730] sm:$0xff]  ;;  %v2157_v3 = vld [vmem:[#allocation12 + $0x748] sm:$0xff] }
 0x65d   : > { %10279 = vmatprep.subr.bf16.mxu1 %v10278_v9  ;;  %v10168_v9 = vpack.c.bf16 %v2152_v58, %v2148_v57  ;;  %v10296_v10 = vpack.c.bf16 %v2154_v51, %v2150_v59  ;;  %v10170_v11 = vpack.c.bf16 %v2161_v5, %v2157_v3  ;;  %v3311_v58 = vld [vmem:[#allocation12 + $0x1058] sm:$0xff]  ;;  %v10312_v51 = vpack.c.bf16 %v3304_v52, %v3300_v50  ;;  %v3334_v46 = vld [vmem:[#allocation12 + $0x1110] sm:$0xff]  ;;  %v3341_v50 = vld [vmem:[#allocation12 + $0x1148] sm:$0xff] }
 0x65e   : > { %v3315_v59 = vld [vmem:[#allocation12 + $0x1078] sm:$0xff]  ;;  %v3345_v52 = vld [vmem:[#allocation12 + $0x1168] sm:$0xff] }
 0x65f   : > { %10153 = vmatpush1.bf16.msra.mxu0 %v10152_v14  ;;  %v10298_v14 = vpack.c.bf16 %v2163_v8, %v2159_v7  ;;  %v3308_v7 = vld [vmem:[#allocation12 + $0x1040] sm:$0xff] }
 0x660   : > { %10281 = vmatpush1.bf16.msra.mxu1 %v10280_v0  ;;  %10155 = vmatprep.subr.bf16.mxu0 %v10154_v15  ;;  %v2162_v0 = vld [vmem:[#allocation12 + $0x770] sm:$0xff]  ;;  %v2165_v15 = vld [vmem:[#allocation12 + $0x788] sm:$0xff]  ;;  %v3312_v8 = vld [vmem:[#allocation12 + $0x1060] sm:$0xff] }
 0x661   : > { %10283 = vmatprep.subr.bf16.mxu1 %v10282_v18  ;;  %v10172_v18 = vpack.c.bf16 %v2160_v12, %v2156_v6  ;;  %v10300_v19 = vpack.c.bf16 %v2162_v0, %v2158_v13  ;;  %v10174_v20 = vpack.c.bf16 %v2169_v41, %v2165_v15  ;;  %v3317_v6 = vld [vmem:[#allocation12 + $0x1088] sm:$0xff]  ;;  %v3319_v12 = vld [vmem:[#allocation12 + $0x1098] sm:$0xff]  ;;  %v3316_v41 = vld [vmem:[#allocation12 + $0x1080] sm:$0xff] }
 0x662   : > { %v3323_v13 = vld [vmem:[#allocation12 + $0x10b8] sm:$0xff] }
 0x663   : > { %10157 = vmatpush1.bf16.msra.mxu0 %v10156_v24  ;;  %v10302_v24 = vpack.c.bf16 %v2171_v17, %v2167_v16  ;;  %v3320_v16 = vld [vmem:[#allocation12 + $0x10a0] sm:$0xff]  ;;  %v3318_v17 = vld [vmem:[#allocation12 + $0x1090] sm:$0xff] }
 0x664   : > { %10285 = vmatpush1.bf16.msra.mxu1 %v10284_v25  ;;  %10159 = vmatprep.subr.bf16.mxu0 %v10158_v26  ;;  %v2170_v25 = vld [vmem:[#allocation12 + $0x7b0] sm:$0xff]  ;;  %v2173_v26 = vld [vmem:[#allocation12 + $0x7c8] sm:$0xff] }
 0x665   : > { %10287 = vmatprep.subr.bf16.mxu1 %v10286_v4  ;;  %v10176_v4 = vpack.c.bf16 %v2168_v22, %v2164_v21  ;;  %v10304_v30 = vpack.c.bf16 %v2170_v25, %v2166_v23  ;;  %v10178_v31 = vpack.c.bf16 %v2177_v27, %v2173_v26  ;;  %v3329_v21 = vld [vmem:[#allocation12 + $0x10e8] sm:$0xff]  ;;  %v3327_v22 = vld [vmem:[#allocation12 + $0x10d8] sm:$0xff]  ;;  %v3324_v27 = vld [vmem:[#allocation12 + $0x10c0] sm:$0xff] }
 0x666   : > { %v3331_v23 = vld [vmem:[#allocation12 + $0x10f8] sm:$0xff] }
 0x667   : > { %10161 = vmatpush1.bf16.msra.mxu0 %v10160_v35  ;;  %v2174_v35 = vld [vmem:[#allocation12 + $0x7d0] sm:$0xff] }
 0x668   : > { %10289 = vmatpush1.bf16.msra.mxu1 %v10288_v37  ;;  %10163 = vmatprep.subr.bf16.mxu0 %v10162_v38  ;;  %v2178_v37 = vld [vmem:[#allocation12 + $0x7f0] sm:$0xff]  ;;  %v10180_v38 = vpack.c.bf16 %v2176_v33, %v2172_v32  ;;  %v3337_v32 = vld [vmem:[#allocation12 + $0x1128] sm:$0xff]  ;;  %v3335_v33 = vld [vmem:[#allocation12 + $0x1118] sm:$0xff] }
 0x669   : > { %10291 = vmatprep.subr.bf16.mxu1 %v10290_v48  ;;  %v10308_v44 = vpack.c.bf16 %v2178_v37, %v2174_v35  ;;  %v3303_v48 = vld [vmem:[#allocation12 + $0x1018] sm:$0xff]  ;;  %v10324_v35 = vpack.c.bf16 %v3328_v28, %v3324_v27 }
 0x66a   : > { %v10438_v57 = vpack.c.bf16 %v3307_v49, %v3303_v48  ;;  %v3338_v49 = vld [vmem:[#allocation12 + $0x1130] sm:$0xff]  ;;  %v3367_v27 = vld [vmem:[#allocation12 + $0x1218] sm:$0xff] }
 0x66b   : > { %10165 = vmatpush1.bf16.msra.mxu0 %v10164_v54  ;;  %v3306_v54 = vld [vmem:[#allocation12 + $0x1030] sm:$0xff]  ;;  %v3371_v28 = vld [vmem:[#allocation12 + $0x1238] sm:$0xff] }
 0x66c   : > { %10293 = vmatpush1.bf16.msra.mxu1 %v10292_v55  ;;  %10167 = vmatprep.subr.bf16.mxu0 %v10166_v56  ;;  %v3309_v55 = vld [vmem:[#allocation12 + $0x1048] sm:$0xff]  ;;  %v10440_v3 = vpack.c.bf16 %v3306_v54, %v3302_v53  ;;  %v3343_v53 = vld [vmem:[#allocation12 + $0x1158] sm:$0xff] }
 0x66d   : > { %10295 = vmatprep.subr.bf16.mxu1 %v10294_v62  ;;  %v3313_v56 = vld [vmem:[#allocation12 + $0x1068] sm:$0xff]  ;;  %v3153_v62 = vld [vmem:[#allocation10 + $0x8] sm:$0xf] }
 0x66e   : > { %v10314_v5 = vpack.c.bf16 %v3313_v56, %v3309_v55  ;;  %v10456_v55 = vpack.c.bf16 %v3338_v49, %v3334_v46  ;;  %v10330_v56 = vpack.c.bf16 %v3345_v52, %v3341_v50  ;;  %v3372_v50 = vld [vmem:[#allocation12 + $0x1240] sm:$0xff] }
 0x66f   : > { %10169 = vmatpush1.bf16.msra.mxu0 %v10168_v9  ;;  %v3310_v9 = vld [vmem:[#allocation12 + $0x1050] sm:$0xff]  ;;  %v3376_v52 = vld [vmem:[#allocation12 + $0x1260] sm:$0xff] }
 0x670   : > { %10297 = vmatpush1.bf16.msra.mxu1 %v10296_v10  ;;  %10171 = vmatprep.subr.bf16.mxu0 %v10170_v11  ;;  %v10442_v10 = vpack.c.bf16 %v3315_v59, %v3311_v58  ;;  %v3314_v11 = vld [vmem:[#allocation12 + $0x1070] sm:$0xff]  ;;  %v3344_v58 = vld [vmem:[#allocation12 + $0x1160] sm:$0xff] }
 0x671   : > { %10299 = vmatprep.subr.bf16.mxu1 %v10298_v14  ;;  %v10316_v14 = vpack.c.bf16 %v3312_v8, %v3308_v7  ;;  %v10444_v0 = vpack.c.bf16 %v3314_v11, %v3310_v9  ;;  %v3342_v59 = vld [vmem:[#allocation12 + $0x1150] sm:$0xff]  ;;  %v3351_v7 = vld [vmem:[#allocation12 + $0x1198] sm:$0xff] }
 0x672   : > { %v3355_v8 = vld [vmem:[#allocation12 + $0x11b8] sm:$0xff] }
 0x673   : > { %10173 = vmatpush1.bf16.msra.mxu0 %v10172_v18  ;;  %v10446_v18 = vpack.c.bf16 %v3323_v13, %v3319_v12  ;;  %v3350_v12 = vld [vmem:[#allocation12 + $0x1190] sm:$0xff]  ;;  %v10462_v13 = vpack.c.bf16 %v3355_v8, %v3351_v7 }
 0x674   : > { %10301 = vmatpush1.bf16.msra.mxu1 %v10300_v19  ;;  %10175 = vmatprep.subr.bf16.mxu0 %v10174_v20  ;;  %v3322_v19 = vld [vmem:[#allocation12 + $0x10b0] sm:$0xff]  ;;  %v3325_v20 = vld [vmem:[#allocation12 + $0x10c8] sm:$0xff] }
 0x675   : > { %10303 = vmatprep.subr.bf16.mxu1 %v10302_v24  ;;  %v10320_v24 = vpack.c.bf16 %v3320_v16, %v3316_v41  ;;  %v10448_v25 = vpack.c.bf16 %v3322_v19, %v3318_v17  ;;  %v10322_v26 = vpack.c.bf16 %v3329_v21, %v3325_v20  ;;  %v3359_v41 = vld [vmem:[#allocation12 + $0x11d8] sm:$0xff]  ;;  %v3356_v20 = vld [vmem:[#allocation12 + $0x11c0] sm:$0xff]  ;;  %v3382_v7 = vld [vmem:[#allocation12 + $0x1290] sm:$0xff] }
 0x676   : > { %v3363_v16 = vld [vmem:[#allocation12 + $0x11f8] sm:$0xff]  ;;  %v3360_v21 = vld [vmem:[#allocation12 + $0x11e0] sm:$0xff] }
 0x677   : > { %10177 = vmatpush1.bf16.msra.mxu0 %v10176_v4  ;;  %v10450_v4 = vpack.c.bf16 %v3331_v23, %v3327_v22  ;;  %v3358_v22 = vld [vmem:[#allocation12 + $0x11d0] sm:$0xff]  ;;  %v10466_v23 = vpack.c.bf16 %v3363_v16, %v3359_v41 }
 0x678   : > { %10305 = vmatpush1.bf16.msra.mxu1 %v10304_v30  ;;  %10179 = vmatprep.subr.bf16.mxu0 %v10178_v31  ;;  %v3330_v30 = vld [vmem:[#allocation12 + $0x10f0] sm:$0xff]  ;;  %v3333_v31 = vld [vmem:[#allocation12 + $0x1108] sm:$0xff] }
 0x679   : > { %10307 = vmatprep.subr.bf16.mxu1 %v10306_v34  ;;  %v3339_v34 = vld [vmem:[#allocation12 + $0x1138] sm:$0xff]  ;;  %v10452_v37 = vpack.c.bf16 %v3330_v30, %v3326_v29  ;;  %v10340_v29 = vpack.c.bf16 %v3360_v21, %v3356_v20  ;;  %v3390_v41 = vld [vmem:[#allocation12 + $0x12d0] sm:$0xff] }
 0x67a   : > { %v10454_v48 = vpack.c.bf16 %v3339_v34, %v3335_v33  ;;  %v3366_v33 = vld [vmem:[#allocation12 + $0x1210] sm:$0xff]  ;;  %v10470_v34 = vpack.c.bf16 %v3371_v28, %v3367_v27  ;;  %v3399_v20 = vld [vmem:[#allocation12 + $0x1318] sm:$0xff] }
 0x67b   : > { %10181 = vmatpush1.bf16.msra.mxu0 %v10180_v38  ;;  %v10326_v38 = vpack.c.bf16 %v3337_v32, %v3333_v31  ;;  %v3364_v31 = vld [vmem:[#allocation12 + $0x1200] sm:$0xff]  ;;  %v3403_v21 = vld [vmem:[#allocation12 + $0x1338] sm:$0xff]  ;;  %v3398_v27 = vld [vmem:[#allocation12 + $0x1310] sm:$0xff] }
 0x67c   : > { %10309 = vmatpush1.bf16.msra.mxu1 %v10308_v44  ;;  %3157 = vmatprep.subr.mxu0 %v13694_v60  ;;  %v3332_v44 = vld [vmem:[#allocation12 + $0x1100] sm:$0xff]  ;;  %v10486_v28 = vpack.c.bf16 %v3403_v21, %v3399_v20  ;;  %v3430_v21 = vld [vmem:[#allocation12 + $0x1410] sm:$0xff] }
 0x67d   : > { %3228 = vmatprep.subr.mxu1 %v13696_v61  ;;  %v10328_v54 = vpack.c.bf16 %v3336_v45, %v3332_v44  ;;  %v3368_v32 = vld [vmem:[#allocation12 + $0x1220] sm:$0xff]  ;;  %v3375_v44 = vld [vmem:[#allocation12 + $0x1258] sm:$0xff] }
 0x67e   : > { %3004 = vmatmul.mubr.f32.vlgmr.msra.gmra.mrb[10].mxu0 %v13720_v47  ;;  %v3379_v45 = vld [vmem:[#allocation12 + $0x1278] sm:$0xff]  ;;  %v10344_v46 = vpack.c.bf16 %v3368_v32, %v3364_v31  ;;  %v3432_v20 = vld [vmem:[#allocation12 + $0x1420] sm:$0xff] }
 0x67f   : > { %3146 = vmatmul.mubr.f32.vlgmr.msra.gmra.mrb[10].mxu1 %v13720_v47  ;;  %3158 = vmatpush1.msra.mxu0 %v13698_v63  ;;  %v3321_v47 = vld [vmem:[#allocation12 + $0x10a8] sm:$0xff]  ;;  %v3407_v31 = vld [vmem:[#allocation12 + $0x1358] sm:$0xff] }
 0x680   : > { %3229 = vmatpush1.msra.mxu1 %v13700_v2  ;;  %3221 = vmatprep.mubr.f32.mxu0 %v13189_v1  ;;  %v10318_v15 = vpack.c.bf16 %v3321_v47, %v3317_v6  ;;  %v3348_v6 = vld [vmem:[#allocation12 + $0x1180] sm:$0xff]  ;;  %v3411_v32 = vld [vmem:[#allocation12 + $0x1378] sm:$0xff] }
 0x681   : > { %3292 = vmatprep.mubr.f32.mxu1 %v13189_v1  ;;  %10311 = vmatprep.subr.bf16.mxu0 %v10310_v36  ;;  %v3347_v36 = vld [vmem:[#allocation12 + $0x1178] sm:$0xff]  ;;  %v3352_v47 = vld [vmem:[#allocation12 + $0x11a0] sm:$0xff] }
 0x682   : > { %9466 = vmatmul.mubr.msk.f32.vlgmr.msra.gmra.mrb[12].mxu0 %vm1778_vm3, %v3153_v62  ;;  %10439 = vmatprep.subr.bf16.mxu1 %v10438_v57  ;;  %v3340_v57 = vld [vmem:[#allocation12 + $0x1140] sm:$0xff]  ;;  %v10336_v17 = vpack.c.bf16 %v3352_v47, %v3348_v6  ;;  %v3391_v6 = vld [vmem:[#allocation12 + $0x12d8] sm:$0xff] }
 0x683   : > { %9467 = vmatmul.mubr.msk.f32.vlgmr.msra.gmra.mrb[12].mxu1 %vm1778_vm3, %v3153_v62  ;;  %10313 = vmatpush1.bf16.msra.mxu0 %v10312_v51  ;;  %v10458_v62 = vpack.c.bf16 %v3347_v36, %v3343_v53  ;;  %v3346_v51 = vld [vmem:[#allocation12 + $0x1170] sm:$0xff]  ;;  %v10332_v9 = vpack.c.bf16 %v3344_v58, %v3340_v57  ;;  %v10474_v36 = vpack.c.bf16 %v3379_v45, %v3375_v44  ;;  %v3383_v57 = vld [vmem:[#allocation12 + $0x1298] sm:$0xff] }
 0x684   : > { %10441 = vmatpush1.bf16.msra.mxu1 %v10440_v3  ;;  %10315 = vmatprep.subr.bf16.mxu0 %v10314_v5  ;;  %v3349_v3 = vld [vmem:[#allocation12 + $0x1188] sm:$0xff]  ;;  %v3374_v53 = vld [vmem:[#allocation12 + $0x1250] sm:$0xff]  ;;  %v3387_v58 = vld [vmem:[#allocation12 + $0x12b8] sm:$0xff]  ;;  %v10490_v45 = vpack.c.bf16 %v3411_v32, %v3407_v31 }
 0x685   : > { %10443 = vmatprep.subr.bf16.mxu1 %v10442_v10  ;;  %v3353_v5 = vld [vmem:[#allocation12 + $0x11a8] sm:$0xff]  ;;  %v10460_v10 = vpack.c.bf16 %v3346_v51, %v3342_v59  ;;  %v10348_v59 = vpack.c.bf16 %v3376_v52, %v3372_v50  ;;  %v10478_v8 = vpack.c.bf16 %v3387_v58, %v3383_v57  ;;  %v3395_v47 = vld [vmem:[#allocation12 + $0x12f8] sm:$0xff]  ;;  %v3406_v44 = vld [vmem:[#allocation12 + $0x1350] sm:$0xff] }
 0x686   : > { %v10334_v11 = vpack.c.bf16 %v3353_v5, %v3349_v3  ;;  %v3380_v3 = vld [vmem:[#allocation12 + $0x1280] sm:$0xff]  ;;  %v10482_v16 = vpack.c.bf16 %v3395_v47, %v3391_v6  ;;  %v3415_v50 = vld [vmem:[#allocation12 + $0x1398] sm:$0xff]  ;;  %v3414_v57 = vld [vmem:[#allocation12 + $0x1390] sm:$0xff] }
 0x687   : > { %10317 = vmatpush1.bf16.msra.mxu0 %v10316_v14  ;;  %v3354_v14 = vld [vmem:[#allocation12 + $0x11b0] sm:$0xff]  ;;  %v3384_v5 = vld [vmem:[#allocation12 + $0x12a0] sm:$0xff]  ;;  %v3419_v52 = vld [vmem:[#allocation12 + $0x13b8] sm:$0xff] }
 0x688   : > { %10445 = vmatpush1.bf16.msra.mxu1 %v10444_v0  ;;  %10319 = vmatprep.subr.bf16.mxu0 %v10318_v15  ;;  %v3357_v0 = vld [vmem:[#allocation12 + $0x11c8] sm:$0xff]  ;;  %v10494_v58 = vpack.c.bf16 %v3419_v52, %v3415_v50  ;;  %v3422_v47 = vld [vmem:[#allocation12 + $0x13d0] sm:$0xff]  ;;  %v3444_v52 = vld [vmem:[#allocation12 + $0x1480] sm:$0xff] }
 0x689   : > { %10447 = vmatprep.subr.bf16.mxu1 %v10446_v18  ;;  %v3361_v15 = vld [vmem:[#allocation12 + $0x11e8] sm:$0xff]  ;;  %v10464_v18 = vpack.c.bf16 %v3354_v14, %v3350_v12  ;;  %v10352_v12 = vpack.c.bf16 %v3384_v5, %v3380_v3  ;;  %v3423_v3 = vld [vmem:[#allocation12 + $0x13d8] sm:$0xff] }
 0x68a   : > { %v10338_v19 = vpack.c.bf16 %v3361_v15, %v3357_v0  ;;  %v3388_v0 = vld [vmem:[#allocation12 + $0x12c0] sm:$0xff]  ;;  %v3427_v5 = vld [vmem:[#allocation12 + $0x13f8] sm:$0xff] }
 0x68b   : > { %10321 = vmatpush1.bf16.msra.mxu0 %v10320_v24  ;;  %v3362_v24 = vld [vmem:[#allocation12 + $0x11f0] sm:$0xff]  ;;  %v3392_v15 = vld [vmem:[#allocation12 + $0x12e0] sm:$0xff]  ;;  %v10498_v6 = vpack.c.bf16 %v3427_v5, %v3423_v3 }
 0x68c   : > { %10449 = vmatpush1.bf16.msra.mxu1 %v10448_v25  ;;  %10323 = vmatprep.subr.bf16.mxu0 %v10322_v26  ;;  %v3365_v25 = vld [vmem:[#allocation12 + $0x1208] sm:$0xff]  ;;  %v3452_v5 = vld [vmem:[#allocation12 + $0x14c0] sm:$0xff] }
 0x68d   : > { %10451 = vmatprep.subr.bf16.mxu1 %v10450_v4  ;;  %v3369_v26 = vld [vmem:[#allocation12 + $0x1228] sm:$0xff]  ;;  %v10468_v4 = vpack.c.bf16 %v3362_v24, %v3358_v22  ;;  %v10356_v22 = vpack.c.bf16 %v3392_v15, %v3388_v0 }
 0x68e   : > { %v10342_v30 = vpack.c.bf16 %v3369_v26, %v3365_v25  ;;  %v3396_v25 = vld [vmem:[#allocation12 + $0x1300] sm:$0xff]  ;;  %v3429_v0 = vld [vmem:[#allocation12 + $0x1408] sm:$0xff] }
 0x68f   : > { %10325 = vmatpush1.bf16.msra.mxu0 %v10324_v35  ;;  %v3370_v35 = vld [vmem:[#allocation12 + $0x1230] sm:$0xff]  ;;  %v3400_v26 = vld [vmem:[#allocation12 + $0x1320] sm:$0xff]  ;;  %v3433_v15 = vld [vmem:[#allocation12 + $0x1428] sm:$0xff] }
 0x690   : > { %10453 = vmatpush1.bf16.msra.mxu1 %v10452_v37  ;;  %10327 = vmatprep.subr.bf16.mxu0 %v10326_v38  ;;  %v3373_v37 = vld [vmem:[#allocation12 + $0x1248] sm:$0xff] }
 0x691   : > { %10455 = vmatprep.subr.bf16.mxu1 %v10454_v48  ;;  %v3377_v38 = vld [vmem:[#allocation12 + $0x1268] sm:$0xff]  ;;  %v10472_v48 = vpack.c.bf16 %v3370_v35, %v3366_v33  ;;  %v10360_v33 = vpack.c.bf16 %v3400_v26, %v3396_v25  ;;  %v3439_v25 = vld [vmem:[#allocation12 + $0x1458] sm:$0xff] }
 0x692   : > { %v10346_v49 = vpack.c.bf16 %v3377_v38, %v3373_v37  ;;  %v3404_v37 = vld [vmem:[#allocation12 + $0x1340] sm:$0xff]  ;;  %v3443_v26 = vld [vmem:[#allocation12 + $0x1478] sm:$0xff] }
 0x693   : > { %10329 = vmatpush1.bf16.msra.mxu0 %v10328_v54  ;;  %v3378_v54 = vld [vmem:[#allocation12 + $0x1270] sm:$0xff]  ;;  %v3408_v38 = vld [vmem:[#allocation12 + $0x1360] sm:$0xff] }
 0x694   : > { %10457 = vmatpush1.bf16.msra.mxu1 %v10456_v55  ;;  %10331 = vmatprep.subr.bf16.mxu0 %v10330_v56  ;;  %v3381_v55 = vld [vmem:[#allocation12 + $0x1288] sm:$0xff] }
 0x695   : > { %10459 = vmatprep.subr.bf16.mxu1 %v10458_v62  ;;  %v3385_v56 = vld [vmem:[#allocation12 + $0x12a8] sm:$0xff]  ;;  %v10476_v62 = vpack.c.bf16 %v3378_v54, %v3374_v53  ;;  %v10364_v53 = vpack.c.bf16 %v3408_v38, %v3404_v37 }
 0x696   : > { %v10350_v51 = vpack.c.bf16 %v3385_v56, %v3381_v55  ;;  %v3412_v55 = vld [vmem:[#allocation12 + $0x1380] sm:$0xff]  ;;  %v3445_v37 = vld [vmem:[#allocation12 + $0x1488] sm:$0xff] }
 0x697   : > { %10333 = vmatpush1.bf16.msra.mxu0 %v10332_v9  ;;  %v3386_v9 = vld [vmem:[#allocation12 + $0x12b0] sm:$0xff]  ;;  %v3416_v56 = vld [vmem:[#allocation12 + $0x13a0] sm:$0xff] }
 0x698   : > { %10461 = vmatpush1.bf16.msra.mxu1 %v10460_v10  ;;  %10335 = vmatprep.subr.bf16.mxu0 %v10334_v11  ;;  %v3389_v10 = vld [vmem:[#allocation12 + $0x12c8] sm:$0xff] }
 0x699   : > { %10463 = vmatprep.subr.bf16.mxu1 %v10462_v13  ;;  %v3393_v11 = vld [vmem:[#allocation12 + $0x12e8] sm:$0xff]  ;;  %v10480_v13 = vpack.c.bf16 %v3386_v9, %v3382_v7  ;;  %v10368_v7 = vpack.c.bf16 %v3416_v56, %v3412_v55  ;;  %v3446_v55 = vld [vmem:[#allocation12 + $0x1490] sm:$0xff] }
 0x69a   : > { %v10354_v14 = vpack.c.bf16 %v3393_v11, %v3389_v10  ;;  %v3420_v10 = vld [vmem:[#allocation12 + $0x13c0] sm:$0xff]  ;;  %v3450_v56 = vld [vmem:[#allocation12 + $0x14b0] sm:$0xff] }
 0x69b   : > { %10337 = vmatpush1.bf16.msra.mxu0 %v10336_v17  ;;  %v3394_v17 = vld [vmem:[#allocation12 + $0x12f0] sm:$0xff]  ;;  %v3424_v11 = vld [vmem:[#allocation12 + $0x13e0] sm:$0xff]  ;;  %v10512_v3 = vpack.c.bf16 %v3450_v56, %v3446_v55 }
 0x69c   : > { %10465 = vmatpush1.bf16.msra.mxu1 %v10464_v18  ;;  %10339 = vmatprep.subr.bf16.mxu0 %v10338_v19  ;;  %v3397_v18 = vld [vmem:[#allocation12 + $0x1308] sm:$0xff] }
 0x69d   : > { %10467 = vmatprep.subr.bf16.mxu1 %v10466_v23  ;;  %v3401_v19 = vld [vmem:[#allocation12 + $0x1328] sm:$0xff]  ;;  %v10484_v23 = vpack.c.bf16 %v3394_v17, %v3390_v41  ;;  %v3431_v41 = vld [vmem:[#allocation12 + $0x1418] sm:$0xff] }
 0x69e   : > { %v10358_v24 = vpack.c.bf16 %v3401_v19, %v3397_v18  ;;  %v3435_v17 = vld [vmem:[#allocation12 + $0x1438] sm:$0xff]  ;;  %v3428_v19 = vld [vmem:[#allocation12 + $0x1400] sm:$0xff] }
 0x69f   : > { %10341 = vmatpush1.bf16.msra.mxu0 %v10340_v29  ;;  %v3402_v29 = vld [vmem:[#allocation12 + $0x1330] sm:$0xff]  ;;  %v10502_v18 = vpack.c.bf16 %v3435_v17, %v3431_v41  ;;  %v3464_v41 = vld [vmem:[#allocation12 + $0x1520] sm:$0xff] }
 0x6a0   : > { %10469 = vmatpush1.bf16.msra.mxu1 %v10468_v4  ;;  %10343 = vmatprep.subr.bf16.mxu0 %v10342_v30  ;;  %v3405_v4 = vld [vmem:[#allocation12 + $0x1348] sm:$0xff] }
 0x6a1   : > { %10471 = vmatprep.subr.bf16.mxu1 %v10470_v34  ;;  %v3409_v30 = vld [vmem:[#allocation12 + $0x1368] sm:$0xff]  ;;  %v10488_v34 = vpack.c.bf16 %v3402_v29, %v3398_v27 }
 0x6a2   : > { %v10362_v35 = vpack.c.bf16 %v3409_v30, %v3405_v4  ;;  %v3436_v4 = vld [vmem:[#allocation12 + $0x1440] sm:$0xff] }
 0x6a3   : > { %10345 = vmatpush1.bf16.msra.mxu0 %v10344_v46  ;;  %v3410_v46 = vld [vmem:[#allocation12 + $0x1370] sm:$0xff]  ;;  %v3440_v30 = vld [vmem:[#allocation12 + $0x1460] sm:$0xff] }
 0x6a4   : > { %10473 = vmatpush1.bf16.msra.mxu1 %v10472_v48  ;;  %10347 = vmatprep.subr.bf16.mxu0 %v10346_v49  ;;  %v3413_v48 = vld [vmem:[#allocation12 + $0x1388] sm:$0xff] }
 0x6a5   : > { %10475 = vmatprep.subr.bf16.mxu1 %v10474_v36  ;;  %v3417_v49 = vld [vmem:[#allocation12 + $0x13a8] sm:$0xff]  ;;  %v10492_v36 = vpack.c.bf16 %v3410_v46, %v3406_v44  ;;  %v3451_v46 = vld [vmem:[#allocation12 + $0x14b8] sm:$0xff] }
 0x6a6   : > { %v10366_v54 = vpack.c.bf16 %v3417_v49, %v3413_v48  ;;  %v3449_v44 = vld [vmem:[#allocation12 + $0x14a8] sm:$0xff]  ;;  %v10380_v49 = vpack.c.bf16 %v3440_v30, %v3436_v4  ;;  %v3470_v4 = vld [vmem:[#allocation12 + $0x1550] sm:$0xff] }
 0x6a7   : > { %10349 = vmatpush1.bf16.msra.mxu0 %v10348_v59  ;;  %v3418_v59 = vld [vmem:[#allocation12 + $0x13b0] sm:$0xff] }
 0x6a8   : > { %10477 = vmatpush1.bf16.msra.mxu1 %v10476_v62  ;;  %10351 = vmatprep.subr.bf16.mxu0 %v10350_v51  ;;  %v3421_v62 = vld [vmem:[#allocation12 + $0x13c8] sm:$0xff]  ;;  %v3474_v30 = vld [vmem:[#allocation12 + $0x1570] sm:$0xff] }
 0x6a9   : > { %10479 = vmatprep.subr.bf16.mxu1 %v10478_v8  ;;  %v3425_v51 = vld [vmem:[#allocation12 + $0x13e8] sm:$0xff]  ;;  %v10496_v8 = vpack.c.bf16 %v3418_v59, %v3414_v57  ;;  %v3455_v59 = vld [vmem:[#allocation12 + $0x14d8] sm:$0xff] }
 0x6aa   : > { %v10370_v9 = vpack.c.bf16 %v3425_v51, %v3421_v62  ;;  %v3453_v57 = vld [vmem:[#allocation12 + $0x14c8] sm:$0xff]  ;;  %v3459_v62 = vld [vmem:[#allocation12 + $0x14f8] sm:$0xff] }
 0x6ab   : > { %10353 = vmatpush1.bf16.msra.mxu0 %v10352_v12  ;;  %v3426_v12 = vld [vmem:[#allocation12 + $0x13f0] sm:$0xff] }
 0x6ac   : > { %10481 = vmatpush1.bf16.msra.mxu1 %v10480_v13  ;;  %10355 = vmatprep.subr.bf16.mxu0 %v10354_v14  ;;  %v10372_v13 = vpack.c.bf16 %v3424_v11, %v3420_v10  ;;  %v10500_v14 = vpack.c.bf16 %v3426_v12, %v3422_v47  ;;  %v3454_v10 = vld [vmem:[#allocation12 + $0x14d0] sm:$0xff]  ;;  %v3465_v47 = vld [vmem:[#allocation12 + $0x1528] sm:$0xff]  ;;  %v3463_v12 = vld [vmem:[#allocation12 + $0x1518] sm:$0xff] }
 0x6ad   : > { %10483 = vmatprep.subr.bf16.mxu1 %v10482_v16  ;;  %v10374_v16 = vpack.c.bf16 %v3433_v15, %v3429_v0  ;;  %v3458_v11 = vld [vmem:[#allocation12 + $0x14f0] sm:$0xff]  ;;  %v3460_v15 = vld [vmem:[#allocation12 + $0x1500] sm:$0xff] }
 0x6ae   : > { %v10516_v0 = vpack.c.bf16 %v3458_v11, %v3454_v10 }
 0x6af   : > { %10357 = vmatpush1.bf16.msra.mxu0 %v10356_v22  ;;  %v3434_v22 = vld [vmem:[#allocation12 + $0x1430] sm:$0xff] }
 0x6b0   : > { %10485 = vmatpush1.bf16.msra.mxu1 %v10484_v23  ;;  %10359 = vmatprep.subr.bf16.mxu0 %v10358_v24  ;;  %v3437_v23 = vld [vmem:[#allocation12 + $0x1448] sm:$0xff]  ;;  %v10504_v29 = vpack.c.bf16 %v3434_v22, %v3430_v21  ;;  %v3471_v22 = vld [vmem:[#allocation12 + $0x1558] sm:$0xff] }
 0x6b1   : > { %10487 = vmatprep.subr.bf16.mxu1 %v10486_v28  ;;  %v3441_v24 = vld [vmem:[#allocation12 + $0x1468] sm:$0xff]  ;;  %v10376_v28 = vpack.c.bf16 %v3432_v20, %v3428_v19  ;;  %v3466_v19 = vld [vmem:[#allocation12 + $0x1530] sm:$0xff] }
 0x6b2   : > { %v10378_v32 = vpack.c.bf16 %v3441_v24, %v3437_v23  ;;  %v3469_v20 = vld [vmem:[#allocation12 + $0x1548] sm:$0xff]  ;;  %v3475_v23 = vld [vmem:[#allocation12 + $0x1578] sm:$0xff]  ;;  %v10392_v24 = vpack.c.bf16 %v3464_v41, %v3460_v15 }
 0x6b3   : > { %10361 = vmatpush1.bf16.msra.mxu0 %v10360_v33  ;;  %v10506_v33 = vpack.c.bf16 %v3443_v26, %v3439_v25  ;;  %v3473_v21 = vld [vmem:[#allocation12 + $0x1568] sm:$0xff]  ;;  %v3468_v26 = vld [vmem:[#allocation12 + $0x1540] sm:$0xff] }
 0x6b4   : > { %10489 = vmatpush1.bf16.msra.mxu1 %v10488_v34  ;;  %10363 = vmatprep.subr.bf16.mxu0 %v10362_v35  ;;  %v3438_v34 = vld [vmem:[#allocation12 + $0x1450] sm:$0xff]  ;;  %v3501_v15 = vld [vmem:[#allocation12 + $0x1648] sm:$0xff] }
 0x6b5   : > { %10491 = vmatprep.subr.bf16.mxu1 %v10490_v45  ;;  %v3442_v35 = vld [vmem:[#allocation12 + $0x1470] sm:$0xff]  ;;  %v3447_v45 = vld [vmem:[#allocation12 + $0x1498] sm:$0xff]  ;;  %v3505_v41 = vld [vmem:[#allocation12 + $0x1668] sm:$0xff] }
 0x6b6   : > { %v10508_v50 = vpack.c.bf16 %v3442_v35, %v3438_v34  ;;  %v3483_v34 = vld [vmem:[#allocation12 + $0x15b8] sm:$0xff] }
 0x6b7   : > { %10365 = vmatpush1.bf16.msra.mxu0 %v10364_v53  ;;  %v3448_v53 = vld [vmem:[#allocation12 + $0x14a0] sm:$0xff] }
 0x6b8   : > { %10493 = vmatpush1.bf16.msra.mxu1 %v10492_v36  ;;  %10367 = vmatprep.subr.bf16.mxu0 %v10366_v54  ;;  %v10382_v36 = vpack.c.bf16 %v3449_v44, %v3445_v37  ;;  %v10510_v54 = vpack.c.bf16 %v3451_v46, %v3447_v45  ;;  %v10384_v51 = vpack.c.bf16 %v3448_v53, %v3444_v52  ;;  %v3476_v44 = vld [vmem:[#allocation12 + $0x1580] sm:$0xff]  ;;  %v3485_v52 = vld [vmem:[#allocation12 + $0x15c8] sm:$0xff] }
 0x6b9   : > { %10495 = vmatprep.subr.bf16.mxu1 %v10494_v58  ;;  %v3457_v58 = vld [vmem:[#allocation12 + $0x14e8] sm:$0xff]  ;;  %v10524_v37 = vpack.c.bf16 %v3474_v30, %v3470_v4  ;;  %v3480_v45 = vld [vmem:[#allocation12 + $0x15a0] sm:$0xff] }
 0x6ba   : > { %v3489_v53 = vld [vmem:[#allocation12 + $0x15e8] sm:$0xff]  ;;  %v10400_v55 = vpack.c.bf16 %v3480_v45, %v3476_v44 }
 0x6bb   : > { %10369 = vmatpush1.bf16.msra.mxu0 %v10368_v7  ;;  %v3456_v7 = vld [vmem:[#allocation12 + $0x14e0] sm:$0xff]  ;;  %v3517_v44 = vld [vmem:[#allocation12 + $0x16c8] sm:$0xff] }
 0x6bc   : > { %10497 = vmatpush1.bf16.msra.mxu1 %v10496_v8  ;;  %10371 = vmatprep.subr.bf16.mxu0 %v10370_v9  ;;  %v10386_v8 = vpack.c.bf16 %v3457_v58, %v3453_v57  ;;  %v10514_v9 = vpack.c.bf16 %v3459_v62, %v3455_v59  ;;  %v3484_v57 = vld [vmem:[#allocation12 + $0x15c0] sm:$0xff]  ;;  %v10402_v59 = vpack.c.bf16 %v3489_v53, %v3485_v52  ;;  %v3521_v45 = vld [vmem:[#allocation12 + $0x16e8] sm:$0xff] }
 0x6bd   : > { %10499 = vmatprep.subr.bf16.mxu1 %v10498_v6  ;;  %v3461_v6 = vld [vmem:[#allocation12 + $0x1508] sm:$0xff]  ;;  %v3488_v58 = vld [vmem:[#allocation12 + $0x15e0] sm:$0xff] }
 0x6be   : > { %v10404_v10 = vpack.c.bf16 %v3488_v58, %v3484_v57  ;;  %v3516_v52 = vld [vmem:[#allocation12 + $0x16c0] sm:$0xff]  ;;  %v3525_v57 = vld [vmem:[#allocation12 + $0x1708] sm:$0xff] }
 0x6bf   : > { %10373 = vmatpush1.bf16.msra.mxu0 %v10372_v13  ;;  %v3467_v13 = vld [vmem:[#allocation12 + $0x1538] sm:$0xff]  ;;  %v3520_v53 = vld [vmem:[#allocation12 + $0x16e0] sm:$0xff]  ;;  %v3529_v58 = vld [vmem:[#allocation12 + $0x1728] sm:$0xff] }
 0x6c0   : > { %10501 = vmatpush1.bf16.msra.mxu1 %v10500_v14  ;;  %10375 = vmatprep.subr.bf16.mxu0 %v10374_v16  ;;  %v10388_v14 = vpack.c.bf16 %v3456_v7, %v3452_v5  ;;  %v10390_v16 = vpack.c.bf16 %v3465_v47, %v3461_v6  ;;  %v10518_v17 = vpack.c.bf16 %v3467_v13, %v3463_v12  ;;  %v3493_v5 = vld [vmem:[#allocation12 + $0x1608] sm:$0xff]  ;;  %v3492_v6 = vld [vmem:[#allocation12 + $0x1600] sm:$0xff] }
 0x6c1   : > { %10503 = vmatprep.subr.bf16.mxu1 %v10502_v18  ;;  %v3462_v18 = vld [vmem:[#allocation12 + $0x1510] sm:$0xff]  ;;  %v3497_v7 = vld [vmem:[#allocation12 + $0x1628] sm:$0xff]  ;;  %v3496_v47 = vld [vmem:[#allocation12 + $0x1620] sm:$0xff] }
 0x6c2   : > { %v10520_v25 = vpack.c.bf16 %v3466_v19, %v3462_v18  ;;  %v10406_v12 = vpack.c.bf16 %v3497_v7, %v3493_v5  ;;  %v10408_v18 = vpack.c.bf16 %v3496_v47, %v3492_v6  ;;  %v3524_v5 = vld [vmem:[#allocation12 + $0x1700] sm:$0xff]  ;;  %v3533_v6 = vld [vmem:[#allocation12 + $0x1748] sm:$0xff] }
 0x6c3   : > { %v3528_v7 = vld [vmem:[#allocation12 + $0x1720] sm:$0xff]  ;;  %v3537_v47 = vld [vmem:[#allocation12 + $0x1768] sm:$0xff] }
 0x755   : > { %v3223_v27 = vpop.f32.mrb[12].mxu0 }
 0x756   : > { %v3225_v31 = vpop.f32.mrb[13].mxu0  ;;  %v13744_v38 = vpop.f32.mrb[12].mxu1 }
 0x757   : > { %3620 = vmatprep.mubr.f32.mxu0 %v3225_v31  ;;  %3762 = vmatprep.mubr.f32.mxu1 %v3225_v31  ;;  %v3296_v48 = vpop.f32.mrb[13].mxu1  ;;  %v3477_v31 = vld [vmem:[#allocation12 + $0x1588] sm:$0xff] }
 0x758   : > { %3621 = vmatmul.mubr.f32.vlgmr.msra.gmra.mrb[10].mxu0 %v3223_v27  ;;  %3763 = vmatmul.mubr.f32.vlgmr.msra.gmra.mrb[10].mxu1 %v3223_v27  ;;  %v3472_v27 = vld [vmem:[#allocation12 + $0x1560] sm:$0xff] }
 0x759   : > { %10377 = vmatpush1.bf16.msra.mxu0 %v10376_v28  ;;  %10505 = vmatpush1.bf16.msra.mxu1 %v10504_v29  ;;  %v10394_v28 = vpack.c.bf16 %v3473_v21, %v3469_v20  ;;  %v10522_v29 = vpack.c.bf16 %v3475_v23, %v3471_v22  ;;  %v10396_v35 = vpack.c.bf16 %v3472_v27, %v3468_v26  ;;  %v3500_v20 = vld [vmem:[#allocation12 + $0x1640] sm:$0xff]  ;;  %v3509_v26 = vld [vmem:[#allocation12 + $0x1688] sm:$0xff] }
 0x75a   : > { %10379 = vmatprep.subr.bf16.mxu0 %v10378_v32  ;;  %10507 = vmatprep.subr.bf16.mxu1 %v10506_v33  ;;  %v3481_v32 = vld [vmem:[#allocation12 + $0x15a8] sm:$0xff]  ;;  %v3479_v33 = vld [vmem:[#allocation12 + $0x1598] sm:$0xff]  ;;  %v3504_v21 = vld [vmem:[#allocation12 + $0x1660] sm:$0xff]  ;;  %v10410_v22 = vpack.c.bf16 %v3505_v41, %v3501_v15 }
 0x75b   : > { %3691 = vmatprep.mubr.f32.mxu0 %v3296_v48  ;;  %3833 = vmatprep.mubr.f32.mxu1 %v3296_v48  ;;  %v10398_v46 = vpack.c.bf16 %v3481_v32, %v3477_v31  ;;  %v10526_v48 = vpack.c.bf16 %v3483_v34, %v3479_v33  ;;  %v3513_v27 = vld [vmem:[#allocation12 + $0x16a8] sm:$0xff]  ;;  %v10412_v4 = vpack.c.bf16 %v3504_v21, %v3500_v20  ;;  %v3508_v31 = vld [vmem:[#allocation12 + $0x1680] sm:$0xff] }
 0x75c   : > { %v3512_v32 = vld [vmem:[#allocation12 + $0x16a0] sm:$0xff]  ;;  %v10414_v33 = vpack.c.bf16 %v3513_v27, %v3509_v26  ;;  %v3541_v20 = vld [vmem:[#allocation12 + $0x1788] sm:$0xff] }
 0x75d   : > { %10381 = vmatpush1.bf16.msra.mxu0 %v10380_v49  ;;  %10509 = vmatpush1.bf16.msra.mxu1 %v10508_v50  ;;  %v3478_v49 = vld [vmem:[#allocation12 + $0x1590] sm:$0xff]  ;;  %v3532_v15 = vld [vmem:[#allocation12 + $0x1740] sm:$0xff]  ;;  %v3545_v21 = vld [vmem:[#allocation12 + $0x17a8] sm:$0xff] }
 0x75e   : > { %10383 = vmatprep.subr.bf16.mxu0 %v10382_v36  ;;  %10511 = vmatprep.subr.bf16.mxu1 %v10510_v54  ;;  %v3482_v50 = vld [vmem:[#allocation12 + $0x15b0] sm:$0xff]  ;;  %v3487_v36 = vld [vmem:[#allocation12 + $0x15d8] sm:$0xff]  ;;  %v3536_v41 = vld [vmem:[#allocation12 + $0x1760] sm:$0xff] }
 0x75f   : > { %v3491_v54 = vld [vmem:[#allocation12 + $0x15f8] sm:$0xff]  ;;  %v10528_v56 = vpack.c.bf16 %v3482_v50, %v3478_v49  ;;  %v10416_v49 = vpack.c.bf16 %v3512_v32, %v3508_v31  ;;  %v3540_v26 = vld [vmem:[#allocation12 + $0x1780] sm:$0xff]  ;;  %v3549_v31 = vld [vmem:[#allocation12 + $0x17c8] sm:$0xff] }
 0x760   : > { %v10530_v62 = vpack.c.bf16 %v3491_v54, %v3487_v36  ;;  %v10418_v36 = vpack.c.bf16 %v3521_v45, %v3517_v44  ;;  %v3544_v27 = vld [vmem:[#allocation12 + $0x17a0] sm:$0xff]  ;;  %v3553_v32 = vld [vmem:[#allocation12 + $0x17e8] sm:$0xff] }
 0x761   : > { %10385 = vmatpush1.bf16.msra.mxu0 %v10384_v51  ;;  %10513 = vmatpush1.bf16.msra.mxu1 %v10512_v3  ;;  %v3486_v51 = vld [vmem:[#allocation12 + $0x15d0] sm:$0xff]  ;;  %v3548_v44 = vld [vmem:[#allocation12 + $0x17c0] sm:$0xff]  ;;  %v10434_v45 = vpack.c.bf16 %v3553_v32, %v3549_v31 }
 0x762   : > { %10387 = vmatprep.subr.bf16.mxu0 %v10386_v8  ;;  %10515 = vmatprep.subr.bf16.mxu1 %v10514_v9  ;;  %v3490_v3 = vld [vmem:[#allocation12 + $0x15f0] sm:$0xff]  ;;  %v3495_v8 = vld [vmem:[#allocation12 + $0x1618] sm:$0xff] }
 0x763   : > { %v3499_v9 = vld [vmem:[#allocation12 + $0x1638] sm:$0xff]  ;;  %v10532_v11 = vpack.c.bf16 %v3490_v3, %v3486_v51  ;;  %v10420_v51 = vpack.c.bf16 %v3520_v53, %v3516_v52  ;;  %v4018_v31 = vld [vmem:[#allocation12 + $0x18d0] sm:$0xff] }
 0x764   : > { %v10534_v13 = vpack.c.bf16 %v3499_v9, %v3495_v8  ;;  %v10422_v8 = vpack.c.bf16 %v3529_v58, %v3525_v57  ;;  %v3992_v57 = vld [vmem:[#allocation12 + $0x1800] sm:$0xff]  ;;  %v4022_v32 = vld [vmem:[#allocation12 + $0x18f0] sm:$0xff] }
 0x765   : > { %10389 = vmatpush1.bf16.msra.mxu0 %v10388_v14  ;;  %10517 = vmatpush1.bf16.msra.mxu1 %v10516_v0  ;;  %v3494_v14 = vld [vmem:[#allocation12 + $0x1610] sm:$0xff]  ;;  %v3996_v58 = vld [vmem:[#allocation12 + $0x1820] sm:$0xff] }
 0x766   : > { %10391 = vmatprep.subr.bf16.mxu0 %v10390_v16  ;;  %10519 = vmatprep.subr.bf16.mxu1 %v10518_v17  ;;  %v3498_v0 = vld [vmem:[#allocation12 + $0x1630] sm:$0xff]  ;;  %v3503_v16 = vld [vmem:[#allocation12 + $0x1658] sm:$0xff] }
 0x767   : > { %v3507_v17 = vld [vmem:[#allocation12 + $0x1678] sm:$0xff]  ;;  %v10536_v19 = vpack.c.bf16 %v3498_v0, %v3494_v14  ;;  %v10424_v14 = vpack.c.bf16 %v3528_v7, %v3524_v5  ;;  %v4005_v7 = vld [vmem:[#allocation12 + $0x1868] sm:$0xff] }
 0x768   : > { %v10538_v23 = vpack.c.bf16 %v3507_v17, %v3503_v16  ;;  %v10426_v16 = vpack.c.bf16 %v3537_v47, %v3533_v6  ;;  %v4004_v6 = vld [vmem:[#allocation12 + $0x1860] sm:$0xff] }
 0x769   : > { %10393 = vmatpush1.bf16.msra.mxu0 %v10392_v24  ;;  %10521 = vmatpush1.bf16.msra.mxu1 %v10520_v25  ;;  %v3502_v24 = vld [vmem:[#allocation12 + $0x1650] sm:$0xff] }
 0x76a   : > { %10395 = vmatprep.subr.bf16.mxu0 %v10394_v28  ;;  %10523 = vmatprep.subr.bf16.mxu1 %v10522_v29  ;;  %v3506_v25 = vld [vmem:[#allocation12 + $0x1670] sm:$0xff]  ;;  %v3511_v28 = vld [vmem:[#allocation12 + $0x1698] sm:$0xff] }
 0x76b   : > { %v3515_v29 = vld [vmem:[#allocation12 + $0x16b8] sm:$0xff]  ;;  %v10540_v30 = vpack.c.bf16 %v3506_v25, %v3502_v24  ;;  %v10428_v24 = vpack.c.bf16 %v3536_v41, %v3532_v15 }
 0x76c   : > { %v10542_v34 = vpack.c.bf16 %v3515_v29, %v3511_v28  ;;  %v10430_v28 = vpack.c.bf16 %v3545_v21, %v3541_v20  ;;  %v4015_v15 = vld [vmem:[#allocation12 + $0x18b8] sm:$0xff]  ;;  %v4010_v20 = vld [vmem:[#allocation12 + $0x1890] sm:$0xff] }
 0x76d   : > { %10397 = vmatpush1.bf16.msra.mxu0 %v10396_v35  ;;  %10525 = vmatpush1.bf16.msra.mxu1 %v10524_v37  ;;  %v3510_v35 = vld [vmem:[#allocation12 + $0x1690] sm:$0xff] }
 0x76e   : > { %10399 = vmatprep.subr.bf16.mxu0 %v10398_v46  ;;  %10527 = vmatprep.subr.bf16.mxu1 %v10526_v48  ;;  %v3514_v37 = vld [vmem:[#allocation12 + $0x16b0] sm:$0xff]  ;;  %v3519_v46 = vld [vmem:[#allocation12 + $0x16d8] sm:$0xff] }
 0x76f   : > { %v3523_v48 = vld [vmem:[#allocation12 + $0x16f8] sm:$0xff]  ;;  %v10544_v50 = vpack.c.bf16 %v3514_v37, %v3510_v35  ;;  %v10432_v35 = vpack.c.bf16 %v3544_v27, %v3540_v26  ;;  %v4014_v21 = vld [vmem:[#allocation12 + $0x18b0] sm:$0xff] }
 0x770   : > { %v10546_v54 = vpack.c.bf16 %v3523_v48, %v3519_v46  ;;  %v3552_v48 = vld [vmem:[#allocation12 + $0x17e0] sm:$0xff]  ;;  %v10704_v27 = vpack.c.bf16 %v4014_v21, %v4010_v20  ;;  %v4050_v21 = vld [vmem:[#allocation12 + $0x19d0] sm:$0xff] }
 0x771   : > { %10401 = vmatpush1.bf16.msra.mxu0 %v10400_v55  ;;  %10529 = vmatpush1.bf16.msra.mxu1 %v10528_v56  ;;  %v3518_v55 = vld [vmem:[#allocation12 + $0x16d0] sm:$0xff]  ;;  %v10436_v52 = vpack.c.bf16 %v3552_v48, %v3548_v44  ;;  %v4028_v48 = vld [vmem:[#allocation12 + $0x1920] sm:$0xff] }
 0x772   : > { %10403 = vmatprep.subr.bf16.mxu0 %v10402_v59  ;;  %10531 = vmatprep.subr.bf16.mxu1 %v10530_v62  ;;  %v3522_v56 = vld [vmem:[#allocation12 + $0x16f0] sm:$0xff]  ;;  %v3527_v59 = vld [vmem:[#allocation12 + $0x1718] sm:$0xff] }
 0x773   : > { %v3531_v62 = vld [vmem:[#allocation12 + $0x1738] sm:$0xff]  ;;  %v10548_v3 = vpack.c.bf16 %v3522_v56, %v3518_v55 }
 0x774   : > { %v10550_v9 = vpack.c.bf16 %v3531_v62, %v3527_v59  ;;  %v3995_v55 = vld [vmem:[#allocation12 + $0x1818] sm:$0xff]  ;;  %v3994_v59 = vld [vmem:[#allocation12 + $0x1810] sm:$0xff] }
 0x775   : > { %10405 = vmatpush1.bf16.msra.mxu0 %v10404_v10  ;;  %10533 = vmatpush1.bf16.msra.mxu1 %v10532_v11  ;;  %v3526_v10 = vld [vmem:[#allocation12 + $0x1710] sm:$0xff]  ;;  %v3999_v56 = vld [vmem:[#allocation12 + $0x1838] sm:$0xff] }
 0x776   : > { %10407 = vmatprep.subr.bf16.mxu0 %v10406_v12  ;;  %10535 = vmatprep.subr.bf16.mxu1 %v10534_v13  ;;  %v3530_v11 = vld [vmem:[#allocation12 + $0x1730] sm:$0xff]  ;;  %v3535_v12 = vld [vmem:[#allocation12 + $0x1758] sm:$0xff]  ;;  %v10694_v5 = vpack.c.bf16 %v3999_v56, %v3995_v55 }
 0x777   : > { %v3539_v13 = vld [vmem:[#allocation12 + $0x1778] sm:$0xff]  ;;  %v10552_v0 = vpack.c.bf16 %v3530_v11, %v3526_v10  ;;  %v3998_v62 = vld [vmem:[#allocation12 + $0x1830] sm:$0xff] }
 0x778   : > { %v10554_v17 = vpack.c.bf16 %v3539_v13, %v3535_v12  ;;  %v3845_v10 = vld [vmem:[#allocation10 + $0xc] sm:$0xf]  ;;  %v10696_v11 = vpack.c.bf16 %v3998_v62, %v3994_v59  ;;  %v4002_v13 = vld [vmem:[#allocation12 + $0x1850] sm:$0xff]  ;;  %v4032_v59 = vld [vmem:[#allocation12 + $0x1940] sm:$0xff] }
 0x779   : > { %10409 = vmatpush1.bf16.msra.mxu0 %v10408_v18  ;;  %10537 = vmatpush1.bf16.msra.mxu1 %v10536_v19  ;;  %v3534_v18 = vld [vmem:[#allocation12 + $0x1750] sm:$0xff]  ;;  %v4035_v55 = vld [vmem:[#allocation12 + $0x1958] sm:$0xff]  ;;  %v4036_v62 = vld [vmem:[#allocation12 + $0x1960] sm:$0xff] }
 0x77a   : > { %10411 = vmatprep.subr.bf16.mxu0 %v10410_v22  ;;  %10539 = vmatprep.subr.bf16.mxu1 %v10538_v23  ;;  %v3538_v19 = vld [vmem:[#allocation12 + $0x1770] sm:$0xff]  ;;  %v3543_v22 = vld [vmem:[#allocation12 + $0x1798] sm:$0xff] }
 0x77b   : > { %v3547_v23 = vld [vmem:[#allocation12 + $0x17b8] sm:$0xff]  ;;  %v10556_v25 = vpack.c.bf16 %v3538_v19, %v3534_v18 }
 0x77c   : > { %v10558_v29 = vpack.c.bf16 %v3547_v23, %v3543_v22  ;;  %v4017_v22 = vld [vmem:[#allocation12 + $0x18c8] sm:$0xff]  ;;  %v4039_v56 = vld [vmem:[#allocation12 + $0x1978] sm:$0xff] }
 0x77d   : > { %10413 = vmatpush1.bf16.msra.mxu0 %v10412_v4  ;;  %10541 = vmatpush1.bf16.msra.mxu1 %v10540_v30  ;;  %v3542_v4 = vld [vmem:[#allocation12 + $0x1790] sm:$0xff]  ;;  %v4021_v23 = vld [vmem:[#allocation12 + $0x18e8] sm:$0xff] }
 0x77e   : > { %10415 = vmatprep.subr.bf16.mxu0 %v10414_v33  ;;  %10543 = vmatprep.subr.bf16.mxu1 %v10542_v34  ;;  %v3546_v30 = vld [vmem:[#allocation12 + $0x17b0] sm:$0xff]  ;;  %v3551_v33 = vld [vmem:[#allocation12 + $0x17d8] sm:$0xff] }
 0x77f   : > { %v3555_v34 = vld [vmem:[#allocation12 + $0x17f8] sm:$0xff]  ;;  %v10560_v37 = vpack.c.bf16 %v3546_v30, %v3542_v4  ;;  %v10578_v4 = vpack.c.bf16 %v4021_v23, %v4017_v22  ;;  %v4054_v22 = vld [vmem:[#allocation12 + $0x19f0] sm:$0xff]  ;;  %v4057_v23 = vld [vmem:[#allocation12 + $0x1a08] sm:$0xff] }
 0x780   : > { %v10562_v46 = vpack.c.bf16 %v3555_v34, %v3551_v33  ;;  %v4025_v33 = vld [vmem:[#allocation12 + $0x1908] sm:$0xff] }
 0x781   : > { %10417 = vmatpush1.bf16.msra.mxu0 %v10416_v49  ;;  %10545 = vmatpush1.bf16.msra.mxu1 %v10544_v50  ;;  %v3550_v49 = vld [vmem:[#allocation12 + $0x17d0] sm:$0xff]  ;;  %v4029_v34 = vld [vmem:[#allocation12 + $0x1928] sm:$0xff] }
 0x782   : > { %10419 = vmatprep.subr.bf16.mxu0 %v10418_v36  ;;  %10547 = vmatprep.subr.bf16.mxu1 %v10546_v54  ;;  %v3554_v50 = vld [vmem:[#allocation12 + $0x17f0] sm:$0xff]  ;;  %v3993_v36 = vld [vmem:[#allocation12 + $0x1808] sm:$0xff] }
 0x783   : > { %v10564_v53 = vpack.c.bf16 %v3554_v50, %v3550_v49  ;;  %v3997_v54 = vld [vmem:[#allocation12 + $0x1828] sm:$0xff]  ;;  %v10582_v49 = vpack.c.bf16 %v4029_v34, %v4025_v33  ;;  %v4062_v33 = vld [vmem:[#allocation12 + $0x1a30] sm:$0xff] }
 0x784   : > { %v4065_v34 = vld [vmem:[#allocation12 + $0x1a48] sm:$0xff] }
 0x785   : > { %10421 = vmatpush1.bf16.msra.mxu0 %v10420_v51  ;;  %10549 = vmatpush1.bf16.msra.mxu1 %v10548_v3  ;;  %v4001_v51 = vld [vmem:[#allocation12 + $0x1848] sm:$0xff]  ;;  %v10566_v3 = vpack.c.bf16 %v3997_v54, %v3993_v36 }
 0x786   : > { %10423 = vmatprep.subr.bf16.mxu0 %v10422_v8  ;;  %10551 = vmatprep.subr.bf16.mxu1 %v10550_v9  ;;  %v4003_v8 = vld [vmem:[#allocation12 + $0x1858] sm:$0xff]  ;;  %v10570_v47 = vpack.c.bf16 %v4005_v7, %v4001_v51  ;;  %v4033_v36 = vld [vmem:[#allocation12 + $0x1948] sm:$0xff]  ;;  %v4038_v7 = vld [vmem:[#allocation12 + $0x1970] sm:$0xff] }
 0x787   : > { %v4007_v9 = vld [vmem:[#allocation12 + $0x1878] sm:$0xff]  ;;  %v4037_v54 = vld [vmem:[#allocation12 + $0x1968] sm:$0xff] }
 0x788   : > { %v10698_v12 = vpack.c.bf16 %v4007_v9, %v4003_v8  ;;  %v10586_v51 = vpack.c.bf16 %v4037_v54, %v4033_v36  ;;  %v4041_v8 = vld [vmem:[#allocation12 + $0x1988] sm:$0xff]  ;;  %v4070_v36 = vld [vmem:[#allocation12 + $0x1a70] sm:$0xff] }
 0x789   : > { %10425 = vmatpush1.bf16.msra.mxu0 %v10424_v14  ;;  %10553 = vmatpush1.bf16.msra.mxu1 %v10552_v0  ;;  %v4006_v14 = vld [vmem:[#allocation12 + $0x1870] sm:$0xff]  ;;  %v4009_v0 = vld [vmem:[#allocation12 + $0x1888] sm:$0xff] }
 0x78a   : > { %10427 = vmatprep.subr.bf16.mxu0 %v10426_v16  ;;  %10555 = vmatprep.subr.bf16.mxu1 %v10554_v17  ;;  %v10700_v41 = vpack.c.bf16 %v4006_v14, %v4002_v13  ;;  %v4008_v16 = vld [vmem:[#allocation12 + $0x1880] sm:$0xff]  ;;  %v4045_v9 = vld [vmem:[#allocation12 + $0x19a8] sm:$0xff]  ;;  %v4042_v14 = vld [vmem:[#allocation12 + $0x1990] sm:$0xff] }
 0x78b   : > { %v4012_v17 = vld [vmem:[#allocation12 + $0x18a0] sm:$0xff]  ;;  %v4073_v54 = vld [vmem:[#allocation12 + $0x1a88] sm:$0xff] }
 0x78c   : > { %v10576_v26 = vpack.c.bf16 %v4012_v17, %v4008_v16  ;;  %v4048_v17 = vld [vmem:[#allocation12 + $0x19c0] sm:$0xff] }
 0x78d   : > { %10429 = vmatpush1.bf16.msra.mxu0 %v10428_v24  ;;  %10557 = vmatpush1.bf16.msra.mxu1 %v10556_v25  ;;  %v4019_v24 = vld [vmem:[#allocation12 + $0x18d8] sm:$0xff] }
 0x78e   : > { %10431 = vmatprep.subr.bf16.mxu0 %v10430_v28  ;;  %10559 = vmatprep.subr.bf16.mxu1 %v10558_v29  ;;  %v4023_v25 = vld [vmem:[#allocation12 + $0x18f8] sm:$0xff]  ;;  %v4016_v28 = vld [vmem:[#allocation12 + $0x18c0] sm:$0xff] }
 0x78f   : > { %v4020_v29 = vld [vmem:[#allocation12 + $0x18e0] sm:$0xff]  ;;  %v10706_v30 = vpack.c.bf16 %v4023_v25, %v4019_v24  ;;  %v4061_v24 = vld [vmem:[#allocation12 + $0x1a28] sm:$0xff]  ;;  %v4059_v25 = vld [vmem:[#allocation12 + $0x1a18] sm:$0xff] }
 0x790   : > { %v10580_v44 = vpack.c.bf16 %v4020_v29, %v4016_v28  ;;  %v10724_v28 = vpack.c.bf16 %v4054_v22, %v4050_v21  ;;  %v4056_v29 = vld [vmem:[#allocation12 + $0x1a00] sm:$0xff]  ;;  %v4090_v22 = vld [vmem:[#allocation12 + $0x1b10] sm:$0xff] }
 0x791   : > { %10433 = vmatpush1.bf16.msra.mxu0 %v10432_v35  ;;  %10561 = vmatpush1.bf16.msra.mxu1 %v10560_v37  ;;  %v4027_v35 = vld [vmem:[#allocation12 + $0x1918] sm:$0xff] }
 0x792   : > { %10435 = vmatprep.subr.bf16.mxu0 %v10434_v45  ;;  %10563 = vmatprep.subr.bf16.mxu1 %v10562_v46  ;;  %v4031_v37 = vld [vmem:[#allocation12 + $0x1938] sm:$0xff]  ;;  %v10708_v45 = vpack.c.bf16 %v4022_v32, %v4018_v31  ;;  %v4024_v46 = vld [vmem:[#allocation12 + $0x1900] sm:$0xff]  ;;  %v4058_v32 = vld [vmem:[#allocation12 + $0x1a10] sm:$0xff] }
 0x793   : > { %v10710_v50 = vpack.c.bf16 %v4031_v37, %v4027_v35  ;;  %v4069_v35 = vld [vmem:[#allocation12 + $0x1a68] sm:$0xff]  ;;  %v4067_v37 = vld [vmem:[#allocation12 + $0x1a58] sm:$0xff] }
 0x795   : > { %10437 = vmatpush1.bf16.msra.mxu0 %v10436_v52  ;;  %10565 = vmatpush1.bf16.msra.mxu1 %v10564_v53  ;;  %v4026_v52 = vld [vmem:[#allocation12 + $0x1910] sm:$0xff] }
 0x796   : > { %3849 = vmatprep.subr.mxu0 %v13694_v60  ;;  %3920 = vmatprep.subr.mxu1 %v13696_v61  ;;  %v10568_v60 = vpack.c.bf16 %v3996_v58, %v3992_v57  ;;  %v4000_v61 = vld [vmem:[#allocation12 + $0x1840] sm:$0xff]  ;;  %v4030_v53 = vld [vmem:[#allocation12 + $0x1930] sm:$0xff]  ;;  %v10584_v57 = vpack.c.bf16 %v4028_v48, %v4024_v46  ;;  %v10728_v46 = vpack.c.bf16 %v4062_v33, %v4058_v32 }
 0x797   : > { %v10712_v58 = vpack.c.bf16 %v4030_v53, %v4026_v52  ;;  %v4064_v48 = vld [vmem:[#allocation12 + $0x1a40] sm:$0xff]  ;;  %v4066_v53 = vld [vmem:[#allocation12 + $0x1a50] sm:$0xff] }
 0x798   : > { %3692 = vmatmul.mubr.f32.vlgmr.msra.gmra.mrb[10].mxu0 %v13744_v38  ;;  %3834 = vmatmul.mubr.f32.vlgmr.msra.gmra.mrb[10].mxu1 %v13744_v38  ;;  %v4013_v38 = vld [vmem:[#allocation12 + $0x18a8] sm:$0xff]  ;;  %v4098_v33 = vld [vmem:[#allocation12 + $0x1b50] sm:$0xff] }
 0x799   : > { %3850 = vmatpush1.msra.mxu0 %v13698_v63  ;;  %3921 = vmatpush1.msra.mxu1 %v13700_v2  ;;  %v4011_v63 = vld [vmem:[#allocation12 + $0x1898] sm:$0xff]  ;;  %v10572_v2 = vpack.c.bf16 %v4004_v6, %v4000_v61  ;;  %v10574_v18 = vpack.c.bf16 %v4013_v38, %v4009_v0  ;;  %v4040_v6 = vld [vmem:[#allocation12 + $0x1980] sm:$0xff]  ;;  %v4046_v0 = vld [vmem:[#allocation12 + $0x19b0] sm:$0xff] }
 0x79a   : > { %3913 = vmatprep.mubr.f32.mxu0 %v13189_v1  ;;  %3984 = vmatprep.mubr.f32.mxu1 %v13189_v1  ;;  %v10702_v19 = vpack.c.bf16 %v4015_v15, %v4011_v63  ;;  %v4049_v38 = vld [vmem:[#allocation12 + $0x19c8] sm:$0xff]  ;;  %v4051_v15 = vld [vmem:[#allocation12 + $0x19d8] sm:$0xff]  ;;  %v10720_v16 = vpack.c.bf16 %v4046_v0, %v4042_v14  ;;  %v4082_v0 = vld [vmem:[#allocation12 + $0x1ad0] sm:$0xff] }
 0x79b   : > { %10567 = vmatprep.subr.bf16.mxu0 %v10566_v3  ;;  %10695 = vmatprep.subr.bf16.mxu1 %v10694_v5  ;;  %v10714_v3 = vpack.c.bf16 %v4039_v56, %v4035_v55  ;;  %v4034_v5 = vld [vmem:[#allocation12 + $0x1950] sm:$0xff]  ;;  %v4053_v63 = vld [vmem:[#allocation12 + $0x19e8] sm:$0xff]  ;;  %v4075_v56 = vld [vmem:[#allocation12 + $0x1a98] sm:$0xff] }
 0x79c   : > { %9468 = vmatmul.mubr.msk.f32.vlgmr.msra.gmra.mrb[14].mxu0 %vm1778_vm3, %v3845_v10  ;;  %9469 = vmatmul.mubr.msk.f32.vlgmr.msra.gmra.mrb[14].mxu1 %vm1778_vm3, %v3845_v10  ;;  %v4043_v10 = vld [vmem:[#allocation12 + $0x1998] sm:$0xff]  ;;  %v10716_v61 = vpack.c.bf16 %v4038_v7, %v4034_v5  ;;  %v4077_v55 = vld [vmem:[#allocation12 + $0x1aa8] sm:$0xff]  ;;  %v4074_v7 = vld [vmem:[#allocation12 + $0x1a90] sm:$0xff] }
 0x79d   : > { %10569 = vmatpush1.bf16.msra.mxu0 %v10568_v60  ;;  %10697 = vmatpush1.bf16.msra.mxu1 %v10696_v11  ;;  %v4047_v60 = vld [vmem:[#allocation12 + $0x19b8] sm:$0xff]  ;;  %v10588_v11 = vpack.c.bf16 %v4036_v62, %v4032_v59  ;;  %v10732_v59 = vpack.c.bf16 %v4070_v36, %v4066_v53  ;;  %v4072_v62 = vld [vmem:[#allocation12 + $0x1a80] sm:$0xff]  ;;  %v4106_v36 = vld [vmem:[#allocation12 + $0x1b90] sm:$0xff] }
 0x79e   : > { %10571 = vmatprep.subr.bf16.mxu0 %v10570_v47  ;;  %10699 = vmatprep.subr.bf16.mxu1 %v10698_v12  ;;  %v4044_v47 = vld [vmem:[#allocation12 + $0x19a0] sm:$0xff]  ;;  %v10590_v12 = vpack.c.bf16 %v4045_v9, %v4041_v8  ;;  %v10718_v13 = vpack.c.bf16 %v4047_v60, %v4043_v10  ;;  %v4078_v8 = vld [vmem:[#allocation12 + $0x1ab0] sm:$0xff]  ;;  %v4081_v9 = vld [vmem:[#allocation12 + $0x1ac8] sm:$0xff] }
 0x79f   : > { %v4085_v10 = vld [vmem:[#allocation12 + $0x1ae8] sm:$0xff]  ;;  %v4083_v60 = vld [vmem:[#allocation12 + $0x1ad8] sm:$0xff] }
 0x7a1   : > { %10573 = vmatpush1.bf16.msra.mxu0 %v10572_v2  ;;  %10701 = vmatpush1.bf16.msra.mxu1 %v10700_v41  ;;  %v4055_v2 = vld [vmem:[#allocation12 + $0x19f8] sm:$0xff]  ;;  %v10592_v41 = vpack.c.bf16 %v4044_v47, %v4040_v6  ;;  %v10736_v6 = vpack.c.bf16 %v4078_v8, %v4074_v7  ;;  %v4080_v47 = vld [vmem:[#allocation12 + $0x1ac0] sm:$0xff]  ;;  %v4114_v8 = vld [vmem:[#allocation12 + $0x1bd0] sm:$0xff] }
 0x7a2   : > { %10575 = vmatprep.subr.bf16.mxu0 %v10574_v18  ;;  %10703 = vmatprep.subr.bf16.mxu1 %v10702_v19  ;;  %v4052_v18 = vld [vmem:[#allocation12 + $0x19e0] sm:$0xff]  ;;  %v10594_v19 = vpack.c.bf16 %v4053_v63, %v4049_v38  ;;  %v10722_v20 = vpack.c.bf16 %v4055_v2, %v4051_v15  ;;  %v4086_v38 = vld [vmem:[#allocation12 + $0x1af0] sm:$0xff]  ;;  %v4089_v63 = vld [vmem:[#allocation12 + $0x1b08] sm:$0xff] }
 0x7a3   : > { %v4093_v15 = vld [vmem:[#allocation12 + $0x1b28] sm:$0xff]  ;;  %v4091_v2 = vld [vmem:[#allocation12 + $0x1b18] sm:$0xff]  ;;  %v4116_v7 = vld [vmem:[#allocation12 + $0x1be0] sm:$0xff] }
 0x7a5   : > { %10577 = vmatpush1.bf16.msra.mxu0 %v10576_v26  ;;  %10705 = vmatpush1.bf16.msra.mxu1 %v10704_v27  ;;  %v4063_v26 = vld [vmem:[#allocation12 + $0x1a38] sm:$0xff]  ;;  %v10596_v27 = vpack.c.bf16 %v4052_v18, %v4048_v17  ;;  %v10740_v17 = vpack.c.bf16 %v4086_v38, %v4082_v0  ;;  %v4088_v18 = vld [vmem:[#allocation12 + $0x1b00] sm:$0xff]  ;;  %v4122_v38 = vld [vmem:[#allocation12 + $0x1c10] sm:$0xff] }
 0x7a6   : > { %10579 = vmatprep.subr.bf16.mxu0 %v10578_v4  ;;  %10707 = vmatprep.subr.bf16.mxu1 %v10706_v30  ;;  %v4060_v4 = vld [vmem:[#allocation12 + $0x1a20] sm:$0xff]  ;;  %v10598_v30 = vpack.c.bf16 %v4061_v24, %v4057_v23  ;;  %v10726_v31 = vpack.c.bf16 %v4063_v26, %v4059_v25  ;;  %v4094_v23 = vld [vmem:[#allocation12 + $0x1b30] sm:$0xff]  ;;  %v4097_v24 = vld [vmem:[#allocation12 + $0x1b48] sm:$0xff] }
 0x7a7   : > { %v4101_v25 = vld [vmem:[#allocation12 + $0x1b68] sm:$0xff]  ;;  %v4099_v26 = vld [vmem:[#allocation12 + $0x1b58] sm:$0xff]  ;;  %v4124_v0 = vld [vmem:[#allocation12 + $0x1c20] sm:$0xff] }
 0x7a9   : > { %10581 = vmatpush1.bf16.msra.mxu0 %v10580_v44  ;;  %10709 = vmatpush1.bf16.msra.mxu1 %v10708_v45  ;;  %v4071_v44 = vld [vmem:[#allocation12 + $0x1a78] sm:$0xff]  ;;  %v10600_v45 = vpack.c.bf16 %v4060_v4, %v4056_v29  ;;  %v10744_v29 = vpack.c.bf16 %v4094_v23, %v4090_v22  ;;  %v4096_v4 = vld [vmem:[#allocation12 + $0x1b40] sm:$0xff] }
 0x7aa   : > { %10583 = vmatprep.subr.bf16.mxu0 %v10582_v49  ;;  %10711 = vmatprep.subr.bf16.mxu1 %v10710_v50  ;;  %v4068_v49 = vld [vmem:[#allocation12 + $0x1a60] sm:$0xff]  ;;  %v10602_v50 = vpack.c.bf16 %v4069_v35, %v4065_v34  ;;  %v10730_v52 = vpack.c.bf16 %v4071_v44, %v4067_v37  ;;  %v4102_v34 = vld [vmem:[#allocation12 + $0x1b70] sm:$0xff]  ;;  %v4105_v35 = vld [vmem:[#allocation12 + $0x1b88] sm:$0xff] }
 0x7ab   : > { %v4109_v37 = vld [vmem:[#allocation12 + $0x1ba8] sm:$0xff]  ;;  %v4107_v44 = vld [vmem:[#allocation12 + $0x1b98] sm:$0xff] }
 0x7ad   : > { %10585 = vmatpush1.bf16.msra.mxu0 %v10584_v57  ;;  %10713 = vmatpush1.bf16.msra.mxu1 %v10712_v58  ;;  %v4079_v57 = vld [vmem:[#allocation12 + $0x1ab8] sm:$0xff]  ;;  %v10604_v58 = vpack.c.bf16 %v4068_v49, %v4064_v48  ;;  %v10748_v48 = vpack.c.bf16 %v4102_v34, %v4098_v33  ;;  %v4104_v49 = vld [vmem:[#allocation12 + $0x1b80] sm:$0xff] }
 0x7ae   : > { %10587 = vmatprep.subr.bf16.mxu0 %v10586_v51  ;;  %10715 = vmatprep.subr.bf16.mxu1 %v10714_v3  ;;  %v4076_v51 = vld [vmem:[#allocation12 + $0x1aa0] sm:$0xff]  ;;  %v10606_v3 = vpack.c.bf16 %v4077_v55, %v4073_v54  ;;  %v10734_v5 = vpack.c.bf16 %v4079_v57, %v4075_v56  ;;  %v4110_v54 = vld [vmem:[#allocation12 + $0x1bb0] sm:$0xff]  ;;  %v4113_v55 = vld [vmem:[#allocation12 + $0x1bc8] sm:$0xff] }
 0x7af   : > { %v4117_v56 = vld [vmem:[#allocation12 + $0x1be8] sm:$0xff]  ;;  %v4115_v57 = vld [vmem:[#allocation12 + $0x1bd8] sm:$0xff]  ;;  %v4136_v34 = vld [vmem:[#allocation12 + $0x1c80] sm:$0xff] }
 0x7b1   : > { %10589 = vmatpush1.bf16.msra.mxu0 %v10588_v11  ;;  %10717 = vmatpush1.bf16.msra.mxu1 %v10716_v61  ;;  %v4087_v11 = vld [vmem:[#allocation12 + $0x1af8] sm:$0xff]  ;;  %v10608_v61 = vpack.c.bf16 %v4076_v51, %v4072_v62  ;;  %v10752_v62 = vpack.c.bf16 %v4110_v54, %v4106_v36  ;;  %v4112_v51 = vld [vmem:[#allocation12 + $0x1bc0] sm:$0xff] }
 0x7b2   : > { %10591 = vmatprep.subr.bf16.mxu0 %v10590_v12  ;;  %10719 = vmatprep.subr.bf16.mxu1 %v10718_v13  ;;  %v4084_v12 = vld [vmem:[#allocation12 + $0x1ae0] sm:$0xff]  ;;  %v10610_v13 = vpack.c.bf16 %v4085_v10, %v4081_v9  ;;  %v10738_v14 = vpack.c.bf16 %v4087_v11, %v4083_v60  ;;  %v4118_v9 = vld [vmem:[#allocation12 + $0x1bf0] sm:$0xff]  ;;  %v10628_v10 = vpack.c.bf16 %v4116_v7, %v4112_v51  ;;  %v4121_v11 = vld [vmem:[#allocation12 + $0x1c08] sm:$0xff] }
 0x7b3   : > { %v10756_v60 = vpack.c.bf16 %v4118_v9, %v4114_v8  ;;  %v4144_v54 = vld [vmem:[#allocation12 + $0x1cc0] sm:$0xff]  ;;  %v4157_v51 = vld [vmem:[#allocation12 + $0x1d28] sm:$0xff] }
 0x7b4   : > { %v4152_v9 = vld [vmem:[#allocation12 + $0x1d00] sm:$0xff] }
 0x7b5   : > { %10593 = vmatpush1.bf16.msra.mxu0 %v10592_v41  ;;  %10721 = vmatpush1.bf16.msra.mxu1 %v10720_v16  ;;  %v4095_v41 = vld [vmem:[#allocation12 + $0x1b38] sm:$0xff]  ;;  %v10612_v16 = vpack.c.bf16 %v4084_v12, %v4080_v47 }
 0x7b6   : > { %10595 = vmatprep.subr.bf16.mxu0 %v10594_v19  ;;  %10723 = vmatprep.subr.bf16.mxu1 %v10722_v20  ;;  %v4092_v19 = vld [vmem:[#allocation12 + $0x1b20] sm:$0xff]  ;;  %v10614_v20 = vpack.c.bf16 %v4093_v15, %v4089_v63  ;;  %v10742_v21 = vpack.c.bf16 %v4095_v41, %v4091_v2  ;;  %v4127_v12 = vld [vmem:[#allocation12 + $0x1c38] sm:$0xff]  ;;  %v4126_v63 = vld [vmem:[#allocation12 + $0x1c30] sm:$0xff] }
 0x7b7   : > { %v4129_v15 = vld [vmem:[#allocation12 + $0x1c48] sm:$0xff]  ;;  %v4131_v41 = vld [vmem:[#allocation12 + $0x1c58] sm:$0xff] }
 0x7b8   : > { %v4133_v2 = vld [vmem:[#allocation12 + $0x1c68] sm:$0xff] }
 0x7b9   : > { %10597 = vmatpush1.bf16.msra.mxu0 %v10596_v27  ;;  %10725 = vmatpush1.bf16.msra.mxu1 %v10724_v28  ;;  %v4103_v27 = vld [vmem:[#allocation12 + $0x1b78] sm:$0xff]  ;;  %v10616_v28 = vpack.c.bf16 %v4092_v19, %v4088_v18  ;;  %v10760_v19 = vpack.c.bf16 %v4126_v63, %v4122_v38  ;;  %v4160_v63 = vld [vmem:[#allocation12 + $0x1d40] sm:$0xff] }
 0x7ba   : > { %10599 = vmatprep.subr.bf16.mxu0 %v10598_v30  ;;  %10727 = vmatprep.subr.bf16.mxu1 %v10726_v31  ;;  %v4100_v30 = vld [vmem:[#allocation12 + $0x1b60] sm:$0xff]  ;;  %v10618_v31 = vpack.c.bf16 %v4101_v25, %v4097_v24  ;;  %v10746_v32 = vpack.c.bf16 %v4103_v27, %v4099_v26  ;;  %v10634_v24 = vpack.c.bf16 %v4133_v2, %v4129_v15  ;;  %v4130_v26 = vld [vmem:[#allocation12 + $0x1c50] sm:$0xff] }
 0x7bb   : > { %v4134_v27 = vld [vmem:[#allocation12 + $0x1c70] sm:$0xff]  ;;  %v4164_v15 = vld [vmem:[#allocation12 + $0x1d60] sm:$0xff] }
 0x7bc   : > { %v10764_v33 = vpack.c.bf16 %v4134_v27, %v4130_v26  ;;  %v4172_v26 = vld [vmem:[#allocation12 + $0x1da0] sm:$0xff] }
 0x7bd   : > { %10601 = vmatpush1.bf16.msra.mxu0 %v10600_v45  ;;  %10729 = vmatpush1.bf16.msra.mxu1 %v10728_v46  ;;  %v4111_v45 = vld [vmem:[#allocation12 + $0x1bb8] sm:$0xff]  ;;  %v10620_v46 = vpack.c.bf16 %v4100_v30, %v4096_v4  ;;  %v4141_v4 = vld [vmem:[#allocation12 + $0x1ca8] sm:$0xff] }
 0x7be   : > { %10603 = vmatprep.subr.bf16.mxu0 %v10602_v50  ;;  %10731 = vmatprep.subr.bf16.mxu1 %v10730_v52  ;;  %v4108_v50 = vld [vmem:[#allocation12 + $0x1ba0] sm:$0xff]  ;;  %v10622_v52 = vpack.c.bf16 %v4109_v37, %v4105_v35  ;;  %v10750_v53 = vpack.c.bf16 %v4111_v45, %v4107_v44  ;;  %v4139_v30 = vld [vmem:[#allocation12 + $0x1c98] sm:$0xff]  ;;  %v4138_v45 = vld [vmem:[#allocation12 + $0x1c90] sm:$0xff] }
 0x7bf   : > { %v4140_v35 = vld [vmem:[#allocation12 + $0x1ca0] sm:$0xff] }
 0x7c1   : > { %10605 = vmatpush1.bf16.msra.mxu0 %v10604_v58  ;;  %10733 = vmatpush1.bf16.msra.mxu1 %v10732_v59  ;;  %v4119_v58 = vld [vmem:[#allocation12 + $0x1bf8] sm:$0xff]  ;;  %v10624_v59 = vpack.c.bf16 %v4108_v50, %v4104_v49  ;;  %v4149_v49 = vld [vmem:[#allocation12 + $0x1ce8] sm:$0xff] }
 0x7c2   : > { %10607 = vmatprep.subr.bf16.mxu0 %v10606_v3  ;;  %10735 = vmatprep.subr.bf16.mxu1 %v10734_v5  ;;  %v10626_v3 = vpack.c.bf16 %v4117_v56, %v4113_v55  ;;  %v10754_v5 = vpack.c.bf16 %v4119_v58, %v4115_v57  ;;  %v4147_v50 = vld [vmem:[#allocation12 + $0x1cd8] sm:$0xff]  ;;  %v4148_v55 = vld [vmem:[#allocation12 + $0x1ce0] sm:$0xff]  ;;  %v4146_v58 = vld [vmem:[#allocation12 + $0x1cd0] sm:$0xff] }
 0x7c3   : > { %v10644_v7 = vpack.c.bf16 %v4148_v55, %v4144_v54 }
 0x7c5   : > { %10609 = vmatpush1.bf16.msra.mxu0 %v10608_v61  ;;  %10737 = vmatpush1.bf16.msra.mxu1 %v10736_v6  ;;  %v4125_v61 = vld [vmem:[#allocation12 + $0x1c28] sm:$0xff]  ;;  %v4123_v6 = vld [vmem:[#allocation12 + $0x1c18] sm:$0xff] }
 0x7c6   : > { %10611 = vmatprep.subr.bf16.mxu0 %v10610_v13  ;;  %10739 = vmatprep.subr.bf16.mxu1 %v10738_v14  ;;  %v10630_v47 = vpack.c.bf16 %v4125_v61, %v4121_v11  ;;  %v10758_v13 = vpack.c.bf16 %v4127_v12, %v4123_v6  ;;  %v4120_v14 = vld [vmem:[#allocation12 + $0x1c00] sm:$0xff]  ;;  %v4154_v61 = vld [vmem:[#allocation12 + $0x1d10] sm:$0xff]  ;;  %v4165_v12 = vld [vmem:[#allocation12 + $0x1d68] sm:$0xff] }
 0x7c7   : > { %v10632_v18 = vpack.c.bf16 %v4124_v0, %v4120_v14  ;;  %v4158_v6 = vld [vmem:[#allocation12 + $0x1d30] sm:$0xff]  ;;  %v4167_v14 = vld [vmem:[#allocation12 + $0x1d78] sm:$0xff] }
 0x7c8   : > { %v10776_v38 = vpack.c.bf16 %v4158_v6, %v4154_v61 }
 0x7c9   : > { %10613 = vmatpush1.bf16.msra.mxu0 %v10612_v16  ;;  %10741 = vmatpush1.bf16.msra.mxu1 %v10740_v17  ;;  %v4135_v16 = vld [vmem:[#allocation12 + $0x1c78] sm:$0xff] }
 0x7ca   : > { %10615 = vmatprep.subr.bf16.mxu0 %v10614_v20  ;;  %10743 = vmatprep.subr.bf16.mxu1 %v10742_v21  ;;  %v4128_v20 = vld [vmem:[#allocation12 + $0x1c40] sm:$0xff]  ;;  %v10762_v25 = vpack.c.bf16 %v4135_v16, %v4131_v41  ;;  %v4162_v16 = vld [vmem:[#allocation12 + $0x1d50] sm:$0xff] }
 0x7cb   : > { %v4132_v21 = vld [vmem:[#allocation12 + $0x1c60] sm:$0xff] }
 0x7cd   : > { %10617 = vmatpush1.bf16.msra.mxu0 %v10616_v28  ;;  %10745 = vmatpush1.bf16.msra.mxu1 %v10744_v29  ;;  %v4137_v28 = vld [vmem:[#allocation12 + $0x1c88] sm:$0xff] }
 0x7ce   : > { %10619 = vmatprep.subr.bf16.mxu0 %v10618_v31  ;;  %10747 = vmatprep.subr.bf16.mxu1 %v10746_v32  ;;  %v4143_v31 = vld [vmem:[#allocation12 + $0x1cb8] sm:$0xff]  ;;  %v10636_v32 = vpack.c.bf16 %v4132_v21, %v4128_v20  ;;  %v10638_v37 = vpack.c.bf16 %v4141_v4, %v4137_v28  ;;  %v4174_v4 = vld [vmem:[#allocation12 + $0x1db0] sm:$0xff] }
 0x7cf   : > { %v10766_v44 = vpack.c.bf16 %v4143_v31, %v4139_v30  ;;  %v4171_v20 = vld [vmem:[#allocation12 + $0x1d98] sm:$0xff]  ;;  %v4177_v30 = vld [vmem:[#allocation12 + $0x1dc8] sm:$0xff] }
 0x7d0   : > { %v4175_v21 = vld [vmem:[#allocation12 + $0x1db8] sm:$0xff]  ;;  %v4181_v31 = vld [vmem:[#allocation12 + $0x1de8] sm:$0xff] }
 0x7d1   : > { %10621 = vmatpush1.bf16.msra.mxu0 %v10620_v46  ;;  %10749 = vmatpush1.bf16.msra.mxu1 %v10748_v48  ;;  %v4142_v46 = vld [vmem:[#allocation12 + $0x1cb0] sm:$0xff]  ;;  %v4145_v48 = vld [vmem:[#allocation12 + $0x1cc8] sm:$0xff]  ;;  %v10782_v28 = vpack.c.bf16 %v4175_v21, %v4171_v20 }
 0x7d2   : > { %10623 = vmatprep.subr.bf16.mxu0 %v10622_v52  ;;  %10751 = vmatprep.subr.bf16.mxu1 %v10750_v53  ;;  %v4151_v52 = vld [vmem:[#allocation12 + $0x1cf8] sm:$0xff]  ;;  %v10640_v53 = vpack.c.bf16 %v4140_v35, %v4136_v34  ;;  %v10768_v36 = vpack.c.bf16 %v4142_v46, %v4138_v45  ;;  %v10642_v56 = vpack.c.bf16 %v4149_v49, %v4145_v48  ;;  %v4178_v48 = vld [vmem:[#allocation12 + $0x1dd0] sm:$0xff]  ;;  %v4209_v20 = vld [vmem:[#allocation12 + $0x1ec8] sm:$0xff] }
 0x7d3   : > { %v10770_v57 = vpack.c.bf16 %v4151_v52, %v4147_v50  ;;  %v10658_v45 = vpack.c.bf16 %v4181_v31, %v4177_v30  ;;  %v4182_v49 = vld [vmem:[#allocation12 + $0x1df0] sm:$0xff]  ;;  %v4185_v50 = vld [vmem:[#allocation12 + $0x1e08] sm:$0xff] }
 0x7d4   : > { %v4189_v52 = vld [vmem:[#allocation12 + $0x1e28] sm:$0xff]  ;;  %v10788_v55 = vpack.c.bf16 %v4182_v49, %v4178_v48  ;;  %v4210_v30 = vld [vmem:[#allocation12 + $0x1ed0] sm:$0xff] }
 0x7d5   : > { %10625 = vmatpush1.bf16.msra.mxu0 %v10624_v59  ;;  %10753 = vmatpush1.bf16.msra.mxu1 %v10752_v62  ;;  %v4150_v59 = vld [vmem:[#allocation12 + $0x1cf0] sm:$0xff]  ;;  %v4153_v62 = vld [vmem:[#allocation12 + $0x1d08] sm:$0xff] }
 0x7d6   : > { %10627 = vmatprep.subr.bf16.mxu0 %v10626_v3  ;;  %10755 = vmatprep.subr.bf16.mxu1 %v10754_v5  ;;  %v4155_v3 = vld [vmem:[#allocation12 + $0x1d18] sm:$0xff]  ;;  %v10772_v8 = vpack.c.bf16 %v4150_v59, %v4146_v58  ;;  %v10662_v58 = vpack.c.bf16 %v4189_v52, %v4185_v50  ;;  %v4213_v21 = vld [vmem:[#allocation12 + $0x1ee8] sm:$0xff]  ;;  %v4214_v31 = vld [vmem:[#allocation12 + $0x1ef0] sm:$0xff] }
 0x7d7   : > { %v4159_v5 = vld [vmem:[#allocation12 + $0x1d38] sm:$0xff]  ;;  %v4218_v50 = vld [vmem:[#allocation12 + $0x1f10] sm:$0xff] }
 0x7d8   : > { %v10774_v11 = vpack.c.bf16 %v4159_v5, %v4155_v3  ;;  %v4193_v3 = vld [vmem:[#allocation12 + $0x1e48] sm:$0xff]  ;;  %v4222_v52 = vld [vmem:[#allocation12 + $0x1f30] sm:$0xff] }
 0x7d9   : > { %10629 = vmatpush1.bf16.msra.mxu0 %v10628_v10  ;;  %10757 = vmatpush1.bf16.msra.mxu1 %v10756_v60  ;;  %v4156_v10 = vld [vmem:[#allocation12 + $0x1d20] sm:$0xff]  ;;  %v10646_v60 = vpack.c.bf16 %v4157_v51, %v4153_v62  ;;  %v4186_v62 = vld [vmem:[#allocation12 + $0x1e10] sm:$0xff]  ;;  %v4197_v5 = vld [vmem:[#allocation12 + $0x1e68] sm:$0xff] }
 0x7da   : > { %10631 = vmatprep.subr.bf16.mxu0 %v10630_v47  ;;  %10759 = vmatprep.subr.bf16.mxu1 %v10758_v13  ;;  %v4161_v47 = vld [vmem:[#allocation12 + $0x1d48] sm:$0xff]  ;;  %v4163_v13 = vld [vmem:[#allocation12 + $0x1d58] sm:$0xff]  ;;  %v10648_v0 = vpack.c.bf16 %v4156_v10, %v4152_v9  ;;  %v4190_v51 = vld [vmem:[#allocation12 + $0x1e30] sm:$0xff]  ;;  %v10666_v61 = vpack.c.bf16 %v4197_v5, %v4193_v3 }
 0x7db   : > { %v10650_v2 = vpack.c.bf16 %v4165_v12, %v4161_v47  ;;  %v10778_v41 = vpack.c.bf16 %v4167_v14, %v4163_v13  ;;  %v10792_v10 = vpack.c.bf16 %v4190_v51, %v4186_v62  ;;  %v4194_v47 = vld [vmem:[#allocation12 + $0x1e50] sm:$0xff]  ;;  %v4201_v13 = vld [vmem:[#allocation12 + $0x1e88] sm:$0xff] }
 0x7dc   : > { %v4198_v12 = vld [vmem:[#allocation12 + $0x1e70] sm:$0xff]  ;;  %v4205_v14 = vld [vmem:[#allocation12 + $0x1ea8] sm:$0xff] }
 0x7dd   : > { %v4226_v3 = vld [vmem:[#allocation12 + $0x1f50] sm:$0xff] }
 0x7de   : > { %v4230_v5 = vld [vmem:[#allocation12 + $0x1f70] sm:$0xff] }
 0x86f   : > { %v3915_v17 = vpop.f32.mrb[14].mxu0  ;;  %v13756_v22 = vpop.f32.mrb[14].mxu1 }
 0x870   : > { %v3917_v23 = vpop.f32.mrb[15].mxu0  ;;  %v3988_v29 = vpop.f32.mrb[15].mxu1 }
 0x871   : > { %4312 = vmatprep.mubr.f32.mxu0 %v3917_v23  ;;  %4454 = vmatprep.mubr.f32.mxu1 %v3917_v23  ;;  %v10652_v23 = vpack.c.bf16 %v4164_v15, %v4160_v63  ;;  %v10796_v15 = vpack.c.bf16 %v4198_v12, %v4194_v47 }
 0x872   : > { %4313 = vmatmul.mubr.f32.vlgmr.msra.gmra.mrb[10].mxu0 %v3915_v17  ;;  %4455 = vmatmul.mubr.f32.vlgmr.msra.gmra.mrb[10].mxu1 %v3915_v17  ;;  %v4166_v17 = vld [vmem:[#allocation12 + $0x1d70] sm:$0xff] }
 0x873   : > { %10633 = vmatpush1.bf16.msra.mxu0 %v10632_v18  ;;  %10761 = vmatpush1.bf16.msra.mxu1 %v10760_v19  ;;  %v4169_v18 = vld [vmem:[#allocation12 + $0x1d88] sm:$0xff] }
 0x874   : > { %10635 = vmatprep.subr.bf16.mxu0 %v10634_v24  ;;  %10763 = vmatprep.subr.bf16.mxu1 %v10762_v25  ;;  %v4173_v19 = vld [vmem:[#allocation12 + $0x1da8] sm:$0xff]  ;;  %v10780_v24 = vpack.c.bf16 %v4166_v17, %v4162_v16  ;;  %v4168_v25 = vld [vmem:[#allocation12 + $0x1d80] sm:$0xff]  ;;  %v10670_v16 = vpack.c.bf16 %v4205_v14, %v4201_v13  ;;  %v4234_v13 = vld [vmem:[#allocation12 + $0x1f90] sm:$0xff] }
 0x875   : > { %4383 = vmatprep.mubr.f32.mxu0 %v3988_v29  ;;  %4525 = vmatprep.mubr.f32.mxu1 %v3988_v29  ;;  %v10654_v27 = vpack.c.bf16 %v4173_v19, %v4169_v18  ;;  %v4170_v29 = vld [vmem:[#allocation12 + $0x1d90] sm:$0xff]  ;;  %v10656_v34 = vpack.c.bf16 %v4172_v26, %v4168_v25 }
 0x876   : > { %v10784_v35 = vpack.c.bf16 %v4174_v4, %v4170_v29  ;;  %v4202_v18 = vld [vmem:[#allocation12 + $0x1e90] sm:$0xff]  ;;  %v10674_v29 = vpack.c.bf16 %v4213_v21, %v4209_v20 }
 0x877   : > { %10637 = vmatpush1.bf16.msra.mxu0 %v10636_v32  ;;  %10765 = vmatpush1.bf16.msra.mxu1 %v10764_v33  ;;  %v4179_v32 = vld [vmem:[#allocation12 + $0x1dd8] sm:$0xff]  ;;  %v4206_v19 = vld [vmem:[#allocation12 + $0x1eb0] sm:$0xff] }
 0x878   : > { %10639 = vmatprep.subr.bf16.mxu0 %v10638_v37  ;;  %10767 = vmatprep.subr.bf16.mxu1 %v10766_v44  ;;  %v4183_v33 = vld [vmem:[#allocation12 + $0x1df8] sm:$0xff]  ;;  %v4176_v37 = vld [vmem:[#allocation12 + $0x1dc0] sm:$0xff]  ;;  %v10800_v26 = vpack.c.bf16 %v4206_v19, %v4202_v18  ;;  %v4238_v14 = vld [vmem:[#allocation12 + $0x1fb0] sm:$0xff] }
 0x879   : > { %v4180_v44 = vld [vmem:[#allocation12 + $0x1de0] sm:$0xff]  ;;  %v10786_v46 = vpack.c.bf16 %v4183_v33, %v4179_v32  ;;  %v4217_v32 = vld [vmem:[#allocation12 + $0x1f08] sm:$0xff]  ;;  %v4242_v20 = vld [vmem:[#allocation12 + $0x1fd0] sm:$0xff] }
 0x87a   : > { %v10660_v54 = vpack.c.bf16 %v4180_v44, %v4176_v37  ;;  %v4221_v33 = vld [vmem:[#allocation12 + $0x1f28] sm:$0xff]  ;;  %v10804_v44 = vpack.c.bf16 %v4214_v31, %v4210_v30  ;;  %v4244_v19 = vld [vmem:[#allocation12 + $0x1fe0] sm:$0xff]  ;;  %v4246_v21 = vld [vmem:[#allocation12 + $0x1ff0] sm:$0xff] }
 0x87b   : > { %10641 = vmatpush1.bf16.msra.mxu0 %v10640_v53  ;;  %10769 = vmatpush1.bf16.msra.mxu1 %v10768_v36  ;;  %v4187_v53 = vld [vmem:[#allocation12 + $0x1e18] sm:$0xff]  ;;  %v10678_v48 = vpack.c.bf16 %v4221_v33, %v4217_v32 }
 0x87c   : > { %10643 = vmatprep.subr.bf16.mxu0 %v10642_v56  ;;  %10771 = vmatprep.subr.bf16.mxu1 %v10770_v57  ;;  %v4191_v36 = vld [vmem:[#allocation12 + $0x1e38] sm:$0xff]  ;;  %v4184_v56 = vld [vmem:[#allocation12 + $0x1e00] sm:$0xff] }
 0x87d   : > { %v4188_v57 = vld [vmem:[#allocation12 + $0x1e20] sm:$0xff]  ;;  %v10790_v59 = vpack.c.bf16 %v4191_v36, %v4187_v53  ;;  %v4225_v53 = vld [vmem:[#allocation12 + $0x1f48] sm:$0xff] }
 0x87e   : > { %v10664_v9 = vpack.c.bf16 %v4188_v57, %v4184_v56  ;;  %v4229_v36 = vld [vmem:[#allocation12 + $0x1f68] sm:$0xff]  ;;  %v10808_v57 = vpack.c.bf16 %v4222_v52, %v4218_v50  ;;  %v4570_v50 = vld [vmem:[#allocation15] sm:$0x3] }
 0x87f   : > { %10645 = vmatpush1.bf16.msra.mxu0 %v10644_v7  ;;  %10773 = vmatpush1.bf16.msra.mxu1 %v10772_v8  ;;  %v4195_v7 = vld [vmem:[#allocation12 + $0x1e58] sm:$0xff]  ;;  %v10682_v62 = vpack.c.bf16 %v4229_v36, %v4225_v53 }
 0x880   : > { %10647 = vmatprep.subr.bf16.mxu0 %v10646_v60  ;;  %10775 = vmatprep.subr.bf16.mxu1 %v10774_v11  ;;  %v4199_v8 = vld [vmem:[#allocation12 + $0x1e78] sm:$0xff]  ;;  %v4192_v60 = vld [vmem:[#allocation12 + $0x1e40] sm:$0xff] }
 0x881   : > { %v4196_v11 = vld [vmem:[#allocation12 + $0x1e60] sm:$0xff]  ;;  %v10794_v6 = vpack.c.bf16 %v4199_v8, %v4195_v7  ;;  %v4233_v7 = vld [vmem:[#allocation12 + $0x1f88] sm:$0xff]  ;;  %v5135_v36 = vld [vmem:[#allocation16 + $0x808] sm:$0xff] }
 0x882   : > { %v10668_v63 = vpack.c.bf16 %v4196_v11, %v4192_v60  ;;  %v4237_v8 = vld [vmem:[#allocation12 + $0x1fa8] sm:$0xff]  ;;  %v10812_v11 = vpack.c.bf16 %v4230_v5, %v4226_v3  ;;  %v5147_v5 = vld [vmem:[#allocation16 + $0x868] sm:$0xff] }
 0x883   : > { %10649 = vmatpush1.bf16.msra.mxu0 %v10648_v0  ;;  %10777 = vmatpush1.bf16.msra.mxu1 %v10776_v38  ;;  %v4203_v0 = vld [vmem:[#allocation12 + $0x1e98] sm:$0xff]  ;;  %v10686_v47 = vpack.c.bf16 %v4237_v8, %v4233_v7  ;;  %v5145_v7 = vld [vmem:[#allocation16 + $0x858] sm:$0xff] }
 0x884   : > { %10651 = vmatprep.subr.bf16.mxu0 %v10650_v2  ;;  %10779 = vmatprep.subr.bf16.mxu1 %v10778_v41  ;;  %v4207_v38 = vld [vmem:[#allocation12 + $0x1eb8] sm:$0xff]  ;;  %v4200_v2 = vld [vmem:[#allocation12 + $0x1e80] sm:$0xff] }
 0x885   : > { %v4204_v41 = vld [vmem:[#allocation12 + $0x1ea0] sm:$0xff]  ;;  %v10798_v17 = vpack.c.bf16 %v4207_v38, %v4203_v0  ;;  %v4241_v0 = vld [vmem:[#allocation12 + $0x1fc8] sm:$0xff] }
 0x886   : > { %v10672_v25 = vpack.c.bf16 %v4204_v41, %v4200_v2  ;;  %v4245_v38 = vld [vmem:[#allocation12 + $0x1fe8] sm:$0xff]  ;;  %v10816_v41 = vpack.c.bf16 %v4238_v14, %v4234_v13  ;;  %v5144_v13 = vld [vmem:[#allocation16 + $0x850] sm:$0xff] }
 0x887   : > { %10653 = vmatpush1.bf16.msra.mxu0 %v10652_v23  ;;  %10781 = vmatpush1.bf16.msra.mxu1 %v10780_v24  ;;  %v4211_v23 = vld [vmem:[#allocation12 + $0x1ed8] sm:$0xff]  ;;  %v5149_v8 = vld [vmem:[#allocation16 + $0x878] sm:$0xff] }
 0x888   : > { %10655 = vmatprep.subr.bf16.mxu0 %v10654_v27  ;;  %10783 = vmatprep.subr.bf16.mxu1 %v10782_v28  ;;  %v4215_v24 = vld [vmem:[#allocation12 + $0x1ef8] sm:$0xff]  ;;  %v4208_v27 = vld [vmem:[#allocation12 + $0x1ec0] sm:$0xff] }
 0x889   : > { %v4212_v28 = vld [vmem:[#allocation12 + $0x1ee0] sm:$0xff]  ;;  %v10802_v4 = vpack.c.bf16 %v4215_v24, %v4211_v23  ;;  %v10820_v24 = vpack.c.bf16 %v4246_v21, %v4242_v20 }
 0x88a   : > { %v10676_v37 = vpack.c.bf16 %v4212_v28, %v4208_v27  ;;  %v5148_v14 = vld [vmem:[#allocation16 + $0x870] sm:$0xff] }
 0x88b   : > { %10657 = vmatpush1.bf16.msra.mxu0 %v10656_v34  ;;  %10785 = vmatpush1.bf16.msra.mxu1 %v10784_v35  ;;  %v4219_v34 = vld [vmem:[#allocation12 + $0x1f18] sm:$0xff] }
 0x88c   : > { %10659 = vmatprep.subr.bf16.mxu0 %v10658_v45  ;;  %10787 = vmatprep.subr.bf16.mxu1 %v10786_v46  ;;  %v4223_v35 = vld [vmem:[#allocation12 + $0x1f38] sm:$0xff]  ;;  %v4216_v45 = vld [vmem:[#allocation12 + $0x1f00] sm:$0xff] }
 0x88d   : > { %v4220_v46 = vld [vmem:[#allocation12 + $0x1f20] sm:$0xff]  ;;  %v10806_v49 = vpack.c.bf16 %v4223_v35, %v4219_v34 }
 0x88e   : > { %v10680_v56 = vpack.c.bf16 %v4220_v46, %v4216_v45  ;;  %v5152_v20 = vld [vmem:[#allocation16 + $0x890] sm:$0xff] }
 0x88f   : > { %10661 = vmatpush1.bf16.msra.mxu0 %v10660_v54  ;;  %10789 = vmatpush1.bf16.msra.mxu1 %v10788_v55  ;;  %v4227_v54 = vld [vmem:[#allocation12 + $0x1f58] sm:$0xff] }
 0x890   : > { %10663 = vmatprep.subr.bf16.mxu0 %v10662_v58  ;;  %10791 = vmatprep.subr.bf16.mxu1 %v10790_v59  ;;  %v4231_v55 = vld [vmem:[#allocation12 + $0x1f78] sm:$0xff]  ;;  %v4224_v58 = vld [vmem:[#allocation12 + $0x1f40] sm:$0xff] }
 0x891   : > { %v4228_v59 = vld [vmem:[#allocation12 + $0x1f60] sm:$0xff]  ;;  %v10810_v51 = vpack.c.bf16 %v4231_v55, %v4227_v54  ;;  %v5139_v54 = vld [vmem:[#allocation16 + $0x828] sm:$0xff] }
 0x892   : > { %v10684_v60 = vpack.c.bf16 %v4228_v59, %v4224_v58  ;;  %v5137_v55 = vld [vmem:[#allocation16 + $0x818] sm:$0xff]  ;;  %v5138_v58 = vld [vmem:[#allocation16 + $0x820] sm:$0xff]  ;;  %v5136_v59 = vld [vmem:[#allocation16 + $0x810] sm:$0xff]  ;;  %v10822_v3 = vpack.c.bf16 %v5139_v54, %v5135_v36 }
 0x893   : > { %10665 = vmatpush1.bf16.msra.mxu0 %v10664_v9  ;;  %10793 = vmatpush1.bf16.msra.mxu1 %v10792_v10  ;;  %v4235_v9 = vld [vmem:[#allocation12 + $0x1f98] sm:$0xff] }
 0x894   : > { %10667 = vmatprep.subr.bf16.mxu0 %v10666_v61  ;;  %10795 = vmatprep.subr.bf16.mxu1 %v10794_v6  ;;  %v4239_v10 = vld [vmem:[#allocation12 + $0x1fb8] sm:$0xff]  ;;  %v4232_v61 = vld [vmem:[#allocation12 + $0x1f80] sm:$0xff] }
 0x895   : > { %v4236_v6 = vld [vmem:[#allocation12 + $0x1fa0] sm:$0xff]  ;;  %v10814_v12 = vpack.c.bf16 %v4239_v10, %v4235_v9 }
 0x896   : > { %v10688_v2 = vpack.c.bf16 %v4236_v6, %v4232_v61  ;;  %v4987_v9 = vld [vmem:[#allocation15 + $0x2] sm:$0x3]  ;;  %v5142_v61 = vld [vmem:[#allocation16 + $0x840] sm:$0xff]  ;;  %v5156_v21 = vld [vmem:[#allocation16 + $0x8b0] sm:$0xff] }
 0x897   : > { %10669 = vmatpush1.bf16.msra.mxu0 %v10668_v63  ;;  %10797 = vmatpush1.bf16.msra.mxu1 %v10796_v15  ;;  %v4243_v63 = vld [vmem:[#allocation12 + $0x1fd8] sm:$0xff]  ;;  %v5146_v6 = vld [vmem:[#allocation16 + $0x860] sm:$0xff] }
 0x898   : > { %10671 = vmatprep.subr.bf16.mxu0 %v10670_v16  ;;  %10799 = vmatprep.subr.bf16.mxu1 %v10798_v17  ;;  %v4247_v15 = vld [vmem:[#allocation12 + $0x1ff8] sm:$0xff]  ;;  %v4240_v16 = vld [vmem:[#allocation12 + $0x1fc0] sm:$0xff]  ;;  %v10690_v17 = vpack.c.bf16 %v4245_v38, %v4241_v0 }
 0x899   : > { %v10818_v18 = vpack.c.bf16 %v4247_v15, %v4243_v63  ;;  %v10692_v23 = vpack.c.bf16 %v4244_v19, %v4240_v16  ;;  %v5151_v0 = vld [vmem:[#allocation16 + $0x888] sm:$0xff]  ;;  %v5153_v63 = vld [vmem:[#allocation16 + $0x898] sm:$0xff]  ;;  %v5150_v16 = vld [vmem:[#allocation16 + $0x880] sm:$0xff] }
 0x89a   : > { %v5155_v38 = vld [vmem:[#allocation16 + $0x8a8] sm:$0xff]  ;;  %v5157_v15 = vld [vmem:[#allocation16 + $0x8b8] sm:$0xff] }
 0x89b   : > { %10673 = vmatpush1.bf16.msra.mxu0 %v10672_v25  ;;  %10801 = vmatpush1.bf16.msra.mxu1 %v10800_v26  ;;  %v4536_v25 = vld [vmem:[#allocation13] sm:$0xf]  ;;  %v10958_v19 = vpack.c.bf16 %v5157_v15, %v5153_v63 }
 0x89c   : > { %10675 = vmatprep.subr.bf16.mxu0 %v10674_v29  ;;  %10803 = vmatprep.subr.bf16.mxu1 %v10802_v4  ;;  %v4541_v26 = vrot.slane %v4536_v25, %v13682_v39  ;;  %v4549_v27 = vrot.slane %v4536_v25, %v13684_v40  ;;  %v4545_v28 = vrot.slane %v4536_v25, %v13686_v42  ;;  %v5184_v15 = vld [vmem:[#allocation16 + $0x990] sm:$0xff] }
 0x89d   : > { %v4553_v29 = vrot.slane %v4536_v25, %v13688_v43  ;;  %v5161_v25 = vld [vmem:[#allocation16 + $0x8d8] sm:$0xff] }
 0x89f   : > { %10677 = vmatpush1.bf16.msra.mxu0 %v10676_v37  ;;  %10805 = vmatpush1.bf16.msra.mxu1 %v10804_v44 }
 0x8a0   : > { %10679 = vmatprep.subr.bf16.mxu0 %v10678_v48  ;;  %10807 = vmatprep.subr.bf16.mxu1 %v10806_v49 }
 0x8a3   : > { %10681 = vmatpush1.bf16.msra.mxu0 %v10680_v56  ;;  %10809 = vmatpush1.bf16.msra.mxu1 %v10808_v57  ;;  %v5141_v56 = vld [vmem:[#allocation16 + $0x838] sm:$0xff]  ;;  %v5134_v57 = vld [vmem:[#allocation16 + $0x800] sm:$0xff] }
 0x8a4   : > { %10683 = vmatprep.subr.bf16.mxu0 %v10682_v62  ;;  %10811 = vmatprep.subr.bf16.mxu1 %v10810_v51  ;;  %v5140_v62 = vld [vmem:[#allocation16 + $0x830] sm:$0xff]  ;;  %v5143_v51 = vld [vmem:[#allocation16 + $0x848] sm:$0xff]  ;;  %v10950_v10 = vpack.c.bf16 %v5141_v56, %v5137_v55 }
 0x8a5   : > { %v5168_v55 = vld [vmem:[#allocation16 + $0x910] sm:$0xff] }
 0x8a6   : > { %v5172_v56 = vld [vmem:[#allocation16 + $0x930] sm:$0xff] }
 0x8a7   : > { %10685 = vmatpush1.bf16.msra.mxu0 %v10684_v60  ;;  %10813 = vmatpush1.bf16.msra.mxu1 %v10812_v11  ;;  %v10824_v60 = vpack.c.bf16 %v5138_v58, %v5134_v57  ;;  %v10952_v11 = vpack.c.bf16 %v5140_v62, %v5136_v59  ;;  %v5175_v57 = vld [vmem:[#allocation16 + $0x948] sm:$0xff]  ;;  %v5177_v59 = vld [vmem:[#allocation16 + $0x958] sm:$0xff] }
 0x8a8   : > { %10687 = vmatprep.subr.bf16.mxu0 %v10686_v47  ;;  %10815 = vmatprep.subr.bf16.mxu1 %v10814_v12  ;;  %v10826_v47 = vpack.c.bf16 %v5147_v5, %v5143_v51  ;;  %v10954_v12 = vpack.c.bf16 %v5149_v8, %v5145_v7  ;;  %v5179_v58 = vld [vmem:[#allocation16 + $0x968] sm:$0xff]  ;;  %v5181_v62 = vld [vmem:[#allocation16 + $0x978] sm:$0xff]  ;;  %v5174_v5 = vld [vmem:[#allocation16 + $0x940] sm:$0xff] }
 0x8a9   : > { %v5178_v7 = vld [vmem:[#allocation16 + $0x960] sm:$0xff]  ;;  %v10842_v8 = vpack.c.bf16 %v5179_v58, %v5175_v57 }
 0x8aa   : > { %v5210_v57 = vld [vmem:[#allocation16 + $0xa60] sm:$0xff] }
 0x8ab   : > { %10689 = vmatpush1.bf16.msra.mxu0 %v10688_v2  ;;  %10817 = vmatpush1.bf16.msra.mxu1 %v10816_v41  ;;  %v10828_v2 = vpack.c.bf16 %v5146_v6, %v5142_v61  ;;  %v10956_v41 = vpack.c.bf16 %v5148_v14, %v5144_v13  ;;  %v5187_v61 = vld [vmem:[#allocation16 + $0x9a8] sm:$0xff]  ;;  %v5185_v6 = vld [vmem:[#allocation16 + $0x998] sm:$0xff]  ;;  %v5182_v14 = vld [vmem:[#allocation16 + $0x980] sm:$0xff] }
 0x8ac   : > { %10691 = vmatprep.subr.bf16.mxu0 %v10690_v17  ;;  %10819 = vmatprep.subr.bf16.mxu1 %v10818_v18  ;;  %v5154_v17 = vld [vmem:[#allocation16 + $0x8a0] sm:$0xff]  ;;  %v10830_v18 = vpack.c.bf16 %v5155_v38, %v5151_v0 }
 0x8ad   : > { %v5186_v0 = vld [vmem:[#allocation16 + $0x9a0] sm:$0xff] }
 0x8af   : > { %10693 = vmatpush1.bf16.msra.mxu0 %v10692_v23  ;;  %10821 = vmatpush1.bf16.msra.mxu1 %v10820_v24  ;;  %v5159_v23 = vld [vmem:[#allocation16 + $0x8c8] sm:$0xff] }
 0x8b0   : > { %v5163_v24 = vld [vmem:[#allocation16 + $0x8e8] sm:$0xff] }
 0x8b2   : > { %4384 = vmatmul.mubr.f32.vlgmr.msra.gmra.mrb[10].mxu0 %v13756_v22  ;;  %4526 = vmatmul.mubr.f32.vlgmr.msra.gmra.mrb[10].mxu1 %v13756_v22 }
 0x8b3   : > { %4652 = vmatprep.mubr.f32.mxu0 %v13189_v1  ;;  %4723 = vmatprep.mubr.f32.mxu1 %v13189_v1 }
 0x985   : > { %v4385_v4 = vpop.f32.mrb[10].mxu0  ;;  %v4527_v30 = vpop.f32.mrb[10].mxu1 }
 0x986   : > { %v4558_v31 = vadd.f32 %v4541_v26, %v4385_v4  ;;  %v4560_v32 = vadd.f32 %v4549_v27, %v4527_v30  ;;  %v4387_v33 = vpop.f32.mrb[11].mxu0  ;;  %v4529_v34 = vpop.f32.mrb[11].mxu1  ;;  %v5165_v26 = vld [vmem:[#allocation16 + $0x8f8] sm:$0xff]  ;;  %v10832_v27 = vpack.c.bf16 %v5154_v17, %v5150_v16  ;;  %v5162_v4 = vld [vmem:[#allocation16 + $0x8e0] sm:$0xff]  ;;  %v10834_v30 = vpack.c.bf16 %v5163_v24, %v5159_v23  ;;  %v5195_v16 = vld [vmem:[#allocation16 + $0x9e8] sm:$0xff] }
 0x987   : > { %v4559_v22 = vadd.f32 %v4545_v28, %v4387_v33  ;;  %v4561_v35 = vadd.f32 %v4553_v29, %v4529_v34  ;;  %v10960_v28 = vpack.c.bf16 %v5156_v21, %v5152_v20  ;;  %v5158_v29 = vld [vmem:[#allocation16 + $0x8c0] sm:$0xff]  ;;  %v5164_v33 = vld [vmem:[#allocation16 + $0x8f0] sm:$0xff]  ;;  %v5167_v34 = vld [vmem:[#allocation16 + $0x908] sm:$0xff] }
 0x988   : > { %v4562_v37 = vmul.f32 0.01, %v4558_v31  ;;  %v4564_v44 = vmul.f32 0.01, %v4560_v32  ;;  %v5193_v17 = vld [vmem:[#allocation16 + $0x9d8] sm:$0xff]  ;;  %v5190_v21 = vld [vmem:[#allocation16 + $0x9c0] sm:$0xff] }
 0x989   : > { %v4563_v45 = vmul.f32 0.01, %v4559_v22  ;;  %v4565_v46 = vmul.f32 0.01, %v4561_v35  ;;  %v5194_v23 = vld [vmem:[#allocation16 + $0x9e0] sm:$0xff] }
 0x98a   : > { %v13770_v52 = vmax.f32 %v4558_v31, %v4562_v37  ;;  %v13772_v53 = vmax.f32 %v4560_v32, %v4564_v44  ;;  %v10962_v31 = vpack.c.bf16 %v5165_v26, %v5161_v25  ;;  %v5160_v32 = vld [vmem:[#allocation16 + $0x8d0] sm:$0xff]  ;;  %v5173_v37 = vld [vmem:[#allocation16 + $0x938] sm:$0xff]  ;;  %v10836_v44 = vpack.c.bf16 %v5162_v4, %v5158_v29  ;;  %v5203_v29 = vld [vmem:[#allocation16 + $0xa28] sm:$0xff] }
 0x98b   : > { %v13766_v48 = vmax.f32 %v4559_v22, %v4563_v45  ;;  %v13768_v49 = vmax.f32 %v4561_v35, %v4565_v46  ;;  %v5171_v22 = vld [vmem:[#allocation16 + $0x928] sm:$0xff]  ;;  %v5169_v35 = vld [vmem:[#allocation16 + $0x918] sm:$0xff]  ;;  %v10964_v45 = vpack.c.bf16 %v5164_v33, %v5160_v32  ;;  %v5166_v46 = vld [vmem:[#allocation16 + $0x900] sm:$0xff] }
 0x98c   : > { %v10838_v36 = vpack.c.bf16 %v5171_v22, %v5167_v34  ;;  %v10966_v54 = vpack.c.bf16 %v5173_v37, %v5169_v35  ;;  %v5192_v26 = vld [vmem:[#allocation16 + $0x9d0] sm:$0xff]  ;;  %v5201_v4 = vld [vmem:[#allocation16 + $0xa18] sm:$0xff]  ;;  %v5198_v33 = vld [vmem:[#allocation16 + $0xa00] sm:$0xff] }
 0x98d   : > { %9470 = vmatprep.subr.msk.mxu0 %vm4575_vm4, %v13766_v48  ;;  %9473 = vmatprep.subr.msk.mxu1 %vm4575_vm4, %v13768_v49  ;;  %v5202_v34 = vld [vmem:[#allocation16 + $0xa20] sm:$0xff]  ;;  %v5200_v37 = vld [vmem:[#allocation16 + $0xa10] sm:$0xff] }
 0x98e   : > { %9471 = vmatpush1.msk.msra.mxu0 %vm4575_vm4, %v13770_v52  ;;  %9474 = vmatpush1.msk.msra.mxu1 %vm4575_vm4, %v13772_v53 }
 0x98f   : > { %9472 = vmatmul.mubr.msk.f32.vlgmr.msra.gmra.mrb[16].mxu0 %vm4571_vm5, %v4570_v50  ;;  %9476 = vmatprep.subr.msk.mxu0 %vm4575_vm4, %v13766_v48 }
 0x990   : > { %9479 = vmatprep.subr.msk.mxu1 %vm4575_vm4, %v13768_v49  ;;  %9475 = vmatmul.mubr.msk.f32.vlgmr.msra.gmra.mrb[16].mxu1 %vm4571_vm5, %v4570_v50  ;;  %v5170_v50 = vld [vmem:[#allocation16 + $0x920] sm:$0xff] }
 0x991   : > { %9477 = vmatpush1.msk.msra.mxu0 %vm4575_vm4, %v13770_v52  ;;  %9480 = vmatpush1.msk.msra.mxu1 %vm4575_vm4, %v13772_v53  ;;  %v10840_v51 = vpack.c.bf16 %v5170_v50, %v5166_v46  ;;  %v5211_v46 = vld [vmem:[#allocation16 + $0xa68] sm:$0xff]  ;;  %v5209_v50 = vld [vmem:[#allocation16 + $0xa58] sm:$0xff] }
 0x992   : > { %5055 = vmatprep.mubr.f32.mxu0 %v13189_v1  ;;  %5126 = vmatprep.mubr.f32.mxu1 %v13189_v1 }
 0x993   : > { %9478 = vmatmul.mubr.msk.f32.vlgmr.msra.gmra.mrb[18].mxu0 %vm4571_vm5, %v4987_v9  ;;  %10823 = vmatprep.subr.bf16.mxu0 %v10822_v3  ;;  %v10968_v3 = vpack.c.bf16 %v5172_v56, %v5168_v55  ;;  %v5206_v56 = vld [vmem:[#allocation16 + $0xa40] sm:$0xff] }
 0x994   : > { %9481 = vmatmul.mubr.msk.f32.vlgmr.msra.gmra.mrb[18].mxu1 %vm4571_vm5, %v4987_v9  ;;  %10951 = vmatprep.subr.bf16.mxu1 %v10950_v10  ;;  %v10970_v9 = vpack.c.bf16 %v5181_v62, %v5177_v59  ;;  %v5176_v10 = vld [vmem:[#allocation16 + $0x950] sm:$0xff] }
 0x995   : > { %10825 = vmatpush1.bf16.msra.mxu0 %v10824_v60  ;;  %10953 = vmatpush1.bf16.msra.mxu1 %v10952_v11  ;;  %v5180_v60 = vld [vmem:[#allocation16 + $0x970] sm:$0xff]  ;;  %v5183_v11 = vld [vmem:[#allocation16 + $0x988] sm:$0xff] }
 0x996   : > { %10827 = vmatprep.subr.bf16.mxu0 %v10826_v47  ;;  %10955 = vmatprep.subr.bf16.mxu1 %v10954_v12  ;;  %v5189_v47 = vld [vmem:[#allocation16 + $0x9b8] sm:$0xff]  ;;  %v10844_v12 = vpack.c.bf16 %v5178_v7, %v5174_v5  ;;  %v10972_v13 = vpack.c.bf16 %v5180_v60, %v5176_v10  ;;  %v10846_v38 = vpack.c.bf16 %v5187_v61, %v5183_v11  ;;  %v5208_v62 = vld [vmem:[#allocation16 + $0xa50] sm:$0xff]  ;;  %v5219_v5 = vld [vmem:[#allocation16 + $0xaa8] sm:$0xff] }
 0x997   : > { %v10974_v63 = vpack.c.bf16 %v5189_v47, %v5185_v6  ;;  %v5217_v7 = vld [vmem:[#allocation16 + $0xa98] sm:$0xff]  ;;  %v5214_v60 = vld [vmem:[#allocation16 + $0xa80] sm:$0xff]  ;;  %v5216_v47 = vld [vmem:[#allocation16 + $0xa90] sm:$0xff] }
 0x998   : > { %v5218_v11 = vld [vmem:[#allocation16 + $0xaa0] sm:$0xff] }
 0x999   : > { %10829 = vmatpush1.bf16.msra.mxu0 %v10828_v2  ;;  %10957 = vmatpush1.bf16.msra.mxu1 %v10956_v41  ;;  %v5188_v2 = vld [vmem:[#allocation16 + $0x9b0] sm:$0xff]  ;;  %v5191_v41 = vld [vmem:[#allocation16 + $0x9c8] sm:$0xff] }
 0x99a   : > { %10831 = vmatprep.subr.bf16.mxu0 %v10830_v18  ;;  %10959 = vmatprep.subr.bf16.mxu1 %v10958_v19  ;;  %v5197_v18 = vld [vmem:[#allocation16 + $0x9f8] sm:$0xff]  ;;  %v10848_v19 = vpack.c.bf16 %v5186_v0, %v5182_v14  ;;  %v10976_v20 = vpack.c.bf16 %v5188_v2, %v5184_v15  ;;  %v10850_v24 = vpack.c.bf16 %v5195_v16, %v5191_v41  ;;  %v5227_v14 = vld [vmem:[#allocation16 + $0xae8] sm:$0xff]  ;;  %v5222_v2 = vld [vmem:[#allocation16 + $0xac0] sm:$0xff] }
 0x99b   : > { %v10978_v25 = vpack.c.bf16 %v5197_v18, %v5193_v17  ;;  %v5225_v0 = vld [vmem:[#allocation16 + $0xad8] sm:$0xff]  ;;  %v5226_v41 = vld [vmem:[#allocation16 + $0xae0] sm:$0xff]  ;;  %v5224_v18 = vld [vmem:[#allocation16 + $0xad0] sm:$0xff] }
 0x99d   : > { %10833 = vmatpush1.bf16.msra.mxu0 %v10832_v27  ;;  %10961 = vmatpush1.bf16.msra.mxu1 %v10960_v28  ;;  %v5196_v27 = vld [vmem:[#allocation16 + $0x9f0] sm:$0xff]  ;;  %v5199_v28 = vld [vmem:[#allocation16 + $0xa08] sm:$0xff] }
 0x99e   : > { %10835 = vmatprep.subr.bf16.mxu0 %v10834_v30  ;;  %10963 = vmatprep.subr.bf16.mxu1 %v10962_v31  ;;  %v5205_v30 = vld [vmem:[#allocation16 + $0xa38] sm:$0xff]  ;;  %v10852_v31 = vpack.c.bf16 %v5194_v23, %v5190_v21  ;;  %v10980_v32 = vpack.c.bf16 %v5196_v27, %v5192_v26  ;;  %v10854_v22 = vpack.c.bf16 %v5203_v29, %v5199_v28  ;;  %v5235_v21 = vld [vmem:[#allocation16 + $0xb28] sm:$0xff]  ;;  %v5230_v27 = vld [vmem:[#allocation16 + $0xb00] sm:$0xff] }
 0x99f   : > { %v10982_v35 = vpack.c.bf16 %v5205_v30, %v5201_v4  ;;  %v5233_v23 = vld [vmem:[#allocation16 + $0xb18] sm:$0xff]  ;;  %v5234_v28 = vld [vmem:[#allocation16 + $0xb20] sm:$0xff]  ;;  %v5232_v30 = vld [vmem:[#allocation16 + $0xb10] sm:$0xff] }
 0x9a1   : > { %10837 = vmatpush1.bf16.msra.mxu0 %v10836_v44  ;;  %10965 = vmatpush1.bf16.msra.mxu1 %v10964_v45  ;;  %v5204_v44 = vld [vmem:[#allocation16 + $0xa30] sm:$0xff]  ;;  %v5207_v45 = vld [vmem:[#allocation16 + $0xa48] sm:$0xff] }
 0x9a2   : > { %10839 = vmatprep.subr.bf16.mxu0 %v10838_v36  ;;  %10967 = vmatprep.subr.bf16.mxu1 %v10966_v54  ;;  %v5213_v36 = vld [vmem:[#allocation16 + $0xa78] sm:$0xff]  ;;  %v10856_v54 = vpack.c.bf16 %v5202_v34, %v5198_v33  ;;  %v10984_v55 = vpack.c.bf16 %v5204_v44, %v5200_v37  ;;  %v10858_v58 = vpack.c.bf16 %v5211_v46, %v5207_v45  ;;  %v5243_v33 = vld [vmem:[#allocation16 + $0xb68] sm:$0xff]  ;;  %v5238_v44 = vld [vmem:[#allocation16 + $0xb40] sm:$0xff] }
 0x9a3   : > { %v10986_v59 = vpack.c.bf16 %v5213_v36, %v5209_v50  ;;  %v5241_v34 = vld [vmem:[#allocation16 + $0xb58] sm:$0xff]  ;;  %v5242_v45 = vld [vmem:[#allocation16 + $0xb60] sm:$0xff]  ;;  %v5240_v36 = vld [vmem:[#allocation16 + $0xb50] sm:$0xff] }
 0x9a5   : > { %10841 = vmatpush1.bf16.msra.mxu0 %v10840_v51  ;;  %10969 = vmatpush1.bf16.msra.mxu1 %v10968_v3  ;;  %v5212_v51 = vld [vmem:[#allocation16 + $0xa70] sm:$0xff]  ;;  %v5215_v3 = vld [vmem:[#allocation16 + $0xa88] sm:$0xff] }
 0x9a6   : > { %10843 = vmatprep.subr.bf16.mxu0 %v10842_v8  ;;  %10971 = vmatprep.subr.bf16.mxu1 %v10970_v9  ;;  %v5221_v8 = vld [vmem:[#allocation16 + $0xab8] sm:$0xff]  ;;  %v10860_v9 = vpack.c.bf16 %v5210_v57, %v5206_v56  ;;  %v10988_v10 = vpack.c.bf16 %v5212_v51, %v5208_v62  ;;  %v10862_v61 = vpack.c.bf16 %v5219_v5, %v5215_v3  ;;  %v5251_v56 = vld [vmem:[#allocation16 + $0xba8] sm:$0xff]  ;;  %v5246_v51 = vld [vmem:[#allocation16 + $0xb80] sm:$0xff] }
 0x9a7   : > { %v10990_v6 = vpack.c.bf16 %v5221_v8, %v5217_v7  ;;  %v5249_v57 = vld [vmem:[#allocation16 + $0xb98] sm:$0xff]  ;;  %v5250_v7 = vld [vmem:[#allocation16 + $0xba0] sm:$0xff]  ;;  %v5248_v8 = vld [vmem:[#allocation16 + $0xb90] sm:$0xff] }
 0x9a9   : > { %10845 = vmatpush1.bf16.msra.mxu0 %v10844_v12  ;;  %10973 = vmatpush1.bf16.msra.mxu1 %v10972_v13  ;;  %v5220_v12 = vld [vmem:[#allocation16 + $0xab0] sm:$0xff]  ;;  %v5223_v13 = vld [vmem:[#allocation16 + $0xac8] sm:$0xff] }
 0x9aa   : > { %10847 = vmatprep.subr.bf16.mxu0 %v10846_v38  ;;  %10975 = vmatprep.subr.bf16.mxu1 %v10974_v63  ;;  %v5229_v38 = vld [vmem:[#allocation16 + $0xaf8] sm:$0xff]  ;;  %v10864_v63 = vpack.c.bf16 %v5218_v11, %v5214_v60  ;;  %v10992_v15 = vpack.c.bf16 %v5220_v12, %v5216_v47  ;;  %v10866_v16 = vpack.c.bf16 %v5227_v14, %v5223_v13  ;;  %v5255_v11 = vld [vmem:[#allocation16 + $0xbc8] sm:$0xff]  ;;  %v5254_v13 = vld [vmem:[#allocation16 + $0xbc0] sm:$0xff] }
 0x9ab   : > { %v10994_v17 = vpack.c.bf16 %v5229_v38, %v5225_v0  ;;  %v5261_v12 = vld [vmem:[#allocation16 + $0xbf8] sm:$0xff]  ;;  %v5258_v14 = vld [vmem:[#allocation16 + $0xbe0] sm:$0xff] }
 0x9ac   : > { %v10884_v38 = vpack.c.bf16 %v5258_v14, %v5254_v13  ;;  %v5286_v13 = vld [vmem:[#allocation16 + $0xcc0] sm:$0xff] }
 0x9ad   : > { %10849 = vmatpush1.bf16.msra.mxu0 %v10848_v19  ;;  %10977 = vmatpush1.bf16.msra.mxu1 %v10976_v20  ;;  %v5228_v19 = vld [vmem:[#allocation16 + $0xaf0] sm:$0xff]  ;;  %v5231_v20 = vld [vmem:[#allocation16 + $0xb08] sm:$0xff]  ;;  %v5290_v14 = vld [vmem:[#allocation16 + $0xce0] sm:$0xff] }
 0x9ae   : > { %10851 = vmatprep.subr.bf16.mxu0 %v10850_v24  ;;  %10979 = vmatprep.subr.bf16.mxu1 %v10978_v25  ;;  %v5237_v24 = vld [vmem:[#allocation16 + $0xb38] sm:$0xff]  ;;  %v10868_v25 = vpack.c.bf16 %v5226_v41, %v5222_v2  ;;  %v10996_v26 = vpack.c.bf16 %v5228_v19, %v5224_v18  ;;  %v10870_v29 = vpack.c.bf16 %v5235_v21, %v5231_v20  ;;  %v5263_v41 = vld [vmem:[#allocation16 + $0xc08] sm:$0xff] }
 0x9af   : > { %v10998_v4 = vpack.c.bf16 %v5237_v24, %v5233_v23  ;;  %v5269_v19 = vld [vmem:[#allocation16 + $0xc38] sm:$0xff]  ;;  %v5262_v23 = vld [vmem:[#allocation16 + $0xc00] sm:$0xff] }
 0x9b0   : > { %v5266_v24 = vld [vmem:[#allocation16 + $0xc20] sm:$0xff] }
 0x9b1   : > { %10853 = vmatpush1.bf16.msra.mxu0 %v10852_v31  ;;  %10981 = vmatpush1.bf16.msra.mxu1 %v10980_v32  ;;  %v5236_v31 = vld [vmem:[#allocation16 + $0xb30] sm:$0xff]  ;;  %v5239_v32 = vld [vmem:[#allocation16 + $0xb48] sm:$0xff] }
 0x9b2   : > { %10855 = vmatprep.subr.bf16.mxu0 %v10854_v22  ;;  %10983 = vmatprep.subr.bf16.mxu1 %v10982_v35  ;;  %v5245_v22 = vld [vmem:[#allocation16 + $0xb78] sm:$0xff]  ;;  %v10872_v35 = vpack.c.bf16 %v5234_v28, %v5230_v27  ;;  %v11000_v37 = vpack.c.bf16 %v5236_v31, %v5232_v30  ;;  %v10874_v46 = vpack.c.bf16 %v5243_v33, %v5239_v32  ;;  %v5268_v27 = vld [vmem:[#allocation16 + $0xc30] sm:$0xff]  ;;  %v5271_v28 = vld [vmem:[#allocation16 + $0xc48] sm:$0xff] }
 0x9b3   : > { %v11002_v50 = vpack.c.bf16 %v5245_v22, %v5241_v34  ;;  %v5273_v30 = vld [vmem:[#allocation16 + $0xc58] sm:$0xff]  ;;  %v10888_v34 = vpack.c.bf16 %v5266_v24, %v5262_v23  ;;  %v5298_v23 = vld [vmem:[#allocation16 + $0xd20] sm:$0xff] }
 0x9b4   : > { %v5277_v31 = vld [vmem:[#allocation16 + $0xc78] sm:$0xff] }
 0x9b5   : > { %10857 = vmatpush1.bf16.msra.mxu0 %v10856_v54  ;;  %10985 = vmatpush1.bf16.msra.mxu1 %v10984_v55  ;;  %v5244_v54 = vld [vmem:[#allocation16 + $0xb70] sm:$0xff]  ;;  %v5247_v55 = vld [vmem:[#allocation16 + $0xb88] sm:$0xff] }
 0x9b6   : > { %10859 = vmatprep.subr.bf16.mxu0 %v10858_v58  ;;  %10987 = vmatprep.subr.bf16.mxu1 %v10986_v59  ;;  %v5253_v58 = vld [vmem:[#allocation16 + $0xbb8] sm:$0xff]  ;;  %v10876_v59 = vpack.c.bf16 %v5242_v45, %v5238_v44  ;;  %v11004_v62 = vpack.c.bf16 %v5244_v54, %v5240_v36  ;;  %v10878_v3 = vpack.c.bf16 %v5251_v56, %v5247_v55  ;;  %v5276_v36 = vld [vmem:[#allocation16 + $0xc70] sm:$0xff]  ;;  %v5279_v54 = vld [vmem:[#allocation16 + $0xc88] sm:$0xff] }
 0x9b7   : > { %v11006_v5 = vpack.c.bf16 %v5253_v58, %v5249_v57  ;;  %v5283_v56 = vld [vmem:[#allocation16 + $0xca8] sm:$0xff]  ;;  %v5281_v57 = vld [vmem:[#allocation16 + $0xc98] sm:$0xff] }
 0x9b8   : > { %v5285_v58 = vld [vmem:[#allocation16 + $0xcb8] sm:$0xff] }
 0x9b9   : > { %10861 = vmatpush1.bf16.msra.mxu0 %v10860_v9  ;;  %10989 = vmatpush1.bf16.msra.mxu1 %v10988_v10  ;;  %v5252_v9 = vld [vmem:[#allocation16 + $0xbb0] sm:$0xff]  ;;  %v10880_v10 = vpack.c.bf16 %v5250_v7, %v5246_v51  ;;  %v10894_v7 = vpack.c.bf16 %v5283_v56, %v5279_v54  ;;  %v5315_v54 = vld [vmem:[#allocation16 + $0xda8] sm:$0xff]  ;;  %v5313_v56 = vld [vmem:[#allocation16 + $0xd98] sm:$0xff] }
 0x9ba   : > { %10863 = vmatprep.subr.bf16.mxu0 %v10862_v61  ;;  %10991 = vmatprep.subr.bf16.mxu1 %v10990_v6  ;;  %v11008_v60 = vpack.c.bf16 %v5252_v9, %v5248_v8  ;;  %v5259_v61 = vld [vmem:[#allocation16 + $0xbe8] sm:$0xff]  ;;  %v5257_v6 = vld [vmem:[#allocation16 + $0xbd8] sm:$0xff]  ;;  %v11022_v8 = vpack.c.bf16 %v5285_v58, %v5281_v57  ;;  %v5280_v9 = vld [vmem:[#allocation16 + $0xc90] sm:$0xff] }
 0x9bb   : > { %v10882_v47 = vpack.c.bf16 %v5259_v61, %v5255_v11  ;;  %v11010_v0 = vpack.c.bf16 %v5261_v12, %v5257_v6  ;;  %v5291_v11 = vld [vmem:[#allocation16 + $0xce8] sm:$0xff]  ;;  %v5289_v61 = vld [vmem:[#allocation16 + $0xcd8] sm:$0xff] }
 0x9bc   : > { %v5293_v6 = vld [vmem:[#allocation16 + $0xcf8] sm:$0xff] }
 0x9bd   : > { %10865 = vmatpush1.bf16.msra.mxu0 %v10864_v63  ;;  %10993 = vmatpush1.bf16.msra.mxu1 %v10992_v15  ;;  %v5256_v63 = vld [vmem:[#allocation16 + $0xbd0] sm:$0xff]  ;;  %v5317_v57 = vld [vmem:[#allocation16 + $0xdb8] sm:$0xff] }
 0x9be   : > { %10867 = vmatprep.subr.bf16.mxu0 %v10866_v16  ;;  %10995 = vmatprep.subr.bf16.mxu1 %v10994_v17  ;;  %v5260_v15 = vld [vmem:[#allocation16 + $0xbf0] sm:$0xff]  ;;  %v5267_v16 = vld [vmem:[#allocation16 + $0xc28] sm:$0xff]  ;;  %v5265_v17 = vld [vmem:[#allocation16 + $0xc18] sm:$0xff] }
 0x9bf   : > { %v11012_v2 = vpack.c.bf16 %v5260_v15, %v5256_v63  ;;  %v10886_v18 = vpack.c.bf16 %v5267_v16, %v5263_v41  ;;  %v11014_v20 = vpack.c.bf16 %v5269_v19, %v5265_v17  ;;  %v5288_v63 = vld [vmem:[#allocation16 + $0xcd0] sm:$0xff]  ;;  %v5299_v41 = vld [vmem:[#allocation16 + $0xd28] sm:$0xff]  ;;  %v5297_v16 = vld [vmem:[#allocation16 + $0xd18] sm:$0xff] }
 0x9c0   : > { %v5292_v15 = vld [vmem:[#allocation16 + $0xcf0] sm:$0xff]  ;;  %v5301_v17 = vld [vmem:[#allocation16 + $0xd38] sm:$0xff] }
 0x9c1   : > { %10869 = vmatpush1.bf16.msra.mxu0 %v10868_v25  ;;  %10997 = vmatpush1.bf16.msra.mxu1 %v10996_v26  ;;  %v5264_v26 = vld [vmem:[#allocation16 + $0xc10] sm:$0xff]  ;;  %v11028_v19 = vpack.c.bf16 %v5292_v15, %v5288_v63  ;;  %v5327_v63 = vld [vmem:[#allocation16 + $0xe08] sm:$0xff] }
 0x9c2   : > { %10871 = vmatprep.subr.bf16.mxu0 %v10870_v29  ;;  %10999 = vmatprep.subr.bf16.mxu1 %v10998_v4  ;;  %v5275_v4 = vld [vmem:[#allocation16 + $0xc68] sm:$0xff]  ;;  %v11016_v22 = vpack.c.bf16 %v5268_v27, %v5264_v26  ;;  %v11030_v26 = vpack.c.bf16 %v5301_v17, %v5297_v16  ;;  %v5296_v27 = vld [vmem:[#allocation16 + $0xd10] sm:$0xff] }
 0x9c3   : > { %v10890_v45 = vpack.c.bf16 %v5275_v4, %v5271_v28  ;;  %v5300_v28 = vld [vmem:[#allocation16 + $0xd30] sm:$0xff]  ;;  %v5303_v4 = vld [vmem:[#allocation16 + $0xd48] sm:$0xff] }
 0x9c4   : > { %v5331_v15 = vld [vmem:[#allocation16 + $0xe28] sm:$0xff] }
 0x9c5   : > { %10873 = vmatpush1.bf16.msra.mxu0 %v10872_v35  ;;  %11001 = vmatpush1.bf16.msra.mxu1 %v11000_v37  ;;  %v5270_v35 = vld [vmem:[#allocation16 + $0xc40] sm:$0xff] }
 0x9c6   : > { %10875 = vmatprep.subr.bf16.mxu0 %v10874_v46  ;;  %11003 = vmatprep.subr.bf16.mxu1 %v11002_v50  ;;  %v5274_v37 = vld [vmem:[#allocation16 + $0xc60] sm:$0xff]  ;;  %v11018_v46 = vpack.c.bf16 %v5277_v31, %v5273_v30  ;;  %v5272_v50 = vld [vmem:[#allocation16 + $0xc50] sm:$0xff]  ;;  %v5307_v30 = vld [vmem:[#allocation16 + $0xd68] sm:$0xff] }
 0x9c7   : > { %v11020_v51 = vpack.c.bf16 %v5276_v36, %v5272_v50  ;;  %v5305_v31 = vld [vmem:[#allocation16 + $0xd58] sm:$0xff]  ;;  %v5308_v50 = vld [vmem:[#allocation16 + $0xd70] sm:$0xff]  ;;  %v5311_v36 = vld [vmem:[#allocation16 + $0xd88] sm:$0xff] }
 0x9c9   : > { %10877 = vmatpush1.bf16.msra.mxu0 %v10876_v59  ;;  %11005 = vmatpush1.bf16.msra.mxu1 %v11004_v62  ;;  %v10892_v62 = vpack.c.bf16 %v5274_v37, %v5270_v35  ;;  %v5302_v35 = vld [vmem:[#allocation16 + $0xd40] sm:$0xff] }
 0x9ca   : > { %10879 = vmatprep.subr.bf16.mxu0 %v10878_v3  ;;  %11007 = vmatprep.subr.bf16.mxu1 %v11006_v5  ;;  %v5278_v3 = vld [vmem:[#allocation16 + $0xc80] sm:$0xff] }
 0x9cb   : > { %v5282_v5 = vld [vmem:[#allocation16 + $0xca0] sm:$0xff] }
 0x9cc   : > { %v5306_v37 = vld [vmem:[#allocation16 + $0xd60] sm:$0xff] }
 0x9cd   : > { %10881 = vmatpush1.bf16.msra.mxu0 %v10880_v10  ;;  %11009 = vmatpush1.bf16.msra.mxu1 %v11008_v60  ;;  %v5284_v10 = vld [vmem:[#allocation16 + $0xcb0] sm:$0xff]  ;;  %v5287_v60 = vld [vmem:[#allocation16 + $0xcc8] sm:$0xff]  ;;  %v10908_v58 = vpack.c.bf16 %v5306_v37, %v5302_v35 }
 0x9ce   : > { %10883 = vmatprep.subr.bf16.mxu0 %v10882_v47  ;;  %11011 = vmatprep.subr.bf16.mxu1 %v11010_v0  ;;  %v10896_v47 = vpack.c.bf16 %v5282_v5, %v5278_v3  ;;  %v11024_v12 = vpack.c.bf16 %v5284_v10, %v5280_v9  ;;  %v10898_v0 = vpack.c.bf16 %v5291_v11, %v5287_v60  ;;  %v5319_v9 = vld [vmem:[#allocation16 + $0xdc8] sm:$0xff]  ;;  %v5321_v60 = vld [vmem:[#allocation16 + $0xdd8] sm:$0xff] }
 0x9cf   : > { %v10910_v3 = vpack.c.bf16 %v5315_v54, %v5311_v36  ;;  %v11038_v5 = vpack.c.bf16 %v5317_v57, %v5313_v56  ;;  %v5323_v10 = vld [vmem:[#allocation16 + $0xde8] sm:$0xff]  ;;  %v5325_v11 = vld [vmem:[#allocation16 + $0xdf8] sm:$0xff] }
 0x9d0   : > { %v5345_v36 = vld [vmem:[#allocation16 + $0xe98] sm:$0xff] }
 0x9d1   : > { %10885 = vmatpush1.bf16.msra.mxu0 %v10884_v38  ;;  %11013 = vmatpush1.bf16.msra.mxu1 %v11012_v2  ;;  %v11026_v38 = vpack.c.bf16 %v5293_v6, %v5289_v61  ;;  %v5295_v2 = vld [vmem:[#allocation16 + $0xd08] sm:$0xff]  ;;  %v5349_v54 = vld [vmem:[#allocation16 + $0xeb8] sm:$0xff] }
 0x9d2   : > { %10887 = vmatprep.subr.bf16.mxu0 %v10886_v18  ;;  %11015 = vmatprep.subr.bf16.mxu1 %v11014_v20  ;;  %v10900_v18 = vpack.c.bf16 %v5290_v14, %v5286_v13  ;;  %v5294_v20 = vld [vmem:[#allocation16 + $0xd00] sm:$0xff]  ;;  %v10902_v24 = vpack.c.bf16 %v5299_v41, %v5295_v2  ;;  %v10914_v13 = vpack.c.bf16 %v5323_v10, %v5319_v9  ;;  %v5329_v2 = vld [vmem:[#allocation16 + $0xe18] sm:$0xff] }
 0x9d3   : > { %v11042_v14 = vpack.c.bf16 %v5325_v11, %v5321_v60  ;;  %v5333_v41 = vld [vmem:[#allocation16 + $0xe38] sm:$0xff] }
 0x9d4   : > { %v5353_v9 = vld [vmem:[#allocation16 + $0xed8] sm:$0xff] }
 0x9d5   : > { %v5357_v10 = vld [vmem:[#allocation16 + $0xef8] sm:$0xff] }
 0xa62   : > { %v13796_v21 = vpop.f32.mrb[16].mxu0 }
 0xa63   : > { %v13798_v25 = vpop.f32.mrb[17].mxu0  ;;  %v13800_v29 = vpop.f32.mrb[16].mxu1 }
 0xa64   : > { %v13802_v32 = vpop.f32.mrb[17].mxu1 }
 0xa66   : > { %v5057_v33 = vpop.f32.mrb[18].mxu0 }
 0xa67   : > { %v5059_v44 = vpop.f32.mrb[19].mxu0  ;;  %v13804_v55 = vpop.f32.mrb[18].mxu1 }
 0xa68   : > { %5454 = vmatprep.mubr.f32.mxu0 %v5059_v44  ;;  %5596 = vmatprep.mubr.f32.mxu1 %v5059_v44  ;;  %v5130_v59 = vpop.f32.mrb[19].mxu1  ;;  %v10906_v44 = vpack.c.bf16 %v5307_v30, %v5303_v4  ;;  %v5337_v4 = vld [vmem:[#allocation16 + $0xe58] sm:$0xff] }
 0xa69   : > { %5455 = vmatmul.mubr.f32.vlgmr.msra.gmra.mrb[20].mxu0 %v5057_v33  ;;  %5597 = vmatmul.mubr.f32.vlgmr.msra.gmra.mrb[20].mxu1 %v5057_v33  ;;  %v5309_v33 = vld [vmem:[#allocation16 + $0xd78] sm:$0xff] }
 0xa6a   : > { %10889 = vmatpush1.bf16.msra.mxu0 %v10888_v34  ;;  %11017 = vmatpush1.bf16.msra.mxu1 %v11016_v22  ;;  %v10904_v34 = vpack.c.bf16 %v5298_v23, %v5294_v20  ;;  %v11032_v22 = vpack.c.bf16 %v5300_v28, %v5296_v27  ;;  %v10918_v20 = vpack.c.bf16 %v5331_v15, %v5327_v63  ;;  %v5335_v27 = vld [vmem:[#allocation16 + $0xe48] sm:$0xff]  ;;  %v5341_v30 = vld [vmem:[#allocation16 + $0xe78] sm:$0xff] }
 0xa6b   : > { %10891 = vmatprep.subr.bf16.mxu0 %v10890_v45  ;;  %11019 = vmatprep.subr.bf16.mxu1 %v11018_v46  ;;  %v11034_v45 = vpack.c.bf16 %v5309_v33, %v5305_v31  ;;  %v5304_v46 = vld [vmem:[#allocation16 + $0xd50] sm:$0xff]  ;;  %v11046_v23 = vpack.c.bf16 %v5333_v41, %v5329_v2  ;;  %v5339_v28 = vld [vmem:[#allocation16 + $0xe68] sm:$0xff]  ;;  %v11050_v37 = vpack.c.bf16 %v5341_v30, %v5337_v4  ;;  %v5361_v63 = vld [vmem:[#allocation16 + $0xf18] sm:$0xff] }
 0xa6c   : > { %5525 = vmatprep.mubr.f32.mxu0 %v5130_v59  ;;  %5667 = vmatprep.mubr.f32.mxu1 %v5130_v59  ;;  %v11036_v59 = vpack.c.bf16 %v5308_v50, %v5304_v46  ;;  %v10922_v35 = vpack.c.bf16 %v5339_v28, %v5335_v27  ;;  %v5343_v46 = vld [vmem:[#allocation16 + $0xe88] sm:$0xff]  ;;  %v5365_v15 = vld [vmem:[#allocation16 + $0xf38] sm:$0xff] }
 0xa6d   : > { %v5347_v50 = vld [vmem:[#allocation16 + $0xea8] sm:$0xff]  ;;  %v5369_v27 = vld [vmem:[#allocation16 + $0xf58] sm:$0xff] }
 0xa6e   : > { %10893 = vmatpush1.bf16.msra.mxu0 %v10892_v62  ;;  %11021 = vmatpush1.bf16.msra.mxu1 %v11020_v51  ;;  %v5310_v62 = vld [vmem:[#allocation16 + $0xd80] sm:$0xff]  ;;  %v5373_v28 = vld [vmem:[#allocation16 + $0xf78] sm:$0xff] }
 0xa6f   : > { %10895 = vmatprep.subr.bf16.mxu0 %v10894_v7  ;;  %11023 = vmatprep.subr.bf16.mxu1 %v11022_v8  ;;  %v5314_v51 = vld [vmem:[#allocation16 + $0xda0] sm:$0xff]  ;;  %v5312_v7 = vld [vmem:[#allocation16 + $0xd90] sm:$0xff] }
 0xa70   : > { %v5316_v8 = vld [vmem:[#allocation16 + $0xdb0] sm:$0xff]  ;;  %v10912_v61 = vpack.c.bf16 %v5314_v51, %v5310_v62  ;;  %v10926_v62 = vpack.c.bf16 %v5347_v50, %v5343_v46  ;;  %v11054_v51 = vpack.c.bf16 %v5349_v54, %v5345_v36  ;;  %v5377_v46 = vld [vmem:[#allocation16 + $0xf98] sm:$0xff] }
 0xa71   : > { %v11040_v6 = vpack.c.bf16 %v5316_v8, %v5312_v7  ;;  %v5351_v7 = vld [vmem:[#allocation16 + $0xec8] sm:$0xff]  ;;  %v5381_v50 = vld [vmem:[#allocation16 + $0xfb8] sm:$0xff] }
 0xa72   : > { %10897 = vmatpush1.bf16.msra.mxu0 %v10896_v47  ;;  %11025 = vmatpush1.bf16.msra.mxu1 %v11024_v12  ;;  %v5318_v47 = vld [vmem:[#allocation16 + $0xdc0] sm:$0xff]  ;;  %v5355_v8 = vld [vmem:[#allocation16 + $0xee8] sm:$0xff] }
 0xa73   : > { %10899 = vmatprep.subr.bf16.mxu0 %v10898_v0  ;;  %11027 = vmatprep.subr.bf16.mxu1 %v11026_v38  ;;  %v5322_v12 = vld [vmem:[#allocation16 + $0xde0] sm:$0xff]  ;;  %v5320_v0 = vld [vmem:[#allocation16 + $0xdd0] sm:$0xff] }
 0xa74   : > { %v5324_v38 = vld [vmem:[#allocation16 + $0xdf0] sm:$0xff]  ;;  %v10916_v16 = vpack.c.bf16 %v5322_v12, %v5318_v47  ;;  %v10930_v47 = vpack.c.bf16 %v5355_v8, %v5351_v7  ;;  %v11058_v12 = vpack.c.bf16 %v5357_v10, %v5353_v9  ;;  %v5385_v7 = vld [vmem:[#allocation16 + $0xfd8] sm:$0xff] }
 0xa75   : > { %v11044_v17 = vpack.c.bf16 %v5324_v38, %v5320_v0  ;;  %v5359_v0 = vld [vmem:[#allocation16 + $0xf08] sm:$0xff]  ;;  %v5389_v8 = vld [vmem:[#allocation16 + $0xff8] sm:$0xff] }
 0xa76   : > { %10901 = vmatpush1.bf16.msra.mxu0 %v10900_v18  ;;  %11029 = vmatpush1.bf16.msra.mxu1 %v11028_v19  ;;  %v5326_v18 = vld [vmem:[#allocation16 + $0xe00] sm:$0xff]  ;;  %v5363_v38 = vld [vmem:[#allocation16 + $0xf28] sm:$0xff] }
 0xa77   : > { %10903 = vmatprep.subr.bf16.mxu0 %v10902_v24  ;;  %11031 = vmatprep.subr.bf16.mxu1 %v11030_v26  ;;  %v5330_v19 = vld [vmem:[#allocation16 + $0xe20] sm:$0xff]  ;;  %v5328_v24 = vld [vmem:[#allocation16 + $0xe10] sm:$0xff] }
 0xa78   : > { %v5332_v26 = vld [vmem:[#allocation16 + $0xe30] sm:$0xff]  ;;  %v10920_v31 = vpack.c.bf16 %v5330_v19, %v5326_v18  ;;  %v10934_v18 = vpack.c.bf16 %v5363_v38, %v5359_v0  ;;  %v11062_v19 = vpack.c.bf16 %v5365_v15, %v5361_v63  ;;  %v4733_v0 = vld [vmem:[#allocation16 + $0x18] sm:$0xff] }
 0xa79   : > { %v11048_v33 = vpack.c.bf16 %v5332_v26, %v5328_v24  ;;  %v5367_v24 = vld [vmem:[#allocation16 + $0xf48] sm:$0xff]  ;;  %v4737_v38 = vld [vmem:[#allocation16 + $0x38] sm:$0xff] }
 0xa7a   : > { %10905 = vmatpush1.bf16.msra.mxu0 %v10904_v34  ;;  %11033 = vmatpush1.bf16.msra.mxu1 %v11032_v22  ;;  %v5334_v34 = vld [vmem:[#allocation16 + $0xe40] sm:$0xff]  ;;  %v5371_v26 = vld [vmem:[#allocation16 + $0xf68] sm:$0xff] }
 0xa7b   : > { %10907 = vmatprep.subr.bf16.mxu0 %v10906_v44  ;;  %11035 = vmatprep.subr.bf16.mxu1 %v11034_v45  ;;  %v5338_v22 = vld [vmem:[#allocation16 + $0xe60] sm:$0xff]  ;;  %v5336_v44 = vld [vmem:[#allocation16 + $0xe50] sm:$0xff] }
 0xa7c   : > { %v5340_v45 = vld [vmem:[#allocation16 + $0xe70] sm:$0xff]  ;;  %v10924_v56 = vpack.c.bf16 %v5338_v22, %v5334_v34  ;;  %v10938_v34 = vpack.c.bf16 %v5371_v26, %v5367_v24  ;;  %v11066_v22 = vpack.c.bf16 %v5373_v28, %v5369_v27  ;;  %v4741_v24 = vld [vmem:[#allocation16 + $0x58] sm:$0xff] }
 0xa7d   : > { %v11052_v57 = vpack.c.bf16 %v5340_v45, %v5336_v44  ;;  %v5375_v44 = vld [vmem:[#allocation16 + $0xf88] sm:$0xff]  ;;  %v4745_v26 = vld [vmem:[#allocation16 + $0x78] sm:$0xff] }
 0xa7e   : > { %10909 = vmatpush1.bf16.msra.mxu0 %v10908_v58  ;;  %11037 = vmatpush1.bf16.msra.mxu1 %v11036_v59  ;;  %v5342_v58 = vld [vmem:[#allocation16 + $0xe80] sm:$0xff]  ;;  %v5379_v45 = vld [vmem:[#allocation16 + $0xfa8] sm:$0xff] }
 0xa7f   : > { %10911 = vmatprep.subr.bf16.mxu0 %v10910_v3  ;;  %11039 = vmatprep.subr.bf16.mxu1 %v11038_v5  ;;  %v5346_v59 = vld [vmem:[#allocation16 + $0xea0] sm:$0xff]  ;;  %v5344_v3 = vld [vmem:[#allocation16 + $0xe90] sm:$0xff] }
 0xa80   : > { %v5348_v5 = vld [vmem:[#allocation16 + $0xeb0] sm:$0xff]  ;;  %v10928_v60 = vpack.c.bf16 %v5346_v59, %v5342_v58  ;;  %v10942_v58 = vpack.c.bf16 %v5379_v45, %v5375_v44  ;;  %v11070_v59 = vpack.c.bf16 %v5381_v50, %v5377_v46  ;;  %v4749_v44 = vld [vmem:[#allocation16 + $0x98] sm:$0xff] }
 0xa81   : > { %v11056_v11 = vpack.c.bf16 %v5348_v5, %v5344_v3  ;;  %v5383_v3 = vld [vmem:[#allocation16 + $0xfc8] sm:$0xff]  ;;  %v4753_v45 = vld [vmem:[#allocation16 + $0xb8] sm:$0xff] }
 0xa82   : > { %10913 = vmatpush1.bf16.msra.mxu0 %v10912_v61  ;;  %11041 = vmatpush1.bf16.msra.mxu1 %v11040_v6  ;;  %v5350_v61 = vld [vmem:[#allocation16 + $0xec0] sm:$0xff]  ;;  %v5387_v5 = vld [vmem:[#allocation16 + $0xfe8] sm:$0xff] }
 0xa83   : > { %10915 = vmatprep.subr.bf16.mxu0 %v10914_v13  ;;  %11043 = vmatprep.subr.bf16.mxu1 %v11042_v14  ;;  %v5354_v6 = vld [vmem:[#allocation16 + $0xee0] sm:$0xff]  ;;  %v5352_v13 = vld [vmem:[#allocation16 + $0xed0] sm:$0xff] }
 0xa84   : > { %v5356_v14 = vld [vmem:[#allocation16 + $0xef0] sm:$0xff]  ;;  %v10932_v2 = vpack.c.bf16 %v5354_v6, %v5350_v61  ;;  %v10946_v61 = vpack.c.bf16 %v5387_v5, %v5383_v3  ;;  %v11074_v6 = vpack.c.bf16 %v5389_v8, %v5385_v7  ;;  %v4761_v3 = vld [vmem:[#allocation16 + $0xf8] sm:$0xff] }
 0xa85   : > { %v11060_v41 = vpack.c.bf16 %v5356_v14, %v5352_v13  ;;  %v4731_v13 = vld [vmem:[#allocation16 + $0x8] sm:$0xff] }
 0xa86   : > { %10917 = vmatpush1.bf16.msra.mxu0 %v10916_v16  ;;  %11045 = vmatpush1.bf16.msra.mxu1 %v11044_v17  ;;  %v5358_v16 = vld [vmem:[#allocation16 + $0xf00] sm:$0xff]  ;;  %v4735_v14 = vld [vmem:[#allocation16 + $0x28] sm:$0xff] }
 0xa87   : > { %10919 = vmatprep.subr.bf16.mxu0 %v10918_v20  ;;  %11047 = vmatprep.subr.bf16.mxu1 %v11046_v23  ;;  %v5362_v17 = vld [vmem:[#allocation16 + $0xf20] sm:$0xff]  ;;  %v5360_v20 = vld [vmem:[#allocation16 + $0xf10] sm:$0xff] }
 0xa88   : > { %v5364_v23 = vld [vmem:[#allocation16 + $0xf30] sm:$0xff]  ;;  %v10936_v4 = vpack.c.bf16 %v5362_v17, %v5358_v16  ;;  %v4730_v16 = vld [vmem:[#allocation16] sm:$0xff] }
 0xa89   : > { %v11064_v30 = vpack.c.bf16 %v5364_v23, %v5360_v20  ;;  %v4734_v17 = vld [vmem:[#allocation16 + $0x20] sm:$0xff]  ;;  %v4739_v20 = vld [vmem:[#allocation16 + $0x48] sm:$0xff] }
 0xa8a   : > { %10921 = vmatpush1.bf16.msra.mxu0 %v10920_v31  ;;  %11049 = vmatpush1.bf16.msra.mxu1 %v11048_v33  ;;  %v5366_v31 = vld [vmem:[#allocation16 + $0xf40] sm:$0xff]  ;;  %v4743_v23 = vld [vmem:[#allocation16 + $0x68] sm:$0xff]  ;;  %v11080_v27 = vpack.c.bf16 %v4734_v17, %v4730_v16 }
 0xa8b   : > { %10923 = vmatprep.subr.bf16.mxu0 %v10922_v35  ;;  %11051 = vmatprep.subr.bf16.mxu1 %v11050_v37  ;;  %v5370_v33 = vld [vmem:[#allocation16 + $0xf60] sm:$0xff]  ;;  %v5368_v35 = vld [vmem:[#allocation16 + $0xf50] sm:$0xff]  ;;  %v4771_v16 = vld [vmem:[#allocation16 + $0x148] sm:$0xff] }
 0xa8c   : > { %v5372_v37 = vld [vmem:[#allocation16 + $0xf70] sm:$0xff]  ;;  %v10940_v36 = vpack.c.bf16 %v5370_v33, %v5366_v31  ;;  %v11082_v33 = vpack.c.bf16 %v4743_v23, %v4739_v20  ;;  %v4775_v17 = vld [vmem:[#allocation16 + $0x168] sm:$0xff] }
 0xa8d   : > { %v11068_v54 = vpack.c.bf16 %v5372_v37, %v5368_v35  ;;  %v4740_v31 = vld [vmem:[#allocation16 + $0x50] sm:$0xff]  ;;  %v4747_v35 = vld [vmem:[#allocation16 + $0x88] sm:$0xff] }
 0xa8e   : > { %10925 = vmatpush1.bf16.msra.mxu0 %v10924_v56  ;;  %11053 = vmatpush1.bf16.msra.mxu1 %v11052_v57  ;;  %v5374_v56 = vld [vmem:[#allocation16 + $0xf80] sm:$0xff]  ;;  %v4751_v37 = vld [vmem:[#allocation16 + $0xa8] sm:$0xff] }
 0xa8f   : > { %10927 = vmatprep.subr.bf16.mxu0 %v10926_v62  ;;  %11055 = vmatprep.subr.bf16.mxu1 %v11054_v51  ;;  %v5378_v57 = vld [vmem:[#allocation16 + $0xfa0] sm:$0xff]  ;;  %v5376_v62 = vld [vmem:[#allocation16 + $0xf90] sm:$0xff] }
 0xa90   : > { %v5380_v51 = vld [vmem:[#allocation16 + $0xfb0] sm:$0xff]  ;;  %v10944_v9 = vpack.c.bf16 %v5378_v57, %v5374_v56  ;;  %v4750_v56 = vld [vmem:[#allocation16 + $0xa0] sm:$0xff] }
 0xa91   : > { %v11072_v10 = vpack.c.bf16 %v5380_v51, %v5376_v62  ;;  %v4748_v57 = vld [vmem:[#allocation16 + $0x90] sm:$0xff]  ;;  %v4755_v62 = vld [vmem:[#allocation16 + $0xc8] sm:$0xff]  ;;  %v4757_v51 = vld [vmem:[#allocation16 + $0xd8] sm:$0xff] }
 0xa92   : > { %10929 = vmatpush1.bf16.msra.mxu0 %v10928_v60  ;;  %11057 = vmatpush1.bf16.msra.mxu1 %v11056_v11  ;;  %v5382_v60 = vld [vmem:[#allocation16 + $0xfc0] sm:$0xff] }
 0xa93   : > { %10931 = vmatprep.subr.bf16.mxu0 %v10930_v47  ;;  %11059 = vmatprep.subr.bf16.mxu1 %v11058_v12  ;;  %v5386_v11 = vld [vmem:[#allocation16 + $0xfe0] sm:$0xff]  ;;  %v5384_v47 = vld [vmem:[#allocation16 + $0xfd0] sm:$0xff] }
 0xa94   : > { %v5388_v12 = vld [vmem:[#allocation16 + $0xff0] sm:$0xff]  ;;  %v10948_v63 = vpack.c.bf16 %v5386_v11, %v5382_v60  ;;  %v11218_v60 = vpack.c.bf16 %v4761_v3, %v4757_v51  ;;  %v4786_v3 = vld [vmem:[#allocation16 + $0x1c0] sm:$0xff] }
 0xa95   : > { %v11076_v15 = vpack.c.bf16 %v5388_v12, %v5384_v47  ;;  %v4760_v11 = vld [vmem:[#allocation16 + $0xf0] sm:$0xff]  ;;  %v4765_v47 = vld [vmem:[#allocation16 + $0x118] sm:$0xff] }
 0xa96   : > { %10933 = vmatpush1.bf16.msra.mxu0 %v10932_v2  ;;  %11061 = vmatpush1.bf16.msra.mxu1 %v11060_v41  ;;  %v11078_v2 = vpack.c.bf16 %v4735_v14, %v4731_v13  ;;  %v11206_v41 = vpack.c.bf16 %v4737_v38, %v4733_v0  ;;  %v4769_v12 = vld [vmem:[#allocation16 + $0x138] sm:$0xff]  ;;  %v4762_v38 = vld [vmem:[#allocation16 + $0x100] sm:$0xff] }
 0xa97   : > { %10935 = vmatprep.subr.bf16.mxu0 %v10934_v18  ;;  %11063 = vmatprep.subr.bf16.mxu1 %v11062_v19  ;;  %v4732_v18 = vld [vmem:[#allocation16 + $0x10] sm:$0xff] }
 0xa98   : > { %v4736_v19 = vld [vmem:[#allocation16 + $0x30] sm:$0xff] }
 0xa99   : > { %v11208_v28 = vpack.c.bf16 %v4736_v19, %v4732_v18  ;;  %v4773_v18 = vld [vmem:[#allocation16 + $0x158] sm:$0xff] }
 0xa9a   : > { %10937 = vmatpush1.bf16.msra.mxu0 %v10936_v4  ;;  %11065 = vmatpush1.bf16.msra.mxu1 %v11064_v30  ;;  %v4738_v4 = vld [vmem:[#allocation16 + $0x40] sm:$0xff]  ;;  %v4777_v19 = vld [vmem:[#allocation16 + $0x178] sm:$0xff] }
 0xa9b   : > { %10939 = vmatprep.subr.bf16.mxu0 %v10938_v34  ;;  %11067 = vmatprep.subr.bf16.mxu1 %v11066_v22  ;;  %v4742_v30 = vld [vmem:[#allocation16 + $0x60] sm:$0xff]  ;;  %v11210_v34 = vpack.c.bf16 %v4745_v26, %v4741_v24  ;;  %v4744_v22 = vld [vmem:[#allocation16 + $0x70] sm:$0xff]  ;;  %v11098_v24 = vpack.c.bf16 %v4775_v17, %v4771_v16 }
 0xa9c   : > { %v11084_v46 = vpack.c.bf16 %v4742_v30, %v4738_v4  ;;  %v11212_v50 = vpack.c.bf16 %v4744_v22, %v4740_v31  ;;  %v4770_v26 = vld [vmem:[#allocation16 + $0x140] sm:$0xff]  ;;  %v11226_v4 = vpack.c.bf16 %v4777_v19, %v4773_v18  ;;  %v4776_v30 = vld [vmem:[#allocation16 + $0x170] sm:$0xff]  ;;  %v4779_v31 = vld [vmem:[#allocation16 + $0x188] sm:$0xff] }
 0xa9d   : > { %v4785_v22 = vld [vmem:[#allocation16 + $0x1b8] sm:$0xff]  ;;  %v4802_v19 = vld [vmem:[#allocation16 + $0x240] sm:$0xff] }
 0xa9e   : > { %10941 = vmatpush1.bf16.msra.mxu0 %v10940_v36  ;;  %11069 = vmatpush1.bf16.msra.mxu1 %v11068_v54  ;;  %v11086_v36 = vpack.c.bf16 %v4751_v37, %v4747_v35  ;;  %v4746_v54 = vld [vmem:[#allocation16 + $0x80] sm:$0xff] }
 0xa9f   : > { %10943 = vmatprep.subr.bf16.mxu0 %v10942_v58  ;;  %11071 = vmatprep.subr.bf16.mxu1 %v11070_v59  ;;  %v11214_v58 = vpack.c.bf16 %v4753_v45, %v4749_v44  ;;  %v4752_v59 = vld [vmem:[#allocation16 + $0xb0] sm:$0xff]  ;;  %v11088_v5 = vpack.c.bf16 %v4750_v56, %v4746_v54  ;;  %v4778_v45 = vld [vmem:[#allocation16 + $0x180] sm:$0xff]  ;;  %v4787_v56 = vld [vmem:[#allocation16 + $0x1c8] sm:$0xff] }
 0xaa0   : > { %v11216_v7 = vpack.c.bf16 %v4752_v59, %v4748_v57  ;;  %v4784_v54 = vld [vmem:[#allocation16 + $0x1b0] sm:$0xff]  ;;  %v4791_v57 = vld [vmem:[#allocation16 + $0x1e8] sm:$0xff]  ;;  %v4793_v59 = vld [vmem:[#allocation16 + $0x1f8] sm:$0xff] }
 0xaa1   : > { %v11106_v51 = vpack.c.bf16 %v4791_v57, %v4787_v56 }
 0xaa2   : > { %10945 = vmatpush1.bf16.msra.mxu0 %v10944_v9  ;;  %11073 = vmatpush1.bf16.msra.mxu1 %v11072_v10  ;;  %v4758_v9 = vld [vmem:[#allocation16 + $0xe0] sm:$0xff]  ;;  %v4756_v10 = vld [vmem:[#allocation16 + $0xd0] sm:$0xff] }
 0xaa3   : > { %10947 = vmatprep.subr.bf16.mxu0 %v10946_v61  ;;  %11075 = vmatprep.subr.bf16.mxu1 %v11074_v6  ;;  %v4763_v61 = vld [vmem:[#allocation16 + $0x108] sm:$0xff]  ;;  %v11220_v14 = vpack.c.bf16 %v4760_v11, %v4756_v10  ;;  %v4801_v11 = vld [vmem:[#allocation16 + $0x238] sm:$0xff] }
 0xaa4   : > { %v4767_v6 = vld [vmem:[#allocation16 + $0x128] sm:$0xff] }
 0xaa5   : > { %v11094_v0 = vpack.c.bf16 %v4767_v6, %v4763_v61  ;;  %v4799_v10 = vld [vmem:[#allocation16 + $0x228] sm:$0xff] }
 0xaa6   : > { %10949 = vmatpush1.bf16.msra.mxu0 %v10948_v63  ;;  %11077 = vmatpush1.bf16.msra.mxu1 %v11076_v15  ;;  %v4766_v63 = vld [vmem:[#allocation16 + $0x120] sm:$0xff]  ;;  %v4764_v15 = vld [vmem:[#allocation16 + $0x110] sm:$0xff] }
 0xaa7   : > { %11079 = vmatprep.subr.bf16.mxu0 %v11078_v2  ;;  %11207 = vmatprep.subr.bf16.mxu1 %v11206_v41  ;;  %v11222_v2 = vpack.c.bf16 %v4769_v12, %v4765_v47  ;;  %v4768_v41 = vld [vmem:[#allocation16 + $0x130] sm:$0xff]  ;;  %v11096_v20 = vpack.c.bf16 %v4766_v63, %v4762_v38  ;;  %v4794_v12 = vld [vmem:[#allocation16 + $0x200] sm:$0xff]  ;;  %v4803_v63 = vld [vmem:[#allocation16 + $0x248] sm:$0xff] }
 0xaa8   : > { %v11224_v23 = vpack.c.bf16 %v4768_v41, %v4764_v15  ;;  %v4800_v38 = vld [vmem:[#allocation16 + $0x230] sm:$0xff]  ;;  %v4807_v15 = vld [vmem:[#allocation16 + $0x268] sm:$0xff]  ;;  %v4809_v41 = vld [vmem:[#allocation16 + $0x278] sm:$0xff] }
 0xaa9   : > { %5526 = vmatmul.mubr.f32.vlgmr.msra.gmra.mrb[20].mxu0 %v13804_v55  ;;  %5668 = vmatmul.mubr.f32.vlgmr.msra.gmra.mrb[20].mxu1 %v13804_v55  ;;  %v4759_v55 = vld [vmem:[#allocation16 + $0xe8] sm:$0xff]  ;;  %v11114_v18 = vpack.c.bf16 %v4807_v15, %v4803_v63 }
 0xaaa   : > { %11081 = vmatpush1.bf16.msra.mxu0 %v11080_v27  ;;  %5738 = vmatprep.mubr.f32.mxu0 %v13798_v25  ;;  %v11090_v8 = vpack.c.bf16 %v4759_v55, %v4755_v62  ;;  %v4774_v27 = vld [vmem:[#allocation16 + $0x160] sm:$0xff] }
 0xaab   : > { %11209 = vmatpush1.bf16.msra.mxu1 %v11208_v28  ;;  %5880 = vmatprep.mubr.f32.mxu1 %v13798_v25  ;;  %v4754_v25 = vld [vmem:[#allocation16 + $0xc0] sm:$0xff]  ;;  %v4772_v28 = vld [vmem:[#allocation16 + $0x150] sm:$0xff]  ;;  %v11100_v35 = vpack.c.bf16 %v4774_v27, %v4770_v26  ;;  %v4811_v27 = vld [vmem:[#allocation16 + $0x288] sm:$0xff] }
 0xaac   : > { %11083 = vmatprep.subr.bf16.mxu0 %v11082_v33  ;;  %11211 = vmatprep.subr.bf16.mxu1 %v11210_v34  ;;  %v11092_v13 = vpack.c.bf16 %v4758_v9, %v4754_v25  ;;  %v4783_v33 = vld [vmem:[#allocation16 + $0x1a8] sm:$0xff]  ;;  %v4781_v34 = vld [vmem:[#allocation16 + $0x198] sm:$0xff]  ;;  %v11228_v37 = vpack.c.bf16 %v4776_v30, %v4772_v28  ;;  %v4792_v25 = vld [vmem:[#allocation16 + $0x1f0] sm:$0xff] }
 0xaad   : > { %v11102_v44 = vpack.c.bf16 %v4783_v33, %v4779_v31  ;;  %v4795_v9 = vld [vmem:[#allocation16 + $0x208] sm:$0xff]  ;;  %v4808_v26 = vld [vmem:[#allocation16 + $0x270] sm:$0xff]  ;;  %v4817_v30 = vld [vmem:[#allocation16 + $0x2b8] sm:$0xff] }
 0xaae   : > { %11085 = vmatpush1.bf16.msra.mxu0 %v11084_v46  ;;  %v4782_v46 = vld [vmem:[#allocation16 + $0x1a0] sm:$0xff]  ;;  %v11110_v47 = vpack.c.bf16 %v4799_v10, %v4795_v9  ;;  %v4815_v28 = vld [vmem:[#allocation16 + $0x2a8] sm:$0xff] }
 0xaaf   : > { %11213 = vmatpush1.bf16.msra.mxu1 %v11212_v50  ;;  %11087 = vmatprep.subr.bf16.mxu0 %v11086_v36  ;;  %v4780_v50 = vld [vmem:[#allocation16 + $0x190] sm:$0xff]  ;;  %v11230_v36 = vpack.c.bf16 %v4785_v22, %v4781_v34  ;;  %v11104_v62 = vpack.c.bf16 %v4782_v46, %v4778_v45  ;;  %v11118_v34 = vpack.c.bf16 %v4815_v28, %v4811_v27  ;;  %v4810_v22 = vld [vmem:[#allocation16 + $0x280] sm:$0xff]  ;;  %v4819_v46 = vld [vmem:[#allocation16 + $0x2c8] sm:$0xff] }
 0xab0   : > { %11215 = vmatprep.subr.bf16.mxu1 %v11214_v58  ;;  %v4789_v58 = vld [vmem:[#allocation16 + $0x1d8] sm:$0xff]  ;;  %v11232_v55 = vpack.c.bf16 %v4784_v54, %v4780_v50  ;;  %v4816_v45 = vld [vmem:[#allocation16 + $0x2b0] sm:$0xff]  ;;  %v4823_v50 = vld [vmem:[#allocation16 + $0x2e8] sm:$0xff] }
 0xab1   : > { %v4825_v54 = vld [vmem:[#allocation16 + $0x2f8] sm:$0xff] }
 0xab2   : > { %11089 = vmatpush1.bf16.msra.mxu0 %v11088_v5  ;;  %v4790_v5 = vld [vmem:[#allocation16 + $0x1e0] sm:$0xff] }
 0xab3   : > { %11217 = vmatpush1.bf16.msra.mxu1 %v11216_v7  ;;  %11091 = vmatprep.subr.bf16.mxu0 %v11090_v8  ;;  %v4788_v7 = vld [vmem:[#allocation16 + $0x1d0] sm:$0xff]  ;;  %v11234_v8 = vpack.c.bf16 %v4793_v59, %v4789_v58  ;;  %v11108_v61 = vpack.c.bf16 %v4790_v5, %v4786_v3  ;;  %v11122_v58 = vpack.c.bf16 %v4823_v50, %v4819_v46  ;;  %v4818_v59 = vld [vmem:[#allocation16 + $0x2c0] sm:$0xff]  ;;  %v4827_v5 = vld [vmem:[#allocation16 + $0x308] sm:$0xff] }
 0xab4   : > { %11219 = vmatprep.subr.bf16.mxu1 %v11218_v60  ;;  %v4797_v60 = vld [vmem:[#allocation16 + $0x218] sm:$0xff]  ;;  %v11236_v6 = vpack.c.bf16 %v4792_v25, %v4788_v7  ;;  %v4824_v3 = vld [vmem:[#allocation16 + $0x2f0] sm:$0xff]  ;;  %v4831_v7 = vld [vmem:[#allocation16 + $0x328] sm:$0xff] }
 0xab5   : > { %v4833_v25 = vld [vmem:[#allocation16 + $0x338] sm:$0xff] }
 0xab6   : > { %11093 = vmatpush1.bf16.msra.mxu0 %v11092_v13  ;;  %v4798_v13 = vld [vmem:[#allocation16 + $0x220] sm:$0xff] }
 0xab7   : > { %11221 = vmatpush1.bf16.msra.mxu1 %v11220_v14  ;;  %11095 = vmatprep.subr.bf16.mxu0 %v11094_v0  ;;  %v4796_v14 = vld [vmem:[#allocation16 + $0x210] sm:$0xff]  ;;  %v11238_v0 = vpack.c.bf16 %v4801_v11, %v4797_v60  ;;  %v11112_v16 = vpack.c.bf16 %v4798_v13, %v4794_v12  ;;  %v11126_v60 = vpack.c.bf16 %v4831_v7, %v4827_v5  ;;  %v4826_v11 = vld [vmem:[#allocation16 + $0x300] sm:$0xff]  ;;  %v4835_v13 = vld [vmem:[#allocation16 + $0x348] sm:$0xff] }
 0xab8   : > { %11223 = vmatprep.subr.bf16.mxu1 %v11222_v2  ;;  %v4805_v2 = vld [vmem:[#allocation16 + $0x258] sm:$0xff]  ;;  %v11240_v17 = vpack.c.bf16 %v4800_v38, %v4796_v14  ;;  %v4832_v12 = vld [vmem:[#allocation16 + $0x330] sm:$0xff]  ;;  %v4839_v14 = vld [vmem:[#allocation16 + $0x368] sm:$0xff] }
 0xab9   : > { %v4841_v38 = vld [vmem:[#allocation16 + $0x378] sm:$0xff] }
 0xaba   : > { %11097 = vmatpush1.bf16.msra.mxu0 %v11096_v20  ;;  %v4806_v20 = vld [vmem:[#allocation16 + $0x260] sm:$0xff] }
 0xabb   : > { %11225 = vmatpush1.bf16.msra.mxu1 %v11224_v23  ;;  %11099 = vmatprep.subr.bf16.mxu0 %v11098_v24  ;;  %v4804_v23 = vld [vmem:[#allocation16 + $0x250] sm:$0xff]  ;;  %v11242_v24 = vpack.c.bf16 %v4809_v41, %v4805_v2  ;;  %v11116_v31 = vpack.c.bf16 %v4806_v20, %v4802_v19  ;;  %v11130_v2 = vpack.c.bf16 %v4839_v14, %v4835_v13  ;;  %v4834_v41 = vld [vmem:[#allocation16 + $0x340] sm:$0xff]  ;;  %v4843_v20 = vld [vmem:[#allocation16 + $0x388] sm:$0xff] }
 0xabc   : > { %11227 = vmatprep.subr.bf16.mxu1 %v11226_v4  ;;  %v4813_v4 = vld [vmem:[#allocation16 + $0x298] sm:$0xff]  ;;  %v11244_v33 = vpack.c.bf16 %v4808_v26, %v4804_v23  ;;  %v4840_v19 = vld [vmem:[#allocation16 + $0x370] sm:$0xff]  ;;  %v4847_v23 = vld [vmem:[#allocation16 + $0x3a8] sm:$0xff] }
 0xabd   : > { %v4849_v26 = vld [vmem:[#allocation16 + $0x3b8] sm:$0xff] }
 0xabe   : > { %11101 = vmatpush1.bf16.msra.mxu0 %v11100_v35  ;;  %v4814_v35 = vld [vmem:[#allocation16 + $0x2a0] sm:$0xff]  ;;  %v4873_v13 = vld [vmem:[#allocation16 + $0x478] sm:$0xff] }
 0xabf   : > { %11229 = vmatpush1.bf16.msra.mxu1 %v11228_v37  ;;  %11103 = vmatprep.subr.bf16.mxu0 %v11102_v44  ;;  %v4812_v37 = vld [vmem:[#allocation16 + $0x290] sm:$0xff]  ;;  %v11246_v44 = vpack.c.bf16 %v4817_v30, %v4813_v4  ;;  %v11120_v56 = vpack.c.bf16 %v4814_v35, %v4810_v22  ;;  %v11134_v4 = vpack.c.bf16 %v4847_v23, %v4843_v20  ;;  %v4842_v30 = vld [vmem:[#allocation16 + $0x380] sm:$0xff]  ;;  %v4851_v35 = vld [vmem:[#allocation16 + $0x3c8] sm:$0xff] }
 0xac0   : > { %11231 = vmatprep.subr.bf16.mxu1 %v11230_v36  ;;  %v4821_v36 = vld [vmem:[#allocation16 + $0x2d8] sm:$0xff]  ;;  %v11248_v57 = vpack.c.bf16 %v4816_v45, %v4812_v37  ;;  %v4848_v22 = vld [vmem:[#allocation16 + $0x3b0] sm:$0xff]  ;;  %v4855_v37 = vld [vmem:[#allocation16 + $0x3e8] sm:$0xff] }
 0xac1   : > { %v4857_v45 = vld [vmem:[#allocation16 + $0x3f8] sm:$0xff] }
 0xac2   : > { %11105 = vmatpush1.bf16.msra.mxu0 %v11104_v62  ;;  %v4822_v62 = vld [vmem:[#allocation16 + $0x2e0] sm:$0xff] }
 0xac3   : > { %11233 = vmatpush1.bf16.msra.mxu1 %v11232_v55  ;;  %11107 = vmatprep.subr.bf16.mxu0 %v11106_v51  ;;  %v4820_v55 = vld [vmem:[#allocation16 + $0x2d0] sm:$0xff]  ;;  %v11250_v51 = vpack.c.bf16 %v4825_v54, %v4821_v36  ;;  %v11124_v9 = vpack.c.bf16 %v4822_v62, %v4818_v59  ;;  %v11138_v36 = vpack.c.bf16 %v4855_v37, %v4851_v35  ;;  %v4850_v54 = vld [vmem:[#allocation16 + $0x3c0] sm:$0xff]  ;;  %v4859_v62 = vld [vmem:[#allocation16 + $0x408] sm:$0xff] }
 0xac4   : > { %11235 = vmatprep.subr.bf16.mxu1 %v11234_v8  ;;  %v4829_v8 = vld [vmem:[#allocation16 + $0x318] sm:$0xff]  ;;  %v11252_v10 = vpack.c.bf16 %v4824_v3, %v4820_v55  ;;  %v4856_v59 = vld [vmem:[#allocation16 + $0x3f0] sm:$0xff]  ;;  %v4863_v55 = vld [vmem:[#allocation16 + $0x428] sm:$0xff] }
 0xac5   : > { %v4865_v3 = vld [vmem:[#allocation16 + $0x438] sm:$0xff] }
 0xac6   : > { %11109 = vmatpush1.bf16.msra.mxu0 %v11108_v61  ;;  %v4830_v61 = vld [vmem:[#allocation16 + $0x320] sm:$0xff] }
 0xac7   : > { %11237 = vmatpush1.bf16.msra.mxu1 %v11236_v6  ;;  %11111 = vmatprep.subr.bf16.mxu0 %v11110_v47  ;;  %v4828_v6 = vld [vmem:[#allocation16 + $0x310] sm:$0xff]  ;;  %v11254_v47 = vpack.c.bf16 %v4833_v25, %v4829_v8  ;;  %v11128_v63 = vpack.c.bf16 %v4830_v61, %v4826_v11  ;;  %v11142_v8 = vpack.c.bf16 %v4863_v55, %v4859_v62  ;;  %v4858_v25 = vld [vmem:[#allocation16 + $0x400] sm:$0xff]  ;;  %v4867_v61 = vld [vmem:[#allocation16 + $0x448] sm:$0xff] }
 0xac8   : > { %11239 = vmatprep.subr.bf16.mxu1 %v11238_v0  ;;  %v4837_v0 = vld [vmem:[#allocation16 + $0x358] sm:$0xff]  ;;  %v11256_v15 = vpack.c.bf16 %v4832_v12, %v4828_v6  ;;  %v4864_v11 = vld [vmem:[#allocation16 + $0x430] sm:$0xff]  ;;  %v4871_v6 = vld [vmem:[#allocation16 + $0x468] sm:$0xff] }
 0xac9   : > { %v4869_v12 = vld [vmem:[#allocation16 + $0x458] sm:$0xff]  ;;  %v4890_v55 = vld [vmem:[#allocation16 + $0x500] sm:$0xff] }
 0xaca   : > { %11113 = vmatpush1.bf16.msra.mxu0 %v11112_v16  ;;  %v4838_v16 = vld [vmem:[#allocation16 + $0x360] sm:$0xff] }
 0xacb   : > { %11241 = vmatpush1.bf16.msra.mxu1 %v11240_v17  ;;  %11115 = vmatprep.subr.bf16.mxu0 %v11114_v18  ;;  %v4836_v17 = vld [vmem:[#allocation16 + $0x350] sm:$0xff]  ;;  %v11258_v18 = vpack.c.bf16 %v4841_v38, %v4837_v0  ;;  %v11132_v27 = vpack.c.bf16 %v4838_v16, %v4834_v41  ;;  %v4866_v0 = vld [vmem:[#allocation16 + $0x440] sm:$0xff]  ;;  %v4875_v41 = vld [vmem:[#allocation16 + $0x488] sm:$0xff] }
 0xacc   : > { %11243 = vmatprep.subr.bf16.mxu1 %v11242_v24  ;;  %v4845_v24 = vld [vmem:[#allocation16 + $0x398] sm:$0xff]  ;;  %v11260_v28 = vpack.c.bf16 %v4840_v19, %v4836_v17  ;;  %v4870_v38 = vld [vmem:[#allocation16 + $0x460] sm:$0xff]  ;;  %v4879_v16 = vld [vmem:[#allocation16 + $0x4a8] sm:$0xff]  ;;  %v11274_v17 = vpack.c.bf16 %v4873_v13, %v4869_v12 }
 0xacd   : > { %v4881_v19 = vld [vmem:[#allocation16 + $0x4b8] sm:$0xff]  ;;  %v11148_v20 = vpack.c.bf16 %v4870_v38, %v4866_v0  ;;  %v4900_v12 = vld [vmem:[#allocation16 + $0x550] sm:$0xff]  ;;  %v4907_v0 = vld [vmem:[#allocation16 + $0x588] sm:$0xff] }
 0xace   : > { %11117 = vmatpush1.bf16.msra.mxu0 %v11116_v31  ;;  %v4846_v31 = vld [vmem:[#allocation16 + $0x3a0] sm:$0xff]  ;;  %v4911_v38 = vld [vmem:[#allocation16 + $0x5a8] sm:$0xff] }
 0xacf   : > { %11245 = vmatpush1.bf16.msra.mxu1 %v11244_v33  ;;  %11119 = vmatprep.subr.bf16.mxu0 %v11118_v34  ;;  %v4844_v33 = vld [vmem:[#allocation16 + $0x390] sm:$0xff]  ;;  %v11262_v34 = vpack.c.bf16 %v4849_v26, %v4845_v24  ;;  %v11136_v46 = vpack.c.bf16 %v4846_v31, %v4842_v30  ;;  %v11150_v24 = vpack.c.bf16 %v4879_v16, %v4875_v41  ;;  %v4874_v26 = vld [vmem:[#allocation16 + $0x480] sm:$0xff]  ;;  %v4883_v31 = vld [vmem:[#allocation16 + $0x4c8] sm:$0xff] }
 0xad0   : > { %11247 = vmatprep.subr.bf16.mxu1 %v11246_v44  ;;  %v4853_v44 = vld [vmem:[#allocation16 + $0x3d8] sm:$0xff]  ;;  %v11264_v50 = vpack.c.bf16 %v4848_v22, %v4844_v33  ;;  %v4880_v30 = vld [vmem:[#allocation16 + $0x4b0] sm:$0xff]  ;;  %v4887_v33 = vld [vmem:[#allocation16 + $0x4e8] sm:$0xff]  ;;  %v11166_v16 = vpack.c.bf16 %v4911_v38, %v4907_v0 }
 0xad1   : > { %v11154_v37 = vpack.c.bf16 %v4887_v33, %v4883_v31  ;;  %v4914_v33 = vld [vmem:[#allocation16 + $0x5c0] sm:$0xff] }
 0xad2   : > { %11121 = vmatpush1.bf16.msra.mxu0 %v11120_v56  ;;  %v4854_v56 = vld [vmem:[#allocation16 + $0x3e0] sm:$0xff] }
 0xad3   : > { %11249 = vmatpush1.bf16.msra.mxu1 %v11248_v57  ;;  %11123 = vmatprep.subr.bf16.mxu0 %v11122_v58  ;;  %v4852_v57 = vld [vmem:[#allocation16 + $0x3d0] sm:$0xff]  ;;  %v11266_v58 = vpack.c.bf16 %v4857_v45, %v4853_v44  ;;  %v11140_v5 = vpack.c.bf16 %v4854_v56, %v4850_v54  ;;  %v4882_v44 = vld [vmem:[#allocation16 + $0x4c0] sm:$0xff]  ;;  %v4895_v54 = vld [vmem:[#allocation16 + $0x528] sm:$0xff] }
 0xad4   : > { %11251 = vmatprep.subr.bf16.mxu1 %v11250_v51  ;;  %v4861_v51 = vld [vmem:[#allocation16 + $0x418] sm:$0xff]  ;;  %v11268_v7 = vpack.c.bf16 %v4856_v59, %v4852_v57  ;;  %v4886_v45 = vld [vmem:[#allocation16 + $0x4e0] sm:$0xff] }
 0xad5   : > { %v4893_v56 = vld [vmem:[#allocation16 + $0x518] sm:$0xff]  ;;  %v4938_v38 = vld [vmem:[#allocation16 + $0x680] sm:$0xff] }
 0xad6   : > { %11125 = vmatpush1.bf16.msra.mxu0 %v11124_v9  ;;  %v4862_v9 = vld [vmem:[#allocation16 + $0x420] sm:$0xff]  ;;  %v4897_v57 = vld [vmem:[#allocation16 + $0x538] sm:$0xff] }
 0xad7   : > { %11253 = vmatpush1.bf16.msra.mxu1 %v11252_v10  ;;  %11127 = vmatprep.subr.bf16.mxu0 %v11126_v60  ;;  %v11270_v10 = vpack.c.bf16 %v4865_v3, %v4861_v51  ;;  %v4860_v60 = vld [vmem:[#allocation16 + $0x410] sm:$0xff]  ;;  %v4894_v51 = vld [vmem:[#allocation16 + $0x520] sm:$0xff] }
 0xad8   : > { %11255 = vmatprep.subr.bf16.mxu1 %v11254_v47  ;;  %v11144_v47 = vpack.c.bf16 %v4862_v9, %v4858_v25  ;;  %v11272_v14 = vpack.c.bf16 %v4864_v11, %v4860_v60  ;;  %v4892_v3 = vld [vmem:[#allocation16 + $0x510] sm:$0xff]  ;;  %v4903_v25 = vld [vmem:[#allocation16 + $0x568] sm:$0xff]  ;;  %v4901_v9 = vld [vmem:[#allocation16 + $0x558] sm:$0xff]  ;;  %v11160_v60 = vpack.c.bf16 %v4894_v51, %v4890_v55 }
 0xad9   : > { %v4935_v55 = vld [vmem:[#allocation16 + $0x668] sm:$0xff]  ;;  %v4933_v51 = vld [vmem:[#allocation16 + $0x658] sm:$0xff] }
 0xada   : > { %11129 = vmatpush1.bf16.msra.mxu0 %v11128_v63  ;;  %v4868_v63 = vld [vmem:[#allocation16 + $0x450] sm:$0xff] }
 0xadb   : > { %11257 = vmatpush1.bf16.msra.mxu1 %v11256_v15  ;;  %11131 = vmatprep.subr.bf16.mxu0 %v11130_v2  ;;  %v11146_v15 = vpack.c.bf16 %v4871_v6, %v4867_v61  ;;  %v4872_v2 = vld [vmem:[#allocation16 + $0x470] sm:$0xff]  ;;  %v4898_v6 = vld [vmem:[#allocation16 + $0x540] sm:$0xff] }
 0xadc   : > { %11259 = vmatprep.subr.bf16.mxu1 %v11258_v18  ;;  %v4877_v18 = vld [vmem:[#allocation16 + $0x498] sm:$0xff]  ;;  %v11276_v23 = vpack.c.bf16 %v4872_v2, %v4868_v63 }
 0xadd   : > { %v4909_v63 = vld [vmem:[#allocation16 + $0x598] sm:$0xff] }
 0xade   : > { %11133 = vmatpush1.bf16.msra.mxu0 %v11132_v27  ;;  %v4878_v27 = vld [vmem:[#allocation16 + $0x4a0] sm:$0xff] }
 0xadf   : > { %11261 = vmatpush1.bf16.msra.mxu1 %v11260_v28  ;;  %11135 = vmatprep.subr.bf16.mxu0 %v11134_v4  ;;  %v4876_v28 = vld [vmem:[#allocation16 + $0x490] sm:$0xff]  ;;  %v11278_v4 = vpack.c.bf16 %v4881_v19, %v4877_v18  ;;  %v11152_v22 = vpack.c.bf16 %v4878_v27, %v4874_v26  ;;  %v4910_v18 = vld [vmem:[#allocation16 + $0x5a0] sm:$0xff]  ;;  %v4919_v26 = vld [vmem:[#allocation16 + $0x5e8] sm:$0xff] }
 0xae0   : > { %11263 = vmatprep.subr.bf16.mxu1 %v11262_v34  ;;  %v4885_v34 = vld [vmem:[#allocation16 + $0x4d8] sm:$0xff]  ;;  %v11280_v35 = vpack.c.bf16 %v4880_v30, %v4876_v28  ;;  %v4908_v19 = vld [vmem:[#allocation16 + $0x590] sm:$0xff] }
 0xae1   : > { %v4917_v27 = vld [vmem:[#allocation16 + $0x5d8] sm:$0xff] }
 0xae2   : > { %11137 = vmatpush1.bf16.msra.mxu0 %v11136_v46  ;;  %v4884_v46 = vld [vmem:[#allocation16 + $0x4d0] sm:$0xff]  ;;  %v4921_v28 = vld [vmem:[#allocation16 + $0x5f8] sm:$0xff] }
 0xae3   : > { %11265 = vmatpush1.bf16.msra.mxu1 %v11264_v50  ;;  %11139 = vmatprep.subr.bf16.mxu0 %v11138_v36  ;;  %v4891_v36 = vld [vmem:[#allocation16 + $0x508] sm:$0xff] }
 0xae4   : > { %11267 = vmatprep.subr.bf16.mxu1 %v11266_v58  ;;  %v11156_v58 = vpack.c.bf16 %v4886_v45, %v4882_v44  ;;  %v11158_v62 = vpack.c.bf16 %v4895_v54, %v4891_v36  ;;  %v4927_v44 = vld [vmem:[#allocation16 + $0x628] sm:$0xff]  ;;  %v4925_v45 = vld [vmem:[#allocation16 + $0x618] sm:$0xff]  ;;  %v4922_v54 = vld [vmem:[#allocation16 + $0x600] sm:$0xff] }
 0xae6   : > { %11141 = vmatpush1.bf16.msra.mxu0 %v11140_v5  ;;  %v11286_v5 = vpack.c.bf16 %v4897_v57, %v4893_v56  ;;  %v4926_v56 = vld [vmem:[#allocation16 + $0x620] sm:$0xff]  ;;  %v4924_v57 = vld [vmem:[#allocation16 + $0x610] sm:$0xff] }
 0xae7   : > { %11269 = vmatpush1.bf16.msra.mxu1 %v11268_v7  ;;  %11143 = vmatprep.subr.bf16.mxu0 %v11142_v8  ;;  %v4896_v7 = vld [vmem:[#allocation16 + $0x530] sm:$0xff]  ;;  %v4899_v8 = vld [vmem:[#allocation16 + $0x548] sm:$0xff] }
 0xae8   : > { %11271 = vmatprep.subr.bf16.mxu1 %v11270_v10  ;;  %v4905_v10 = vld [vmem:[#allocation16 + $0x578] sm:$0xff]  ;;  %v11288_v11 = vpack.c.bf16 %v4896_v7, %v4892_v3  ;;  %v11162_v61 = vpack.c.bf16 %v4903_v25, %v4899_v8  ;;  %v4930_v25 = vld [vmem:[#allocation16 + $0x640] sm:$0xff] }
 0xae9   : > { %5739 = vmatmul.mubr.f32.vlgmr.msra.gmra.mrb[20].mxu0 %v13796_v21  ;;  %v11290_v13 = vpack.c.bf16 %v4905_v10, %v4901_v9  ;;  %v4937_v3 = vld [vmem:[#allocation16 + $0x678] sm:$0xff]  ;;  %v4934_v9 = vld [vmem:[#allocation16 + $0x660] sm:$0xff]  ;;  %v4932_v10 = vld [vmem:[#allocation16 + $0x650] sm:$0xff] }
 0xaea   : > { %5881 = vmatmul.mubr.f32.vlgmr.msra.gmra.mrb[20].mxu1 %v13796_v21  ;;  %11145 = vmatpush1.bf16.msra.mxu0 %v11144_v47  ;;  %v4889_v21 = vld [vmem:[#allocation16 + $0x4f8] sm:$0xff]  ;;  %v4902_v47 = vld [vmem:[#allocation16 + $0x560] sm:$0xff] }
 0xaeb   : > { %5809 = vmatprep.mubr.f32.mxu0 %v13802_v32  ;;  %11273 = vmatpush1.bf16.msra.mxu1 %v11272_v14  ;;  %v11282_v50 = vpack.c.bf16 %v4889_v21, %v4885_v34  ;;  %v4904_v14 = vld [vmem:[#allocation16 + $0x570] sm:$0xff]  ;;  %v11164_v2 = vpack.c.bf16 %v4902_v47, %v4898_v6  ;;  %v4918_v34 = vld [vmem:[#allocation16 + $0x5e0] sm:$0xff]  ;;  %v4943_v6 = vld [vmem:[#allocation16 + $0x6a8] sm:$0xff] }
 0xaec   : > { %5951 = vmatprep.mubr.f32.mxu1 %v13802_v32  ;;  %11147 = vmatprep.subr.bf16.mxu0 %v11146_v15  ;;  %v4888_v32 = vld [vmem:[#allocation16 + $0x4f0] sm:$0xff]  ;;  %v4913_v15 = vld [vmem:[#allocation16 + $0x5b8] sm:$0xff]  ;;  %v11292_v41 = vpack.c.bf16 %v4904_v14, %v4900_v12 }
 0xaed   : > { %11275 = vmatprep.subr.bf16.mxu1 %v11274_v17  ;;  %v11284_v59 = vpack.c.bf16 %v4888_v32, %v4884_v46  ;;  %v4906_v17 = vld [vmem:[#allocation16 + $0x580] sm:$0xff]  ;;  %v4916_v21 = vld [vmem:[#allocation16 + $0x5d0] sm:$0xff]  ;;  %v4929_v46 = vld [vmem:[#allocation16 + $0x638] sm:$0xff] }
 0xaee   : > { %11149 = vmatpush1.bf16.msra.mxu0 %v11148_v20  ;;  %v11294_v20 = vpack.c.bf16 %v4913_v15, %v4909_v63  ;;  %v4941_v47 = vld [vmem:[#allocation16 + $0x698] sm:$0xff]  ;;  %v4942_v63 = vld [vmem:[#allocation16 + $0x6a0] sm:$0xff]  ;;  %v4940_v15 = vld [vmem:[#allocation16 + $0x690] sm:$0xff] }
 0xaef   : > { %11277 = vmatpush1.bf16.msra.mxu1 %v11276_v23  ;;  %11151 = vmatprep.subr.bf16.mxu0 %v11150_v24  ;;  %v4912_v23 = vld [vmem:[#allocation16 + $0x5b0] sm:$0xff]  ;;  %v4915_v24 = vld [vmem:[#allocation16 + $0x5c8] sm:$0xff]  ;;  %v4945_v12 = vld [vmem:[#allocation16 + $0x6b8] sm:$0xff] }
 0xaf0   : > { %11279 = vmatprep.subr.bf16.mxu1 %v11278_v4  ;;  %v11168_v4 = vpack.c.bf16 %v4910_v18, %v4906_v17  ;;  %v11296_v30 = vpack.c.bf16 %v4912_v23, %v4908_v19  ;;  %v11170_v31 = vpack.c.bf16 %v4919_v26, %v4915_v24  ;;  %v4951_v17 = vld [vmem:[#allocation16 + $0x6e8] sm:$0xff]  ;;  %v4949_v18 = vld [vmem:[#allocation16 + $0x6d8] sm:$0xff]  ;;  %v4946_v26 = vld [vmem:[#allocation16 + $0x6c0] sm:$0xff] }
 0xaf1   : > { %v4953_v19 = vld [vmem:[#allocation16 + $0x6f8] sm:$0xff] }
 0xaf2   : > { %11153 = vmatpush1.bf16.msra.mxu0 %v11152_v22  ;;  %v11298_v22 = vpack.c.bf16 %v4921_v28, %v4917_v27  ;;  %v4950_v27 = vld [vmem:[#allocation16 + $0x6e0] sm:$0xff]  ;;  %v4948_v28 = vld [vmem:[#allocation16 + $0x6d0] sm:$0xff] }
 0xaf3   : > { %11281 = vmatpush1.bf16.msra.mxu1 %v11280_v35  ;;  %11155 = vmatprep.subr.bf16.mxu0 %v11154_v37  ;;  %v4920_v35 = vld [vmem:[#allocation16 + $0x5f0] sm:$0xff]  ;;  %v4923_v37 = vld [vmem:[#allocation16 + $0x608] sm:$0xff] }
 0xaf4   : > { %11283 = vmatprep.subr.bf16.mxu1 %v11282_v50  ;;  %v11172_v50 = vpack.c.bf16 %v4918_v34, %v4914_v33  ;;  %v11300_v32 = vpack.c.bf16 %v4920_v35, %v4916_v21  ;;  %v11174_v36 = vpack.c.bf16 %v4927_v44, %v4923_v37  ;;  %v4959_v33 = vld [vmem:[#allocation16 + $0x728] sm:$0xff]  ;;  %v4957_v34 = vld [vmem:[#allocation16 + $0x718] sm:$0xff]  ;;  %v4954_v44 = vld [vmem:[#allocation16 + $0x700] sm:$0xff] }
 0xaf5   : > { %v4961_v21 = vld [vmem:[#allocation16 + $0x738] sm:$0xff] }
 0xaf6   : > { %11157 = vmatpush1.bf16.msra.mxu0 %v11156_v58  ;;  %v11302_v58 = vpack.c.bf16 %v4929_v46, %v4925_v45  ;;  %v4958_v45 = vld [vmem:[#allocation16 + $0x720] sm:$0xff]  ;;  %v4956_v46 = vld [vmem:[#allocation16 + $0x710] sm:$0xff] }
 0xaf7   : > { %11285 = vmatpush1.bf16.msra.mxu1 %v11284_v59  ;;  %11159 = vmatprep.subr.bf16.mxu0 %v11158_v62  ;;  %v4928_v59 = vld [vmem:[#allocation16 + $0x630] sm:$0xff]  ;;  %v4931_v62 = vld [vmem:[#allocation16 + $0x648] sm:$0xff] }
 0xaf8   : > { %11287 = vmatprep.subr.bf16.mxu1 %v11286_v5  ;;  %v11176_v5 = vpack.c.bf16 %v4926_v56, %v4922_v54  ;;  %v11304_v7 = vpack.c.bf16 %v4928_v59, %v4924_v57  ;;  %v11178_v8 = vpack.c.bf16 %v4935_v55, %v4931_v62  ;;  %v4967_v54 = vld [vmem:[#allocation16 + $0x768] sm:$0xff]  ;;  %v4965_v56 = vld [vmem:[#allocation16 + $0x758] sm:$0xff]  ;;  %v4962_v55 = vld [vmem:[#allocation16 + $0x740] sm:$0xff] }
 0xaf9   : > { %v4969_v57 = vld [vmem:[#allocation16 + $0x778] sm:$0xff] }
 0xafa   : > { %11161 = vmatpush1.bf16.msra.mxu0 %v11160_v60  ;;  %v11306_v60 = vpack.c.bf16 %v4937_v3, %v4933_v51  ;;  %v4966_v51 = vld [vmem:[#allocation16 + $0x760] sm:$0xff]  ;;  %v4964_v3 = vld [vmem:[#allocation16 + $0x750] sm:$0xff] }
 0xafb   : > { %11289 = vmatpush1.bf16.msra.mxu1 %v11288_v11  ;;  %11163 = vmatprep.subr.bf16.mxu0 %v11162_v61  ;;  %v4936_v11 = vld [vmem:[#allocation16 + $0x670] sm:$0xff]  ;;  %v4939_v61 = vld [vmem:[#allocation16 + $0x688] sm:$0xff] }
 0xafc   : > { %11291 = vmatprep.subr.bf16.mxu1 %v11290_v13  ;;  %v11180_v13 = vpack.c.bf16 %v4934_v9, %v4930_v25  ;;  %v11308_v14 = vpack.c.bf16 %v4936_v11, %v4932_v10  ;;  %v11182_v0 = vpack.c.bf16 %v4943_v6, %v4939_v61  ;;  %v4975_v25 = vld [vmem:[#allocation16 + $0x7a8] sm:$0xff]  ;;  %v4973_v9 = vld [vmem:[#allocation16 + $0x798] sm:$0xff]  ;;  %v4970_v6 = vld [vmem:[#allocation16 + $0x780] sm:$0xff] }
 0xafd   : > { %v4977_v10 = vld [vmem:[#allocation16 + $0x7b8] sm:$0xff] }
 0xafe   : > { %11165 = vmatpush1.bf16.msra.mxu0 %v11164_v2  ;;  %v11310_v2 = vpack.c.bf16 %v4945_v12, %v4941_v47  ;;  %v4974_v47 = vld [vmem:[#allocation16 + $0x7a0] sm:$0xff]  ;;  %v4972_v12 = vld [vmem:[#allocation16 + $0x790] sm:$0xff] }
 0xaff   : > { %11293 = vmatpush1.bf16.msra.mxu1 %v11292_v41  ;;  %11167 = vmatprep.subr.bf16.mxu0 %v11166_v16  ;;  %v4944_v41 = vld [vmem:[#allocation16 + $0x6b0] sm:$0xff]  ;;  %v4947_v16 = vld [vmem:[#allocation16 + $0x6c8] sm:$0xff] }
 0xb00   : > { %11295 = vmatprep.subr.bf16.mxu1 %v11294_v20  ;;  %v11184_v20 = vpack.c.bf16 %v4942_v63, %v4938_v38  ;;  %v11312_v23 = vpack.c.bf16 %v4944_v41, %v4940_v15  ;;  %v11186_v24 = vpack.c.bf16 %v4951_v17, %v4947_v16  ;;  %v4983_v38 = vld [vmem:[#allocation16 + $0x7e8] sm:$0xff]  ;;  %v4981_v63 = vld [vmem:[#allocation16 + $0x7d8] sm:$0xff]  ;;  %v4978_v17 = vld [vmem:[#allocation16 + $0x7c0] sm:$0xff] }
 0xb01   : > { %v4985_v15 = vld [vmem:[#allocation16 + $0x7f8] sm:$0xff] }
 0xb02   : > { %11169 = vmatpush1.bf16.msra.mxu0 %v11168_v4  ;;  %v11314_v4 = vpack.c.bf16 %v4953_v19, %v4949_v18  ;;  %v4982_v18 = vld [vmem:[#allocation16 + $0x7e0] sm:$0xff]  ;;  %v11330_v19 = vpack.c.bf16 %v4985_v15, %v4981_v63  ;;  %v6132_v15 = vld [vmem:[#allocation16 + $0x10d0] sm:$0xff] }
 0xb03   : > { %11297 = vmatpush1.bf16.msra.mxu1 %v11296_v30  ;;  %11171 = vmatprep.subr.bf16.mxu0 %v11170_v31  ;;  %v4952_v30 = vld [vmem:[#allocation16 + $0x6f0] sm:$0xff]  ;;  %v4955_v31 = vld [vmem:[#allocation16 + $0x708] sm:$0xff]  ;;  %v6134_v63 = vld [vmem:[#allocation16 + $0x10e0] sm:$0xff] }
 0xb04   : > { %11299 = vmatprep.subr.bf16.mxu1 %v11298_v22  ;;  %v11188_v22 = vpack.c.bf16 %v4950_v27, %v4946_v26  ;;  %v11316_v35 = vpack.c.bf16 %v4952_v30, %v4948_v28  ;;  %v11190_v37 = vpack.c.bf16 %v4959_v33, %v4955_v31  ;;  %v6107_v27 = vld [vmem:[#allocation16 + $0x1008] sm:$0xff]  ;;  %v6113_v30 = vld [vmem:[#allocation16 + $0x1038] sm:$0xff]  ;;  %v6106_v31 = vld [vmem:[#allocation16 + $0x1000] sm:$0xff] }
 0xb05   : > { %v6111_v28 = vld [vmem:[#allocation16 + $0x1028] sm:$0xff]  ;;  %v6110_v33 = vld [vmem:[#allocation16 + $0x1020] sm:$0xff] }
 0xb06   : > { %11173 = vmatpush1.bf16.msra.mxu0 %v11172_v50  ;;  %v11318_v50 = vpack.c.bf16 %v4961_v21, %v4957_v34  ;;  %v6108_v34 = vld [vmem:[#allocation16 + $0x1010] sm:$0xff]  ;;  %v11334_v21 = vpack.c.bf16 %v6111_v28, %v6107_v27  ;;  %v6142_v27 = vld [vmem:[#allocation16 + $0x1120] sm:$0xff] }
 0xb07   : > { %11301 = vmatpush1.bf16.msra.mxu1 %v11300_v32  ;;  %11175 = vmatprep.subr.bf16.mxu0 %v11174_v36  ;;  %v4960_v32 = vld [vmem:[#allocation16 + $0x730] sm:$0xff]  ;;  %v4963_v36 = vld [vmem:[#allocation16 + $0x748] sm:$0xff] }
 0xb08   : > { %11303 = vmatprep.subr.bf16.mxu1 %v11302_v58  ;;  %v11192_v58 = vpack.c.bf16 %v4958_v45, %v4954_v44  ;;  %v11320_v59 = vpack.c.bf16 %v4960_v32, %v4956_v46  ;;  %v11194_v62 = vpack.c.bf16 %v4967_v54, %v4963_v36  ;;  %v6117_v45 = vld [vmem:[#allocation16 + $0x1058] sm:$0xff]  ;;  %v11336_v32 = vpack.c.bf16 %v6110_v33, %v6106_v31  ;;  %v6140_v28 = vld [vmem:[#allocation16 + $0x1110] sm:$0xff]  ;;  %v6147_v31 = vld [vmem:[#allocation16 + $0x1148] sm:$0xff] }
 0xb09   : > { %v6121_v46 = vld [vmem:[#allocation16 + $0x1078] sm:$0xff]  ;;  %v6151_v33 = vld [vmem:[#allocation16 + $0x1168] sm:$0xff] }
 0xb0a   : > { %11177 = vmatpush1.bf16.msra.mxu0 %v11176_v5  ;;  %v11322_v5 = vpack.c.bf16 %v4969_v57, %v4965_v56  ;;  %v6114_v56 = vld [vmem:[#allocation16 + $0x1040] sm:$0xff] }
 0xb0b   : > { %11305 = vmatpush1.bf16.msra.mxu1 %v11304_v7  ;;  %11179 = vmatprep.subr.bf16.mxu0 %v11178_v8  ;;  %v4968_v7 = vld [vmem:[#allocation16 + $0x770] sm:$0xff]  ;;  %v4971_v8 = vld [vmem:[#allocation16 + $0x788] sm:$0xff]  ;;  %v6118_v57 = vld [vmem:[#allocation16 + $0x1060] sm:$0xff] }
 0xb0c   : > { %11307 = vmatprep.subr.bf16.mxu1 %v11306_v60  ;;  %v11196_v60 = vpack.c.bf16 %v4966_v51, %v4962_v55  ;;  %v11324_v11 = vpack.c.bf16 %v4968_v7, %v4964_v3  ;;  %v11198_v61 = vpack.c.bf16 %v4975_v25, %v4971_v8  ;;  %v6127_v55 = vld [vmem:[#allocation16 + $0x10a8] sm:$0xff]  ;;  %v6125_v51 = vld [vmem:[#allocation16 + $0x1098] sm:$0xff]  ;;  %v6122_v25 = vld [vmem:[#allocation16 + $0x1080] sm:$0xff] }
 0xb0d   : > { %v6129_v3 = vld [vmem:[#allocation16 + $0x10b8] sm:$0xff] }
 0xb0e   : > { %11181 = vmatpush1.bf16.msra.mxu0 %v11180_v13  ;;  %v11326_v13 = vpack.c.bf16 %v4977_v10, %v4973_v9  ;;  %v6126_v9 = vld [vmem:[#allocation16 + $0x10a0] sm:$0xff]  ;;  %v6124_v10 = vld [vmem:[#allocation16 + $0x1090] sm:$0xff] }
 0xb0f   : > { %11309 = vmatpush1.bf16.msra.mxu1 %v11308_v14  ;;  %11183 = vmatprep.subr.bf16.mxu0 %v11182_v0  ;;  %v4976_v14 = vld [vmem:[#allocation16 + $0x7b0] sm:$0xff]  ;;  %v4979_v0 = vld [vmem:[#allocation16 + $0x7c8] sm:$0xff] }
 0xb10   : > { %11311 = vmatprep.subr.bf16.mxu1 %v11310_v2  ;;  %v11200_v2 = vpack.c.bf16 %v4974_v47, %v4970_v6  ;;  %v11328_v41 = vpack.c.bf16 %v4976_v14, %v4972_v12  ;;  %v11202_v16 = vpack.c.bf16 %v4983_v38, %v4979_v0  ;;  %v6135_v6 = vld [vmem:[#allocation16 + $0x10e8] sm:$0xff]  ;;  %v6133_v47 = vld [vmem:[#allocation16 + $0x10d8] sm:$0xff]  ;;  %v6130_v38 = vld [vmem:[#allocation16 + $0x10c0] sm:$0xff] }
 0xb11   : > { %v6137_v12 = vld [vmem:[#allocation16 + $0x10f8] sm:$0xff] }
 0xb12   : > { %11185 = vmatpush1.bf16.msra.mxu0 %v11184_v20  ;;  %v4980_v20 = vld [vmem:[#allocation16 + $0x7d0] sm:$0xff] }
 0xb13   : > { %11313 = vmatpush1.bf16.msra.mxu1 %v11312_v23  ;;  %11187 = vmatprep.subr.bf16.mxu0 %v11186_v24  ;;  %v4984_v23 = vld [vmem:[#allocation16 + $0x7f0] sm:$0xff]  ;;  %v11204_v24 = vpack.c.bf16 %v4982_v18, %v4978_v17  ;;  %v6143_v17 = vld [vmem:[#allocation16 + $0x1128] sm:$0xff]  ;;  %v6141_v18 = vld [vmem:[#allocation16 + $0x1118] sm:$0xff] }
 0xb14   : > { %11315 = vmatprep.subr.bf16.mxu1 %v11314_v4  ;;  %v11332_v26 = vpack.c.bf16 %v4984_v23, %v4980_v20  ;;  %v6109_v4 = vld [vmem:[#allocation16 + $0x1018] sm:$0xff]  ;;  %v11348_v20 = vpack.c.bf16 %v6134_v63, %v6130_v38 }
 0xb15   : > { %v11462_v44 = vpack.c.bf16 %v6113_v30, %v6109_v4  ;;  %v6144_v30 = vld [vmem:[#allocation16 + $0x1130] sm:$0xff]  ;;  %v6173_v38 = vld [vmem:[#allocation16 + $0x1218] sm:$0xff] }
 0xb16   : > { %11189 = vmatpush1.bf16.msra.mxu0 %v11188_v22  ;;  %v6112_v22 = vld [vmem:[#allocation16 + $0x1030] sm:$0xff]  ;;  %v6177_v63 = vld [vmem:[#allocation16 + $0x1238] sm:$0xff] }
 0xb17   : > { %11317 = vmatpush1.bf16.msra.mxu1 %v11316_v35  ;;  %11191 = vmatprep.subr.bf16.mxu0 %v11190_v37  ;;  %v6115_v35 = vld [vmem:[#allocation16 + $0x1048] sm:$0xff]  ;;  %v11464_v36 = vpack.c.bf16 %v6112_v22, %v6108_v34  ;;  %v6149_v34 = vld [vmem:[#allocation16 + $0x1158] sm:$0xff] }
 0xb18   : > { %11319 = vmatprep.subr.bf16.mxu1 %v11318_v50  ;;  %v6119_v37 = vld [vmem:[#allocation16 + $0x1068] sm:$0xff]  ;;  %v5959_v50 = vld [vmem:[#allocation15 + $0x4] sm:$0x3] }
 0xb19   : > { %v11338_v54 = vpack.c.bf16 %v6119_v37, %v6115_v35  ;;  %v11480_v35 = vpack.c.bf16 %v6144_v30, %v6140_v28  ;;  %v11354_v37 = vpack.c.bf16 %v6151_v33, %v6147_v31  ;;  %v6178_v31 = vld [vmem:[#allocation16 + $0x1240] sm:$0xff] }
 0xb1a   : > { %11193 = vmatpush1.bf16.msra.mxu0 %v11192_v58  ;;  %v6116_v58 = vld [vmem:[#allocation16 + $0x1050] sm:$0xff]  ;;  %v6182_v33 = vld [vmem:[#allocation16 + $0x1260] sm:$0xff] }
 0xb1b   : > { %11321 = vmatpush1.bf16.msra.mxu1 %v11320_v59  ;;  %11195 = vmatprep.subr.bf16.mxu0 %v11194_v62  ;;  %v11466_v59 = vpack.c.bf16 %v6121_v46, %v6117_v45  ;;  %v6123_v62 = vld [vmem:[#allocation16 + $0x1088] sm:$0xff]  ;;  %v6150_v45 = vld [vmem:[#allocation16 + $0x1160] sm:$0xff]  ;;  %v6148_v46 = vld [vmem:[#allocation16 + $0x1150] sm:$0xff] }
 0xb1c   : > { %11323 = vmatprep.subr.bf16.mxu1 %v11322_v5  ;;  %v11340_v5 = vpack.c.bf16 %v6118_v57, %v6114_v56  ;;  %v11342_v8 = vpack.c.bf16 %v6127_v55, %v6123_v62  ;;  %v6157_v56 = vld [vmem:[#allocation16 + $0x1198] sm:$0xff]  ;;  %v6154_v62 = vld [vmem:[#allocation16 + $0x1180] sm:$0xff] }
 0xb1d   : > { %v6161_v57 = vld [vmem:[#allocation16 + $0x11b8] sm:$0xff]  ;;  %v6158_v55 = vld [vmem:[#allocation16 + $0x11a0] sm:$0xff] }
 0xb1e   : > { %11197 = vmatpush1.bf16.msra.mxu0 %v11196_v60  ;;  %v11470_v60 = vpack.c.bf16 %v6129_v3, %v6125_v51  ;;  %v6156_v51 = vld [vmem:[#allocation16 + $0x1190] sm:$0xff]  ;;  %v11486_v3 = vpack.c.bf16 %v6161_v57, %v6157_v56 }
 0xb1f   : > { %11325 = vmatpush1.bf16.msra.mxu1 %v11324_v11  ;;  %11199 = vmatprep.subr.bf16.mxu0 %v11198_v61  ;;  %v6128_v11 = vld [vmem:[#allocation16 + $0x10b0] sm:$0xff]  ;;  %v6131_v61 = vld [vmem:[#allocation16 + $0x10c8] sm:$0xff] }
 0xb20   : > { %11327 = vmatprep.subr.bf16.mxu1 %v11326_v13  ;;  %v11344_v13 = vpack.c.bf16 %v6126_v9, %v6122_v25  ;;  %v11472_v14 = vpack.c.bf16 %v6128_v11, %v6124_v10  ;;  %v11346_v0 = vpack.c.bf16 %v6135_v6, %v6131_v61  ;;  %v6165_v25 = vld [vmem:[#allocation16 + $0x11d8] sm:$0xff]  ;;  %v11360_v10 = vpack.c.bf16 %v6158_v55, %v6154_v62  ;;  %v6162_v61 = vld [vmem:[#allocation16 + $0x11c0] sm:$0xff]  ;;  %v6188_v56 = vld [vmem:[#allocation16 + $0x1290] sm:$0xff] }
 0xb21   : > { %v6169_v9 = vld [vmem:[#allocation16 + $0x11f8] sm:$0xff]  ;;  %v6166_v6 = vld [vmem:[#allocation16 + $0x11e0] sm:$0xff] }
 0xb22   : > { %11201 = vmatpush1.bf16.msra.mxu0 %v11200_v2  ;;  %v11474_v2 = vpack.c.bf16 %v6137_v12, %v6133_v47  ;;  %v6164_v47 = vld [vmem:[#allocation16 + $0x11d0] sm:$0xff]  ;;  %v11490_v12 = vpack.c.bf16 %v6169_v9, %v6165_v25  ;;  %v6197_v62 = vld [vmem:[#allocation16 + $0x12d8] sm:$0xff] }
 0xb23   : > { %11329 = vmatpush1.bf16.msra.mxu1 %v11328_v41  ;;  %11203 = vmatprep.subr.bf16.mxu0 %v11202_v16  ;;  %v6136_v41 = vld [vmem:[#allocation16 + $0x10f0] sm:$0xff]  ;;  %v6139_v16 = vld [vmem:[#allocation16 + $0x1108] sm:$0xff]  ;;  %v6201_v55 = vld [vmem:[#allocation16 + $0x12f8] sm:$0xff] }
 0xb24   : > { %11331 = vmatprep.subr.bf16.mxu1 %v11330_v19  ;;  %v6145_v19 = vld [vmem:[#allocation16 + $0x1138] sm:$0xff]  ;;  %v11476_v23 = vpack.c.bf16 %v6136_v41, %v6132_v15  ;;  %v11364_v15 = vpack.c.bf16 %v6166_v6, %v6162_v61  ;;  %v6196_v25 = vld [vmem:[#allocation16 + $0x12d0] sm:$0xff]  ;;  %v11506_v9 = vpack.c.bf16 %v6201_v55, %v6197_v62 }
 0xb25   : > { %v11478_v4 = vpack.c.bf16 %v6145_v19, %v6141_v18  ;;  %v6172_v18 = vld [vmem:[#allocation16 + $0x1210] sm:$0xff]  ;;  %v11494_v19 = vpack.c.bf16 %v6177_v63, %v6173_v38  ;;  %v6205_v61 = vld [vmem:[#allocation16 + $0x1318] sm:$0xff] }
 0xb26   : > { %11205 = vmatpush1.bf16.msra.mxu0 %v11204_v24  ;;  %v11350_v24 = vpack.c.bf16 %v6143_v17, %v6139_v16  ;;  %v6170_v16 = vld [vmem:[#allocation16 + $0x1200] sm:$0xff]  ;;  %v6209_v6 = vld [vmem:[#allocation16 + $0x1338] sm:$0xff]  ;;  %v6204_v38 = vld [vmem:[#allocation16 + $0x1310] sm:$0xff] }
 0xb27   : > { %11333 = vmatpush1.bf16.msra.mxu1 %v11332_v26  ;;  %9482 = vmatprep.subr.msk.mxu0 %vm4575_vm4, %v13766_v48  ;;  %v6138_v26 = vld [vmem:[#allocation16 + $0x1100] sm:$0xff]  ;;  %v11510_v63 = vpack.c.bf16 %v6209_v6, %v6205_v61  ;;  %v6228_v55 = vld [vmem:[#allocation16 + $0x13d0] sm:$0xff] }
 0xb28   : > { %9485 = vmatprep.subr.msk.mxu1 %vm4575_vm4, %v13768_v49  ;;  %v11352_v22 = vpack.c.bf16 %v6142_v27, %v6138_v26  ;;  %v6174_v17 = vld [vmem:[#allocation16 + $0x1220] sm:$0xff]  ;;  %v6181_v26 = vld [vmem:[#allocation16 + $0x1258] sm:$0xff]  ;;  %v6236_v6 = vld [vmem:[#allocation16 + $0x1410] sm:$0xff] }
 0xb29   : > { %5810 = vmatmul.mubr.f32.vlgmr.msra.gmra.mrb[20].mxu0 %v13800_v29  ;;  %v6185_v27 = vld [vmem:[#allocation16 + $0x1278] sm:$0xff]  ;;  %v11368_v28 = vpack.c.bf16 %v6174_v17, %v6170_v16  ;;  %v6238_v61 = vld [vmem:[#allocation16 + $0x1420] sm:$0xff] }
 0xb2a   : > { %5952 = vmatmul.mubr.f32.vlgmr.msra.gmra.mrb[20].mxu1 %v13800_v29  ;;  %9483 = vmatpush1.msk.msra.mxu0 %vm4575_vm4, %v13770_v52  ;;  %v6120_v29 = vld [vmem:[#allocation16 + $0x1070] sm:$0xff]  ;;  %v6213_v16 = vld [vmem:[#allocation16 + $0x1358] sm:$0xff] }
 0xb2b   : > { %9486 = vmatpush1.msk.msra.mxu1 %vm4575_vm4, %v13772_v53  ;;  %6027 = vmatprep.mubr.f32.mxu0 %v13189_v1  ;;  %v11468_v7 = vpack.c.bf16 %v6120_v29, %v6116_v58  ;;  %v6217_v17 = vld [vmem:[#allocation16 + $0x1378] sm:$0xff] }
 0xb2c   : > { %6098 = vmatprep.mubr.f32.mxu1 %v13189_v1  ;;  %11335 = vmatprep.subr.bf16.mxu0 %v11334_v21  ;;  %v6153_v21 = vld [vmem:[#allocation16 + $0x1178] sm:$0xff] }
 0xb2d   : > { %9484 = vmatmul.mubr.msk.f32.vlgmr.msra.gmra.mrb[22].mxu0 %vm4571_vm5, %v5959_v50  ;;  %11463 = vmatprep.subr.bf16.mxu1 %v11462_v44  ;;  %v6146_v44 = vld [vmem:[#allocation16 + $0x1140] sm:$0xff] }
 0xb2e   : > { %9487 = vmatmul.mubr.msk.f32.vlgmr.msra.gmra.mrb[22].mxu1 %vm4571_vm5, %v5959_v50  ;;  %11337 = vmatpush1.bf16.msra.mxu0 %v11336_v32  ;;  %v11482_v50 = vpack.c.bf16 %v6153_v21, %v6149_v34  ;;  %v6152_v32 = vld [vmem:[#allocation16 + $0x1170] sm:$0xff]  ;;  %v11356_v58 = vpack.c.bf16 %v6150_v45, %v6146_v44  ;;  %v11498_v21 = vpack.c.bf16 %v6185_v27, %v6181_v26  ;;  %v6189_v44 = vld [vmem:[#allocation16 + $0x1298] sm:$0xff] }
 0xb2f   : > { %11465 = vmatpush1.bf16.msra.mxu1 %v11464_v36  ;;  %11339 = vmatprep.subr.bf16.mxu0 %v11338_v54  ;;  %v6155_v36 = vld [vmem:[#allocation16 + $0x1188] sm:$0xff]  ;;  %v6180_v34 = vld [vmem:[#allocation16 + $0x1250] sm:$0xff]  ;;  %v6193_v45 = vld [vmem:[#allocation16 + $0x12b8] sm:$0xff]  ;;  %v11514_v27 = vpack.c.bf16 %v6217_v17, %v6213_v16 }
 0xb30   : > { %11467 = vmatprep.subr.bf16.mxu1 %v11466_v59  ;;  %v6159_v54 = vld [vmem:[#allocation16 + $0x11a8] sm:$0xff]  ;;  %v11484_v59 = vpack.c.bf16 %v6152_v32, %v6148_v46  ;;  %v11372_v46 = vpack.c.bf16 %v6182_v33, %v6178_v31  ;;  %v11502_v57 = vpack.c.bf16 %v6193_v45, %v6189_v44  ;;  %v6212_v26 = vld [vmem:[#allocation16 + $0x1350] sm:$0xff]  ;;  %v6221_v31 = vld [vmem:[#allocation16 + $0x1398] sm:$0xff] }
 0xb31   : > { %v11358_v29 = vpack.c.bf16 %v6159_v54, %v6155_v36  ;;  %v6186_v36 = vld [vmem:[#allocation16 + $0x1280] sm:$0xff]  ;;  %v6225_v33 = vld [vmem:[#allocation16 + $0x13b8] sm:$0xff]  ;;  %v6220_v44 = vld [vmem:[#allocation16 + $0x1390] sm:$0xff] }
 0xb32   : > { %11341 = vmatpush1.bf16.msra.mxu0 %v11340_v5  ;;  %v6160_v5 = vld [vmem:[#allocation16 + $0x11b0] sm:$0xff]  ;;  %v6190_v54 = vld [vmem:[#allocation16 + $0x12a0] sm:$0xff]  ;;  %v11518_v45 = vpack.c.bf16 %v6225_v33, %v6221_v31 }
 0xb33   : > { %11469 = vmatpush1.bf16.msra.mxu1 %v11468_v7  ;;  %11343 = vmatprep.subr.bf16.mxu0 %v11342_v8  ;;  %v6163_v7 = vld [vmem:[#allocation16 + $0x11c8] sm:$0xff]  ;;  %v6250_v33 = vld [vmem:[#allocation16 + $0x1480] sm:$0xff] }
 0xb34   : > { %11471 = vmatprep.subr.bf16.mxu1 %v11470_v60  ;;  %v6167_v8 = vld [vmem:[#allocation16 + $0x11e8] sm:$0xff]  ;;  %v11488_v60 = vpack.c.bf16 %v6160_v5, %v6156_v51  ;;  %v11376_v51 = vpack.c.bf16 %v6190_v54, %v6186_v36  ;;  %v6229_v36 = vld [vmem:[#allocation16 + $0x13d8] sm:$0xff] }
 0xb35   : > { %v11362_v11 = vpack.c.bf16 %v6167_v8, %v6163_v7  ;;  %v6194_v7 = vld [vmem:[#allocation16 + $0x12c0] sm:$0xff]  ;;  %v6233_v54 = vld [vmem:[#allocation16 + $0x13f8] sm:$0xff] }
 0xb36   : > { %11345 = vmatpush1.bf16.msra.mxu0 %v11344_v13  ;;  %v6168_v13 = vld [vmem:[#allocation16 + $0x11f0] sm:$0xff]  ;;  %v6198_v8 = vld [vmem:[#allocation16 + $0x12e0] sm:$0xff]  ;;  %v11522_v62 = vpack.c.bf16 %v6233_v54, %v6229_v36 }
 0xb37   : > { %11473 = vmatpush1.bf16.msra.mxu1 %v11472_v14  ;;  %11347 = vmatprep.subr.bf16.mxu0 %v11346_v0  ;;  %v6171_v14 = vld [vmem:[#allocation16 + $0x1208] sm:$0xff]  ;;  %v6258_v54 = vld [vmem:[#allocation16 + $0x14c0] sm:$0xff] }
 0xb38   : > { %11475 = vmatprep.subr.bf16.mxu1 %v11474_v2  ;;  %v6175_v0 = vld [vmem:[#allocation16 + $0x1228] sm:$0xff]  ;;  %v11492_v2 = vpack.c.bf16 %v6168_v13, %v6164_v47  ;;  %v11380_v47 = vpack.c.bf16 %v6198_v8, %v6194_v7 }
 0xb39   : > { %v11366_v41 = vpack.c.bf16 %v6175_v0, %v6171_v14  ;;  %v6202_v14 = vld [vmem:[#allocation16 + $0x1300] sm:$0xff]  ;;  %v6235_v7 = vld [vmem:[#allocation16 + $0x1408] sm:$0xff] }
 0xb3a   : > { %11349 = vmatpush1.bf16.msra.mxu0 %v11348_v20  ;;  %v6176_v20 = vld [vmem:[#allocation16 + $0x1230] sm:$0xff]  ;;  %v6206_v0 = vld [vmem:[#allocation16 + $0x1320] sm:$0xff]  ;;  %v6239_v8 = vld [vmem:[#allocation16 + $0x1428] sm:$0xff] }
 0xb3b   : > { %11477 = vmatpush1.bf16.msra.mxu1 %v11476_v23  ;;  %11351 = vmatprep.subr.bf16.mxu0 %v11350_v24  ;;  %v6179_v23 = vld [vmem:[#allocation16 + $0x1248] sm:$0xff] }
 0xb3c   : > { %11479 = vmatprep.subr.bf16.mxu1 %v11478_v4  ;;  %v6183_v24 = vld [vmem:[#allocation16 + $0x1268] sm:$0xff]  ;;  %v11496_v4 = vpack.c.bf16 %v6176_v20, %v6172_v18  ;;  %v11384_v18 = vpack.c.bf16 %v6206_v0, %v6202_v14  ;;  %v6245_v14 = vld [vmem:[#allocation16 + $0x1458] sm:$0xff] }
 0xb3d   : > { %v11370_v30 = vpack.c.bf16 %v6183_v24, %v6179_v23  ;;  %v6210_v23 = vld [vmem:[#allocation16 + $0x1340] sm:$0xff]  ;;  %v6249_v0 = vld [vmem:[#allocation16 + $0x1478] sm:$0xff] }
 0xb3e   : > { %11353 = vmatpush1.bf16.msra.mxu0 %v11352_v22  ;;  %v6184_v22 = vld [vmem:[#allocation16 + $0x1270] sm:$0xff]  ;;  %v6214_v24 = vld [vmem:[#allocation16 + $0x1360] sm:$0xff] }
 0xb3f   : > { %11481 = vmatpush1.bf16.msra.mxu1 %v11480_v35  ;;  %11355 = vmatprep.subr.bf16.mxu0 %v11354_v37  ;;  %v6187_v35 = vld [vmem:[#allocation16 + $0x1288] sm:$0xff] }
 0xb40   : > { %11483 = vmatprep.subr.bf16.mxu1 %v11482_v50  ;;  %v6191_v37 = vld [vmem:[#allocation16 + $0x12a8] sm:$0xff]  ;;  %v11500_v50 = vpack.c.bf16 %v6184_v22, %v6180_v34  ;;  %v11388_v34 = vpack.c.bf16 %v6214_v24, %v6210_v23 }
 0xb41   : > { %v11374_v32 = vpack.c.bf16 %v6191_v37, %v6187_v35  ;;  %v6218_v35 = vld [vmem:[#allocation16 + $0x1380] sm:$0xff]  ;;  %v6251_v23 = vld [vmem:[#allocation16 + $0x1488] sm:$0xff] }
 0xb42   : > { %11357 = vmatpush1.bf16.msra.mxu0 %v11356_v58  ;;  %v6192_v58 = vld [vmem:[#allocation16 + $0x12b0] sm:$0xff]  ;;  %v6222_v37 = vld [vmem:[#allocation16 + $0x13a0] sm:$0xff] }
 0xb43   : > { %11485 = vmatpush1.bf16.msra.mxu1 %v11484_v59  ;;  %11359 = vmatprep.subr.bf16.mxu0 %v11358_v29  ;;  %v6195_v59 = vld [vmem:[#allocation16 + $0x12c8] sm:$0xff] }
 0xb44   : > { %11487 = vmatprep.subr.bf16.mxu1 %v11486_v3  ;;  %v6199_v29 = vld [vmem:[#allocation16 + $0x12e8] sm:$0xff]  ;;  %v11504_v3 = vpack.c.bf16 %v6192_v58, %v6188_v56  ;;  %v11392_v56 = vpack.c.bf16 %v6222_v37, %v6218_v35  ;;  %v6252_v35 = vld [vmem:[#allocation16 + $0x1490] sm:$0xff] }
 0xb45   : > { %v11378_v5 = vpack.c.bf16 %v6199_v29, %v6195_v59  ;;  %v6226_v59 = vld [vmem:[#allocation16 + $0x13c0] sm:$0xff]  ;;  %v6256_v37 = vld [vmem:[#allocation16 + $0x14b0] sm:$0xff] }
 0xb46   : > { %11361 = vmatpush1.bf16.msra.mxu0 %v11360_v10  ;;  %v6200_v10 = vld [vmem:[#allocation16 + $0x12f0] sm:$0xff]  ;;  %v6230_v29 = vld [vmem:[#allocation16 + $0x13e0] sm:$0xff]  ;;  %v11536_v36 = vpack.c.bf16 %v6256_v37, %v6252_v35 }
 0xb47   : > { %11489 = vmatpush1.bf16.msra.mxu1 %v11488_v60  ;;  %11363 = vmatprep.subr.bf16.mxu0 %v11362_v11  ;;  %v6203_v60 = vld [vmem:[#allocation16 + $0x1308] sm:$0xff] }
 0xb48   : > { %11491 = vmatprep.subr.bf16.mxu1 %v11490_v12  ;;  %v6207_v11 = vld [vmem:[#allocation16 + $0x1328] sm:$0xff]  ;;  %v11508_v12 = vpack.c.bf16 %v6200_v10, %v6196_v25  ;;  %v6237_v25 = vld [vmem:[#allocation16 + $0x1418] sm:$0xff] }
 0xb49   : > { %v11382_v13 = vpack.c.bf16 %v6207_v11, %v6203_v60  ;;  %v6241_v10 = vld [vmem:[#allocation16 + $0x1438] sm:$0xff]  ;;  %v6234_v11 = vld [vmem:[#allocation16 + $0x1400] sm:$0xff] }
 0xb4a   : > { %11365 = vmatpush1.bf16.msra.mxu0 %v11364_v15  ;;  %v6208_v15 = vld [vmem:[#allocation16 + $0x1330] sm:$0xff]  ;;  %v11526_v60 = vpack.c.bf16 %v6241_v10, %v6237_v25  ;;  %v6270_v25 = vld [vmem:[#allocation16 + $0x1520] sm:$0xff] }
 0xb4b   : > { %11493 = vmatpush1.bf16.msra.mxu1 %v11492_v2  ;;  %11367 = vmatprep.subr.bf16.mxu0 %v11366_v41  ;;  %v6211_v2 = vld [vmem:[#allocation16 + $0x1348] sm:$0xff] }
 0xb4c   : > { %11495 = vmatprep.subr.bf16.mxu1 %v11494_v19  ;;  %v6215_v41 = vld [vmem:[#allocation16 + $0x1368] sm:$0xff]  ;;  %v11512_v19 = vpack.c.bf16 %v6208_v15, %v6204_v38 }
 0xb4d   : > { %v11386_v20 = vpack.c.bf16 %v6215_v41, %v6211_v2  ;;  %v6242_v2 = vld [vmem:[#allocation16 + $0x1440] sm:$0xff] }
 0xb4e   : > { %11369 = vmatpush1.bf16.msra.mxu0 %v11368_v28  ;;  %v6216_v28 = vld [vmem:[#allocation16 + $0x1370] sm:$0xff]  ;;  %v6246_v41 = vld [vmem:[#allocation16 + $0x1460] sm:$0xff] }
 0xb4f   : > { %11497 = vmatpush1.bf16.msra.mxu1 %v11496_v4  ;;  %11371 = vmatprep.subr.bf16.mxu0 %v11370_v30  ;;  %v6219_v4 = vld [vmem:[#allocation16 + $0x1388] sm:$0xff] }
 0xb50   : > { %11499 = vmatprep.subr.bf16.mxu1 %v11498_v21  ;;  %v6223_v30 = vld [vmem:[#allocation16 + $0x13a8] sm:$0xff]  ;;  %v11516_v21 = vpack.c.bf16 %v6216_v28, %v6212_v26  ;;  %v6257_v28 = vld [vmem:[#allocation16 + $0x14b8] sm:$0xff] }
 0xb51   : > { %v11390_v22 = vpack.c.bf16 %v6223_v30, %v6219_v4  ;;  %v6255_v26 = vld [vmem:[#allocation16 + $0x14a8] sm:$0xff]  ;;  %v11404_v30 = vpack.c.bf16 %v6246_v41, %v6242_v2  ;;  %v6276_v2 = vld [vmem:[#allocation16 + $0x1550] sm:$0xff] }
 0xb52   : > { %11373 = vmatpush1.bf16.msra.mxu0 %v11372_v46  ;;  %v6224_v46 = vld [vmem:[#allocation16 + $0x13b0] sm:$0xff] }
 0xb53   : > { %11501 = vmatpush1.bf16.msra.mxu1 %v11500_v50  ;;  %11375 = vmatprep.subr.bf16.mxu0 %v11374_v32  ;;  %v6227_v50 = vld [vmem:[#allocation16 + $0x13c8] sm:$0xff]  ;;  %v6280_v41 = vld [vmem:[#allocation16 + $0x1570] sm:$0xff] }
 0xb54   : > { %11503 = vmatprep.subr.bf16.mxu1 %v11502_v57  ;;  %v6231_v32 = vld [vmem:[#allocation16 + $0x13e8] sm:$0xff]  ;;  %v11520_v57 = vpack.c.bf16 %v6224_v46, %v6220_v44  ;;  %v6261_v46 = vld [vmem:[#allocation16 + $0x14d8] sm:$0xff] }
 0xb55   : > { %v11394_v58 = vpack.c.bf16 %v6231_v32, %v6227_v50  ;;  %v6259_v44 = vld [vmem:[#allocation16 + $0x14c8] sm:$0xff]  ;;  %v6265_v50 = vld [vmem:[#allocation16 + $0x14f8] sm:$0xff] }
 0xb56   : > { %11377 = vmatpush1.bf16.msra.mxu0 %v11376_v51  ;;  %v6232_v51 = vld [vmem:[#allocation16 + $0x13f0] sm:$0xff] }
 0xb57   : > { %11505 = vmatpush1.bf16.msra.mxu1 %v11504_v3  ;;  %11379 = vmatprep.subr.bf16.mxu0 %v11378_v5  ;;  %v11396_v3 = vpack.c.bf16 %v6230_v29, %v6226_v59  ;;  %v11524_v5 = vpack.c.bf16 %v6232_v51, %v6228_v55  ;;  %v6260_v59 = vld [vmem:[#allocation16 + $0x14d0] sm:$0xff]  ;;  %v6271_v55 = vld [vmem:[#allocation16 + $0x1528] sm:$0xff]  ;;  %v6269_v51 = vld [vmem:[#allocation16 + $0x1518] sm:$0xff] }
 0xb58   : > { %11507 = vmatprep.subr.bf16.mxu1 %v11506_v9  ;;  %v11398_v9 = vpack.c.bf16 %v6239_v8, %v6235_v7  ;;  %v6264_v29 = vld [vmem:[#allocation16 + $0x14f0] sm:$0xff]  ;;  %v6266_v8 = vld [vmem:[#allocation16 + $0x1500] sm:$0xff] }
 0xb59   : > { %v11540_v7 = vpack.c.bf16 %v6264_v29, %v6260_v59 }
 0xb5a   : > { %11381 = vmatpush1.bf16.msra.mxu0 %v11380_v47  ;;  %v6240_v47 = vld [vmem:[#allocation16 + $0x1430] sm:$0xff] }
 0xb5b   : > { %11509 = vmatpush1.bf16.msra.mxu1 %v11508_v12  ;;  %11383 = vmatprep.subr.bf16.mxu0 %v11382_v13  ;;  %v6243_v12 = vld [vmem:[#allocation16 + $0x1448] sm:$0xff]  ;;  %v11528_v15 = vpack.c.bf16 %v6240_v47, %v6236_v6  ;;  %v6277_v47 = vld [vmem:[#allocation16 + $0x1558] sm:$0xff] }
 0xb5c   : > { %11511 = vmatprep.subr.bf16.mxu1 %v11510_v63  ;;  %v6247_v13 = vld [vmem:[#allocation16 + $0x1468] sm:$0xff]  ;;  %v11400_v63 = vpack.c.bf16 %v6238_v61, %v6234_v11  ;;  %v6272_v11 = vld [vmem:[#allocation16 + $0x1530] sm:$0xff] }
 0xb5d   : > { %v11402_v17 = vpack.c.bf16 %v6247_v13, %v6243_v12  ;;  %v6275_v61 = vld [vmem:[#allocation16 + $0x1548] sm:$0xff]  ;;  %v6281_v12 = vld [vmem:[#allocation16 + $0x1578] sm:$0xff]  ;;  %v11416_v13 = vpack.c.bf16 %v6270_v25, %v6266_v8 }
 0xb5e   : > { %11385 = vmatpush1.bf16.msra.mxu0 %v11384_v18  ;;  %v11530_v18 = vpack.c.bf16 %v6249_v0, %v6245_v14  ;;  %v6279_v6 = vld [vmem:[#allocation16 + $0x1568] sm:$0xff]  ;;  %v6274_v0 = vld [vmem:[#allocation16 + $0x1540] sm:$0xff] }
 0xb5f   : > { %11513 = vmatpush1.bf16.msra.mxu1 %v11512_v19  ;;  %11387 = vmatprep.subr.bf16.mxu0 %v11386_v20  ;;  %v6244_v19 = vld [vmem:[#allocation16 + $0x1450] sm:$0xff]  ;;  %v6307_v8 = vld [vmem:[#allocation16 + $0x1648] sm:$0xff] }
 0xb60   : > { %11515 = vmatprep.subr.bf16.mxu1 %v11514_v27  ;;  %v6248_v20 = vld [vmem:[#allocation16 + $0x1470] sm:$0xff]  ;;  %v6253_v27 = vld [vmem:[#allocation16 + $0x1498] sm:$0xff]  ;;  %v6311_v25 = vld [vmem:[#allocation16 + $0x1668] sm:$0xff] }
 0xb61   : > { %v11532_v31 = vpack.c.bf16 %v6248_v20, %v6244_v19  ;;  %v6289_v19 = vld [vmem:[#allocation16 + $0x15b8] sm:$0xff] }
 0xb62   : > { %11389 = vmatpush1.bf16.msra.mxu0 %v11388_v34  ;;  %v6254_v34 = vld [vmem:[#allocation16 + $0x14a0] sm:$0xff] }
 0xb63   : > { %11517 = vmatpush1.bf16.msra.mxu1 %v11516_v21  ;;  %11391 = vmatprep.subr.bf16.mxu0 %v11390_v22  ;;  %v11406_v21 = vpack.c.bf16 %v6255_v26, %v6251_v23  ;;  %v11534_v22 = vpack.c.bf16 %v6257_v28, %v6253_v27  ;;  %v11408_v32 = vpack.c.bf16 %v6254_v34, %v6250_v33  ;;  %v6282_v26 = vld [vmem:[#allocation16 + $0x1580] sm:$0xff]  ;;  %v6291_v33 = vld [vmem:[#allocation16 + $0x15c8] sm:$0xff] }
 0xb64   : > { %11519 = vmatprep.subr.bf16.mxu1 %v11518_v45  ;;  %v6263_v45 = vld [vmem:[#allocation16 + $0x14e8] sm:$0xff]  ;;  %v11548_v23 = vpack.c.bf16 %v6280_v41, %v6276_v2  ;;  %v6286_v27 = vld [vmem:[#allocation16 + $0x15a0] sm:$0xff] }
 0xb65   : > { %v6295_v34 = vld [vmem:[#allocation16 + $0x15e8] sm:$0xff]  ;;  %v11424_v35 = vpack.c.bf16 %v6286_v27, %v6282_v26 }
 0xb66   : > { %11393 = vmatpush1.bf16.msra.mxu0 %v11392_v56  ;;  %v6262_v56 = vld [vmem:[#allocation16 + $0x14e0] sm:$0xff]  ;;  %v6323_v26 = vld [vmem:[#allocation16 + $0x16c8] sm:$0xff] }
 0xb67   : > { %11521 = vmatpush1.bf16.msra.mxu1 %v11520_v57  ;;  %11395 = vmatprep.subr.bf16.mxu0 %v11394_v58  ;;  %v11410_v57 = vpack.c.bf16 %v6263_v45, %v6259_v44  ;;  %v11538_v58 = vpack.c.bf16 %v6265_v50, %v6261_v46  ;;  %v6290_v44 = vld [vmem:[#allocation16 + $0x15c0] sm:$0xff]  ;;  %v11426_v46 = vpack.c.bf16 %v6295_v34, %v6291_v33  ;;  %v6327_v27 = vld [vmem:[#allocation16 + $0x16e8] sm:$0xff] }
 0xb68   : > { %11523 = vmatprep.subr.bf16.mxu1 %v11522_v62  ;;  %v6267_v62 = vld [vmem:[#allocation16 + $0x1508] sm:$0xff]  ;;  %v6294_v45 = vld [vmem:[#allocation16 + $0x15e0] sm:$0xff] }
 0xb69   : > { %v11428_v59 = vpack.c.bf16 %v6294_v45, %v6290_v44  ;;  %v6322_v33 = vld [vmem:[#allocation16 + $0x16c0] sm:$0xff]  ;;  %v6331_v44 = vld [vmem:[#allocation16 + $0x1708] sm:$0xff] }
 0xb6a   : > { %11397 = vmatpush1.bf16.msra.mxu0 %v11396_v3  ;;  %v6273_v3 = vld [vmem:[#allocation16 + $0x1538] sm:$0xff]  ;;  %v6326_v34 = vld [vmem:[#allocation16 + $0x16e0] sm:$0xff]  ;;  %v6335_v45 = vld [vmem:[#allocation16 + $0x1728] sm:$0xff] }
 0xb6b   : > { %11525 = vmatpush1.bf16.msra.mxu1 %v11524_v5  ;;  %11399 = vmatprep.subr.bf16.mxu0 %v11398_v9  ;;  %v11412_v5 = vpack.c.bf16 %v6262_v56, %v6258_v54  ;;  %v11414_v9 = vpack.c.bf16 %v6271_v55, %v6267_v62  ;;  %v11542_v10 = vpack.c.bf16 %v6273_v3, %v6269_v51  ;;  %v6299_v54 = vld [vmem:[#allocation16 + $0x1608] sm:$0xff]  ;;  %v6298_v62 = vld [vmem:[#allocation16 + $0x1600] sm:$0xff] }
 0xb6c   : > { %11527 = vmatprep.subr.bf16.mxu1 %v11526_v60  ;;  %v6268_v60 = vld [vmem:[#allocation16 + $0x1510] sm:$0xff]  ;;  %v6303_v56 = vld [vmem:[#allocation16 + $0x1628] sm:$0xff]  ;;  %v6302_v55 = vld [vmem:[#allocation16 + $0x1620] sm:$0xff] }
 0xb6d   : > { %v11544_v14 = vpack.c.bf16 %v6272_v11, %v6268_v60  ;;  %v11430_v51 = vpack.c.bf16 %v6303_v56, %v6299_v54  ;;  %v11432_v60 = vpack.c.bf16 %v6302_v55, %v6298_v62  ;;  %v6330_v54 = vld [vmem:[#allocation16 + $0x1700] sm:$0xff]  ;;  %v6339_v62 = vld [vmem:[#allocation16 + $0x1748] sm:$0xff] }
 0xb6e   : > { %v6334_v56 = vld [vmem:[#allocation16 + $0x1720] sm:$0xff]  ;;  %v6343_v55 = vld [vmem:[#allocation16 + $0x1768] sm:$0xff] }
 0xc00   : > { %v6029_v38 = vpop.f32.mrb[22].mxu0 }
 0xc01   : > { %v6031_v16 = vpop.f32.mrb[23].mxu0  ;;  %v13828_v24 = vpop.f32.mrb[22].mxu1 }
 0xc02   : > { %6426 = vmatprep.mubr.f32.mxu0 %v6031_v16  ;;  %6568 = vmatprep.mubr.f32.mxu1 %v6031_v16  ;;  %v6102_v4 = vpop.f32.mrb[23].mxu1  ;;  %v6283_v16 = vld [vmem:[#allocation16 + $0x1588] sm:$0xff] }
 0xc03   : > { %6427 = vmatmul.mubr.f32.vlgmr.msra.gmra.mrb[20].mxu0 %v6029_v38  ;;  %6569 = vmatmul.mubr.f32.vlgmr.msra.gmra.mrb[20].mxu1 %v6029_v38  ;;  %v6278_v38 = vld [vmem:[#allocation16 + $0x1560] sm:$0xff] }
 0xc04   : > { %11401 = vmatpush1.bf16.msra.mxu0 %v11400_v63  ;;  %11529 = vmatpush1.bf16.msra.mxu1 %v11528_v15  ;;  %v11418_v63 = vpack.c.bf16 %v6279_v6, %v6275_v61  ;;  %v11546_v15 = vpack.c.bf16 %v6281_v12, %v6277_v47  ;;  %v11420_v20 = vpack.c.bf16 %v6278_v38, %v6274_v0  ;;  %v6306_v61 = vld [vmem:[#allocation16 + $0x1640] sm:$0xff]  ;;  %v6315_v0 = vld [vmem:[#allocation16 + $0x1688] sm:$0xff] }
 0xc05   : > { %11403 = vmatprep.subr.bf16.mxu0 %v11402_v17  ;;  %11531 = vmatprep.subr.bf16.mxu1 %v11530_v18  ;;  %v6287_v17 = vld [vmem:[#allocation16 + $0x15a8] sm:$0xff]  ;;  %v6285_v18 = vld [vmem:[#allocation16 + $0x1598] sm:$0xff]  ;;  %v6310_v6 = vld [vmem:[#allocation16 + $0x1660] sm:$0xff]  ;;  %v11434_v47 = vpack.c.bf16 %v6311_v25, %v6307_v8 }
 0xc06   : > { %6497 = vmatprep.mubr.f32.mxu0 %v6102_v4  ;;  %6639 = vmatprep.mubr.f32.mxu1 %v6102_v4  ;;  %v11422_v28 = vpack.c.bf16 %v6287_v17, %v6283_v16  ;;  %v11550_v4 = vpack.c.bf16 %v6289_v19, %v6285_v18  ;;  %v6319_v38 = vld [vmem:[#allocation16 + $0x16a8] sm:$0xff]  ;;  %v11436_v2 = vpack.c.bf16 %v6310_v6, %v6306_v61  ;;  %v6314_v16 = vld [vmem:[#allocation16 + $0x1680] sm:$0xff] }
 0xc07   : > { %v6318_v17 = vld [vmem:[#allocation16 + $0x16a0] sm:$0xff]  ;;  %v11438_v18 = vpack.c.bf16 %v6319_v38, %v6315_v0  ;;  %v6347_v61 = vld [vmem:[#allocation16 + $0x1788] sm:$0xff] }
 0xc08   : > { %11405 = vmatpush1.bf16.msra.mxu0 %v11404_v30  ;;  %11533 = vmatpush1.bf16.msra.mxu1 %v11532_v31  ;;  %v6284_v30 = vld [vmem:[#allocation16 + $0x1590] sm:$0xff]  ;;  %v6338_v8 = vld [vmem:[#allocation16 + $0x1740] sm:$0xff]  ;;  %v6351_v6 = vld [vmem:[#allocation16 + $0x17a8] sm:$0xff] }
 0xc09   : > { %11407 = vmatprep.subr.bf16.mxu0 %v11406_v21  ;;  %11535 = vmatprep.subr.bf16.mxu1 %v11534_v22  ;;  %v6288_v31 = vld [vmem:[#allocation16 + $0x15b0] sm:$0xff]  ;;  %v6293_v21 = vld [vmem:[#allocation16 + $0x15d8] sm:$0xff]  ;;  %v6342_v25 = vld [vmem:[#allocation16 + $0x1760] sm:$0xff] }
 0xc0a   : > { %v6297_v22 = vld [vmem:[#allocation16 + $0x15f8] sm:$0xff]  ;;  %v11552_v37 = vpack.c.bf16 %v6288_v31, %v6284_v30  ;;  %v11440_v30 = vpack.c.bf16 %v6318_v17, %v6314_v16  ;;  %v6346_v0 = vld [vmem:[#allocation16 + $0x1780] sm:$0xff]  ;;  %v6355_v16 = vld [vmem:[#allocation16 + $0x17c8] sm:$0xff] }
 0xc0b   : > { %v11554_v50 = vpack.c.bf16 %v6297_v22, %v6293_v21  ;;  %v11442_v21 = vpack.c.bf16 %v6327_v27, %v6323_v26  ;;  %v6350_v38 = vld [vmem:[#allocation16 + $0x17a0] sm:$0xff]  ;;  %v6359_v17 = vld [vmem:[#allocation16 + $0x17e8] sm:$0xff] }
 0xc0c   : > { %11409 = vmatpush1.bf16.msra.mxu0 %v11408_v32  ;;  %11537 = vmatpush1.bf16.msra.mxu1 %v11536_v36  ;;  %v6292_v32 = vld [vmem:[#allocation16 + $0x15d0] sm:$0xff]  ;;  %v6354_v26 = vld [vmem:[#allocation16 + $0x17c0] sm:$0xff]  ;;  %v11458_v27 = vpack.c.bf16 %v6359_v17, %v6355_v16 }
 0xc0d   : > { %11411 = vmatprep.subr.bf16.mxu0 %v11410_v57  ;;  %11539 = vmatprep.subr.bf16.mxu1 %v11538_v58  ;;  %v6296_v36 = vld [vmem:[#allocation16 + $0x15f0] sm:$0xff]  ;;  %v6301_v57 = vld [vmem:[#allocation16 + $0x1618] sm:$0xff] }
 0xc0e   : > { %v6305_v58 = vld [vmem:[#allocation16 + $0x1638] sm:$0xff]  ;;  %v11556_v29 = vpack.c.bf16 %v6296_v36, %v6292_v32  ;;  %v11444_v32 = vpack.c.bf16 %v6326_v34, %v6322_v33  ;;  %v6824_v16 = vld [vmem:[#allocation16 + $0x18d0] sm:$0xff] }
 0xc0f   : > { %v11558_v3 = vpack.c.bf16 %v6305_v58, %v6301_v57  ;;  %v11446_v57 = vpack.c.bf16 %v6335_v45, %v6331_v44  ;;  %v6798_v44 = vld [vmem:[#allocation16 + $0x1800] sm:$0xff]  ;;  %v6828_v17 = vld [vmem:[#allocation16 + $0x18f0] sm:$0xff] }
 0xc10   : > { %11413 = vmatpush1.bf16.msra.mxu0 %v11412_v5  ;;  %11541 = vmatpush1.bf16.msra.mxu1 %v11540_v7  ;;  %v6300_v5 = vld [vmem:[#allocation16 + $0x1610] sm:$0xff]  ;;  %v6802_v45 = vld [vmem:[#allocation16 + $0x1820] sm:$0xff] }
 0xc11   : > { %11415 = vmatprep.subr.bf16.mxu0 %v11414_v9  ;;  %11543 = vmatprep.subr.bf16.mxu1 %v11542_v10  ;;  %v6304_v7 = vld [vmem:[#allocation16 + $0x1630] sm:$0xff]  ;;  %v6309_v9 = vld [vmem:[#allocation16 + $0x1658] sm:$0xff] }
 0xc12   : > { %v6313_v10 = vld [vmem:[#allocation16 + $0x1678] sm:$0xff]  ;;  %v11560_v11 = vpack.c.bf16 %v6304_v7, %v6300_v5  ;;  %v11448_v5 = vpack.c.bf16 %v6334_v56, %v6330_v54  ;;  %v6811_v56 = vld [vmem:[#allocation16 + $0x1868] sm:$0xff] }
 0xc13   : > { %v11562_v12 = vpack.c.bf16 %v6313_v10, %v6309_v9  ;;  %v11450_v9 = vpack.c.bf16 %v6343_v55, %v6339_v62  ;;  %v6810_v62 = vld [vmem:[#allocation16 + $0x1860] sm:$0xff] }
 0xc14   : > { %11417 = vmatpush1.bf16.msra.mxu0 %v11416_v13  ;;  %11545 = vmatpush1.bf16.msra.mxu1 %v11544_v14  ;;  %v6308_v13 = vld [vmem:[#allocation16 + $0x1650] sm:$0xff] }
 0xc15   : > { %11419 = vmatprep.subr.bf16.mxu0 %v11418_v63  ;;  %11547 = vmatprep.subr.bf16.mxu1 %v11546_v15  ;;  %v6312_v14 = vld [vmem:[#allocation16 + $0x1670] sm:$0xff]  ;;  %v6317_v63 = vld [vmem:[#allocation16 + $0x1698] sm:$0xff] }
 0xc16   : > { %v6321_v15 = vld [vmem:[#allocation16 + $0x16b8] sm:$0xff]  ;;  %v11564_v41 = vpack.c.bf16 %v6312_v14, %v6308_v13  ;;  %v11452_v13 = vpack.c.bf16 %v6342_v25, %v6338_v8 }
 0xc17   : > { %v11566_v19 = vpack.c.bf16 %v6321_v15, %v6317_v63  ;;  %v11454_v63 = vpack.c.bf16 %v6351_v6, %v6347_v61  ;;  %v6821_v8 = vld [vmem:[#allocation16 + $0x18b8] sm:$0xff]  ;;  %v6816_v61 = vld [vmem:[#allocation16 + $0x1890] sm:$0xff] }
 0xc18   : > { %11421 = vmatpush1.bf16.msra.mxu0 %v11420_v20  ;;  %11549 = vmatpush1.bf16.msra.mxu1 %v11548_v23  ;;  %v6316_v20 = vld [vmem:[#allocation16 + $0x1690] sm:$0xff] }
 0xc19   : > { %11423 = vmatprep.subr.bf16.mxu0 %v11422_v28  ;;  %11551 = vmatprep.subr.bf16.mxu1 %v11550_v4  ;;  %v6320_v23 = vld [vmem:[#allocation16 + $0x16b0] sm:$0xff]  ;;  %v6325_v28 = vld [vmem:[#allocation16 + $0x16d8] sm:$0xff] }
 0xc1a   : > { %v6329_v4 = vld [vmem:[#allocation16 + $0x16f8] sm:$0xff]  ;;  %v11568_v31 = vpack.c.bf16 %v6320_v23, %v6316_v20  ;;  %v11456_v20 = vpack.c.bf16 %v6350_v38, %v6346_v0  ;;  %v6820_v6 = vld [vmem:[#allocation16 + $0x18b0] sm:$0xff] }
 0xc1b   : > { %v11570_v22 = vpack.c.bf16 %v6329_v4, %v6325_v28  ;;  %v6358_v4 = vld [vmem:[#allocation16 + $0x17e0] sm:$0xff]  ;;  %v11728_v38 = vpack.c.bf16 %v6820_v6, %v6816_v61  ;;  %v6856_v6 = vld [vmem:[#allocation16 + $0x19d0] sm:$0xff] }
 0xc1c   : > { %11425 = vmatpush1.bf16.msra.mxu0 %v11424_v35  ;;  %11553 = vmatpush1.bf16.msra.mxu1 %v11552_v37  ;;  %v6324_v35 = vld [vmem:[#allocation16 + $0x16d0] sm:$0xff]  ;;  %v11460_v33 = vpack.c.bf16 %v6358_v4, %v6354_v26  ;;  %v6834_v4 = vld [vmem:[#allocation16 + $0x1920] sm:$0xff] }
 0xc1d   : > { %11427 = vmatprep.subr.bf16.mxu0 %v11426_v46  ;;  %11555 = vmatprep.subr.bf16.mxu1 %v11554_v50  ;;  %v6328_v37 = vld [vmem:[#allocation16 + $0x16f0] sm:$0xff]  ;;  %v6333_v46 = vld [vmem:[#allocation16 + $0x1718] sm:$0xff] }
 0xc1e   : > { %v6337_v50 = vld [vmem:[#allocation16 + $0x1738] sm:$0xff]  ;;  %v11572_v36 = vpack.c.bf16 %v6328_v37, %v6324_v35 }
 0xc1f   : > { %v11574_v58 = vpack.c.bf16 %v6337_v50, %v6333_v46  ;;  %v6801_v35 = vld [vmem:[#allocation16 + $0x1818] sm:$0xff]  ;;  %v6800_v46 = vld [vmem:[#allocation16 + $0x1810] sm:$0xff] }
 0xc20   : > { %11429 = vmatpush1.bf16.msra.mxu0 %v11428_v59  ;;  %11557 = vmatpush1.bf16.msra.mxu1 %v11556_v29  ;;  %v6332_v59 = vld [vmem:[#allocation16 + $0x1710] sm:$0xff]  ;;  %v6805_v37 = vld [vmem:[#allocation16 + $0x1838] sm:$0xff] }
 0xc21   : > { %11431 = vmatprep.subr.bf16.mxu0 %v11430_v51  ;;  %11559 = vmatprep.subr.bf16.mxu1 %v11558_v3  ;;  %v6336_v29 = vld [vmem:[#allocation16 + $0x1730] sm:$0xff]  ;;  %v6341_v51 = vld [vmem:[#allocation16 + $0x1758] sm:$0xff]  ;;  %v11718_v54 = vpack.c.bf16 %v6805_v37, %v6801_v35 }
 0xc22   : > { %v6345_v3 = vld [vmem:[#allocation16 + $0x1778] sm:$0xff]  ;;  %v11576_v7 = vpack.c.bf16 %v6336_v29, %v6332_v59  ;;  %v6804_v50 = vld [vmem:[#allocation16 + $0x1830] sm:$0xff]  ;;  %v6806_v29 = vld [vmem:[#allocation16 + $0x1840] sm:$0xff] }
 0xc23   : > { %v11578_v10 = vpack.c.bf16 %v6345_v3, %v6341_v51  ;;  %v11720_v59 = vpack.c.bf16 %v6804_v50, %v6800_v46  ;;  %v6808_v3 = vld [vmem:[#allocation16 + $0x1850] sm:$0xff]  ;;  %v6841_v35 = vld [vmem:[#allocation16 + $0x1958] sm:$0xff]  ;;  %v6838_v46 = vld [vmem:[#allocation16 + $0x1940] sm:$0xff] }
 0xc24   : > { %11433 = vmatpush1.bf16.msra.mxu0 %v11432_v60  ;;  %11561 = vmatpush1.bf16.msra.mxu1 %v11560_v11  ;;  %v6340_v60 = vld [vmem:[#allocation16 + $0x1750] sm:$0xff]  ;;  %v6845_v37 = vld [vmem:[#allocation16 + $0x1978] sm:$0xff]  ;;  %v6842_v50 = vld [vmem:[#allocation16 + $0x1960] sm:$0xff] }
 0xc25   : > { %11435 = vmatprep.subr.bf16.mxu0 %v11434_v47  ;;  %11563 = vmatprep.subr.bf16.mxu1 %v11562_v12  ;;  %v6344_v11 = vld [vmem:[#allocation16 + $0x1770] sm:$0xff]  ;;  %v6349_v47 = vld [vmem:[#allocation16 + $0x1798] sm:$0xff] }
 0xc26   : > { %v6353_v12 = vld [vmem:[#allocation16 + $0x17b8] sm:$0xff]  ;;  %v11580_v14 = vpack.c.bf16 %v6344_v11, %v6340_v60 }
 0xc27   : > { %v11582_v15 = vpack.c.bf16 %v6353_v12, %v6349_v47  ;;  %v6823_v47 = vld [vmem:[#allocation16 + $0x18c8] sm:$0xff] }
 0xc28   : > { %11437 = vmatpush1.bf16.msra.mxu0 %v11436_v2  ;;  %11565 = vmatpush1.bf16.msra.mxu1 %v11564_v41  ;;  %v6348_v2 = vld [vmem:[#allocation16 + $0x1790] sm:$0xff]  ;;  %v6827_v12 = vld [vmem:[#allocation16 + $0x18e8] sm:$0xff] }
 0xc29   : > { %11439 = vmatprep.subr.bf16.mxu0 %v11438_v18  ;;  %11567 = vmatprep.subr.bf16.mxu1 %v11566_v19  ;;  %v6352_v41 = vld [vmem:[#allocation16 + $0x17b0] sm:$0xff]  ;;  %v6357_v18 = vld [vmem:[#allocation16 + $0x17d8] sm:$0xff] }
 0xc2a   : > { %v6361_v19 = vld [vmem:[#allocation16 + $0x17f8] sm:$0xff]  ;;  %v11584_v23 = vpack.c.bf16 %v6352_v41, %v6348_v2  ;;  %v11602_v2 = vpack.c.bf16 %v6827_v12, %v6823_v47  ;;  %v6860_v47 = vld [vmem:[#allocation16 + $0x19f0] sm:$0xff]  ;;  %v6863_v12 = vld [vmem:[#allocation16 + $0x1a08] sm:$0xff] }
 0xc2b   : > { %v11586_v28 = vpack.c.bf16 %v6361_v19, %v6357_v18  ;;  %v6831_v18 = vld [vmem:[#allocation16 + $0x1908] sm:$0xff] }
 0xc2c   : > { %11441 = vmatpush1.bf16.msra.mxu0 %v11440_v30  ;;  %11569 = vmatpush1.bf16.msra.mxu1 %v11568_v31  ;;  %v6356_v30 = vld [vmem:[#allocation16 + $0x17d0] sm:$0xff]  ;;  %v6835_v19 = vld [vmem:[#allocation16 + $0x1928] sm:$0xff] }
 0xc2d   : > { %11443 = vmatprep.subr.bf16.mxu0 %v11442_v21  ;;  %11571 = vmatprep.subr.bf16.mxu1 %v11570_v22  ;;  %v6360_v31 = vld [vmem:[#allocation16 + $0x17f0] sm:$0xff]  ;;  %v6799_v21 = vld [vmem:[#allocation16 + $0x1808] sm:$0xff] }
 0xc2e   : > { %v11588_v34 = vpack.c.bf16 %v6360_v31, %v6356_v30  ;;  %v6803_v22 = vld [vmem:[#allocation16 + $0x1828] sm:$0xff]  ;;  %v11606_v30 = vpack.c.bf16 %v6835_v19, %v6831_v18  ;;  %v6868_v18 = vld [vmem:[#allocation16 + $0x1a30] sm:$0xff] }
 0xc2f   : > { %v6871_v19 = vld [vmem:[#allocation16 + $0x1a48] sm:$0xff] }
 0xc30   : > { %11445 = vmatpush1.bf16.msra.mxu0 %v11444_v32  ;;  %11573 = vmatpush1.bf16.msra.mxu1 %v11572_v36  ;;  %v6807_v32 = vld [vmem:[#allocation16 + $0x1848] sm:$0xff]  ;;  %v11590_v36 = vpack.c.bf16 %v6803_v22, %v6799_v21 }
 0xc31   : > { %11447 = vmatprep.subr.bf16.mxu0 %v11446_v57  ;;  %11575 = vmatprep.subr.bf16.mxu1 %v11574_v58  ;;  %v6809_v57 = vld [vmem:[#allocation16 + $0x1858] sm:$0xff]  ;;  %v11594_v55 = vpack.c.bf16 %v6811_v56, %v6807_v32  ;;  %v6839_v21 = vld [vmem:[#allocation16 + $0x1948] sm:$0xff]  ;;  %v6844_v56 = vld [vmem:[#allocation16 + $0x1970] sm:$0xff] }
 0xc32   : > { %v6813_v58 = vld [vmem:[#allocation16 + $0x1878] sm:$0xff]  ;;  %v6843_v22 = vld [vmem:[#allocation16 + $0x1968] sm:$0xff] }
 0xc33   : > { %v11722_v51 = vpack.c.bf16 %v6813_v58, %v6809_v57  ;;  %v11610_v32 = vpack.c.bf16 %v6843_v22, %v6839_v21  ;;  %v6847_v57 = vld [vmem:[#allocation16 + $0x1988] sm:$0xff]  ;;  %v6876_v21 = vld [vmem:[#allocation16 + $0x1a70] sm:$0xff] }
 0xc34   : > { %11449 = vmatpush1.bf16.msra.mxu0 %v11448_v5  ;;  %11577 = vmatpush1.bf16.msra.mxu1 %v11576_v7  ;;  %v6812_v5 = vld [vmem:[#allocation16 + $0x1870] sm:$0xff]  ;;  %v6817_v7 = vld [vmem:[#allocation16 + $0x1898] sm:$0xff]  ;;  %v6851_v58 = vld [vmem:[#allocation16 + $0x19a8] sm:$0xff] }
 0xc35   : > { %11451 = vmatprep.subr.bf16.mxu0 %v11450_v9  ;;  %11579 = vmatprep.subr.bf16.mxu1 %v11578_v10  ;;  %v11724_v25 = vpack.c.bf16 %v6812_v5, %v6808_v3  ;;  %v6814_v9 = vld [vmem:[#allocation16 + $0x1880] sm:$0xff]  ;;  %v11726_v11 = vpack.c.bf16 %v6821_v8, %v6817_v7  ;;  %v6848_v5 = vld [vmem:[#allocation16 + $0x1990] sm:$0xff]  ;;  %v6859_v7 = vld [vmem:[#allocation16 + $0x19e8] sm:$0xff] }
 0xc36   : > { %v6818_v10 = vld [vmem:[#allocation16 + $0x18a0] sm:$0xff]  ;;  %v6857_v8 = vld [vmem:[#allocation16 + $0x19d8] sm:$0xff]  ;;  %v6879_v22 = vld [vmem:[#allocation16 + $0x1a88] sm:$0xff] }
 0xc37   : > { %v11600_v0 = vpack.c.bf16 %v6818_v10, %v6814_v9  ;;  %v6854_v10 = vld [vmem:[#allocation16 + $0x19c0] sm:$0xff] }
 0xc38   : > { %11453 = vmatpush1.bf16.msra.mxu0 %v11452_v13  ;;  %11581 = vmatpush1.bf16.msra.mxu1 %v11580_v14  ;;  %v6825_v13 = vld [vmem:[#allocation16 + $0x18d8] sm:$0xff] }
 0xc39   : > { %11455 = vmatprep.subr.bf16.mxu0 %v11454_v63  ;;  %11583 = vmatprep.subr.bf16.mxu1 %v11582_v15  ;;  %v6829_v14 = vld [vmem:[#allocation16 + $0x18f8] sm:$0xff]  ;;  %v6822_v63 = vld [vmem:[#allocation16 + $0x18c0] sm:$0xff] }
 0xc3a   : > { %v6826_v15 = vld [vmem:[#allocation16 + $0x18e0] sm:$0xff]  ;;  %v11730_v41 = vpack.c.bf16 %v6829_v14, %v6825_v13  ;;  %v6867_v13 = vld [vmem:[#allocation16 + $0x1a28] sm:$0xff]  ;;  %v6865_v14 = vld [vmem:[#allocation16 + $0x1a18] sm:$0xff] }
 0xc3b   : > { %v11604_v26 = vpack.c.bf16 %v6826_v15, %v6822_v63  ;;  %v11748_v63 = vpack.c.bf16 %v6860_v47, %v6856_v6  ;;  %v6862_v15 = vld [vmem:[#allocation16 + $0x1a00] sm:$0xff]  ;;  %v6896_v47 = vld [vmem:[#allocation16 + $0x1b10] sm:$0xff] }
 0xc3c   : > { %11457 = vmatpush1.bf16.msra.mxu0 %v11456_v20  ;;  %11585 = vmatpush1.bf16.msra.mxu1 %v11584_v23  ;;  %v6833_v20 = vld [vmem:[#allocation16 + $0x1918] sm:$0xff] }
 0xc3d   : > { %11459 = vmatprep.subr.bf16.mxu0 %v11458_v27  ;;  %11587 = vmatprep.subr.bf16.mxu1 %v11586_v28  ;;  %v6837_v23 = vld [vmem:[#allocation16 + $0x1938] sm:$0xff]  ;;  %v11732_v27 = vpack.c.bf16 %v6828_v17, %v6824_v16  ;;  %v6830_v28 = vld [vmem:[#allocation16 + $0x1900] sm:$0xff]  ;;  %v6864_v17 = vld [vmem:[#allocation16 + $0x1a10] sm:$0xff] }
 0xc3e   : > { %v11734_v31 = vpack.c.bf16 %v6837_v23, %v6833_v20  ;;  %v6875_v20 = vld [vmem:[#allocation16 + $0x1a68] sm:$0xff]  ;;  %v6873_v23 = vld [vmem:[#allocation16 + $0x1a58] sm:$0xff] }
 0xc40   : > { %11461 = vmatpush1.bf16.msra.mxu0 %v11460_v33  ;;  %11589 = vmatpush1.bf16.msra.mxu1 %v11588_v34  ;;  %v6832_v33 = vld [vmem:[#allocation16 + $0x1910] sm:$0xff] }
 0xc41   : > { %9488 = vmatprep.subr.msk.mxu0 %vm4575_vm4, %v13766_v48  ;;  %9491 = vmatprep.subr.msk.mxu1 %vm4575_vm4, %v13768_v49  ;;  %v6651_v48 = vld [vmem:[#allocation15 + $0x6] sm:$0x3]  ;;  %v11592_v49 = vpack.c.bf16 %v6802_v45, %v6798_v44  ;;  %v6836_v34 = vld [vmem:[#allocation16 + $0x1930] sm:$0xff]  ;;  %v11608_v44 = vpack.c.bf16 %v6834_v4, %v6830_v28  ;;  %v11752_v28 = vpack.c.bf16 %v6868_v18, %v6864_v17  ;;  %v6870_v4 = vld [vmem:[#allocation16 + $0x1a40] sm:$0xff] }
 0xc42   : > { %v11736_v45 = vpack.c.bf16 %v6836_v34, %v6832_v33  ;;  %v6872_v34 = vld [vmem:[#allocation16 + $0x1a50] sm:$0xff] }
 0xc43   : > { %6498 = vmatmul.mubr.f32.vlgmr.msra.gmra.mrb[20].mxu0 %v13828_v24  ;;  %6640 = vmatmul.mubr.f32.vlgmr.msra.gmra.mrb[20].mxu1 %v13828_v24  ;;  %v6815_v24 = vld [vmem:[#allocation16 + $0x1888] sm:$0xff]  ;;  %v6904_v18 = vld [vmem:[#allocation16 + $0x1b50] sm:$0xff] }
 0xc44   : > { %9489 = vmatpush1.msk.msra.mxu0 %vm4575_vm4, %v13770_v52  ;;  %9492 = vmatpush1.msk.msra.mxu1 %vm4575_vm4, %v13772_v53  ;;  %v6819_v52 = vld [vmem:[#allocation16 + $0x18a8] sm:$0xff]  ;;  %v11596_v53 = vpack.c.bf16 %v6810_v62, %v6806_v29  ;;  %v6846_v62 = vld [vmem:[#allocation16 + $0x1980] sm:$0xff] }
 0xc45   : > { %6719 = vmatprep.mubr.f32.mxu0 %v13189_v1  ;;  %6790 = vmatprep.mubr.f32.mxu1 %v13189_v1  ;;  %v11598_v60 = vpack.c.bf16 %v6819_v52, %v6815_v24  ;;  %v6852_v24 = vld [vmem:[#allocation16 + $0x19b0] sm:$0xff]  ;;  %v6855_v52 = vld [vmem:[#allocation16 + $0x19c8] sm:$0xff] }
 0xc46   : > { %11591 = vmatprep.subr.bf16.mxu0 %v11590_v36  ;;  %11719 = vmatprep.subr.bf16.mxu1 %v11718_v54  ;;  %v11738_v36 = vpack.c.bf16 %v6845_v37, %v6841_v35  ;;  %v6840_v54 = vld [vmem:[#allocation16 + $0x1950] sm:$0xff]  ;;  %v11744_v9 = vpack.c.bf16 %v6852_v24, %v6848_v5  ;;  %v6883_v35 = vld [vmem:[#allocation16 + $0x1aa8] sm:$0xff]  ;;  %v6881_v37 = vld [vmem:[#allocation16 + $0x1a98] sm:$0xff] }
 0xc47   : > { %9490 = vmatmul.mubr.msk.f32.vlgmr.msra.gmra.mrb[24].mxu0 %vm4571_vm5, %v6651_v48  ;;  %9493 = vmatmul.mubr.msk.f32.vlgmr.msra.gmra.mrb[24].mxu1 %vm4571_vm5, %v6651_v48  ;;  %v6849_v48 = vld [vmem:[#allocation16 + $0x1998] sm:$0xff]  ;;  %v11740_v29 = vpack.c.bf16 %v6844_v56, %v6840_v54  ;;  %v6880_v56 = vld [vmem:[#allocation16 + $0x1a90] sm:$0xff] }
 0xc48   : > { %11593 = vmatpush1.bf16.msra.mxu0 %v11592_v49  ;;  %11721 = vmatpush1.bf16.msra.mxu1 %v11720_v59  ;;  %v6853_v49 = vld [vmem:[#allocation16 + $0x19b8] sm:$0xff]  ;;  %v11612_v59 = vpack.c.bf16 %v6842_v50, %v6838_v46  ;;  %v11756_v46 = vpack.c.bf16 %v6876_v21, %v6872_v34  ;;  %v6878_v50 = vld [vmem:[#allocation16 + $0x1a80] sm:$0xff]  ;;  %v6888_v24 = vld [vmem:[#allocation16 + $0x1ad0] sm:$0xff] }
 0xc49   : > { %11595 = vmatprep.subr.bf16.mxu0 %v11594_v55  ;;  %11723 = vmatprep.subr.bf16.mxu1 %v11722_v51  ;;  %v6850_v55 = vld [vmem:[#allocation16 + $0x19a0] sm:$0xff]  ;;  %v11614_v51 = vpack.c.bf16 %v6851_v58, %v6847_v57  ;;  %v11742_v3 = vpack.c.bf16 %v6853_v49, %v6849_v48  ;;  %v6884_v57 = vld [vmem:[#allocation16 + $0x1ab0] sm:$0xff]  ;;  %v6887_v58 = vld [vmem:[#allocation16 + $0x1ac8] sm:$0xff] }
 0xc4a   : > { %v6891_v48 = vld [vmem:[#allocation16 + $0x1ae8] sm:$0xff]  ;;  %v6889_v49 = vld [vmem:[#allocation16 + $0x1ad8] sm:$0xff]  ;;  %v6912_v21 = vld [vmem:[#allocation16 + $0x1b90] sm:$0xff] }
 0xc4c   : > { %11597 = vmatpush1.bf16.msra.mxu0 %v11596_v53  ;;  %11725 = vmatpush1.bf16.msra.mxu1 %v11724_v25  ;;  %v6861_v53 = vld [vmem:[#allocation16 + $0x19f8] sm:$0xff]  ;;  %v11616_v25 = vpack.c.bf16 %v6850_v55, %v6846_v62  ;;  %v11760_v62 = vpack.c.bf16 %v6884_v57, %v6880_v56  ;;  %v6886_v55 = vld [vmem:[#allocation16 + $0x1ac0] sm:$0xff]  ;;  %v6920_v57 = vld [vmem:[#allocation16 + $0x1bd0] sm:$0xff] }
 0xc4d   : > { %11599 = vmatprep.subr.bf16.mxu0 %v11598_v60  ;;  %11727 = vmatprep.subr.bf16.mxu1 %v11726_v11  ;;  %v6858_v60 = vld [vmem:[#allocation16 + $0x19e0] sm:$0xff]  ;;  %v11618_v11 = vpack.c.bf16 %v6859_v7, %v6855_v52  ;;  %v11746_v61 = vpack.c.bf16 %v6861_v53, %v6857_v8  ;;  %v6892_v52 = vld [vmem:[#allocation16 + $0x1af0] sm:$0xff]  ;;  %v6895_v7 = vld [vmem:[#allocation16 + $0x1b08] sm:$0xff] }
 0xc4e   : > { %v6899_v8 = vld [vmem:[#allocation16 + $0x1b28] sm:$0xff]  ;;  %v6897_v53 = vld [vmem:[#allocation16 + $0x1b18] sm:$0xff]  ;;  %v6922_v56 = vld [vmem:[#allocation16 + $0x1be0] sm:$0xff] }
 0xc50   : > { %11601 = vmatpush1.bf16.msra.mxu0 %v11600_v0  ;;  %11729 = vmatpush1.bf16.msra.mxu1 %v11728_v38  ;;  %v6869_v0 = vld [vmem:[#allocation16 + $0x1a38] sm:$0xff]  ;;  %v11620_v38 = vpack.c.bf16 %v6858_v60, %v6854_v10  ;;  %v11764_v10 = vpack.c.bf16 %v6892_v52, %v6888_v24  ;;  %v6894_v60 = vld [vmem:[#allocation16 + $0x1b00] sm:$0xff]  ;;  %v6928_v52 = vld [vmem:[#allocation16 + $0x1c10] sm:$0xff] }
 0xc51   : > { %11603 = vmatprep.subr.bf16.mxu0 %v11602_v2  ;;  %11731 = vmatprep.subr.bf16.mxu1 %v11730_v41  ;;  %v6866_v2 = vld [vmem:[#allocation16 + $0x1a20] sm:$0xff]  ;;  %v11622_v41 = vpack.c.bf16 %v6867_v13, %v6863_v12  ;;  %v11750_v16 = vpack.c.bf16 %v6869_v0, %v6865_v14  ;;  %v6900_v12 = vld [vmem:[#allocation16 + $0x1b30] sm:$0xff]  ;;  %v6903_v13 = vld [vmem:[#allocation16 + $0x1b48] sm:$0xff] }
 0xc52   : > { %v6907_v14 = vld [vmem:[#allocation16 + $0x1b68] sm:$0xff]  ;;  %v6905_v0 = vld [vmem:[#allocation16 + $0x1b58] sm:$0xff]  ;;  %v6930_v24 = vld [vmem:[#allocation16 + $0x1c20] sm:$0xff] }
 0xc54   : > { %11605 = vmatpush1.bf16.msra.mxu0 %v11604_v26  ;;  %11733 = vmatpush1.bf16.msra.mxu1 %v11732_v27  ;;  %v6877_v26 = vld [vmem:[#allocation16 + $0x1a78] sm:$0xff]  ;;  %v11624_v27 = vpack.c.bf16 %v6866_v2, %v6862_v15  ;;  %v11768_v15 = vpack.c.bf16 %v6900_v12, %v6896_v47  ;;  %v6902_v2 = vld [vmem:[#allocation16 + $0x1b40] sm:$0xff] }
 0xc55   : > { %11607 = vmatprep.subr.bf16.mxu0 %v11606_v30  ;;  %11735 = vmatprep.subr.bf16.mxu1 %v11734_v31  ;;  %v6874_v30 = vld [vmem:[#allocation16 + $0x1a60] sm:$0xff]  ;;  %v11626_v31 = vpack.c.bf16 %v6875_v20, %v6871_v19  ;;  %v11754_v33 = vpack.c.bf16 %v6877_v26, %v6873_v23  ;;  %v6908_v19 = vld [vmem:[#allocation16 + $0x1b70] sm:$0xff]  ;;  %v6911_v20 = vld [vmem:[#allocation16 + $0x1b88] sm:$0xff] }
 0xc56   : > { %v6915_v23 = vld [vmem:[#allocation16 + $0x1ba8] sm:$0xff]  ;;  %v6913_v26 = vld [vmem:[#allocation16 + $0x1b98] sm:$0xff] }
 0xc58   : > { %11609 = vmatpush1.bf16.msra.mxu0 %v11608_v44  ;;  %11737 = vmatpush1.bf16.msra.mxu1 %v11736_v45  ;;  %v6885_v44 = vld [vmem:[#allocation16 + $0x1ab8] sm:$0xff]  ;;  %v11628_v45 = vpack.c.bf16 %v6874_v30, %v6870_v4  ;;  %v11772_v4 = vpack.c.bf16 %v6908_v19, %v6904_v18  ;;  %v6910_v30 = vld [vmem:[#allocation16 + $0x1b80] sm:$0xff] }
 0xc59   : > { %11611 = vmatprep.subr.bf16.mxu0 %v11610_v32  ;;  %11739 = vmatprep.subr.bf16.mxu1 %v11738_v36  ;;  %v6882_v32 = vld [vmem:[#allocation16 + $0x1aa0] sm:$0xff]  ;;  %v11630_v36 = vpack.c.bf16 %v6883_v35, %v6879_v22  ;;  %v11758_v54 = vpack.c.bf16 %v6885_v44, %v6881_v37  ;;  %v6916_v22 = vld [vmem:[#allocation16 + $0x1bb0] sm:$0xff]  ;;  %v6919_v35 = vld [vmem:[#allocation16 + $0x1bc8] sm:$0xff] }
 0xc5a   : > { %v6923_v37 = vld [vmem:[#allocation16 + $0x1be8] sm:$0xff]  ;;  %v6921_v44 = vld [vmem:[#allocation16 + $0x1bd8] sm:$0xff]  ;;  %v6942_v19 = vld [vmem:[#allocation16 + $0x1c80] sm:$0xff] }
 0xc5c   : > { %11613 = vmatpush1.bf16.msra.mxu0 %v11612_v59  ;;  %11741 = vmatpush1.bf16.msra.mxu1 %v11740_v29  ;;  %v6893_v59 = vld [vmem:[#allocation16 + $0x1af8] sm:$0xff]  ;;  %v11632_v29 = vpack.c.bf16 %v6882_v32, %v6878_v50  ;;  %v11776_v50 = vpack.c.bf16 %v6916_v22, %v6912_v21  ;;  %v6918_v32 = vld [vmem:[#allocation16 + $0x1bc0] sm:$0xff] }
 0xc5d   : > { %11615 = vmatprep.subr.bf16.mxu0 %v11614_v51  ;;  %11743 = vmatprep.subr.bf16.mxu1 %v11742_v3  ;;  %v6890_v51 = vld [vmem:[#allocation16 + $0x1ae0] sm:$0xff]  ;;  %v11634_v3 = vpack.c.bf16 %v6891_v48, %v6887_v58  ;;  %v11762_v5 = vpack.c.bf16 %v6893_v59, %v6889_v49  ;;  %v6924_v58 = vld [vmem:[#allocation16 + $0x1bf0] sm:$0xff]  ;;  %v11652_v48 = vpack.c.bf16 %v6922_v56, %v6918_v32  ;;  %v6927_v59 = vld [vmem:[#allocation16 + $0x1c08] sm:$0xff] }
 0xc5e   : > { %v11780_v49 = vpack.c.bf16 %v6924_v58, %v6920_v57  ;;  %v6950_v22 = vld [vmem:[#allocation16 + $0x1cc0] sm:$0xff]  ;;  %v6963_v32 = vld [vmem:[#allocation16 + $0x1d28] sm:$0xff] }
 0xc5f   : > { %v6958_v58 = vld [vmem:[#allocation16 + $0x1d00] sm:$0xff] }
 0xc60   : > { %11617 = vmatpush1.bf16.msra.mxu0 %v11616_v25  ;;  %11745 = vmatpush1.bf16.msra.mxu1 %v11744_v9  ;;  %v6901_v25 = vld [vmem:[#allocation16 + $0x1b38] sm:$0xff]  ;;  %v11636_v9 = vpack.c.bf16 %v6890_v51, %v6886_v55 }
 0xc61   : > { %11619 = vmatprep.subr.bf16.mxu0 %v11618_v11  ;;  %11747 = vmatprep.subr.bf16.mxu1 %v11746_v61  ;;  %v6898_v11 = vld [vmem:[#allocation16 + $0x1b20] sm:$0xff]  ;;  %v11638_v61 = vpack.c.bf16 %v6899_v8, %v6895_v7  ;;  %v11766_v6 = vpack.c.bf16 %v6901_v25, %v6897_v53  ;;  %v6933_v51 = vld [vmem:[#allocation16 + $0x1c38] sm:$0xff]  ;;  %v6932_v7 = vld [vmem:[#allocation16 + $0x1c30] sm:$0xff] }
 0xc62   : > { %v6935_v8 = vld [vmem:[#allocation16 + $0x1c48] sm:$0xff]  ;;  %v6937_v25 = vld [vmem:[#allocation16 + $0x1c58] sm:$0xff] }
 0xc63   : > { %v6939_v53 = vld [vmem:[#allocation16 + $0x1c68] sm:$0xff] }
 0xc64   : > { %11621 = vmatpush1.bf16.msra.mxu0 %v11620_v38  ;;  %11749 = vmatpush1.bf16.msra.mxu1 %v11748_v63  ;;  %v6909_v38 = vld [vmem:[#allocation16 + $0x1b78] sm:$0xff]  ;;  %v11640_v63 = vpack.c.bf16 %v6898_v11, %v6894_v60  ;;  %v11784_v11 = vpack.c.bf16 %v6932_v7, %v6928_v52  ;;  %v6966_v7 = vld [vmem:[#allocation16 + $0x1d40] sm:$0xff] }
 0xc65   : > { %11623 = vmatprep.subr.bf16.mxu0 %v11622_v41  ;;  %11751 = vmatprep.subr.bf16.mxu1 %v11750_v16  ;;  %v6906_v41 = vld [vmem:[#allocation16 + $0x1b60] sm:$0xff]  ;;  %v11642_v16 = vpack.c.bf16 %v6907_v14, %v6903_v13  ;;  %v11770_v17 = vpack.c.bf16 %v6909_v38, %v6905_v0  ;;  %v11658_v13 = vpack.c.bf16 %v6939_v53, %v6935_v8  ;;  %v6936_v0 = vld [vmem:[#allocation16 + $0x1c50] sm:$0xff] }
 0xc66   : > { %v6940_v38 = vld [vmem:[#allocation16 + $0x1c70] sm:$0xff]  ;;  %v6970_v8 = vld [vmem:[#allocation16 + $0x1d60] sm:$0xff] }
 0xc67   : > { %v11788_v18 = vpack.c.bf16 %v6940_v38, %v6936_v0  ;;  %v6978_v0 = vld [vmem:[#allocation16 + $0x1da0] sm:$0xff] }
 0xc68   : > { %11625 = vmatpush1.bf16.msra.mxu0 %v11624_v27  ;;  %11753 = vmatpush1.bf16.msra.mxu1 %v11752_v28  ;;  %v6917_v27 = vld [vmem:[#allocation16 + $0x1bb8] sm:$0xff]  ;;  %v11644_v28 = vpack.c.bf16 %v6906_v41, %v6902_v2  ;;  %v6947_v2 = vld [vmem:[#allocation16 + $0x1ca8] sm:$0xff] }
 0xc69   : > { %11627 = vmatprep.subr.bf16.mxu0 %v11626_v31  ;;  %11755 = vmatprep.subr.bf16.mxu1 %v11754_v33  ;;  %v6914_v31 = vld [vmem:[#allocation16 + $0x1ba0] sm:$0xff]  ;;  %v11646_v33 = vpack.c.bf16 %v6915_v23, %v6911_v20  ;;  %v11774_v34 = vpack.c.bf16 %v6917_v27, %v6913_v26  ;;  %v6945_v41 = vld [vmem:[#allocation16 + $0x1c98] sm:$0xff]  ;;  %v6944_v27 = vld [vmem:[#allocation16 + $0x1c90] sm:$0xff] }
 0xc6a   : > { %v6946_v20 = vld [vmem:[#allocation16 + $0x1ca0] sm:$0xff] }
 0xc6c   : > { %11629 = vmatpush1.bf16.msra.mxu0 %v11628_v45  ;;  %11757 = vmatpush1.bf16.msra.mxu1 %v11756_v46  ;;  %v6925_v45 = vld [vmem:[#allocation16 + $0x1bf8] sm:$0xff]  ;;  %v11648_v46 = vpack.c.bf16 %v6914_v31, %v6910_v30  ;;  %v6955_v30 = vld [vmem:[#allocation16 + $0x1ce8] sm:$0xff] }
 0xc6d   : > { %11631 = vmatprep.subr.bf16.mxu0 %v11630_v36  ;;  %11759 = vmatprep.subr.bf16.mxu1 %v11758_v54  ;;  %v11650_v36 = vpack.c.bf16 %v6923_v37, %v6919_v35  ;;  %v11778_v54 = vpack.c.bf16 %v6925_v45, %v6921_v44  ;;  %v6953_v31 = vld [vmem:[#allocation16 + $0x1cd8] sm:$0xff]  ;;  %v6954_v35 = vld [vmem:[#allocation16 + $0x1ce0] sm:$0xff]  ;;  %v6952_v45 = vld [vmem:[#allocation16 + $0x1cd0] sm:$0xff] }
 0xc6e   : > { %v11668_v56 = vpack.c.bf16 %v6954_v35, %v6950_v22 }
 0xc70   : > { %11633 = vmatpush1.bf16.msra.mxu0 %v11632_v29  ;;  %11761 = vmatpush1.bf16.msra.mxu1 %v11760_v62  ;;  %v6931_v29 = vld [vmem:[#allocation16 + $0x1c28] sm:$0xff]  ;;  %v6929_v62 = vld [vmem:[#allocation16 + $0x1c18] sm:$0xff] }
 0xc71   : > { %11635 = vmatprep.subr.bf16.mxu0 %v11634_v3  ;;  %11763 = vmatprep.subr.bf16.mxu1 %v11762_v5  ;;  %v11654_v55 = vpack.c.bf16 %v6931_v29, %v6927_v59  ;;  %v11782_v3 = vpack.c.bf16 %v6933_v51, %v6929_v62  ;;  %v6926_v5 = vld [vmem:[#allocation16 + $0x1c00] sm:$0xff]  ;;  %v6960_v29 = vld [vmem:[#allocation16 + $0x1d10] sm:$0xff]  ;;  %v6971_v51 = vld [vmem:[#allocation16 + $0x1d68] sm:$0xff] }
 0xc72   : > { %v11656_v60 = vpack.c.bf16 %v6930_v24, %v6926_v5  ;;  %v6964_v62 = vld [vmem:[#allocation16 + $0x1d30] sm:$0xff]  ;;  %v6973_v5 = vld [vmem:[#allocation16 + $0x1d78] sm:$0xff] }
 0xc73   : > { %v11800_v52 = vpack.c.bf16 %v6964_v62, %v6960_v29 }
 0xc74   : > { %11637 = vmatpush1.bf16.msra.mxu0 %v11636_v9  ;;  %11765 = vmatpush1.bf16.msra.mxu1 %v11764_v10  ;;  %v6941_v9 = vld [vmem:[#allocation16 + $0x1c78] sm:$0xff] }
 0xc75   : > { %11639 = vmatprep.subr.bf16.mxu0 %v11638_v61  ;;  %11767 = vmatprep.subr.bf16.mxu1 %v11766_v6  ;;  %v6934_v61 = vld [vmem:[#allocation16 + $0x1c40] sm:$0xff]  ;;  %v11786_v14 = vpack.c.bf16 %v6941_v9, %v6937_v25  ;;  %v6968_v9 = vld [vmem:[#allocation16 + $0x1d50] sm:$0xff] }
 0xc76   : > { %v6938_v6 = vld [vmem:[#allocation16 + $0x1c60] sm:$0xff] }
 0xc78   : > { %11641 = vmatpush1.bf16.msra.mxu0 %v11640_v63  ;;  %11769 = vmatpush1.bf16.msra.mxu1 %v11768_v15  ;;  %v6943_v63 = vld [vmem:[#allocation16 + $0x1c88] sm:$0xff] }
 0xc79   : > { %11643 = vmatprep.subr.bf16.mxu0 %v11642_v16  ;;  %11771 = vmatprep.subr.bf16.mxu1 %v11770_v17  ;;  %v6949_v16 = vld [vmem:[#allocation16 + $0x1cb8] sm:$0xff]  ;;  %v11660_v17 = vpack.c.bf16 %v6938_v6, %v6934_v61  ;;  %v11662_v23 = vpack.c.bf16 %v6947_v2, %v6943_v63  ;;  %v6980_v2 = vld [vmem:[#allocation16 + $0x1db0] sm:$0xff] }
 0xc7a   : > { %v11790_v26 = vpack.c.bf16 %v6949_v16, %v6945_v41  ;;  %v6977_v61 = vld [vmem:[#allocation16 + $0x1d98] sm:$0xff]  ;;  %v6983_v41 = vld [vmem:[#allocation16 + $0x1dc8] sm:$0xff] }
 0xc7b   : > { %v6981_v6 = vld [vmem:[#allocation16 + $0x1db8] sm:$0xff]  ;;  %v6987_v16 = vld [vmem:[#allocation16 + $0x1de8] sm:$0xff] }
 0xc7c   : > { %11645 = vmatpush1.bf16.msra.mxu0 %v11644_v28  ;;  %11773 = vmatpush1.bf16.msra.mxu1 %v11772_v4  ;;  %v6948_v28 = vld [vmem:[#allocation16 + $0x1cb0] sm:$0xff]  ;;  %v6951_v4 = vld [vmem:[#allocation16 + $0x1cc8] sm:$0xff]  ;;  %v11806_v63 = vpack.c.bf16 %v6981_v6, %v6977_v61 }
 0xc7d   : > { %11647 = vmatprep.subr.bf16.mxu0 %v11646_v33  ;;  %11775 = vmatprep.subr.bf16.mxu1 %v11774_v34  ;;  %v6957_v33 = vld [vmem:[#allocation16 + $0x1cf8] sm:$0xff]  ;;  %v11664_v34 = vpack.c.bf16 %v6946_v20, %v6942_v19  ;;  %v11792_v21 = vpack.c.bf16 %v6948_v28, %v6944_v27  ;;  %v11666_v37 = vpack.c.bf16 %v6955_v30, %v6951_v4  ;;  %v6984_v4 = vld [vmem:[#allocation16 + $0x1dd0] sm:$0xff]  ;;  %v7015_v61 = vld [vmem:[#allocation16 + $0x1ec8] sm:$0xff] }
 0xc7e   : > { %v11794_v44 = vpack.c.bf16 %v6957_v33, %v6953_v31  ;;  %v11682_v27 = vpack.c.bf16 %v6987_v16, %v6983_v41  ;;  %v6988_v30 = vld [vmem:[#allocation16 + $0x1df0] sm:$0xff]  ;;  %v6991_v31 = vld [vmem:[#allocation16 + $0x1e08] sm:$0xff] }
 0xc7f   : > { %v6995_v33 = vld [vmem:[#allocation16 + $0x1e28] sm:$0xff]  ;;  %v11812_v35 = vpack.c.bf16 %v6988_v30, %v6984_v4  ;;  %v7016_v41 = vld [vmem:[#allocation16 + $0x1ed0] sm:$0xff] }
 0xc80   : > { %11649 = vmatpush1.bf16.msra.mxu0 %v11648_v46  ;;  %11777 = vmatpush1.bf16.msra.mxu1 %v11776_v50  ;;  %v6956_v46 = vld [vmem:[#allocation16 + $0x1cf0] sm:$0xff]  ;;  %v6959_v50 = vld [vmem:[#allocation16 + $0x1d08] sm:$0xff] }
 0xc81   : > { %11651 = vmatprep.subr.bf16.mxu0 %v11650_v36  ;;  %11779 = vmatprep.subr.bf16.mxu1 %v11778_v54  ;;  %v6961_v36 = vld [vmem:[#allocation16 + $0x1d18] sm:$0xff]  ;;  %v11796_v57 = vpack.c.bf16 %v6956_v46, %v6952_v45  ;;  %v11686_v45 = vpack.c.bf16 %v6995_v33, %v6991_v31  ;;  %v7019_v6 = vld [vmem:[#allocation16 + $0x1ee8] sm:$0xff]  ;;  %v7020_v16 = vld [vmem:[#allocation16 + $0x1ef0] sm:$0xff] }
 0xc82   : > { %v6965_v54 = vld [vmem:[#allocation16 + $0x1d38] sm:$0xff]  ;;  %v7024_v31 = vld [vmem:[#allocation16 + $0x1f10] sm:$0xff] }
 0xc83   : > { %v11798_v59 = vpack.c.bf16 %v6965_v54, %v6961_v36  ;;  %v6999_v36 = vld [vmem:[#allocation16 + $0x1e48] sm:$0xff]  ;;  %v7028_v33 = vld [vmem:[#allocation16 + $0x1f30] sm:$0xff] }
 0xc84   : > { %11653 = vmatpush1.bf16.msra.mxu0 %v11652_v48  ;;  %11781 = vmatpush1.bf16.msra.mxu1 %v11780_v49  ;;  %v6962_v48 = vld [vmem:[#allocation16 + $0x1d20] sm:$0xff]  ;;  %v11670_v49 = vpack.c.bf16 %v6963_v32, %v6959_v50  ;;  %v6992_v50 = vld [vmem:[#allocation16 + $0x1e10] sm:$0xff]  ;;  %v7003_v54 = vld [vmem:[#allocation16 + $0x1e68] sm:$0xff] }
 0xc85   : > { %11655 = vmatprep.subr.bf16.mxu0 %v11654_v55  ;;  %11783 = vmatprep.subr.bf16.mxu1 %v11782_v3  ;;  %v6967_v55 = vld [vmem:[#allocation16 + $0x1d48] sm:$0xff]  ;;  %v6969_v3 = vld [vmem:[#allocation16 + $0x1d58] sm:$0xff]  ;;  %v11672_v24 = vpack.c.bf16 %v6962_v48, %v6958_v58  ;;  %v6996_v32 = vld [vmem:[#allocation16 + $0x1e30] sm:$0xff]  ;;  %v11690_v29 = vpack.c.bf16 %v7003_v54, %v6999_v36 }
 0xc86   : > { %v11674_v53 = vpack.c.bf16 %v6971_v51, %v6967_v55  ;;  %v11802_v25 = vpack.c.bf16 %v6973_v5, %v6969_v3  ;;  %v11816_v48 = vpack.c.bf16 %v6996_v32, %v6992_v50  ;;  %v7000_v55 = vld [vmem:[#allocation16 + $0x1e50] sm:$0xff]  ;;  %v7007_v3 = vld [vmem:[#allocation16 + $0x1e88] sm:$0xff] }
 0xc87   : > { %v7004_v51 = vld [vmem:[#allocation16 + $0x1e70] sm:$0xff]  ;;  %v7011_v5 = vld [vmem:[#allocation16 + $0x1ea8] sm:$0xff] }
 0xc88   : > { %v7032_v36 = vld [vmem:[#allocation16 + $0x1f50] sm:$0xff] }
 0xc89   : > { %v7036_v54 = vld [vmem:[#allocation16 + $0x1f70] sm:$0xff] }
 0xd1a   : > { %v6721_v10 = vpop.f32.mrb[24].mxu0  ;;  %v13844_v47 = vpop.f32.mrb[24].mxu1 }
 0xd1b   : > { %v6723_v12 = vpop.f32.mrb[25].mxu0  ;;  %v6794_v15 = vpop.f32.mrb[25].mxu1 }
 0xd1c   : > { %7118 = vmatprep.mubr.f32.mxu0 %v6723_v12  ;;  %7260 = vmatprep.mubr.f32.mxu1 %v6723_v12  ;;  %v11676_v12 = vpack.c.bf16 %v6970_v8, %v6966_v7  ;;  %v11820_v8 = vpack.c.bf16 %v7004_v51, %v7000_v55 }
 0xd1d   : > { %7119 = vmatmul.mubr.f32.vlgmr.msra.gmra.mrb[20].mxu0 %v6721_v10  ;;  %7261 = vmatmul.mubr.f32.vlgmr.msra.gmra.mrb[20].mxu1 %v6721_v10  ;;  %v6972_v10 = vld [vmem:[#allocation16 + $0x1d70] sm:$0xff] }
 0xd1e   : > { %11657 = vmatpush1.bf16.msra.mxu0 %v11656_v60  ;;  %11785 = vmatpush1.bf16.msra.mxu1 %v11784_v11  ;;  %v6975_v60 = vld [vmem:[#allocation16 + $0x1d88] sm:$0xff] }
 0xd1f   : > { %11659 = vmatprep.subr.bf16.mxu0 %v11658_v13  ;;  %11787 = vmatprep.subr.bf16.mxu1 %v11786_v14  ;;  %v6979_v11 = vld [vmem:[#allocation16 + $0x1da8] sm:$0xff]  ;;  %v11804_v13 = vpack.c.bf16 %v6972_v10, %v6968_v9  ;;  %v6974_v14 = vld [vmem:[#allocation16 + $0x1d80] sm:$0xff]  ;;  %v11694_v9 = vpack.c.bf16 %v7011_v5, %v7007_v3  ;;  %v7040_v3 = vld [vmem:[#allocation16 + $0x1f90] sm:$0xff] }
 0xd20   : > { %7189 = vmatprep.mubr.f32.mxu0 %v6794_v15  ;;  %7331 = vmatprep.mubr.f32.mxu1 %v6794_v15  ;;  %v11678_v38 = vpack.c.bf16 %v6979_v11, %v6975_v60  ;;  %v6976_v15 = vld [vmem:[#allocation16 + $0x1d90] sm:$0xff]  ;;  %v11680_v19 = vpack.c.bf16 %v6978_v0, %v6974_v14 }
 0xd21   : > { %v11808_v20 = vpack.c.bf16 %v6980_v2, %v6976_v15  ;;  %v7008_v60 = vld [vmem:[#allocation16 + $0x1e90] sm:$0xff]  ;;  %v11698_v15 = vpack.c.bf16 %v7019_v6, %v7015_v61 }
 0xd22   : > { %11661 = vmatpush1.bf16.msra.mxu0 %v11660_v17  ;;  %11789 = vmatpush1.bf16.msra.mxu1 %v11788_v18  ;;  %v6985_v17 = vld [vmem:[#allocation16 + $0x1dd8] sm:$0xff]  ;;  %v7012_v11 = vld [vmem:[#allocation16 + $0x1eb0] sm:$0xff] }
 0xd23   : > { %11663 = vmatprep.subr.bf16.mxu0 %v11662_v23  ;;  %11791 = vmatprep.subr.bf16.mxu1 %v11790_v26  ;;  %v6989_v18 = vld [vmem:[#allocation16 + $0x1df8] sm:$0xff]  ;;  %v6982_v23 = vld [vmem:[#allocation16 + $0x1dc0] sm:$0xff]  ;;  %v11824_v0 = vpack.c.bf16 %v7012_v11, %v7008_v60  ;;  %v7044_v5 = vld [vmem:[#allocation16 + $0x1fb0] sm:$0xff] }
 0xd24   : > { %v6986_v26 = vld [vmem:[#allocation16 + $0x1de0] sm:$0xff]  ;;  %v11810_v28 = vpack.c.bf16 %v6989_v18, %v6985_v17  ;;  %v7023_v17 = vld [vmem:[#allocation16 + $0x1f08] sm:$0xff]  ;;  %v7048_v61 = vld [vmem:[#allocation16 + $0x1fd0] sm:$0xff] }
 0xd25   : > { %v11684_v22 = vpack.c.bf16 %v6986_v26, %v6982_v23  ;;  %v7027_v18 = vld [vmem:[#allocation16 + $0x1f28] sm:$0xff]  ;;  %v11828_v26 = vpack.c.bf16 %v7020_v16, %v7016_v41  ;;  %v7050_v11 = vld [vmem:[#allocation16 + $0x1fe0] sm:$0xff]  ;;  %v7052_v6 = vld [vmem:[#allocation16 + $0x1ff0] sm:$0xff] }
 0xd26   : > { %11665 = vmatpush1.bf16.msra.mxu0 %v11664_v34  ;;  %11793 = vmatpush1.bf16.msra.mxu1 %v11792_v21  ;;  %v6993_v34 = vld [vmem:[#allocation16 + $0x1e18] sm:$0xff]  ;;  %v11702_v4 = vpack.c.bf16 %v7027_v18, %v7023_v17 }
 0xd27   : > { %11667 = vmatprep.subr.bf16.mxu0 %v11666_v37  ;;  %11795 = vmatprep.subr.bf16.mxu1 %v11794_v44  ;;  %v6997_v21 = vld [vmem:[#allocation16 + $0x1e38] sm:$0xff]  ;;  %v6990_v37 = vld [vmem:[#allocation16 + $0x1e00] sm:$0xff] }
 0xd28   : > { %v6994_v44 = vld [vmem:[#allocation16 + $0x1e20] sm:$0xff]  ;;  %v11814_v46 = vpack.c.bf16 %v6997_v21, %v6993_v34  ;;  %v7031_v34 = vld [vmem:[#allocation16 + $0x1f48] sm:$0xff] }
 0xd29   : > { %v11688_v58 = vpack.c.bf16 %v6994_v44, %v6990_v37  ;;  %v7035_v21 = vld [vmem:[#allocation16 + $0x1f68] sm:$0xff]  ;;  %v11832_v44 = vpack.c.bf16 %v7028_v33, %v7024_v31  ;;  %v7376_v31 = vld [vmem:[#allocation19] sm:$0x1] }
 0xd2a   : > { %11669 = vmatpush1.bf16.msra.mxu0 %v11668_v56  ;;  %11797 = vmatpush1.bf16.msra.mxu1 %v11796_v57  ;;  %v7001_v56 = vld [vmem:[#allocation16 + $0x1e58] sm:$0xff]  ;;  %v11706_v50 = vpack.c.bf16 %v7035_v21, %v7031_v34  ;;  %v7941_v21 = vld [vmem:[#allocation21 + $0x808] sm:$0xff] }
 0xd2b   : > { %11671 = vmatprep.subr.bf16.mxu0 %v11670_v49  ;;  %11799 = vmatprep.subr.bf16.mxu1 %v11798_v59  ;;  %v7005_v57 = vld [vmem:[#allocation16 + $0x1e78] sm:$0xff]  ;;  %v6998_v49 = vld [vmem:[#allocation16 + $0x1e40] sm:$0xff] }
 0xd2c   : > { %v7002_v59 = vld [vmem:[#allocation16 + $0x1e60] sm:$0xff]  ;;  %v11818_v62 = vpack.c.bf16 %v7005_v57, %v7001_v56  ;;  %v7039_v56 = vld [vmem:[#allocation16 + $0x1f88] sm:$0xff] }
 0xd2d   : > { %v11692_v7 = vpack.c.bf16 %v7002_v59, %v6998_v49  ;;  %v7043_v57 = vld [vmem:[#allocation16 + $0x1fa8] sm:$0xff]  ;;  %v11836_v59 = vpack.c.bf16 %v7036_v54, %v7032_v36 }
 0xd2e   : > { %11673 = vmatpush1.bf16.msra.mxu0 %v11672_v24  ;;  %11801 = vmatpush1.bf16.msra.mxu1 %v11800_v52  ;;  %v7009_v24 = vld [vmem:[#allocation16 + $0x1e98] sm:$0xff]  ;;  %v11710_v55 = vpack.c.bf16 %v7043_v57, %v7039_v56  ;;  %v7953_v54 = vld [vmem:[#allocation21 + $0x868] sm:$0xff] }
 0xd2f   : > { %11675 = vmatprep.subr.bf16.mxu0 %v11674_v53  ;;  %11803 = vmatprep.subr.bf16.mxu1 %v11802_v25  ;;  %v7013_v52 = vld [vmem:[#allocation16 + $0x1eb8] sm:$0xff]  ;;  %v7006_v53 = vld [vmem:[#allocation16 + $0x1e80] sm:$0xff] }
 0xd30   : > { %v7010_v25 = vld [vmem:[#allocation16 + $0x1ea0] sm:$0xff]  ;;  %v11822_v10 = vpack.c.bf16 %v7013_v52, %v7009_v24  ;;  %v7047_v24 = vld [vmem:[#allocation16 + $0x1fc8] sm:$0xff] }
 0xd31   : > { %v11696_v14 = vpack.c.bf16 %v7010_v25, %v7006_v53  ;;  %v7051_v52 = vld [vmem:[#allocation16 + $0x1fe8] sm:$0xff]  ;;  %v11840_v25 = vpack.c.bf16 %v7044_v5, %v7040_v3  ;;  %v7951_v56 = vld [vmem:[#allocation21 + $0x858] sm:$0xff]  ;;  %v7950_v3 = vld [vmem:[#allocation21 + $0x850] sm:$0xff] }
 0xd32   : > { %11677 = vmatpush1.bf16.msra.mxu0 %v11676_v12  ;;  %11805 = vmatpush1.bf16.msra.mxu1 %v11804_v13  ;;  %v7017_v12 = vld [vmem:[#allocation16 + $0x1ed8] sm:$0xff] }
 0xd33   : > { %11679 = vmatprep.subr.bf16.mxu0 %v11678_v38  ;;  %11807 = vmatprep.subr.bf16.mxu1 %v11806_v63  ;;  %v7021_v13 = vld [vmem:[#allocation16 + $0x1ef8] sm:$0xff]  ;;  %v7014_v38 = vld [vmem:[#allocation16 + $0x1ec0] sm:$0xff] }
 0xd34   : > { %v7018_v63 = vld [vmem:[#allocation16 + $0x1ee0] sm:$0xff]  ;;  %v11826_v2 = vpack.c.bf16 %v7021_v13, %v7017_v12  ;;  %v11844_v13 = vpack.c.bf16 %v7052_v6, %v7048_v61  ;;  %v7954_v5 = vld [vmem:[#allocation21 + $0x870] sm:$0xff]  ;;  %v7965_v6 = vld [vmem:[#allocation21 + $0x8c8] sm:$0xff] }
 0xd35   : > { %v11700_v23 = vpack.c.bf16 %v7018_v63, %v7014_v38  ;;  %v7955_v57 = vld [vmem:[#allocation21 + $0x878] sm:$0xff]  ;;  %v7962_v61 = vld [vmem:[#allocation21 + $0x8b0] sm:$0xff] }
 0xd36   : > { %11681 = vmatpush1.bf16.msra.mxu0 %v11680_v19  ;;  %11809 = vmatpush1.bf16.msra.mxu1 %v11808_v20  ;;  %v7025_v19 = vld [vmem:[#allocation16 + $0x1f18] sm:$0xff] }
 0xd37   : > { %11683 = vmatprep.subr.bf16.mxu0 %v11682_v27  ;;  %11811 = vmatprep.subr.bf16.mxu1 %v11810_v28  ;;  %v7029_v20 = vld [vmem:[#allocation16 + $0x1f38] sm:$0xff]  ;;  %v7022_v27 = vld [vmem:[#allocation16 + $0x1f00] sm:$0xff] }
 0xd38   : > { %v7026_v28 = vld [vmem:[#allocation16 + $0x1f20] sm:$0xff]  ;;  %v11830_v30 = vpack.c.bf16 %v7029_v20, %v7025_v19 }
 0xd39   : > { %v11704_v37 = vpack.c.bf16 %v7026_v28, %v7022_v27 }
 0xd3a   : > { %11685 = vmatpush1.bf16.msra.mxu0 %v11684_v22  ;;  %11813 = vmatpush1.bf16.msra.mxu1 %v11812_v35  ;;  %v7033_v22 = vld [vmem:[#allocation16 + $0x1f58] sm:$0xff] }
 0xd3b   : > { %11687 = vmatprep.subr.bf16.mxu0 %v11686_v45  ;;  %11815 = vmatprep.subr.bf16.mxu1 %v11814_v46  ;;  %v7037_v35 = vld [vmem:[#allocation16 + $0x1f78] sm:$0xff]  ;;  %v7030_v45 = vld [vmem:[#allocation16 + $0x1f40] sm:$0xff] }
 0xd3c   : > { %v7034_v46 = vld [vmem:[#allocation16 + $0x1f60] sm:$0xff]  ;;  %v11834_v32 = vpack.c.bf16 %v7037_v35, %v7033_v22  ;;  %v7945_v22 = vld [vmem:[#allocation21 + $0x828] sm:$0xff] }
 0xd3d   : > { %v11708_v49 = vpack.c.bf16 %v7034_v46, %v7030_v45  ;;  %v7943_v35 = vld [vmem:[#allocation21 + $0x818] sm:$0xff]  ;;  %v7944_v45 = vld [vmem:[#allocation21 + $0x820] sm:$0xff]  ;;  %v7942_v46 = vld [vmem:[#allocation21 + $0x810] sm:$0xff]  ;;  %v11846_v36 = vpack.c.bf16 %v7945_v22, %v7941_v21 }
 0xd3e   : > { %11689 = vmatpush1.bf16.msra.mxu0 %v11688_v58  ;;  %11817 = vmatpush1.bf16.msra.mxu1 %v11816_v48  ;;  %v7041_v58 = vld [vmem:[#allocation16 + $0x1f98] sm:$0xff]  ;;  %v7985_v21 = vld [vmem:[#allocation21 + $0x968] sm:$0xff] }
 0xd3f   : > { %11691 = vmatprep.subr.bf16.mxu0 %v11690_v29  ;;  %11819 = vmatprep.subr.bf16.mxu1 %v11818_v62  ;;  %v7045_v48 = vld [vmem:[#allocation16 + $0x1fb8] sm:$0xff]  ;;  %v7038_v29 = vld [vmem:[#allocation16 + $0x1f80] sm:$0xff] }
 0xd40   : > { %v7042_v62 = vld [vmem:[#allocation16 + $0x1fa0] sm:$0xff]  ;;  %v11838_v51 = vpack.c.bf16 %v7045_v48, %v7041_v58 }
 0xd41   : > { %v11712_v53 = vpack.c.bf16 %v7042_v62, %v7038_v29  ;;  %v7793_v58 = vld [vmem:[#allocation19 + $0x1] sm:$0x1]  ;;  %v7948_v29 = vld [vmem:[#allocation21 + $0x840] sm:$0xff] }
 0xd42   : > { %11693 = vmatpush1.bf16.msra.mxu0 %v11692_v7  ;;  %11821 = vmatpush1.bf16.msra.mxu1 %v11820_v8  ;;  %v7049_v7 = vld [vmem:[#allocation16 + $0x1fd8] sm:$0xff]  ;;  %v7952_v62 = vld [vmem:[#allocation21 + $0x860] sm:$0xff] }
 0xd43   : > { %11695 = vmatprep.subr.bf16.mxu0 %v11694_v9  ;;  %11823 = vmatprep.subr.bf16.mxu1 %v11822_v10  ;;  %v7053_v8 = vld [vmem:[#allocation16 + $0x1ff8] sm:$0xff]  ;;  %v7046_v9 = vld [vmem:[#allocation16 + $0x1fc0] sm:$0xff]  ;;  %v11714_v10 = vpack.c.bf16 %v7051_v52, %v7047_v24  ;;  %v7957_v24 = vld [vmem:[#allocation21 + $0x888] sm:$0xff] }
 0xd44   : > { %v11842_v60 = vpack.c.bf16 %v7053_v8, %v7049_v7  ;;  %v11716_v12 = vpack.c.bf16 %v7050_v11, %v7046_v9  ;;  %v7961_v52 = vld [vmem:[#allocation21 + $0x8a8] sm:$0xff]  ;;  %v7959_v7 = vld [vmem:[#allocation21 + $0x898] sm:$0xff]  ;;  %v7956_v9 = vld [vmem:[#allocation21 + $0x880] sm:$0xff] }
 0xd45   : > { %v7963_v8 = vld [vmem:[#allocation21 + $0x8b8] sm:$0xff]  ;;  %v7958_v11 = vld [vmem:[#allocation21 + $0x890] sm:$0xff] }
 0xd46   : > { %11697 = vmatpush1.bf16.msra.mxu0 %v11696_v14  ;;  %11825 = vmatpush1.bf16.msra.mxu1 %v11824_v0  ;;  %v7342_v14 = vld [vmem:[#allocation18] sm:$0xf] }
 0xd47   : > { %11699 = vmatprep.subr.bf16.mxu0 %v11698_v15  ;;  %11827 = vmatprep.subr.bf16.mxu1 %v11826_v2  ;;  %v7347_v0 = vrot.slane %v7342_v14, %v13682_v39  ;;  %v7355_v38 = vrot.slane %v7342_v14, %v13684_v40  ;;  %v7351_v63 = vrot.slane %v7342_v14, %v13686_v42  ;;  %v7983_v22 = vld [vmem:[#allocation21 + $0x958] sm:$0xff] }
 0xd48   : > { %v7359_v15 = vrot.slane %v7342_v14, %v13688_v43  ;;  %v7971_v14 = vld [vmem:[#allocation21 + $0x8f8] sm:$0xff] }
 0xd4a   : > { %11701 = vmatpush1.bf16.msra.mxu0 %v11700_v23  ;;  %11829 = vmatpush1.bf16.msra.mxu1 %v11828_v26 }
 0xd4b   : > { %11703 = vmatprep.subr.bf16.mxu0 %v11702_v4  ;;  %11831 = vmatprep.subr.bf16.mxu1 %v11830_v30 }
 0xd4e   : > { %11705 = vmatpush1.bf16.msra.mxu0 %v11704_v37  ;;  %11833 = vmatpush1.bf16.msra.mxu1 %v11832_v44  ;;  %v7947_v37 = vld [vmem:[#allocation21 + $0x838] sm:$0xff]  ;;  %v7940_v44 = vld [vmem:[#allocation21 + $0x800] sm:$0xff] }
 0xd4f   : > { %11707 = vmatprep.subr.bf16.mxu0 %v11706_v50  ;;  %11835 = vmatprep.subr.bf16.mxu1 %v11834_v32  ;;  %v7946_v50 = vld [vmem:[#allocation21 + $0x830] sm:$0xff]  ;;  %v7949_v32 = vld [vmem:[#allocation21 + $0x848] sm:$0xff]  ;;  %v11974_v48 = vpack.c.bf16 %v7947_v37, %v7943_v35  ;;  %v7987_v35 = vld [vmem:[#allocation21 + $0x978] sm:$0xff] }
 0xd52   : > { %11709 = vmatpush1.bf16.msra.mxu0 %v11708_v49  ;;  %11837 = vmatpush1.bf16.msra.mxu1 %v11836_v59  ;;  %v11848_v49 = vpack.c.bf16 %v7944_v45, %v7940_v44  ;;  %v11976_v59 = vpack.c.bf16 %v7946_v50, %v7942_v46  ;;  %v7980_v45 = vld [vmem:[#allocation21 + $0x940] sm:$0xff] }
 0xd53   : > { %11711 = vmatprep.subr.bf16.mxu0 %v11710_v55  ;;  %11839 = vmatprep.subr.bf16.mxu1 %v11838_v51  ;;  %v11850_v55 = vpack.c.bf16 %v7953_v54, %v7949_v32  ;;  %v11978_v51 = vpack.c.bf16 %v7955_v57, %v7951_v56  ;;  %v7984_v46 = vld [vmem:[#allocation21 + $0x960] sm:$0xff]  ;;  %v11994_v32 = vpack.c.bf16 %v7987_v35, %v7983_v22  ;;  %v7986_v54 = vld [vmem:[#allocation21 + $0x970] sm:$0xff]  ;;  %v7989_v56 = vld [vmem:[#allocation21 + $0x988] sm:$0xff] }
 0xd54   : > { %v7993_v57 = vld [vmem:[#allocation21 + $0x9a8] sm:$0xff]  ;;  %v8023_v22 = vld [vmem:[#allocation21 + $0xa98] sm:$0xff] }
 0xd55   : > { %v8027_v35 = vld [vmem:[#allocation21 + $0xab8] sm:$0xff] }
 0xd56   : > { %11713 = vmatpush1.bf16.msra.mxu0 %v11712_v53  ;;  %11841 = vmatpush1.bf16.msra.mxu1 %v11840_v25  ;;  %v11852_v53 = vpack.c.bf16 %v7952_v62, %v7948_v29  ;;  %v11980_v25 = vpack.c.bf16 %v7954_v5, %v7950_v3  ;;  %v7988_v29 = vld [vmem:[#allocation21 + $0x980] sm:$0xff]  ;;  %v7990_v3 = vld [vmem:[#allocation21 + $0x990] sm:$0xff] }
 0xd57   : > { %11715 = vmatprep.subr.bf16.mxu0 %v11714_v10  ;;  %11843 = vmatprep.subr.bf16.mxu1 %v11842_v60  ;;  %v11854_v10 = vpack.c.bf16 %v7961_v52, %v7957_v24  ;;  %v11982_v60 = vpack.c.bf16 %v7963_v8, %v7959_v7  ;;  %v7992_v62 = vld [vmem:[#allocation21 + $0x9a0] sm:$0xff]  ;;  %v7994_v5 = vld [vmem:[#allocation21 + $0x9b0] sm:$0xff]  ;;  %v7997_v24 = vld [vmem:[#allocation21 + $0x9c8] sm:$0xff] }
 0xd58   : > { %v8001_v52 = vld [vmem:[#allocation21 + $0x9e8] sm:$0xff]  ;;  %v7999_v7 = vld [vmem:[#allocation21 + $0x9d8] sm:$0xff] }
 0xd59   : > { %v8003_v8 = vld [vmem:[#allocation21 + $0x9f8] sm:$0xff] }
 0xd5a   : > { %11717 = vmatpush1.bf16.msra.mxu0 %v11716_v12  ;;  %11845 = vmatpush1.bf16.msra.mxu1 %v11844_v13  ;;  %v7969_v12 = vld [vmem:[#allocation21 + $0x8e8] sm:$0xff]  ;;  %v7967_v13 = vld [vmem:[#allocation21 + $0x8d8] sm:$0xff] }
 0xd5d   : > { %7190 = vmatmul.mubr.f32.vlgmr.msra.gmra.mrb[20].mxu0 %v13844_v47  ;;  %7332 = vmatmul.mubr.f32.vlgmr.msra.gmra.mrb[20].mxu1 %v13844_v47 }
 0xd5e   : > { %7458 = vmatprep.mubr.f32.mxu0 %v13189_v1  ;;  %7529 = vmatprep.mubr.f32.mxu1 %v13189_v1 }
 0xe30   : > { %v7191_v2 = vpop.f32.mrb[20].mxu0  ;;  %v7333_v41 = vpop.f32.mrb[20].mxu1 }
 0xe31   : > { %v7364_v16 = vadd.f32 %v7347_v0, %v7191_v2  ;;  %v7366_v17 = vadd.f32 %v7355_v38, %v7333_v41  ;;  %v7193_v18 = vpop.f32.mrb[21].mxu0  ;;  %v7335_v19 = vpop.f32.mrb[21].mxu1  ;;  %v11984_v38 = vpack.c.bf16 %v7962_v61, %v7958_v11  ;;  %v11858_v2 = vpack.c.bf16 %v7969_v12, %v7965_v6  ;;  %v7998_v11 = vld [vmem:[#allocation21 + $0x9d0] sm:$0xff]  ;;  %v8005_v6 = vld [vmem:[#allocation21 + $0xa08] sm:$0xff] }
 0xe32   : > { %v7365_v47 = vadd.f32 %v7351_v63, %v7193_v18  ;;  %v7367_v20 = vadd.f32 %v7359_v15, %v7335_v19  ;;  %v7964_v63 = vld [vmem:[#allocation21 + $0x8c0] sm:$0xff]  ;;  %v11986_v41 = vpack.c.bf16 %v7971_v14, %v7967_v13  ;;  %v7973_v18 = vld [vmem:[#allocation21 + $0x908] sm:$0xff]  ;;  %v8002_v61 = vld [vmem:[#allocation21 + $0x9f0] sm:$0xff] }
 0xe33   : > { %v7368_v23 = vmul.f32 0.01, %v7364_v16  ;;  %v7370_v26 = vmul.f32 0.01, %v7366_v17  ;;  %v7968_v15 = vld [vmem:[#allocation21 + $0x8e0] sm:$0xff]  ;;  %v7977_v19 = vld [vmem:[#allocation21 + $0x928] sm:$0xff] }
 0xe34   : > { %v7369_v27 = vmul.f32 0.01, %v7365_v47  ;;  %v7371_v28 = vmul.f32 0.01, %v7367_v20  ;;  %v8009_v12 = vld [vmem:[#allocation21 + $0xa28] sm:$0xff]  ;;  %v8007_v13 = vld [vmem:[#allocation21 + $0xa18] sm:$0xff] }
 0xe35   : > { %v7372_v33 = vmax.f32 %v7364_v16, %v7368_v23  ;;  %v7374_v34 = vmax.f32 %v7366_v17, %v7370_v26  ;;  %v7966_v16 = vld [vmem:[#allocation21 + $0x8d0] sm:$0xff]  ;;  %v11860_v23 = vpack.c.bf16 %v7968_v15, %v7964_v63  ;;  %v8011_v14 = vld [vmem:[#allocation21 + $0xa38] sm:$0xff]  ;;  %v8004_v63 = vld [vmem:[#allocation21 + $0xa00] sm:$0xff] }
 0xe36   : > { %v7373_v4 = vmax.f32 %v7365_v47, %v7369_v27  ;;  %v7375_v30 = vmax.f32 %v7367_v20, %v7371_v28  ;;  %v7970_v17 = vld [vmem:[#allocation21 + $0x8f0] sm:$0xff]  ;;  %v7975_v47 = vld [vmem:[#allocation21 + $0x918] sm:$0xff]  ;;  %v7972_v27 = vld [vmem:[#allocation21 + $0x900] sm:$0xff] }
 0xe37   : > { %v7979_v20 = vld [vmem:[#allocation21 + $0x938] sm:$0xff]  ;;  %v11988_v26 = vpack.c.bf16 %v7970_v17, %v7966_v16  ;;  %v7976_v28 = vld [vmem:[#allocation21 + $0x920] sm:$0xff]  ;;  %v8006_v16 = vld [vmem:[#allocation21 + $0xa10] sm:$0xff] }
 0xe38   : > { %9494 = vmatprep.subr.msk.mxu0 %vm7381_vm6, %v7373_v4  ;;  %9497 = vmatprep.subr.msk.mxu1 %vm7381_vm6, %v7375_v30  ;;  %v11864_v37 = vpack.c.bf16 %v7976_v28, %v7972_v27  ;;  %v8008_v15 = vld [vmem:[#allocation21 + $0xa20] sm:$0xff]  ;;  %v8010_v17 = vld [vmem:[#allocation21 + $0xa30] sm:$0xff] }
 0xe39   : > { %9495 = vmatpush1.msk.msra.mxu0 %vm7381_vm6, %v7372_v33  ;;  %9498 = vmatpush1.msk.msra.mxu1 %vm7381_vm6, %v7374_v34  ;;  %v8012_v27 = vld [vmem:[#allocation21 + $0xa40] sm:$0xff] }
 0xe3a   : > { %9496 = vmatmul.mubr.msk.f32.vlgmr.msra.gmra.mrb[26].mxu0 %vm7377_vm7, %v7376_v31  ;;  %9500 = vmatprep.subr.msk.mxu0 %vm7381_vm6, %v7373_v4  ;;  %v11862_v4 = vpack.c.bf16 %v7977_v19, %v7973_v18  ;;  %v8013_v18 = vld [vmem:[#allocation21 + $0xa48] sm:$0xff]  ;;  %v8016_v28 = vld [vmem:[#allocation21 + $0xa60] sm:$0xff] }
 0xe3b   : > { %9503 = vmatprep.subr.msk.mxu1 %vm7381_vm6, %v7375_v30  ;;  %9499 = vmatmul.mubr.msk.f32.vlgmr.msra.gmra.mrb[26].mxu1 %vm7377_vm7, %v7376_v31  ;;  %v11990_v30 = vpack.c.bf16 %v7979_v20, %v7975_v47  ;;  %v7974_v31 = vld [vmem:[#allocation21 + $0x910] sm:$0xff]  ;;  %v8017_v19 = vld [vmem:[#allocation21 + $0xa68] sm:$0xff]  ;;  %v8015_v47 = vld [vmem:[#allocation21 + $0xa58] sm:$0xff] }
 0xe3c   : > { %9501 = vmatpush1.msk.msra.mxu0 %vm7381_vm6, %v7372_v33  ;;  %9504 = vmatpush1.msk.msra.mxu1 %vm7381_vm6, %v7374_v34  ;;  %v7978_v33 = vld [vmem:[#allocation21 + $0x930] sm:$0xff]  ;;  %v7981_v34 = vld [vmem:[#allocation21 + $0x948] sm:$0xff]  ;;  %v8019_v20 = vld [vmem:[#allocation21 + $0xa78] sm:$0xff] }
 0xe3d   : > { %7861 = vmatprep.mubr.f32.mxu0 %v13189_v1  ;;  %7932 = vmatprep.mubr.f32.mxu1 %v13189_v1  ;;  %v7960_v1 = vld [vmem:[#allocation21 + $0x8a0] sm:$0xff]  ;;  %v11992_v44 = vpack.c.bf16 %v7978_v33, %v7974_v31  ;;  %v11866_v50 = vpack.c.bf16 %v7985_v21, %v7981_v34  ;;  %v8014_v31 = vld [vmem:[#allocation21 + $0xa50] sm:$0xff]  ;;  %v8021_v34 = vld [vmem:[#allocation21 + $0xa88] sm:$0xff] }
 0xe3e   : > { %9502 = vmatmul.mubr.msk.f32.vlgmr.msra.gmra.mrb[28].mxu0 %vm7377_vm7, %v7793_v58  ;;  %11847 = vmatprep.subr.bf16.mxu0 %v11846_v36  ;;  %v11856_v0 = vpack.c.bf16 %v7960_v1, %v7956_v9  ;;  %v7982_v36 = vld [vmem:[#allocation21 + $0x950] sm:$0xff]  ;;  %v7996_v9 = vld [vmem:[#allocation21 + $0x9c0] sm:$0xff]  ;;  %v8025_v21 = vld [vmem:[#allocation21 + $0xaa8] sm:$0xff] }
 0xe3f   : > { %9505 = vmatmul.mubr.msk.f32.vlgmr.msra.gmra.mrb[28].mxu1 %vm7377_vm7, %v7793_v58  ;;  %11975 = vmatprep.subr.bf16.mxu1 %v11974_v48  ;;  %v7991_v58 = vld [vmem:[#allocation21 + $0x998] sm:$0xff]  ;;  %v8000_v1 = vld [vmem:[#allocation21 + $0x9e0] sm:$0xff]  ;;  %v8018_v33 = vld [vmem:[#allocation21 + $0xa70] sm:$0xff] }
 0xe40   : > { %11849 = vmatpush1.bf16.msra.mxu0 %v11848_v49  ;;  %11977 = vmatpush1.bf16.msra.mxu1 %v11976_v59  ;;  %v7995_v48 = vld [vmem:[#allocation21 + $0x9b8] sm:$0xff]  ;;  %v11868_v49 = vpack.c.bf16 %v7984_v46, %v7980_v45  ;;  %v11996_v59 = vpack.c.bf16 %v7986_v54, %v7982_v36  ;;  %v8020_v45 = vld [vmem:[#allocation21 + $0xa80] sm:$0xff]  ;;  %v8022_v36 = vld [vmem:[#allocation21 + $0xa90] sm:$0xff] }
 0xe41   : > { %11851 = vmatprep.subr.bf16.mxu0 %v11850_v55  ;;  %11979 = vmatprep.subr.bf16.mxu1 %v11978_v51  ;;  %v11870_v55 = vpack.c.bf16 %v7993_v57, %v7989_v56  ;;  %v11998_v51 = vpack.c.bf16 %v7995_v48, %v7991_v58  ;;  %v8024_v46 = vld [vmem:[#allocation21 + $0xaa0] sm:$0xff]  ;;  %v8026_v54 = vld [vmem:[#allocation21 + $0xab0] sm:$0xff]  ;;  %v8029_v56 = vld [vmem:[#allocation21 + $0xac8] sm:$0xff] }
 0xe42   : > { %v8033_v57 = vld [vmem:[#allocation21 + $0xae8] sm:$0xff]  ;;  %v8031_v58 = vld [vmem:[#allocation21 + $0xad8] sm:$0xff] }
 0xe43   : > { %v8035_v48 = vld [vmem:[#allocation21 + $0xaf8] sm:$0xff] }
 0xe44   : > { %11853 = vmatpush1.bf16.msra.mxu0 %v11852_v53  ;;  %11981 = vmatpush1.bf16.msra.mxu1 %v11980_v25  ;;  %v11872_v53 = vpack.c.bf16 %v7992_v62, %v7988_v29  ;;  %v12000_v25 = vpack.c.bf16 %v7994_v5, %v7990_v3  ;;  %v8028_v29 = vld [vmem:[#allocation21 + $0xac0] sm:$0xff]  ;;  %v8030_v3 = vld [vmem:[#allocation21 + $0xad0] sm:$0xff] }
 0xe45   : > { %11855 = vmatprep.subr.bf16.mxu0 %v11854_v10  ;;  %11983 = vmatprep.subr.bf16.mxu1 %v11982_v60  ;;  %v11874_v10 = vpack.c.bf16 %v8001_v52, %v7997_v24  ;;  %v12002_v60 = vpack.c.bf16 %v8003_v8, %v7999_v7  ;;  %v8032_v62 = vld [vmem:[#allocation21 + $0xae0] sm:$0xff]  ;;  %v8034_v5 = vld [vmem:[#allocation21 + $0xaf0] sm:$0xff]  ;;  %v8037_v24 = vld [vmem:[#allocation21 + $0xb08] sm:$0xff] }
 0xe46   : > { %v8041_v52 = vld [vmem:[#allocation21 + $0xb28] sm:$0xff]  ;;  %v8039_v7 = vld [vmem:[#allocation21 + $0xb18] sm:$0xff] }
 0xe47   : > { %v8043_v8 = vld [vmem:[#allocation21 + $0xb38] sm:$0xff] }
 0xe48   : > { %11857 = vmatpush1.bf16.msra.mxu0 %v11856_v0  ;;  %11985 = vmatpush1.bf16.msra.mxu1 %v11984_v38  ;;  %v11876_v0 = vpack.c.bf16 %v8000_v1, %v7996_v9  ;;  %v12004_v38 = vpack.c.bf16 %v8002_v61, %v7998_v11  ;;  %v8036_v9 = vld [vmem:[#allocation21 + $0xb00] sm:$0xff]  ;;  %v8038_v11 = vld [vmem:[#allocation21 + $0xb10] sm:$0xff] }
 0xe49   : > { %11859 = vmatprep.subr.bf16.mxu0 %v11858_v2  ;;  %11987 = vmatprep.subr.bf16.mxu1 %v11986_v41  ;;  %v11878_v2 = vpack.c.bf16 %v8009_v12, %v8005_v6  ;;  %v12006_v41 = vpack.c.bf16 %v8011_v14, %v8007_v13  ;;  %v8040_v1 = vld [vmem:[#allocation21 + $0xb20] sm:$0xff]  ;;  %v8042_v61 = vld [vmem:[#allocation21 + $0xb30] sm:$0xff]  ;;  %v8045_v6 = vld [vmem:[#allocation21 + $0xb48] sm:$0xff] }
 0xe4a   : > { %v8049_v12 = vld [vmem:[#allocation21 + $0xb68] sm:$0xff]  ;;  %v8047_v13 = vld [vmem:[#allocation21 + $0xb58] sm:$0xff] }
 0xe4b   : > { %v8051_v14 = vld [vmem:[#allocation21 + $0xb78] sm:$0xff] }
 0xe4c   : > { %11861 = vmatpush1.bf16.msra.mxu0 %v11860_v23  ;;  %11989 = vmatpush1.bf16.msra.mxu1 %v11988_v26  ;;  %v11880_v23 = vpack.c.bf16 %v8008_v15, %v8004_v63  ;;  %v12008_v26 = vpack.c.bf16 %v8010_v17, %v8006_v16  ;;  %v8044_v63 = vld [vmem:[#allocation21 + $0xb40] sm:$0xff]  ;;  %v8046_v16 = vld [vmem:[#allocation21 + $0xb50] sm:$0xff] }
 0xe4d   : > { %11863 = vmatprep.subr.bf16.mxu0 %v11862_v4  ;;  %11991 = vmatprep.subr.bf16.mxu1 %v11990_v30  ;;  %v11882_v4 = vpack.c.bf16 %v8017_v19, %v8013_v18  ;;  %v12010_v30 = vpack.c.bf16 %v8019_v20, %v8015_v47  ;;  %v8048_v15 = vld [vmem:[#allocation21 + $0xb60] sm:$0xff]  ;;  %v8050_v17 = vld [vmem:[#allocation21 + $0xb70] sm:$0xff]  ;;  %v8053_v18 = vld [vmem:[#allocation21 + $0xb88] sm:$0xff] }
 0xe4e   : > { %v8057_v19 = vld [vmem:[#allocation21 + $0xba8] sm:$0xff]  ;;  %v8055_v47 = vld [vmem:[#allocation21 + $0xb98] sm:$0xff] }
 0xe4f   : > { %v8059_v20 = vld [vmem:[#allocation21 + $0xbb8] sm:$0xff] }
 0xe50   : > { %11865 = vmatpush1.bf16.msra.mxu0 %v11864_v37  ;;  %11993 = vmatpush1.bf16.msra.mxu1 %v11992_v44  ;;  %v11884_v37 = vpack.c.bf16 %v8016_v28, %v8012_v27  ;;  %v12012_v44 = vpack.c.bf16 %v8018_v33, %v8014_v31  ;;  %v8052_v27 = vld [vmem:[#allocation21 + $0xb80] sm:$0xff]  ;;  %v11902_v28 = vpack.c.bf16 %v8057_v19, %v8053_v18  ;;  %v8054_v31 = vld [vmem:[#allocation21 + $0xb90] sm:$0xff] }
 0xe51   : > { %11867 = vmatprep.subr.bf16.mxu0 %v11866_v50  ;;  %11995 = vmatprep.subr.bf16.mxu1 %v11994_v32  ;;  %v11886_v50 = vpack.c.bf16 %v8025_v21, %v8021_v34  ;;  %v12014_v32 = vpack.c.bf16 %v8027_v35, %v8023_v22  ;;  %v8058_v33 = vld [vmem:[#allocation21 + $0xbb0] sm:$0xff]  ;;  %v8061_v22 = vld [vmem:[#allocation21 + $0xbc8] sm:$0xff] }
 0xe52   : > { %v12032_v21 = vpack.c.bf16 %v8058_v33, %v8054_v31  ;;  %v8065_v35 = vld [vmem:[#allocation21 + $0xbe8] sm:$0xff]  ;;  %v8095_v31 = vld [vmem:[#allocation21 + $0xcd8] sm:$0xff] }
 0xe53   : > { %v8099_v33 = vld [vmem:[#allocation21 + $0xcf8] sm:$0xff] }
 0xe54   : > { %11869 = vmatpush1.bf16.msra.mxu0 %v11868_v49  ;;  %11997 = vmatpush1.bf16.msra.mxu1 %v11996_v59  ;;  %v11888_v49 = vpack.c.bf16 %v8024_v46, %v8020_v45  ;;  %v12016_v59 = vpack.c.bf16 %v8026_v54, %v8022_v36  ;;  %v8067_v45 = vld [vmem:[#allocation21 + $0xbf8] sm:$0xff]  ;;  %v8060_v46 = vld [vmem:[#allocation21 + $0xbc0] sm:$0xff]  ;;  %v8062_v54 = vld [vmem:[#allocation21 + $0xbd0] sm:$0xff] }
 0xe55   : > { %11871 = vmatprep.subr.bf16.mxu0 %v11870_v55  ;;  %11999 = vmatprep.subr.bf16.mxu1 %v11998_v51  ;;  %v11890_v55 = vpack.c.bf16 %v8033_v57, %v8029_v56  ;;  %v12018_v51 = vpack.c.bf16 %v8035_v48, %v8031_v58  ;;  %v8066_v56 = vld [vmem:[#allocation21 + $0xbf0] sm:$0xff]  ;;  %v8069_v58 = vld [vmem:[#allocation21 + $0xc08] sm:$0xff] }
 0xe56   : > { %v12036_v57 = vpack.c.bf16 %v8066_v56, %v8062_v54  ;;  %v8073_v48 = vld [vmem:[#allocation21 + $0xc28] sm:$0xff]  ;;  %v8107_v54 = vld [vmem:[#allocation21 + $0xd38] sm:$0xff] }
 0xe58   : > { %11873 = vmatpush1.bf16.msra.mxu0 %v11872_v53  ;;  %12001 = vmatpush1.bf16.msra.mxu1 %v12000_v25  ;;  %v11892_v53 = vpack.c.bf16 %v8032_v62, %v8028_v29  ;;  %v12020_v25 = vpack.c.bf16 %v8034_v5, %v8030_v3  ;;  %v8075_v29 = vld [vmem:[#allocation21 + $0xc38] sm:$0xff]  ;;  %v8072_v3 = vld [vmem:[#allocation21 + $0xc20] sm:$0xff] }
 0xe59   : > { %11875 = vmatprep.subr.bf16.mxu0 %v11874_v10  ;;  %12003 = vmatprep.subr.bf16.mxu1 %v12002_v60  ;;  %v11894_v10 = vpack.c.bf16 %v8041_v52, %v8037_v24  ;;  %v12022_v60 = vpack.c.bf16 %v8043_v8, %v8039_v7  ;;  %v8070_v24 = vld [vmem:[#allocation21 + $0xc10] sm:$0xff]  ;;  %v8077_v7 = vld [vmem:[#allocation21 + $0xc48] sm:$0xff] }
 0xe5a   : > { %v8074_v52 = vld [vmem:[#allocation21 + $0xc30] sm:$0xff] }
 0xe5c   : > { %11877 = vmatpush1.bf16.msra.mxu0 %v11876_v0  ;;  %12005 = vmatpush1.bf16.msra.mxu1 %v12004_v38  ;;  %v11896_v0 = vpack.c.bf16 %v8040_v1, %v8036_v9  ;;  %v12024_v38 = vpack.c.bf16 %v8042_v61, %v8038_v11  ;;  %v8083_v9 = vld [vmem:[#allocation21 + $0xc78] sm:$0xff]  ;;  %v12040_v11 = vpack.c.bf16 %v8074_v52, %v8070_v24  ;;  %v8076_v61 = vld [vmem:[#allocation21 + $0xc40] sm:$0xff] }
 0xe5d   : > { %11879 = vmatprep.subr.bf16.mxu0 %v11878_v2  ;;  %12007 = vmatprep.subr.bf16.mxu1 %v12006_v41  ;;  %v11898_v2 = vpack.c.bf16 %v8049_v12, %v8045_v6  ;;  %v12026_v41 = vpack.c.bf16 %v8051_v14, %v8047_v13  ;;  %v8080_v6 = vld [vmem:[#allocation21 + $0xc60] sm:$0xff]  ;;  %v8111_v24 = vld [vmem:[#allocation21 + $0xd58] sm:$0xff] }
 0xe5e   : > { %v11916_v18 = vpack.c.bf16 %v8080_v6, %v8076_v61  ;;  %v8115_v52 = vld [vmem:[#allocation21 + $0xd78] sm:$0xff]  ;;  %v8114_v61 = vld [vmem:[#allocation21 + $0xd70] sm:$0xff]  ;;  %v8117_v6 = vld [vmem:[#allocation21 + $0xd88] sm:$0xff] }
 0xe60   : > { %11881 = vmatpush1.bf16.msra.mxu0 %v11880_v23  ;;  %12009 = vmatpush1.bf16.msra.mxu1 %v12008_v26  ;;  %v11900_v23 = vpack.c.bf16 %v8048_v15, %v8044_v63  ;;  %v12028_v26 = vpack.c.bf16 %v8050_v17, %v8046_v16  ;;  %v8085_v63 = vld [vmem:[#allocation21 + $0xc88] sm:$0xff]  ;;  %v8091_v16 = vld [vmem:[#allocation21 + $0xcb8] sm:$0xff] }
 0xe61   : > { %11883 = vmatprep.subr.bf16.mxu0 %v11882_v4  ;;  %12011 = vmatprep.subr.bf16.mxu1 %v12010_v30  ;;  %v12030_v4 = vpack.c.bf16 %v8059_v20, %v8055_v47  ;;  %v8056_v30 = vld [vmem:[#allocation21 + $0xba0] sm:$0xff] }
 0xe62   : > { %v11904_v34 = vpack.c.bf16 %v8056_v30, %v8052_v27  ;;  %v8084_v47 = vld [vmem:[#allocation21 + $0xc80] sm:$0xff]  ;;  %v8086_v27 = vld [vmem:[#allocation21 + $0xc90] sm:$0xff]  ;;  %v8097_v30 = vld [vmem:[#allocation21 + $0xce8] sm:$0xff] }
 0xe63   : > { %v8088_v20 = vld [vmem:[#allocation21 + $0xca0] sm:$0xff] }
 0xe64   : > { %11885 = vmatpush1.bf16.msra.mxu0 %v11884_v37  ;;  %12013 = vmatpush1.bf16.msra.mxu1 %v12012_v44  ;;  %v8063_v37 = vld [vmem:[#allocation21 + $0xbd8] sm:$0xff]  ;;  %v11906_v44 = vpack.c.bf16 %v8065_v35, %v8061_v22  ;;  %v8092_v22 = vld [vmem:[#allocation21 + $0xcc0] sm:$0xff] }
 0xe65   : > { %11887 = vmatprep.subr.bf16.mxu0 %v11886_v50  ;;  %12015 = vmatprep.subr.bf16.mxu1 %v12014_v32  ;;  %v8064_v50 = vld [vmem:[#allocation21 + $0xbe0] sm:$0xff]  ;;  %v12034_v32 = vpack.c.bf16 %v8067_v45, %v8063_v37  ;;  %v8094_v45 = vld [vmem:[#allocation21 + $0xcd0] sm:$0xff] }
 0xe66   : > { %v11908_v36 = vpack.c.bf16 %v8064_v50, %v8060_v46  ;;  %v8096_v35 = vld [vmem:[#allocation21 + $0xce0] sm:$0xff]  ;;  %v8098_v46 = vld [vmem:[#allocation21 + $0xcf0] sm:$0xff]  ;;  %v8101_v50 = vld [vmem:[#allocation21 + $0xd08] sm:$0xff] }
 0xe67   : > { %v11924_v56 = vpack.c.bf16 %v8096_v35, %v8092_v22  ;;  %v8137_v22 = vld [vmem:[#allocation21 + $0xe28] sm:$0xff]  ;;  %v8135_v35 = vld [vmem:[#allocation21 + $0xe18] sm:$0xff] }
 0xe68   : > { %11889 = vmatpush1.bf16.msra.mxu0 %v11888_v49  ;;  %12017 = vmatpush1.bf16.msra.mxu1 %v12016_v59  ;;  %v8071_v49 = vld [vmem:[#allocation21 + $0xc18] sm:$0xff]  ;;  %v11910_v59 = vpack.c.bf16 %v8073_v48, %v8069_v58  ;;  %v8100_v58 = vld [vmem:[#allocation21 + $0xd00] sm:$0xff] }
 0xe69   : > { %11891 = vmatprep.subr.bf16.mxu0 %v11890_v55  ;;  %12019 = vmatprep.subr.bf16.mxu1 %v12018_v51  ;;  %v12038_v62 = vpack.c.bf16 %v8075_v29, %v8071_v49  ;;  %v8068_v51 = vld [vmem:[#allocation21 + $0xc00] sm:$0xff]  ;;  %v8102_v29 = vld [vmem:[#allocation21 + $0xd10] sm:$0xff] }
 0xe6a   : > { %v8104_v48 = vld [vmem:[#allocation21 + $0xd20] sm:$0xff] }
 0xe6c   : > { %11893 = vmatpush1.bf16.msra.mxu0 %v11892_v53  ;;  %12021 = vmatpush1.bf16.msra.mxu1 %v12020_v25  ;;  %v8081_v53 = vld [vmem:[#allocation21 + $0xc68] sm:$0xff]  ;;  %v8079_v25 = vld [vmem:[#allocation21 + $0xc58] sm:$0xff] }
 0xe6d   : > { %11895 = vmatprep.subr.bf16.mxu0 %v11894_v10  ;;  %12023 = vmatprep.subr.bf16.mxu1 %v12022_v60  ;;  %v11912_v60 = vpack.c.bf16 %v8072_v3, %v8068_v51  ;;  %v11914_v13 = vpack.c.bf16 %v8081_v53, %v8077_v7  ;;  %v12042_v14 = vpack.c.bf16 %v8083_v9, %v8079_v25  ;;  %v8109_v51 = vld [vmem:[#allocation21 + $0xd48] sm:$0xff]  ;;  %v8108_v25 = vld [vmem:[#allocation21 + $0xd40] sm:$0xff] }
 0xe6e   : > { %v8113_v3 = vld [vmem:[#allocation21 + $0xd68] sm:$0xff]  ;;  %v11928_v7 = vpack.c.bf16 %v8104_v48, %v8100_v58  ;;  %v8112_v9 = vld [vmem:[#allocation21 + $0xd60] sm:$0xff]  ;;  %v8143_v48 = vld [vmem:[#allocation21 + $0xe58] sm:$0xff] }
 0xe6f   : > { %v8145_v58 = vld [vmem:[#allocation21 + $0xe68] sm:$0xff] }
 0xe70   : > { %11897 = vmatpush1.bf16.msra.mxu0 %v11896_v0  ;;  %12025 = vmatpush1.bf16.msra.mxu1 %v12024_v38  ;;  %v8078_v0 = vld [vmem:[#allocation21 + $0xc50] sm:$0xff] }
 0xe71   : > { %11899 = vmatprep.subr.bf16.mxu0 %v11898_v2  ;;  %12027 = vmatprep.subr.bf16.mxu1 %v12026_v41  ;;  %v8082_v38 = vld [vmem:[#allocation21 + $0xc70] sm:$0xff]  ;;  %v8089_v2 = vld [vmem:[#allocation21 + $0xca8] sm:$0xff]  ;;  %v8087_v41 = vld [vmem:[#allocation21 + $0xc98] sm:$0xff] }
 0xe72   : > { %v12044_v19 = vpack.c.bf16 %v8082_v38, %v8078_v0  ;;  %v11932_v0 = vpack.c.bf16 %v8112_v9, %v8108_v25  ;;  %v8153_v25 = vld [vmem:[#allocation21 + $0xea8] sm:$0xff]  ;;  %v8151_v9 = vld [vmem:[#allocation21 + $0xe98] sm:$0xff] }
 0xe74   : > { %11901 = vmatpush1.bf16.msra.mxu0 %v11900_v23  ;;  %12029 = vmatpush1.bf16.msra.mxu1 %v12028_v26  ;;  %v11918_v23 = vpack.c.bf16 %v8089_v2, %v8085_v63  ;;  %v12046_v26 = vpack.c.bf16 %v8091_v16, %v8087_v41  ;;  %v8116_v63 = vld [vmem:[#allocation21 + $0xd80] sm:$0xff] }
 0xe75   : > { %11903 = vmatprep.subr.bf16.mxu0 %v11902_v28  ;;  %12031 = vmatprep.subr.bf16.mxu1 %v12030_v4  ;;  %v8090_v28 = vld [vmem:[#allocation21 + $0xcb0] sm:$0xff]  ;;  %v8093_v4 = vld [vmem:[#allocation21 + $0xcc8] sm:$0xff]  ;;  %v8120_v2 = vld [vmem:[#allocation21 + $0xda0] sm:$0xff] }
 0xe76   : > { %v11922_v37 = vpack.c.bf16 %v8097_v30, %v8093_v4  ;;  %v8128_v4 = vld [vmem:[#allocation21 + $0xde0] sm:$0xff] }
 0xe78   : > { %11905 = vmatpush1.bf16.msra.mxu0 %v11904_v34  ;;  %12033 = vmatpush1.bf16.msra.mxu1 %v12032_v21  ;;  %v11920_v34 = vpack.c.bf16 %v8088_v20, %v8084_v47  ;;  %v12048_v21 = vpack.c.bf16 %v8090_v28, %v8086_v27  ;;  %v8129_v47 = vld [vmem:[#allocation21 + $0xde8] sm:$0xff]  ;;  %v8127_v20 = vld [vmem:[#allocation21 + $0xdd8] sm:$0xff]  ;;  %v8124_v28 = vld [vmem:[#allocation21 + $0xdc0] sm:$0xff] }
 0xe79   : > { %11907 = vmatprep.subr.bf16.mxu0 %v11906_v44  ;;  %12035 = vmatprep.subr.bf16.mxu1 %v12034_v32  ;;  %v12050_v44 = vpack.c.bf16 %v8099_v33, %v8095_v31  ;;  %v8105_v32 = vld [vmem:[#allocation21 + $0xd28] sm:$0xff]  ;;  %v8126_v33 = vld [vmem:[#allocation21 + $0xdd0] sm:$0xff] }
 0xe7a   : > { %v11926_v49 = vpack.c.bf16 %v8105_v32, %v8101_v50  ;;  %v8136_v50 = vld [vmem:[#allocation21 + $0xe20] sm:$0xff] }
 0xe7c   : > { %11909 = vmatpush1.bf16.msra.mxu0 %v11908_v36  ;;  %12037 = vmatpush1.bf16.msra.mxu1 %v12036_v57  ;;  %v8103_v36 = vld [vmem:[#allocation21 + $0xd18] sm:$0xff]  ;;  %v12052_v57 = vpack.c.bf16 %v8098_v46, %v8094_v45  ;;  %v8132_v46 = vld [vmem:[#allocation21 + $0xe00] sm:$0xff] }
 0xe7d   : > { %11911 = vmatprep.subr.bf16.mxu0 %v11910_v59  ;;  %12039 = vmatprep.subr.bf16.mxu1 %v12038_v62  ;;  %v12054_v59 = vpack.c.bf16 %v8107_v54, %v8103_v36  ;;  %v8106_v62 = vld [vmem:[#allocation21 + $0xd30] sm:$0xff] }
 0xe7e   : > { %v12056_v53 = vpack.c.bf16 %v8106_v62, %v8102_v29  ;;  %v8134_v54 = vld [vmem:[#allocation21 + $0xe10] sm:$0xff]  ;;  %v8140_v62 = vld [vmem:[#allocation21 + $0xe40] sm:$0xff] }
 0xf0d   : > { %v13868_v55 = vpop.f32.mrb[26].mxu0 }
 0xf0e   : > { %v13870_v5 = vpop.f32.mrb[27].mxu0  ;;  %v13872_v8 = vpop.f32.mrb[26].mxu1 }
 0xf0f   : > { %v13874_v1 = vpop.f32.mrb[27].mxu1 }
 0xf11   : > { %v7863_v10 = vpop.f32.mrb[28].mxu0 }
 0xf12   : > { %v7865_v12 = vpop.f32.mrb[29].mxu0  ;;  %v13876_v15 = vpop.f32.mrb[28].mxu1 }
 0xf13   : > { %8260 = vmatprep.mubr.f32.mxu0 %v7865_v12  ;;  %8402 = vmatprep.mubr.f32.mxu1 %v7865_v12  ;;  %v7936_v17 = vpop.f32.mrb[29].mxu1  ;;  %v8121_v12 = vld [vmem:[#allocation21 + $0xda8] sm:$0xff] }
 0xf14   : > { %8261 = vmatmul.mubr.f32.vlgmr.msra.gmra.mrb[30].mxu0 %v7863_v10  ;;  %8403 = vmatmul.mubr.f32.vlgmr.msra.gmra.mrb[30].mxu1 %v7863_v10  ;;  %v11930_v10 = vpack.c.bf16 %v8113_v3, %v8109_v51  ;;  %v11934_v41 = vpack.c.bf16 %v8121_v12, %v8117_v6  ;;  %v8144_v51 = vld [vmem:[#allocation21 + $0xe60] sm:$0xff] }
 0xf15   : > { %11913 = vmatpush1.bf16.msra.mxu0 %v11912_v60  ;;  %12041 = vmatpush1.bf16.msra.mxu1 %v12040_v11  ;;  %v12058_v60 = vpack.c.bf16 %v8115_v52, %v8111_v24  ;;  %v8110_v11 = vld [vmem:[#allocation21 + $0xd50] sm:$0xff]  ;;  %v8152_v6 = vld [vmem:[#allocation21 + $0xea0] sm:$0xff] }
 0xf16   : > { %11915 = vmatprep.subr.bf16.mxu0 %v11914_v13  ;;  %12043 = vmatprep.subr.bf16.mxu1 %v12042_v14  ;;  %v8119_v13 = vld [vmem:[#allocation21 + $0xd98] sm:$0xff]  ;;  %v12060_v38 = vpack.c.bf16 %v8114_v61, %v8110_v11  ;;  %v8142_v52 = vld [vmem:[#allocation21 + $0xe50] sm:$0xff]  ;;  %v8148_v61 = vld [vmem:[#allocation21 + $0xe80] sm:$0xff] }
 0xf17   : > { %8331 = vmatprep.mubr.f32.mxu0 %v7936_v17  ;;  %8473 = vmatprep.mubr.f32.mxu1 %v7936_v17  ;;  %v8123_v14 = vld [vmem:[#allocation21 + $0xdb8] sm:$0xff]  ;;  %v8118_v17 = vld [vmem:[#allocation21 + $0xd90] sm:$0xff] }
 0xf18   : > { %v12062_v16 = vpack.c.bf16 %v8123_v14, %v8119_v13  ;;  %v8150_v14 = vld [vmem:[#allocation21 + $0xe90] sm:$0xff] }
 0xf19   : > { %11917 = vmatpush1.bf16.msra.mxu0 %v11916_v18  ;;  %12045 = vmatpush1.bf16.msra.mxu1 %v12044_v19  ;;  %v8122_v18 = vld [vmem:[#allocation21 + $0xdb0] sm:$0xff]  ;;  %v8125_v19 = vld [vmem:[#allocation21 + $0xdc8] sm:$0xff] }
 0xf1a   : > { %11919 = vmatprep.subr.bf16.mxu0 %v11918_v23  ;;  %12047 = vmatprep.subr.bf16.mxu1 %v12046_v26  ;;  %v8131_v23 = vld [vmem:[#allocation21 + $0xdf8] sm:$0xff]  ;;  %v11936_v26 = vpack.c.bf16 %v8120_v2, %v8116_v63  ;;  %v12064_v27 = vpack.c.bf16 %v8122_v18, %v8118_v17  ;;  %v11938_v30 = vpack.c.bf16 %v8129_v47, %v8125_v19  ;;  %v8161_v63 = vld [vmem:[#allocation21 + $0xee8] sm:$0xff]  ;;  %v8156_v18 = vld [vmem:[#allocation21 + $0xec0] sm:$0xff] }
 0xf1b   : > { %v12066_v31 = vpack.c.bf16 %v8131_v23, %v8127_v20  ;;  %v8159_v2 = vld [vmem:[#allocation21 + $0xed8] sm:$0xff]  ;;  %v8160_v19 = vld [vmem:[#allocation21 + $0xee0] sm:$0xff]  ;;  %v8158_v23 = vld [vmem:[#allocation21 + $0xed0] sm:$0xff] }
 0xf1d   : > { %11921 = vmatpush1.bf16.msra.mxu0 %v11920_v34  ;;  %12049 = vmatpush1.bf16.msra.mxu1 %v12048_v21  ;;  %v8130_v34 = vld [vmem:[#allocation21 + $0xdf0] sm:$0xff]  ;;  %v8133_v21 = vld [vmem:[#allocation21 + $0xe08] sm:$0xff] }
 0xf1e   : > { %11923 = vmatprep.subr.bf16.mxu0 %v11922_v37  ;;  %12051 = vmatprep.subr.bf16.mxu1 %v12050_v44  ;;  %v8139_v37 = vld [vmem:[#allocation21 + $0xe38] sm:$0xff]  ;;  %v11940_v44 = vpack.c.bf16 %v8128_v4, %v8124_v28  ;;  %v12068_v45 = vpack.c.bf16 %v8130_v34, %v8126_v33  ;;  %v11942_v32 = vpack.c.bf16 %v8137_v22, %v8133_v21  ;;  %v8169_v28 = vld [vmem:[#allocation21 + $0xf28] sm:$0xff]  ;;  %v8164_v34 = vld [vmem:[#allocation21 + $0xf00] sm:$0xff] }
 0xf1f   : > { %v12070_v36 = vpack.c.bf16 %v8139_v37, %v8135_v35  ;;  %v8167_v4 = vld [vmem:[#allocation21 + $0xf18] sm:$0xff]  ;;  %v8168_v21 = vld [vmem:[#allocation21 + $0xf20] sm:$0xff]  ;;  %v8166_v37 = vld [vmem:[#allocation21 + $0xf10] sm:$0xff] }
 0xf21   : > { %11925 = vmatpush1.bf16.msra.mxu0 %v11924_v56  ;;  %12053 = vmatpush1.bf16.msra.mxu1 %v12052_v57  ;;  %v8138_v56 = vld [vmem:[#allocation21 + $0xe30] sm:$0xff]  ;;  %v8141_v57 = vld [vmem:[#allocation21 + $0xe48] sm:$0xff] }
 0xf22   : > { %11927 = vmatprep.subr.bf16.mxu0 %v11926_v49  ;;  %12055 = vmatprep.subr.bf16.mxu1 %v12054_v59  ;;  %v8147_v49 = vld [vmem:[#allocation21 + $0xe78] sm:$0xff]  ;;  %v11944_v59 = vpack.c.bf16 %v8136_v50, %v8132_v46  ;;  %v12072_v29 = vpack.c.bf16 %v8138_v56, %v8134_v54  ;;  %v11946_v3 = vpack.c.bf16 %v8145_v58, %v8141_v57  ;;  %v8177_v46 = vld [vmem:[#allocation21 + $0xf68] sm:$0xff]  ;;  %v8172_v56 = vld [vmem:[#allocation21 + $0xf40] sm:$0xff] }
 0xf23   : > { %v12074_v24 = vpack.c.bf16 %v8147_v49, %v8143_v48  ;;  %v8175_v50 = vld [vmem:[#allocation21 + $0xf58] sm:$0xff]  ;;  %v8176_v57 = vld [vmem:[#allocation21 + $0xf60] sm:$0xff]  ;;  %v8174_v49 = vld [vmem:[#allocation21 + $0xf50] sm:$0xff] }
 0xf25   : > { %11929 = vmatpush1.bf16.msra.mxu0 %v11928_v7  ;;  %12057 = vmatpush1.bf16.msra.mxu1 %v12056_v53  ;;  %v8146_v7 = vld [vmem:[#allocation21 + $0xe70] sm:$0xff]  ;;  %v8149_v53 = vld [vmem:[#allocation21 + $0xe88] sm:$0xff] }
 0xf26   : > { %11931 = vmatprep.subr.bf16.mxu0 %v11930_v10  ;;  %12059 = vmatprep.subr.bf16.mxu1 %v12058_v60  ;;  %v8155_v10 = vld [vmem:[#allocation21 + $0xeb8] sm:$0xff]  ;;  %v11948_v60 = vpack.c.bf16 %v8144_v51, %v8140_v62  ;;  %v12076_v11 = vpack.c.bf16 %v8146_v7, %v8142_v52  ;;  %v11950_v12 = vpack.c.bf16 %v8153_v25, %v8149_v53  ;;  %v8185_v62 = vld [vmem:[#allocation21 + $0xfa8] sm:$0xff]  ;;  %v8180_v7 = vld [vmem:[#allocation21 + $0xf80] sm:$0xff] }
 0xf27   : > { %v12078_v13 = vpack.c.bf16 %v8155_v10, %v8151_v9  ;;  %v8183_v51 = vld [vmem:[#allocation21 + $0xf98] sm:$0xff]  ;;  %v8184_v53 = vld [vmem:[#allocation21 + $0xfa0] sm:$0xff]  ;;  %v8182_v10 = vld [vmem:[#allocation21 + $0xf90] sm:$0xff] }
 0xf29   : > { %11933 = vmatpush1.bf16.msra.mxu0 %v11932_v0  ;;  %12061 = vmatpush1.bf16.msra.mxu1 %v12060_v38  ;;  %v8154_v0 = vld [vmem:[#allocation21 + $0xeb0] sm:$0xff]  ;;  %v8157_v38 = vld [vmem:[#allocation21 + $0xec8] sm:$0xff] }
 0xf2a   : > { %11935 = vmatprep.subr.bf16.mxu0 %v11934_v41  ;;  %12063 = vmatprep.subr.bf16.mxu1 %v12062_v16  ;;  %v8163_v41 = vld [vmem:[#allocation21 + $0xef8] sm:$0xff]  ;;  %v11952_v16 = vpack.c.bf16 %v8152_v6, %v8148_v61  ;;  %v12080_v17 = vpack.c.bf16 %v8154_v0, %v8150_v14  ;;  %v11954_v47 = vpack.c.bf16 %v8161_v63, %v8157_v38  ;;  %v8193_v61 = vld [vmem:[#allocation21 + $0xfe8] sm:$0xff]  ;;  %v8188_v0 = vld [vmem:[#allocation21 + $0xfc0] sm:$0xff] }
 0xf2b   : > { %v12082_v20 = vpack.c.bf16 %v8163_v41, %v8159_v2  ;;  %v8191_v6 = vld [vmem:[#allocation21 + $0xfd8] sm:$0xff]  ;;  %v8192_v38 = vld [vmem:[#allocation21 + $0xfe0] sm:$0xff]  ;;  %v8190_v41 = vld [vmem:[#allocation21 + $0xfd0] sm:$0xff] }
 0xf2d   : > { %11937 = vmatpush1.bf16.msra.mxu0 %v11936_v26  ;;  %12065 = vmatpush1.bf16.msra.mxu1 %v12064_v27  ;;  %v8162_v26 = vld [vmem:[#allocation21 + $0xef0] sm:$0xff]  ;;  %v8165_v27 = vld [vmem:[#allocation21 + $0xf08] sm:$0xff] }
 0xf2e   : > { %11939 = vmatprep.subr.bf16.mxu0 %v11938_v30  ;;  %12067 = vmatprep.subr.bf16.mxu1 %v12066_v31  ;;  %v8171_v30 = vld [vmem:[#allocation21 + $0xf38] sm:$0xff]  ;;  %v11956_v31 = vpack.c.bf16 %v8160_v19, %v8156_v18  ;;  %v12084_v33 = vpack.c.bf16 %v8162_v26, %v8158_v23  ;;  %v11958_v22 = vpack.c.bf16 %v8169_v28, %v8165_v27  ;;  %v7541_v18 = vld [vmem:[#allocation21 + $0x28] sm:$0xff]  ;;  %v7536_v28 = vld [vmem:[#allocation21] sm:$0xff] }
 0xf2f   : > { %v12086_v35 = vpack.c.bf16 %v8171_v30, %v8167_v4  ;;  %v7539_v19 = vld [vmem:[#allocation21 + $0x18] sm:$0xff]  ;;  %v7540_v4 = vld [vmem:[#allocation21 + $0x20] sm:$0xff]  ;;  %v7538_v30 = vld [vmem:[#allocation21 + $0x10] sm:$0xff] }
 0xf31   : > { %11941 = vmatpush1.bf16.msra.mxu0 %v11940_v44  ;;  %12069 = vmatpush1.bf16.msra.mxu1 %v12068_v45  ;;  %v8170_v44 = vld [vmem:[#allocation21 + $0xf30] sm:$0xff]  ;;  %v8173_v45 = vld [vmem:[#allocation21 + $0xf48] sm:$0xff] }
 0xf32   : > { %11943 = vmatprep.subr.bf16.mxu0 %v11942_v32  ;;  %12071 = vmatprep.subr.bf16.mxu1 %v12070_v36  ;;  %v8179_v32 = vld [vmem:[#allocation21 + $0xf78] sm:$0xff]  ;;  %v11960_v36 = vpack.c.bf16 %v8168_v21, %v8164_v34  ;;  %v12088_v54 = vpack.c.bf16 %v8170_v44, %v8166_v37  ;;  %v11962_v58 = vpack.c.bf16 %v8177_v46, %v8173_v45  ;;  %v7549_v34 = vld [vmem:[#allocation21 + $0x68] sm:$0xff]  ;;  %v7544_v44 = vld [vmem:[#allocation21 + $0x40] sm:$0xff] }
 0xf33   : > { %v12090_v48 = vpack.c.bf16 %v8179_v32, %v8175_v50  ;;  %v7547_v21 = vld [vmem:[#allocation21 + $0x58] sm:$0xff]  ;;  %v7548_v45 = vld [vmem:[#allocation21 + $0x60] sm:$0xff]  ;;  %v7546_v46 = vld [vmem:[#allocation21 + $0x50] sm:$0xff] }
 0xf35   : > { %11945 = vmatpush1.bf16.msra.mxu0 %v11944_v59  ;;  %12073 = vmatpush1.bf16.msra.mxu1 %v12072_v29  ;;  %v8178_v59 = vld [vmem:[#allocation21 + $0xf70] sm:$0xff]  ;;  %v8181_v29 = vld [vmem:[#allocation21 + $0xf88] sm:$0xff] }
 0xf36   : > { %11947 = vmatprep.subr.bf16.mxu0 %v11946_v3  ;;  %12075 = vmatprep.subr.bf16.mxu1 %v12074_v24  ;;  %v8187_v3 = vld [vmem:[#allocation21 + $0xfb8] sm:$0xff]  ;;  %v11964_v24 = vpack.c.bf16 %v8176_v57, %v8172_v56  ;;  %v12092_v52 = vpack.c.bf16 %v8178_v59, %v8174_v49  ;;  %v11966_v25 = vpack.c.bf16 %v8185_v62, %v8181_v29  ;;  %v7557_v56 = vld [vmem:[#allocation21 + $0xa8] sm:$0xff]  ;;  %v7552_v29 = vld [vmem:[#allocation21 + $0x80] sm:$0xff] }
 0xf37   : > { %v12094_v9 = vpack.c.bf16 %v8187_v3, %v8183_v51  ;;  %v7555_v57 = vld [vmem:[#allocation21 + $0x98] sm:$0xff]  ;;  %v7556_v62 = vld [vmem:[#allocation21 + $0xa0] sm:$0xff]  ;;  %v7554_v51 = vld [vmem:[#allocation21 + $0x90] sm:$0xff] }
 0xf39   : > { %11949 = vmatpush1.bf16.msra.mxu0 %v11948_v60  ;;  %12077 = vmatpush1.bf16.msra.mxu1 %v12076_v11  ;;  %v8186_v60 = vld [vmem:[#allocation21 + $0xfb0] sm:$0xff]  ;;  %v8189_v11 = vld [vmem:[#allocation21 + $0xfc8] sm:$0xff] }
 0xf3a   : > { %11951 = vmatprep.subr.bf16.mxu0 %v11950_v12  ;;  %12079 = vmatprep.subr.bf16.mxu1 %v12078_v13  ;;  %v8195_v12 = vld [vmem:[#allocation21 + $0xff8] sm:$0xff]  ;;  %v11968_v13 = vpack.c.bf16 %v8184_v53, %v8180_v7  ;;  %v12096_v14 = vpack.c.bf16 %v8186_v60, %v8182_v10  ;;  %v11970_v63 = vpack.c.bf16 %v8193_v61, %v8189_v11  ;;  %v7564_v60 = vld [vmem:[#allocation21 + $0xe0] sm:$0xff]  ;;  %v7562_v11 = vld [vmem:[#allocation21 + $0xd0] sm:$0xff] }
 0xf3b   : > { %v12098_v2 = vpack.c.bf16 %v8195_v12, %v8191_v6  ;;  %v7563_v7 = vld [vmem:[#allocation21 + $0xd8] sm:$0xff]  ;;  %v7566_v6 = vld [vmem:[#allocation21 + $0xf0] sm:$0xff]  ;;  %v7569_v12 = vld [vmem:[#allocation21 + $0x108] sm:$0xff] }
 0xf3c   : > { %v7567_v53 = vld [vmem:[#allocation21 + $0xf8] sm:$0xff] }
 0xf3d   : > { %11953 = vmatpush1.bf16.msra.mxu0 %v11952_v16  ;;  %12081 = vmatpush1.bf16.msra.mxu1 %v12080_v17  ;;  %v8194_v16 = vld [vmem:[#allocation21 + $0xff0] sm:$0xff]  ;;  %v7537_v17 = vld [vmem:[#allocation21 + $0x8] sm:$0xff]  ;;  %v12242_v61 = vpack.c.bf16 %v7567_v53, %v7563_v7 }
 0xf3e   : > { %11955 = vmatprep.subr.bf16.mxu0 %v11954_v47  ;;  %12083 = vmatprep.subr.bf16.mxu1 %v12082_v20  ;;  %v7543_v47 = vld [vmem:[#allocation21 + $0x38] sm:$0xff]  ;;  %v11972_v20 = vpack.c.bf16 %v8192_v38, %v8188_v0  ;;  %v12100_v23 = vpack.c.bf16 %v8194_v16, %v8190_v41  ;;  %v12102_v26 = vpack.c.bf16 %v7541_v18, %v7537_v17  ;;  %v7568_v41 = vld [vmem:[#allocation21 + $0x100] sm:$0xff]  ;;  %v7570_v17 = vld [vmem:[#allocation21 + $0x110] sm:$0xff] }
 0xf3f   : > { %v12230_v27 = vpack.c.bf16 %v7543_v47, %v7539_v19  ;;  %v7575_v0 = vld [vmem:[#allocation21 + $0x138] sm:$0xff]  ;;  %v7572_v16 = vld [vmem:[#allocation21 + $0x120] sm:$0xff]  ;;  %v7574_v19 = vld [vmem:[#allocation21 + $0x130] sm:$0xff] }
 0xf40   : > { %v7577_v47 = vld [vmem:[#allocation21 + $0x148] sm:$0xff]  ;;  %v7598_v7 = vld [vmem:[#allocation21 + $0x1f0] sm:$0xff] }
 0xf41   : > { %11957 = vmatpush1.bf16.msra.mxu0 %v11956_v31  ;;  %12085 = vmatpush1.bf16.msra.mxu1 %v12084_v33  ;;  %v7542_v31 = vld [vmem:[#allocation21 + $0x30] sm:$0xff]  ;;  %v7545_v33 = vld [vmem:[#allocation21 + $0x48] sm:$0xff] }
 0xf42   : > { %11959 = vmatprep.subr.bf16.mxu0 %v11958_v22  ;;  %12087 = vmatprep.subr.bf16.mxu1 %v12086_v35  ;;  %v7551_v22 = vld [vmem:[#allocation21 + $0x78] sm:$0xff]  ;;  %v12104_v35 = vpack.c.bf16 %v7540_v4, %v7536_v28  ;;  %v12232_v37 = vpack.c.bf16 %v7542_v31, %v7538_v30  ;;  %v12106_v50 = vpack.c.bf16 %v7549_v34, %v7545_v33  ;;  %v7576_v30 = vld [vmem:[#allocation21 + $0x140] sm:$0xff]  ;;  %v7578_v33 = vld [vmem:[#allocation21 + $0x150] sm:$0xff] }
 0xf43   : > { %v12234_v32 = vpack.c.bf16 %v7551_v22, %v7547_v21  ;;  %v12248_v28 = vpack.c.bf16 %v7574_v19, %v7570_v17  ;;  %v7580_v31 = vld [vmem:[#allocation21 + $0x160] sm:$0xff]  ;;  %v7582_v21 = vld [vmem:[#allocation21 + $0x170] sm:$0xff]  ;;  %v7585_v22 = vld [vmem:[#allocation21 + $0x188] sm:$0xff] }
 0xf44   : > { %v7601_v53 = vld [vmem:[#allocation21 + $0x208] sm:$0xff]  ;;  %v7612_v19 = vld [vmem:[#allocation21 + $0x260] sm:$0xff] }
 0xf45   : > { %11961 = vmatpush1.bf16.msra.mxu0 %v11960_v36  ;;  %12089 = vmatpush1.bf16.msra.mxu1 %v12088_v54  ;;  %v7550_v36 = vld [vmem:[#allocation21 + $0x70] sm:$0xff]  ;;  %v7553_v54 = vld [vmem:[#allocation21 + $0x88] sm:$0xff] }
 0xf46   : > { %11963 = vmatprep.subr.bf16.mxu0 %v11962_v58  ;;  %12091 = vmatprep.subr.bf16.mxu1 %v12090_v48  ;;  %v7559_v58 = vld [vmem:[#allocation21 + $0xb8] sm:$0xff]  ;;  %v12108_v48 = vpack.c.bf16 %v7548_v45, %v7544_v44  ;;  %v12236_v49 = vpack.c.bf16 %v7550_v36, %v7546_v46  ;;  %v12110_v59 = vpack.c.bf16 %v7557_v56, %v7553_v54  ;;  %v7588_v36 = vld [vmem:[#allocation21 + $0x1a0] sm:$0xff]  ;;  %v7586_v54 = vld [vmem:[#allocation21 + $0x190] sm:$0xff] }
 0xf47   : > { %v12238_v3 = vpack.c.bf16 %v7559_v58, %v7555_v57  ;;  %v7591_v44 = vld [vmem:[#allocation21 + $0x1b8] sm:$0xff]  ;;  %v12124_v45 = vpack.c.bf16 %v7580_v31, %v7576_v30  ;;  %v12252_v46 = vpack.c.bf16 %v7582_v21, %v7578_v33  ;;  %v7590_v57 = vld [vmem:[#allocation21 + $0x1b0] sm:$0xff]  ;;  %v7593_v58 = vld [vmem:[#allocation21 + $0x1c8] sm:$0xff] }
 0xf48   : > { %v7620_v21 = vld [vmem:[#allocation21 + $0x2a0] sm:$0xff] }
 0xf49   : > { %11965 = vmatpush1.bf16.msra.mxu0 %v11964_v24  ;;  %12093 = vmatpush1.bf16.msra.mxu1 %v12092_v52  ;;  %v7558_v24 = vld [vmem:[#allocation21 + $0xb0] sm:$0xff]  ;;  %v7561_v52 = vld [vmem:[#allocation21 + $0xc8] sm:$0xff] }
 0xf4a   : > { %11967 = vmatprep.subr.bf16.mxu0 %v11966_v25  ;;  %12095 = vmatprep.subr.bf16.mxu1 %v12094_v9  ;;  %v12112_v25 = vpack.c.bf16 %v7556_v62, %v7552_v29  ;;  %v12240_v9 = vpack.c.bf16 %v7558_v24, %v7554_v51  ;;  %v12256_v62 = vpack.c.bf16 %v7590_v57, %v7586_v54  ;;  %v7596_v24 = vld [vmem:[#allocation21 + $0x1e0] sm:$0xff] }
 0xf4b   : > { %v7628_v57 = vld [vmem:[#allocation21 + $0x2e0] sm:$0xff] }
 0xf4d   : > { %11969 = vmatpush1.bf16.msra.mxu0 %v11968_v13  ;;  %12097 = vmatpush1.bf16.msra.mxu1 %v12096_v14  ;;  %v7573_v13 = vld [vmem:[#allocation21 + $0x128] sm:$0xff]  ;;  %v7571_v14 = vld [vmem:[#allocation21 + $0x118] sm:$0xff] }
 0xf4e   : > { %11971 = vmatprep.subr.bf16.mxu0 %v11970_v63  ;;  %12099 = vmatprep.subr.bf16.mxu1 %v12098_v2  ;;  %v12244_v63 = vpack.c.bf16 %v7566_v6, %v7562_v11  ;;  %v12118_v2 = vpack.c.bf16 %v7573_v13, %v7569_v12  ;;  %v12246_v18 = vpack.c.bf16 %v7575_v0, %v7571_v14  ;;  %v7604_v6 = vld [vmem:[#allocation21 + $0x220] sm:$0xff]  ;;  %v7602_v12 = vld [vmem:[#allocation21 + $0x210] sm:$0xff]  ;;  %v7609_v0 = vld [vmem:[#allocation21 + $0x248] sm:$0xff] }
 0xf4f   : > { %v7606_v14 = vld [vmem:[#allocation21 + $0x230] sm:$0xff] }
 0xf51   : > { %11973 = vmatpush1.bf16.msra.mxu0 %v11972_v20  ;;  %12101 = vmatpush1.bf16.msra.mxu1 %v12100_v23  ;;  %v7581_v20 = vld [vmem:[#allocation21 + $0x168] sm:$0xff]  ;;  %v7579_v23 = vld [vmem:[#allocation21 + $0x158] sm:$0xff] }
 0xf52   : > { %12103 = vmatprep.subr.bf16.mxu0 %v12102_v26  ;;  %12231 = vmatprep.subr.bf16.mxu1 %v12230_v27  ;;  %v7583_v26 = vld [vmem:[#allocation21 + $0x178] sm:$0xff]  ;;  %v12120_v27 = vpack.c.bf16 %v7572_v16, %v7568_v41  ;;  %v12122_v4 = vpack.c.bf16 %v7581_v20, %v7577_v47  ;;  %v12264_v16 = vpack.c.bf16 %v7606_v14, %v7602_v12  ;;  %v7610_v47 = vld [vmem:[#allocation21 + $0x250] sm:$0xff]  ;;  %v7644_v14 = vld [vmem:[#allocation21 + $0x360] sm:$0xff] }
 0xf53   : > { %v12250_v34 = vpack.c.bf16 %v7583_v26, %v7579_v23  ;;  %v7614_v23 = vld [vmem:[#allocation21 + $0x270] sm:$0xff]  ;;  %v7617_v26 = vld [vmem:[#allocation21 + $0x288] sm:$0xff] }
 0xf54   : > { %8332 = vmatmul.mubr.f32.vlgmr.msra.gmra.mrb[30].mxu0 %v13876_v15  ;;  %8474 = vmatmul.mubr.f32.vlgmr.msra.gmra.mrb[30].mxu1 %v13876_v15  ;;  %v7565_v15 = vld [vmem:[#allocation21 + $0xe8] sm:$0xff]  ;;  %v12268_v31 = vpack.c.bf16 %v7614_v23, %v7610_v47  ;;  %v7652_v23 = vld [vmem:[#allocation21 + $0x3a0] sm:$0xff] }
 0xf55   : > { %12105 = vmatpush1.bf16.msra.mxu0 %v12104_v35  ;;  %8544 = vmatprep.mubr.f32.mxu0 %v13870_v5  ;;  %v12114_v10 = vpack.c.bf16 %v7565_v15, %v7561_v52  ;;  %v7589_v35 = vld [vmem:[#allocation21 + $0x1a8] sm:$0xff]  ;;  %v7594_v52 = vld [vmem:[#allocation21 + $0x1d0] sm:$0xff] }
 0xf56   : > { %12233 = vmatpush1.bf16.msra.mxu1 %v12232_v37  ;;  %8686 = vmatprep.mubr.f32.mxu1 %v13870_v5  ;;  %v7560_v5 = vld [vmem:[#allocation21 + $0xc0] sm:$0xff]  ;;  %v7587_v37 = vld [vmem:[#allocation21 + $0x198] sm:$0xff] }
 0xf57   : > { %12107 = vmatprep.subr.bf16.mxu0 %v12106_v50  ;;  %12235 = vmatprep.subr.bf16.mxu1 %v12234_v32  ;;  %v12116_v38 = vpack.c.bf16 %v7564_v60, %v7560_v5  ;;  %v12126_v50 = vpack.c.bf16 %v7589_v35, %v7585_v22  ;;  %v7584_v32 = vld [vmem:[#allocation21 + $0x180] sm:$0xff]  ;;  %v12254_v56 = vpack.c.bf16 %v7591_v44, %v7587_v37  ;;  %v7618_v22 = vld [vmem:[#allocation21 + $0x290] sm:$0xff]  ;;  %v7625_v44 = vld [vmem:[#allocation21 + $0x2c8] sm:$0xff] }
 0xf58   : > { %v12128_v29 = vpack.c.bf16 %v7588_v36, %v7584_v32  ;;  %v12260_v60 = vpack.c.bf16 %v7598_v7, %v7594_v52  ;;  %v7622_v37 = vld [vmem:[#allocation21 + $0x2b0] sm:$0xff]  ;;  %v7636_v7 = vld [vmem:[#allocation21 + $0x320] sm:$0xff] }
 0xf59   : > { %12109 = vmatpush1.bf16.msra.mxu0 %v12108_v48  ;;  %v7597_v48 = vld [vmem:[#allocation21 + $0x1e8] sm:$0xff]  ;;  %v12272_v36 = vpack.c.bf16 %v7622_v37, %v7618_v22  ;;  %v7660_v37 = vld [vmem:[#allocation21 + $0x3e0] sm:$0xff] }
 0xf5a   : > { %12237 = vmatpush1.bf16.msra.mxu1 %v12236_v49  ;;  %12111 = vmatprep.subr.bf16.mxu0 %v12110_v59  ;;  %v7595_v49 = vld [vmem:[#allocation21 + $0x1d8] sm:$0xff]  ;;  %v12130_v51 = vpack.c.bf16 %v7597_v48, %v7593_v58  ;;  %v7626_v58 = vld [vmem:[#allocation21 + $0x2d0] sm:$0xff] }
 0xf5b   : > { %12239 = vmatprep.subr.bf16.mxu1 %v12238_v3  ;;  %v7599_v59 = vld [vmem:[#allocation21 + $0x1f8] sm:$0xff]  ;;  %v7592_v3 = vld [vmem:[#allocation21 + $0x1c0] sm:$0xff] }
 0xf5c   : > { %v12258_v15 = vpack.c.bf16 %v7599_v59, %v7595_v49  ;;  %v12132_v5 = vpack.c.bf16 %v7596_v24, %v7592_v3  ;;  %v7630_v49 = vld [vmem:[#allocation21 + $0x2f0] sm:$0xff]  ;;  %v7633_v59 = vld [vmem:[#allocation21 + $0x308] sm:$0xff] }
 0xf5d   : > { %12113 = vmatpush1.bf16.msra.mxu0 %v12112_v25  ;;  %v7605_v25 = vld [vmem:[#allocation21 + $0x228] sm:$0xff]  ;;  %v12276_v24 = vpack.c.bf16 %v7630_v49, %v7626_v58  ;;  %v7668_v49 = vld [vmem:[#allocation21 + $0x420] sm:$0xff] }
 0xf5e   : > { %12241 = vmatpush1.bf16.msra.mxu1 %v12240_v9  ;;  %12115 = vmatprep.subr.bf16.mxu0 %v12114_v10  ;;  %v7603_v9 = vld [vmem:[#allocation21 + $0x218] sm:$0xff]  ;;  %v12134_v11 = vpack.c.bf16 %v7605_v25, %v7601_v53  ;;  %v7634_v53 = vld [vmem:[#allocation21 + $0x310] sm:$0xff] }
 0xf5f   : > { %12243 = vmatprep.subr.bf16.mxu1 %v12242_v61  ;;  %v7607_v10 = vld [vmem:[#allocation21 + $0x238] sm:$0xff]  ;;  %v7600_v61 = vld [vmem:[#allocation21 + $0x200] sm:$0xff] }
 0xf60   : > { %v12262_v13 = vpack.c.bf16 %v7607_v10, %v7603_v9  ;;  %v12136_v41 = vpack.c.bf16 %v7604_v6, %v7600_v61  ;;  %v7638_v9 = vld [vmem:[#allocation21 + $0x330] sm:$0xff]  ;;  %v7641_v10 = vld [vmem:[#allocation21 + $0x348] sm:$0xff] }
 0xf61   : > { %12117 = vmatpush1.bf16.msra.mxu0 %v12116_v38  ;;  %v7613_v38 = vld [vmem:[#allocation21 + $0x268] sm:$0xff]  ;;  %v12280_v6 = vpack.c.bf16 %v7638_v9, %v7634_v53  ;;  %v7672_v53 = vld [vmem:[#allocation21 + $0x440] sm:$0xff]  ;;  %v7674_v9 = vld [vmem:[#allocation21 + $0x450] sm:$0xff] }
 0xf62   : > { %12245 = vmatpush1.bf16.msra.mxu1 %v12244_v63  ;;  %12119 = vmatprep.subr.bf16.mxu0 %v12118_v2  ;;  %v7611_v63 = vld [vmem:[#allocation21 + $0x258] sm:$0xff]  ;;  %v12138_v17 = vpack.c.bf16 %v7613_v38, %v7609_v0  ;;  %v7642_v0 = vld [vmem:[#allocation21 + $0x350] sm:$0xff] }
 0xf63   : > { %12247 = vmatprep.subr.bf16.mxu1 %v12246_v18  ;;  %v7615_v2 = vld [vmem:[#allocation21 + $0x278] sm:$0xff]  ;;  %v7608_v18 = vld [vmem:[#allocation21 + $0x240] sm:$0xff] }
 0xf64   : > { %v12266_v20 = vpack.c.bf16 %v7615_v2, %v7611_v63  ;;  %v12140_v30 = vpack.c.bf16 %v7612_v19, %v7608_v18  ;;  %v7646_v63 = vld [vmem:[#allocation21 + $0x370] sm:$0xff]  ;;  %v7649_v2 = vld [vmem:[#allocation21 + $0x388] sm:$0xff] }
 0xf65   : > { %12121 = vmatpush1.bf16.msra.mxu0 %v12120_v27  ;;  %v7621_v27 = vld [vmem:[#allocation21 + $0x2a8] sm:$0xff]  ;;  %v12284_v19 = vpack.c.bf16 %v7646_v63, %v7642_v0  ;;  %v7684_v63 = vld [vmem:[#allocation21 + $0x4a0] sm:$0xff] }
 0xf66   : > { %12249 = vmatpush1.bf16.msra.mxu1 %v12248_v28  ;;  %12123 = vmatprep.subr.bf16.mxu0 %v12122_v4  ;;  %v7619_v28 = vld [vmem:[#allocation21 + $0x298] sm:$0xff]  ;;  %v12142_v33 = vpack.c.bf16 %v7621_v27, %v7617_v26  ;;  %v7650_v26 = vld [vmem:[#allocation21 + $0x390] sm:$0xff] }
 0xf67   : > { %12251 = vmatprep.subr.bf16.mxu1 %v12250_v34  ;;  %v7623_v4 = vld [vmem:[#allocation21 + $0x2b8] sm:$0xff]  ;;  %v7616_v34 = vld [vmem:[#allocation21 + $0x280] sm:$0xff] }
 0xf68   : > { %v12270_v35 = vpack.c.bf16 %v7623_v4, %v7619_v28  ;;  %v12144_v32 = vpack.c.bf16 %v7620_v21, %v7616_v34  ;;  %v7654_v28 = vld [vmem:[#allocation21 + $0x3b0] sm:$0xff]  ;;  %v7657_v4 = vld [vmem:[#allocation21 + $0x3c8] sm:$0xff] }
 0xf69   : > { %12125 = vmatpush1.bf16.msra.mxu0 %v12124_v45  ;;  %v7629_v45 = vld [vmem:[#allocation21 + $0x2e8] sm:$0xff]  ;;  %v12288_v21 = vpack.c.bf16 %v7654_v28, %v7650_v26  ;;  %v7688_v26 = vld [vmem:[#allocation21 + $0x4c0] sm:$0xff]  ;;  %v7690_v28 = vld [vmem:[#allocation21 + $0x4d0] sm:$0xff] }
 0xf6a   : > { %12253 = vmatpush1.bf16.msra.mxu1 %v12252_v46  ;;  %12127 = vmatprep.subr.bf16.mxu0 %v12126_v50  ;;  %v7627_v46 = vld [vmem:[#allocation21 + $0x2d8] sm:$0xff]  ;;  %v12146_v54 = vpack.c.bf16 %v7629_v45, %v7625_v44  ;;  %v7658_v44 = vld [vmem:[#allocation21 + $0x3d0] sm:$0xff] }
 0xf6b   : > { %12255 = vmatprep.subr.bf16.mxu1 %v12254_v56  ;;  %v7631_v50 = vld [vmem:[#allocation21 + $0x2f8] sm:$0xff]  ;;  %v7624_v56 = vld [vmem:[#allocation21 + $0x2c0] sm:$0xff] }
 0xf6c   : > { %v12274_v48 = vpack.c.bf16 %v7631_v50, %v7627_v46  ;;  %v12148_v3 = vpack.c.bf16 %v7628_v57, %v7624_v56  ;;  %v7662_v46 = vld [vmem:[#allocation21 + $0x3f0] sm:$0xff]  ;;  %v7665_v50 = vld [vmem:[#allocation21 + $0x408] sm:$0xff] }
 0xf6d   : > { %12129 = vmatpush1.bf16.msra.mxu0 %v12128_v29  ;;  %v7637_v29 = vld [vmem:[#allocation21 + $0x328] sm:$0xff]  ;;  %v12292_v57 = vpack.c.bf16 %v7662_v46, %v7658_v44  ;;  %v7700_v44 = vld [vmem:[#allocation21 + $0x520] sm:$0xff] }
 0xf6e   : > { %12257 = vmatpush1.bf16.msra.mxu1 %v12256_v62  ;;  %12131 = vmatprep.subr.bf16.mxu0 %v12130_v51  ;;  %v7635_v62 = vld [vmem:[#allocation21 + $0x318] sm:$0xff]  ;;  %v12150_v52 = vpack.c.bf16 %v7637_v29, %v7633_v59  ;;  %v7666_v29 = vld [vmem:[#allocation21 + $0x410] sm:$0xff] }
 0xf6f   : > { %12259 = vmatprep.subr.bf16.mxu1 %v12258_v15  ;;  %v7639_v51 = vld [vmem:[#allocation21 + $0x338] sm:$0xff]  ;;  %v7632_v15 = vld [vmem:[#allocation21 + $0x300] sm:$0xff] }
 0xf70   : > { %v12278_v25 = vpack.c.bf16 %v7639_v51, %v7635_v62  ;;  %v12152_v61 = vpack.c.bf16 %v7636_v7, %v7632_v15  ;;  %v7670_v62 = vld [vmem:[#allocation21 + $0x430] sm:$0xff]  ;;  %v7673_v51 = vld [vmem:[#allocation21 + $0x448] sm:$0xff]  ;;  %v7679_v15 = vld [vmem:[#allocation21 + $0x478] sm:$0xff] }
 0xf71   : > { %12133 = vmatpush1.bf16.msra.mxu0 %v12132_v5  ;;  %v7645_v5 = vld [vmem:[#allocation21 + $0x368] sm:$0xff]  ;;  %v12296_v7 = vpack.c.bf16 %v7670_v62, %v7666_v29  ;;  %v7706_v29 = vld [vmem:[#allocation21 + $0x550] sm:$0xff] }
 0xf72   : > { %12261 = vmatpush1.bf16.msra.mxu1 %v12260_v60  ;;  %12135 = vmatprep.subr.bf16.mxu0 %v12134_v11  ;;  %v7643_v60 = vld [vmem:[#allocation21 + $0x358] sm:$0xff]  ;;  %v12154_v12 = vpack.c.bf16 %v7645_v5, %v7641_v10  ;;  %v7678_v5 = vld [vmem:[#allocation21 + $0x470] sm:$0xff] }
 0xf73   : > { %12263 = vmatprep.subr.bf16.mxu1 %v12262_v13  ;;  %v7647_v11 = vld [vmem:[#allocation21 + $0x378] sm:$0xff]  ;;  %v7640_v13 = vld [vmem:[#allocation21 + $0x340] sm:$0xff] }
 0xf74   : > { %v12282_v38 = vpack.c.bf16 %v7647_v11, %v7643_v60  ;;  %v12156_v18 = vpack.c.bf16 %v7644_v14, %v7640_v13  ;;  %v7681_v60 = vld [vmem:[#allocation21 + $0x488] sm:$0xff]  ;;  %v12300_v14 = vpack.c.bf16 %v7678_v5, %v7674_v9  ;;  %v7712_v9 = vld [vmem:[#allocation21 + $0x580] sm:$0xff]  ;;  %v7714_v5 = vld [vmem:[#allocation21 + $0x590] sm:$0xff] }
 0xf75   : > { %12137 = vmatpush1.bf16.msra.mxu0 %v12136_v41  ;;  %v7653_v41 = vld [vmem:[#allocation21 + $0x3a8] sm:$0xff] }
 0xf76   : > { %12265 = vmatpush1.bf16.msra.mxu1 %v12264_v16  ;;  %12139 = vmatprep.subr.bf16.mxu0 %v12138_v17  ;;  %v7651_v16 = vld [vmem:[#allocation21 + $0x398] sm:$0xff]  ;;  %v12158_v47 = vpack.c.bf16 %v7653_v41, %v7649_v2  ;;  %v7685_v11 = vld [vmem:[#allocation21 + $0x4a8] sm:$0xff]  ;;  %v7682_v2 = vld [vmem:[#allocation21 + $0x490] sm:$0xff] }
 0xf77   : > { %12267 = vmatprep.subr.bf16.mxu1 %v12266_v20  ;;  %v7655_v17 = vld [vmem:[#allocation21 + $0x3b8] sm:$0xff]  ;;  %v7648_v20 = vld [vmem:[#allocation21 + $0x380] sm:$0xff]  ;;  %v12174_v0 = vpack.c.bf16 %v7685_v11, %v7681_v60  ;;  %v7718_v11 = vld [vmem:[#allocation21 + $0x5b0] sm:$0xff] }
 0xf78   : > { %v12286_v27 = vpack.c.bf16 %v7655_v17, %v7651_v16  ;;  %v12160_v34 = vpack.c.bf16 %v7652_v23, %v7648_v20  ;;  %v7686_v16 = vld [vmem:[#allocation21 + $0x4b0] sm:$0xff]  ;;  %v7689_v17 = vld [vmem:[#allocation21 + $0x4c8] sm:$0xff] }
 0xf79   : > { %12141 = vmatpush1.bf16.msra.mxu0 %v12140_v30  ;;  %v7661_v30 = vld [vmem:[#allocation21 + $0x3e8] sm:$0xff]  ;;  %v12304_v20 = vpack.c.bf16 %v7686_v16, %v7682_v2  ;;  %v7724_v2 = vld [vmem:[#allocation21 + $0x5e0] sm:$0xff] }
 0xf7a   : > { %12269 = vmatpush1.bf16.msra.mxu1 %v12268_v31  ;;  %12143 = vmatprep.subr.bf16.mxu0 %v12142_v33  ;;  %v7659_v31 = vld [vmem:[#allocation21 + $0x3d8] sm:$0xff]  ;;  %v12162_v22 = vpack.c.bf16 %v7661_v30, %v7657_v4  ;;  %v7697_v30 = vld [vmem:[#allocation21 + $0x508] sm:$0xff] }
 0xf7b   : > { %12271 = vmatprep.subr.bf16.mxu1 %v12270_v35  ;;  %v7663_v33 = vld [vmem:[#allocation21 + $0x3f8] sm:$0xff]  ;;  %v7656_v35 = vld [vmem:[#allocation21 + $0x3c0] sm:$0xff] }
 0xf7c   : > { %v12290_v45 = vpack.c.bf16 %v7663_v33, %v7659_v31  ;;  %v12164_v56 = vpack.c.bf16 %v7660_v37, %v7656_v35  ;;  %v7701_v31 = vld [vmem:[#allocation21 + $0x528] sm:$0xff]  ;;  %v7699_v33 = vld [vmem:[#allocation21 + $0x518] sm:$0xff]  ;;  %v7696_v37 = vld [vmem:[#allocation21 + $0x500] sm:$0xff] }
 0xf7d   : > { %12145 = vmatpush1.bf16.msra.mxu0 %v12144_v32  ;;  %v7669_v32 = vld [vmem:[#allocation21 + $0x428] sm:$0xff]  ;;  %v12182_v35 = vpack.c.bf16 %v7701_v31, %v7697_v30  ;;  %v7734_v30 = vld [vmem:[#allocation21 + $0x630] sm:$0xff] }
 0xf7e   : > { %12273 = vmatpush1.bf16.msra.mxu1 %v12272_v36  ;;  %12147 = vmatprep.subr.bf16.mxu0 %v12146_v54  ;;  %v7667_v36 = vld [vmem:[#allocation21 + $0x418] sm:$0xff]  ;;  %v12166_v58 = vpack.c.bf16 %v7669_v32, %v7665_v50  ;;  %v7702_v50 = vld [vmem:[#allocation21 + $0x530] sm:$0xff]  ;;  %v7705_v32 = vld [vmem:[#allocation21 + $0x548] sm:$0xff] }
 0xf7f   : > { %12275 = vmatprep.subr.bf16.mxu1 %v12274_v48  ;;  %v7671_v54 = vld [vmem:[#allocation21 + $0x438] sm:$0xff]  ;;  %v7664_v48 = vld [vmem:[#allocation21 + $0x400] sm:$0xff]  ;;  %v7737_v31 = vld [vmem:[#allocation21 + $0x648] sm:$0xff] }
 0xf80   : > { %v12294_v59 = vpack.c.bf16 %v7671_v54, %v7667_v36  ;;  %v7709_v36 = vld [vmem:[#allocation21 + $0x568] sm:$0xff]  ;;  %v7707_v54 = vld [vmem:[#allocation21 + $0x558] sm:$0xff] }
 0xf81   : > { %12149 = vmatpush1.bf16.msra.mxu0 %v12148_v3  ;;  %v7677_v3 = vld [vmem:[#allocation21 + $0x468] sm:$0xff] }
 0xf82   : > { %12277 = vmatpush1.bf16.msra.mxu1 %v12276_v24  ;;  %12151 = vmatprep.subr.bf16.mxu0 %v12150_v52  ;;  %v12168_v24 = vpack.c.bf16 %v7668_v49, %v7664_v48  ;;  %v7675_v52 = vld [vmem:[#allocation21 + $0x458] sm:$0xff]  ;;  %v12170_v10 = vpack.c.bf16 %v7677_v3, %v7673_v51  ;;  %v12186_v48 = vpack.c.bf16 %v7709_v36, %v7705_v32  ;;  %v7704_v49 = vld [vmem:[#allocation21 + $0x540] sm:$0xff]  ;;  %v7710_v51 = vld [vmem:[#allocation21 + $0x570] sm:$0xff] }
 0xf83   : > { %12279 = vmatprep.subr.bf16.mxu1 %v12278_v25  ;;  %v7676_v25 = vld [vmem:[#allocation21 + $0x460] sm:$0xff]  ;;  %v7713_v3 = vld [vmem:[#allocation21 + $0x588] sm:$0xff]  ;;  %v7742_v32 = vld [vmem:[#allocation21 + $0x670] sm:$0xff] }
 0xf84   : > { %v12172_v13 = vpack.c.bf16 %v7676_v25, %v7672_v53  ;;  %v12316_v53 = vpack.c.bf16 %v7710_v51, %v7706_v29  ;;  %v7745_v36 = vld [vmem:[#allocation21 + $0x688] sm:$0xff]  ;;  %v7748_v29 = vld [vmem:[#allocation21 + $0x6a0] sm:$0xff] }
 0xf85   : > { %12153 = vmatpush1.bf16.msra.mxu0 %v12152_v61  ;;  %v12298_v61 = vpack.c.bf16 %v7679_v15, %v7675_v52  ;;  %v7715_v52 = vld [vmem:[#allocation21 + $0x598] sm:$0xff] }
 0xf86   : > { %12281 = vmatpush1.bf16.msra.mxu1 %v12280_v6  ;;  %12155 = vmatprep.subr.bf16.mxu0 %v12154_v12  ;;  %v7683_v6 = vld [vmem:[#allocation21 + $0x498] sm:$0xff] }
 0xf87   : > { %12283 = vmatprep.subr.bf16.mxu1 %v12282_v38  ;;  %v7687_v12 = vld [vmem:[#allocation21 + $0x4b8] sm:$0xff]  ;;  %v7680_v38 = vld [vmem:[#allocation21 + $0x480] sm:$0xff] }
 0xf88   : > { %v12302_v41 = vpack.c.bf16 %v7687_v12, %v7683_v6  ;;  %v7719_v15 = vld [vmem:[#allocation21 + $0x5b8] sm:$0xff]  ;;  %v7725_v6 = vld [vmem:[#allocation21 + $0x5e8] sm:$0xff] }
 0xf89   : > { %12157 = vmatpush1.bf16.msra.mxu0 %v12156_v18  ;;  %v7693_v18 = vld [vmem:[#allocation21 + $0x4e8] sm:$0xff]  ;;  %v12318_v60 = vpack.c.bf16 %v7719_v15, %v7715_v52  ;;  %v7723_v12 = vld [vmem:[#allocation21 + $0x5d8] sm:$0xff] }
 0xf8a   : > { %12285 = vmatpush1.bf16.msra.mxu1 %v12284_v19  ;;  %12159 = vmatprep.subr.bf16.mxu0 %v12158_v47  ;;  %v7691_v19 = vld [vmem:[#allocation21 + $0x4d8] sm:$0xff]  ;;  %v12176_v47 = vpack.c.bf16 %v7684_v63, %v7680_v38  ;;  %v12178_v23 = vpack.c.bf16 %v7693_v18, %v7689_v17  ;;  %v7720_v63 = vld [vmem:[#allocation21 + $0x5c0] sm:$0xff]  ;;  %v7726_v17 = vld [vmem:[#allocation21 + $0x5f0] sm:$0xff] }
 0xf8b   : > { %12287 = vmatprep.subr.bf16.mxu1 %v12286_v27  ;;  %v7692_v27 = vld [vmem:[#allocation21 + $0x4e0] sm:$0xff]  ;;  %v7729_v18 = vld [vmem:[#allocation21 + $0x608] sm:$0xff]  ;;  %v7755_v15 = vld [vmem:[#allocation21 + $0x6d8] sm:$0xff] }
 0xf8c   : > { %v7757_v52 = vld [vmem:[#allocation21 + $0x6e8] sm:$0xff] }
 0xf8d   : > { %12161 = vmatpush1.bf16.msra.mxu0 %v12160_v34  ;;  %v7703_v34 = vld [vmem:[#allocation21 + $0x538] sm:$0xff] }
 0xf8e   : > { %12289 = vmatpush1.bf16.msra.mxu1 %v12288_v21  ;;  %12163 = vmatprep.subr.bf16.mxu0 %v12162_v22  ;;  %v12180_v21 = vpack.c.bf16 %v7692_v27, %v7688_v26  ;;  %v12310_v46 = vpack.c.bf16 %v7703_v34, %v7699_v33  ;;  %v7728_v27 = vld [vmem:[#allocation21 + $0x600] sm:$0xff]  ;;  %v7741_v33 = vld [vmem:[#allocation21 + $0x668] sm:$0xff]  ;;  %v7739_v34 = vld [vmem:[#allocation21 + $0x658] sm:$0xff] }
 0xf8f   : > { %12291 = vmatprep.subr.bf16.mxu1 %v12290_v45  ;;  %v7698_v45 = vld [vmem:[#allocation21 + $0x510] sm:$0xff] }
 0xf91   : > { %12165 = vmatpush1.bf16.msra.mxu0 %v12164_v56  ;;  %v7711_v56 = vld [vmem:[#allocation21 + $0x578] sm:$0xff] }
 0xf92   : > { %12293 = vmatpush1.bf16.msra.mxu1 %v12292_v57  ;;  %12167 = vmatprep.subr.bf16.mxu0 %v12166_v58  ;;  %v12184_v57 = vpack.c.bf16 %v7700_v44, %v7696_v37  ;;  %v12312_v58 = vpack.c.bf16 %v7702_v50, %v7698_v45  ;;  %v12314_v62 = vpack.c.bf16 %v7711_v56, %v7707_v54  ;;  %v7736_v44 = vld [vmem:[#allocation21 + $0x640] sm:$0xff]  ;;  %v7749_v54 = vld [vmem:[#allocation21 + $0x6a8] sm:$0xff]  ;;  %v7747_v56 = vld [vmem:[#allocation21 + $0x698] sm:$0xff] }
 0xf93   : > { %12295 = vmatprep.subr.bf16.mxu1 %v12294_v59  ;;  %v7708_v59 = vld [vmem:[#allocation21 + $0x560] sm:$0xff]  ;;  %v12202_v37 = vpack.c.bf16 %v7741_v33, %v7737_v31  ;;  %v7774_v31 = vld [vmem:[#allocation21 + $0x770] sm:$0xff]  ;;  %v7777_v33 = vld [vmem:[#allocation21 + $0x788] sm:$0xff] }
 0xf94   : > { %8545 = vmatmul.mubr.f32.vlgmr.msra.gmra.mrb[30].mxu0 %v13868_v55  ;;  %v7740_v45 = vld [vmem:[#allocation21 + $0x660] sm:$0xff] }
 0xf95   : > { %8687 = vmatmul.mubr.f32.vlgmr.msra.gmra.mrb[30].mxu1 %v13868_v55  ;;  %12169 = vmatpush1.bf16.msra.mxu0 %v12168_v24  ;;  %v7695_v55 = vld [vmem:[#allocation21 + $0x4f8] sm:$0xff]  ;;  %v7717_v24 = vld [vmem:[#allocation21 + $0x5a8] sm:$0xff] }
 0xf96   : > { %8615 = vmatprep.mubr.f32.mxu0 %v13874_v1  ;;  %12297 = vmatpush1.bf16.msra.mxu1 %v12296_v7  ;;  %v12306_v4 = vpack.c.bf16 %v7695_v55, %v7691_v19  ;;  %v12188_v7 = vpack.c.bf16 %v7708_v59, %v7704_v49  ;;  %v12190_v25 = vpack.c.bf16 %v7717_v24, %v7713_v3  ;;  %v7733_v19 = vld [vmem:[#allocation21 + $0x628] sm:$0xff]  ;;  %v7731_v55 = vld [vmem:[#allocation21 + $0x618] sm:$0xff]  ;;  %v7744_v59 = vld [vmem:[#allocation21 + $0x680] sm:$0xff] }
 0xf97   : > { %8757 = vmatprep.mubr.f32.mxu1 %v13874_v1  ;;  %12171 = vmatprep.subr.bf16.mxu0 %v12170_v10  ;;  %v7694_v1 = vld [vmem:[#allocation21 + $0x4f0] sm:$0xff]  ;;  %v7716_v10 = vld [vmem:[#allocation21 + $0x5a0] sm:$0xff]  ;;  %v12198_v26 = vpack.c.bf16 %v7733_v19, %v7729_v18  ;;  %v12206_v49 = vpack.c.bf16 %v7749_v54, %v7745_v36  ;;  %v7753_v24 = vld [vmem:[#allocation21 + $0x6c8] sm:$0xff] }
 0xf98   : > { %12299 = vmatprep.subr.bf16.mxu1 %v12298_v61  ;;  %v12308_v22 = vpack.c.bf16 %v7694_v1, %v7690_v28  ;;  %v7721_v61 = vld [vmem:[#allocation21 + $0x5c8] sm:$0xff]  ;;  %v7732_v28 = vld [vmem:[#allocation21 + $0x620] sm:$0xff]  ;;  %v7750_v3 = vld [vmem:[#allocation21 + $0x6b0] sm:$0xff] }
 0xf99   : > { %12173 = vmatpush1.bf16.msra.mxu0 %v12172_v13  ;;  %v7727_v13 = vld [vmem:[#allocation21 + $0x5f8] sm:$0xff]  ;;  %v12194_v38 = vpack.c.bf16 %v7725_v6, %v7721_v61  ;;  %v7758_v61 = vld [vmem:[#allocation21 + $0x6f0] sm:$0xff]  ;;  %v7761_v6 = vld [vmem:[#allocation21 + $0x708] sm:$0xff] }
 0xf9a   : > { %12301 = vmatpush1.bf16.msra.mxu1 %v12300_v14  ;;  %12175 = vmatprep.subr.bf16.mxu0 %v12174_v0  ;;  %v12192_v14 = vpack.c.bf16 %v7716_v10, %v7712_v9  ;;  %v12320_v0 = vpack.c.bf16 %v7718_v11, %v7714_v5  ;;  %v12322_v16 = vpack.c.bf16 %v7727_v13, %v7723_v12  ;;  %v7752_v10 = vld [vmem:[#allocation21 + $0x6c0] sm:$0xff]  ;;  %v7765_v12 = vld [vmem:[#allocation21 + $0x728] sm:$0xff]  ;;  %v7763_v13 = vld [vmem:[#allocation21 + $0x718] sm:$0xff] }
 0xf9b   : > { %12303 = vmatprep.subr.bf16.mxu1 %v12302_v41  ;;  %v7722_v41 = vld [vmem:[#allocation21 + $0x5d0] sm:$0xff]  ;;  %v12210_v9 = vpack.c.bf16 %v7757_v52, %v7753_v24  ;;  %v7756_v5 = vld [vmem:[#allocation21 + $0x6e0] sm:$0xff]  ;;  %v7769_v19 = vld [vmem:[#allocation21 + $0x748] sm:$0xff] }
 0xf9c   : > { %v7766_v18 = vld [vmem:[#allocation21 + $0x730] sm:$0xff]  ;;  %v7785_v54 = vld [vmem:[#allocation21 + $0x7c8] sm:$0xff]  ;;  %v8814_v52 = vld [vmem:[%s14349_s14 + $0x80] sm:$0xff] }
 0xf9d   : > { %12177 = vmatpush1.bf16.msra.mxu0 %v12176_v47  ;;  %v7735_v47 = vld [vmem:[#allocation21 + $0x638] sm:$0xff]  ;;  %v7782_v36 = vld [vmem:[#allocation21 + $0x7b0] sm:$0xff] }
 0xf9e   : > { %12305 = vmatpush1.bf16.msra.mxu1 %v12304_v20  ;;  %12179 = vmatprep.subr.bf16.mxu0 %v12178_v23  ;;  %v12196_v20 = vpack.c.bf16 %v7724_v2, %v7720_v63  ;;  %v12324_v23 = vpack.c.bf16 %v7726_v17, %v7722_v41  ;;  %v12326_v1 = vpack.c.bf16 %v7735_v47, %v7731_v55  ;;  %v7760_v2 = vld [vmem:[#allocation21 + $0x700] sm:$0xff]  ;;  %v7773_v55 = vld [vmem:[#allocation21 + $0x768] sm:$0xff]  ;;  %v7771_v47 = vld [vmem:[#allocation21 + $0x758] sm:$0xff] }
 0xf9f   : > { %12307 = vmatprep.subr.bf16.mxu1 %v12306_v4  ;;  %v7730_v4 = vld [vmem:[#allocation21 + $0x610] sm:$0xff]  ;;  %v12214_v63 = vpack.c.bf16 %v7765_v12, %v7761_v6  ;;  %v7764_v41 = vld [vmem:[#allocation21 + $0x720] sm:$0xff] }
 0xfa0   : > { %v7790_v24 = vld [vmem:[#allocation21 + $0x7f0] sm:$0xff]  ;;  %v8831_v6 = vld [vmem:[%s14349_s14 + $0x108] sm:$0xff] }
 0xfa1   : > { %12181 = vmatpush1.bf16.msra.mxu0 %v12180_v21  ;;  %v7743_v21 = vld [vmem:[#allocation21 + $0x678] sm:$0xff]  ;;  %v8816_v12 = vld [vmem:[%s14349_s14 + $0x90] sm:$0xff] }
 0xfa2   : > { %12309 = vmatpush1.bf16.msra.mxu1 %v12308_v22  ;;  %12183 = vmatprep.subr.bf16.mxu0 %v12182_v35  ;;  %v12200_v22 = vpack.c.bf16 %v7732_v28, %v7728_v27  ;;  %v12328_v35 = vpack.c.bf16 %v7734_v30, %v7730_v4  ;;  %v12330_v50 = vpack.c.bf16 %v7743_v21, %v7739_v34  ;;  %v7768_v28 = vld [vmem:[#allocation21 + $0x740] sm:$0xff]  ;;  %v7781_v34 = vld [vmem:[#allocation21 + $0x7a8] sm:$0xff]  ;;  %v7779_v21 = vld [vmem:[#allocation21 + $0x798] sm:$0xff] }
 0xfa3   : > { %12311 = vmatprep.subr.bf16.mxu1 %v12310_v46  ;;  %v7738_v46 = vld [vmem:[#allocation21 + $0x650] sm:$0xff]  ;;  %v12218_v27 = vpack.c.bf16 %v7773_v55, %v7769_v19  ;;  %v7772_v4 = vld [vmem:[#allocation21 + $0x760] sm:$0xff] }
 0xfa4   : > { %v8833_v19 = vld [vmem:[%s14349_s14 + $0x118] sm:$0xff]  ;;  %v8818_v55 = vld [vmem:[%s14349_s14 + $0xa0] sm:$0xff] }
 0xfa5   : > { %12185 = vmatpush1.bf16.msra.mxu0 %v12184_v57  ;;  %v7751_v57 = vld [vmem:[#allocation21 + $0x6b8] sm:$0xff] }
 0xfa6   : > { %12313 = vmatpush1.bf16.msra.mxu1 %v12312_v58  ;;  %12187 = vmatprep.subr.bf16.mxu0 %v12186_v48  ;;  %v12204_v58 = vpack.c.bf16 %v7740_v45, %v7736_v44  ;;  %v12332_v48 = vpack.c.bf16 %v7742_v32, %v7738_v46  ;;  %v12334_v51 = vpack.c.bf16 %v7751_v57, %v7747_v56  ;;  %v7776_v45 = vld [vmem:[#allocation21 + $0x780] sm:$0xff]  ;;  %v7789_v56 = vld [vmem:[#allocation21 + $0x7e8] sm:$0xff]  ;;  %v7787_v57 = vld [vmem:[#allocation21 + $0x7d8] sm:$0xff] }
 0xfa7   : > { %12315 = vmatprep.subr.bf16.mxu1 %v12314_v62  ;;  %v7746_v62 = vld [vmem:[#allocation21 + $0x690] sm:$0xff]  ;;  %v12222_v44 = vpack.c.bf16 %v7781_v34, %v7777_v33  ;;  %v7780_v46 = vld [vmem:[#allocation21 + $0x7a0] sm:$0xff] }
 0xfa8   : > { %v8820_v33 = vld [vmem:[%s14349_s14 + $0xb0] sm:$0xff]  ;;  %v8821_v34 = vld [vmem:[%s14349_s14 + $0xb8] sm:$0xff] }
 0xfa9   : > { %12189 = vmatpush1.bf16.msra.mxu0 %v12188_v7  ;;  %v7759_v7 = vld [vmem:[#allocation21 + $0x6f8] sm:$0xff] }
 0xfaa   : > { %12317 = vmatpush1.bf16.msra.mxu1 %v12316_v53  ;;  %12191 = vmatprep.subr.bf16.mxu0 %v12190_v25  ;;  %v12208_v53 = vpack.c.bf16 %v7748_v29, %v7744_v59  ;;  %v12336_v25 = vpack.c.bf16 %v7750_v3, %v7746_v62  ;;  %v12338_v11 = vpack.c.bf16 %v7759_v7, %v7755_v15  ;;  %v7784_v29 = vld [vmem:[#allocation21 + $0x7c0] sm:$0xff] }
 0xfab   : > { %12319 = vmatprep.subr.bf16.mxu1 %v12318_v60  ;;  %v7754_v60 = vld [vmem:[#allocation21 + $0x6d0] sm:$0xff]  ;;  %v12226_v59 = vpack.c.bf16 %v7789_v56, %v7785_v54  ;;  %v7788_v62 = vld [vmem:[#allocation21 + $0x7e0] sm:$0xff] }
 0xfac   : > { %v8815_v15 = vld [vmem:[%s14349_s14 + $0x88] sm:$0xff]  ;;  %v8846_v7 = vld [vmem:[%s14349_s14 + $0x180] sm:$0xff] }
 0xfad   : > { %12193 = vmatpush1.bf16.msra.mxu0 %v12192_v14  ;;  %v7767_v14 = vld [vmem:[#allocation21 + $0x738] sm:$0xff]  ;;  %v8823_v56 = vld [vmem:[%s14349_s14 + $0xc8] sm:$0xff] }
 0xfae   : > { %12321 = vmatpush1.bf16.msra.mxu1 %v12320_v0  ;;  %12195 = vmatprep.subr.bf16.mxu0 %v12194_v38  ;;  %v12212_v0 = vpack.c.bf16 %v7756_v5, %v7752_v10  ;;  %v12340_v38 = vpack.c.bf16 %v7758_v61, %v7754_v60  ;;  %v12342_v17 = vpack.c.bf16 %v7767_v14, %v7763_v13  ;;  %v8798_v5 = vld [vmem:[%s14349_s14] sm:$0xff]  ;;  %v8799_v60 = vld [vmem:[%s14349_s14 + $0x8] sm:$0xff]  ;;  %v8817_v13 = vld [vmem:[%s14349_s14 + $0x98] sm:$0xff] }
 0xfaf   : > { %12323 = vmatprep.subr.bf16.mxu1 %v12322_v16  ;;  %v7762_v16 = vld [vmem:[#allocation21 + $0x710] sm:$0xff]  ;;  %v12358_v10 = vpack.c.bf16 %v8815_v15, %v8814_v52  ;;  %v8822_v54 = vld [vmem:[%s14349_s14 + $0xc0] sm:$0xff] }
 0xfb0   : > { %v8848_v14 = vld [vmem:[%s14349_s14 + $0x190] sm:$0xff]  ;;  %v8825_v15 = vld [vmem:[%s14349_s14 + $0xd8] sm:$0xff] }
 0xfb1   : > { %12197 = vmatpush1.bf16.msra.mxu0 %v12196_v20  ;;  %v7775_v20 = vld [vmem:[#allocation21 + $0x778] sm:$0xff]  ;;  %v8824_v52 = vld [vmem:[%s14349_s14 + $0xd0] sm:$0xff] }
 0xfb2   : > { %12325 = vmatpush1.bf16.msra.mxu1 %v12324_v23  ;;  %12199 = vmatprep.subr.bf16.mxu0 %v12198_v26  ;;  %v12216_v23 = vpack.c.bf16 %v7764_v41, %v7760_v2  ;;  %v12344_v26 = vpack.c.bf16 %v7766_v18, %v7762_v16  ;;  %v12346_v30 = vpack.c.bf16 %v7775_v20, %v7771_v47  ;;  %v8800_v41 = vld [vmem:[%s14349_s14 + $0x10] sm:$0xff]  ;;  %v8801_v16 = vld [vmem:[%s14349_s14 + $0x18] sm:$0xff]  ;;  %v8819_v47 = vld [vmem:[%s14349_s14 + $0xa8] sm:$0xff] }
 0xfb3   : > { %12327 = vmatprep.subr.bf16.mxu1 %v12326_v1  ;;  %v7770_v1 = vld [vmem:[#allocation21 + $0x750] sm:$0xff]  ;;  %v12362_v2 = vpack.c.bf16 %v8817_v13, %v8816_v12  ;;  %v8850_v20 = vld [vmem:[%s14349_s14 + $0x1a0] sm:$0xff] }
 0xfb5   : > { %12201 = vmatpush1.bf16.msra.mxu0 %v12200_v22  ;;  %v7783_v22 = vld [vmem:[#allocation21 + $0x7b8] sm:$0xff] }
 0xfb6   : > { %12329 = vmatpush1.bf16.msra.mxu1 %v12328_v35  ;;  %12203 = vmatprep.subr.bf16.mxu0 %v12202_v37  ;;  %v12220_v35 = vpack.c.bf16 %v7772_v4, %v7768_v28  ;;  %v12348_v37 = vpack.c.bf16 %v7774_v31, %v7770_v1  ;;  %v12350_v32 = vpack.c.bf16 %v7783_v22, %v7779_v21  ;;  %v8802_v4 = vld [vmem:[%s14349_s14 + $0x20] sm:$0xff]  ;;  %v8803_v1 = vld [vmem:[%s14349_s14 + $0x28] sm:$0xff]  ;;  %v8852_v21 = vld [vmem:[%s14349_s14 + $0x1b0] sm:$0xff] }
 0xfb7   : > { %12331 = vmatprep.subr.bf16.mxu1 %v12330_v50  ;;  %v7778_v50 = vld [vmem:[#allocation21 + $0x790] sm:$0xff]  ;;  %v12366_v28 = vpack.c.bf16 %v8819_v47, %v8818_v55  ;;  %v8835_v31 = vld [vmem:[%s14349_s14 + $0x128] sm:$0xff] }
 0xfb8   : > { %v8853_v22 = vld [vmem:[%s14349_s14 + $0x1b8] sm:$0xff] }
 0xfb9   : > { %12205 = vmatpush1.bf16.msra.mxu0 %v12204_v58  ;;  %v7791_v58 = vld [vmem:[#allocation21 + $0x7f8] sm:$0xff] }
 0xfba   : > { %12333 = vmatpush1.bf16.msra.mxu1 %v12332_v48  ;;  %12207 = vmatprep.subr.bf16.mxu0 %v12206_v49  ;;  %v12224_v48 = vpack.c.bf16 %v7780_v46, %v7776_v45  ;;  %v12352_v49 = vpack.c.bf16 %v7782_v36, %v7778_v50  ;;  %v12354_v3 = vpack.c.bf16 %v7791_v58, %v7787_v57  ;;  %v8804_v45 = vld [vmem:[%s14349_s14 + $0x30] sm:$0xff]  ;;  %v8805_v46 = vld [vmem:[%s14349_s14 + $0x38] sm:$0xff]  ;;  %v8854_v57 = vld [vmem:[%s14349_s14 + $0x1c0] sm:$0xff] }
 0xfbb   : > { %12335 = vmatprep.subr.bf16.mxu1 %v12334_v51  ;;  %v7786_v51 = vld [vmem:[#allocation21 + $0x7d0] sm:$0xff]  ;;  %v8855_v58 = vld [vmem:[%s14349_s14 + $0x1c8] sm:$0xff] }
 0xfbc   : > { %v8836_v50 = vld [vmem:[%s14349_s14 + $0x130] sm:$0xff]  ;;  %v8837_v36 = vld [vmem:[%s14349_s14 + $0x138] sm:$0xff] }
 0xfbd   : > { %12209 = vmatpush1.bf16.msra.mxu0 %v12208_v53  ;;  %v8847_v53 = vld [vmem:[%s14349_s14 + $0x188] sm:$0xff] }
 0xfbe   : > { %12337 = vmatpush1.bf16.msra.mxu1 %v12336_v25  ;;  %12211 = vmatprep.subr.bf16.mxu0 %v12210_v9  ;;  %v12228_v25 = vpack.c.bf16 %v7788_v62, %v7784_v29  ;;  %v12356_v9 = vpack.c.bf16 %v7790_v24, %v7786_v51  ;;  %v12390_v61 = vpack.c.bf16 %v8847_v53, %v8846_v7  ;;  %v8806_v29 = vld [vmem:[%s14349_s14 + $0x40] sm:$0xff]  ;;  %v8807_v62 = vld [vmem:[%s14349_s14 + $0x48] sm:$0xff]  ;;  %v8856_v7 = vld [vmem:[%s14349_s14 + $0x1d0] sm:$0xff] }
 0xfbf   : > { %12339 = vmatprep.subr.bf16.mxu1 %v12338_v11  ;;  %v8830_v11 = vld [vmem:[%s14349_s14 + $0x100] sm:$0xff]  ;;  %v8839_v24 = vld [vmem:[%s14349_s14 + $0x148] sm:$0xff]  ;;  %v8857_v53 = vld [vmem:[%s14349_s14 + $0x1d8] sm:$0xff] }
 0xfc0   : > { %v8838_v51 = vld [vmem:[%s14349_s14 + $0x140] sm:$0xff] }
 0xfc1   : > { %12213 = vmatpush1.bf16.msra.mxu0 %v12212_v0  ;;  %v8849_v0 = vld [vmem:[%s14349_s14 + $0x198] sm:$0xff] }
 0xfc2   : > { %12341 = vmatpush1.bf16.msra.mxu1 %v12340_v38  ;;  %12215 = vmatprep.subr.bf16.mxu0 %v12214_v63  ;;  %v12360_v38 = vpack.c.bf16 %v8799_v60, %v8798_v5  ;;  %v12392_v63 = vpack.c.bf16 %v8831_v6, %v8830_v11  ;;  %v12394_v18 = vpack.c.bf16 %v8849_v0, %v8848_v14  ;;  %v8808_v5 = vld [vmem:[%s14349_s14 + $0x50] sm:$0xff]  ;;  %v8809_v60 = vld [vmem:[%s14349_s14 + $0x58] sm:$0xff]  ;;  %v8826_v14 = vld [vmem:[%s14349_s14 + $0xe0] sm:$0xff] }
 0xfc3   : > { %12343 = vmatprep.subr.bf16.mxu1 %v12342_v17  ;;  %v8832_v17 = vld [vmem:[%s14349_s14 + $0x110] sm:$0xff]  ;;  %v12410_v11 = vpack.c.bf16 %v8857_v53, %v8856_v7  ;;  %v8841_v6 = vld [vmem:[%s14349_s14 + $0x158] sm:$0xff]  ;;  %v12380_v12 = vpack.c.bf16 %v8809_v60, %v8808_v5  ;;  %v8827_v0 = vld [vmem:[%s14349_s14 + $0xe8] sm:$0xff] }
 0xfc4   : > { %v9023_v7 = vld [vmem:[%s14350_s16 + $0x98] sm:$0xff] }
 0xfc5   : > { %12217 = vmatpush1.bf16.msra.mxu0 %v12216_v23  ;;  %v8851_v23 = vld [vmem:[%s14349_s14 + $0x1a8] sm:$0xff] }
 0xfc6   : > { %12345 = vmatpush1.bf16.msra.mxu1 %v12344_v26  ;;  %12219 = vmatprep.subr.bf16.mxu0 %v12218_v27  ;;  %v12364_v26 = vpack.c.bf16 %v8801_v16, %v8800_v41  ;;  %v12396_v27 = vpack.c.bf16 %v8833_v19, %v8832_v17  ;;  %v8810_v41 = vld [vmem:[%s14349_s14 + $0x60] sm:$0xff]  ;;  %v8811_v17 = vld [vmem:[%s14349_s14 + $0x68] sm:$0xff] }
 0xfc7   : > { %12347 = vmatprep.subr.bf16.mxu1 %v12346_v30  ;;  %v8834_v30 = vld [vmem:[%s14349_s14 + $0x120] sm:$0xff]  ;;  %v8843_v19 = vld [vmem:[%s14349_s14 + $0x168] sm:$0xff]  ;;  %v12384_v55 = vpack.c.bf16 %v8811_v17, %v8810_v41 }
 0xfc8   : > { %v9056_v41 = vld [vmem:[%s14350_s16 + $0x1a0] sm:$0xff] }
 0xfc9   : > { %12221 = vmatpush1.bf16.msra.mxu0 %v12220_v35  ;;  %v12368_v35 = vpack.c.bf16 %v8803_v1, %v8802_v4  ;;  %v8812_v4 = vld [vmem:[%s14349_s14 + $0x70] sm:$0xff]  ;;  %v8813_v1 = vld [vmem:[%s14349_s14 + $0x78] sm:$0xff] }
 0xfca   : > { %12349 = vmatpush1.bf16.msra.mxu1 %v12348_v37  ;;  %12223 = vmatprep.subr.bf16.mxu0 %v12222_v44  ;;  %v12400_v37 = vpack.c.bf16 %v8835_v31, %v8834_v30  ;;  %v12370_v44 = vpack.c.bf16 %v8821_v34, %v8820_v33  ;;  %v8844_v31 = vld [vmem:[%s14349_s14 + $0x170] sm:$0xff]  ;;  %v8845_v33 = vld [vmem:[%s14349_s14 + $0x178] sm:$0xff] }
 0xfcb   : > { %12351 = vmatprep.subr.bf16.mxu1 %v12350_v32  ;;  %v12402_v32 = vpack.c.bf16 %v8853_v22, %v8852_v21  ;;  %v12420_v34 = vpack.c.bf16 %v8845_v33, %v8844_v31  ;;  %v9020_v21 = vld [vmem:[%s14350_s16 + $0x80] sm:$0xff]  ;;  %v9021_v22 = vld [vmem:[%s14350_s16 + $0x88] sm:$0xff]  ;;  %v9010_v33 = vld [vmem:[%s14350_s16 + $0x30] sm:$0xff] }
 0xfcd   : > { %12225 = vmatpush1.bf16.msra.mxu0 %v12224_v48  ;;  %v12372_v48 = vpack.c.bf16 %v8805_v46, %v8804_v45  ;;  %v8764_v46 = vld [vmem:[#allocation22] sm:$0xf] }
 0xfce   : > { %12353 = vmatpush1.bf16.msra.mxu1 %v12352_v49  ;;  %12227 = vmatprep.subr.bf16.mxu0 %v12226_v59  ;;  %v12404_v49 = vpack.c.bf16 %v8837_v36, %v8836_v50  ;;  %v12374_v59 = vpack.c.bf16 %v8823_v56, %v8822_v54  ;;  %v8769_v50 = vrot.slane %v8764_v46, %v13682_v39  ;;  %v9005_v39 = vld [vmem:[%s14350_s16 + $0x8] sm:$0xff] }
 0xfcf   : > { %12355 = vmatprep.subr.bf16.mxu1 %v12354_v3  ;;  %v12406_v3 = vpack.c.bf16 %v8855_v58, %v8854_v57  ;;  %v8773_v36 = vrot.slane %v8764_v46, %v13686_v42  ;;  %v8781_v54 = vrot.slane %v8764_v46, %v13688_v43  ;;  %v9036_v43 = vld [vmem:[%s14350_s16 + $0x100] sm:$0xff] }
 0xfd1   : > { %12229 = vmatpush1.bf16.msra.mxu0 %v12228_v25  ;;  %v12376_v25 = vpack.c.bf16 %v8807_v62, %v8806_v29 }
 0xfd2   : > { %12357 = vmatpush1.bf16.msra.mxu1 %v12356_v9  ;;  %12359 = vmatprep.subr.bf16.mxu0 %v12358_v10  ;;  %v12408_v9 = vpack.c.bf16 %v8839_v24, %v8838_v51  ;;  %v12378_v10 = vpack.c.bf16 %v8825_v15, %v8824_v52  ;;  %v9037_v24 = vld [vmem:[%s14350_s16 + $0x108] sm:$0xff]  ;;  %v9022_v15 = vld [vmem:[%s14350_s16 + $0x90] sm:$0xff] }
 0xfd3   : > { %12391 = vmatprep.subr.bf16.mxu1 %v12390_v61  ;;  %v8840_v61 = vld [vmem:[%s14349_s14 + $0x150] sm:$0xff] }
 0xfd4   : > { %8616 = vmatmul.mubr.f32.vlgmr.msra.gmra.mrb[30].mxu0 %v13872_v8  ;;  %v12412_v13 = vpack.c.bf16 %v8841_v6, %v8840_v61  ;;  %v9006_v61 = vld [vmem:[%s14350_s16 + $0x10] sm:$0xff]  ;;  %v9007_v6 = vld [vmem:[%s14350_s16 + $0x18] sm:$0xff] }
 0xfd5   : > { %8758 = vmatmul.mubr.f32.vlgmr.msra.gmra.mrb[30].mxu1 %v13872_v8  ;;  %12361 = vmatpush3.bf16.msra.mxu0 %v12360_v38  ;;  %v12398_v8 = vpack.c.bf16 %v8851_v23, %v8850_v20  ;;  %v8858_v38 = vld [vmem:[%s14349_s14 + $0x1e0] sm:$0xff]  ;;  %v8828_v20 = vld [vmem:[%s14349_s14 + $0xf0] sm:$0xff]  ;;  %v8829_v23 = vld [vmem:[%s14349_s14 + $0xf8] sm:$0xff]  ;;  %v12428_v17 = vpack.c.bf16 %v9007_v6, %v9006_v61 }
 0xfd6   : > { %12393 = vmatpush3.bf16.msra.mxu1 %v12392_v63  ;;  %12363 = vmatprep.subr.bf16.mxu0 %v12362_v2  ;;  %v12382_v63 = vpack.c.bf16 %v8827_v0, %v8826_v14  ;;  %v8859_v2 = vld [vmem:[%s14349_s14 + $0x1e8] sm:$0xff]  ;;  %v12426_v14 = vpack.c.bf16 %v9023_v7, %v9022_v15  ;;  %v9039_v0 = vld [vmem:[%s14350_s16 + $0x118] sm:$0xff]  ;;  %v9032_v15 = vld [vmem:[%s14350_s16 + $0xe0] sm:$0xff] }
 0xfd7   : > { %12395 = vmatprep.subr.bf16.mxu1 %v12394_v18  ;;  %v12414_v16 = vpack.c.bf16 %v8859_v2, %v8858_v38  ;;  %v8842_v18 = vld [vmem:[%s14349_s14 + $0x160] sm:$0xff]  ;;  %v9033_v7 = vld [vmem:[%s14350_s16 + $0xe8] sm:$0xff] }
 0xfd8   : > { %v12416_v47 = vpack.c.bf16 %v8843_v19, %v8842_v18  ;;  %v9024_v38 = vld [vmem:[%s14350_s16 + $0xa0] sm:$0xff]  ;;  %v9017_v61 = vld [vmem:[%s14350_s16 + $0x68] sm:$0xff] }
 0xfd9   : > { %12365 = vmatpush3.bf16.msra.mxu0 %v12364_v26  ;;  %v8860_v26 = vld [vmem:[%s14349_s14 + $0x1f0] sm:$0xff]  ;;  %v9048_v6 = vld [vmem:[%s14350_s16 + $0x160] sm:$0xff] }
 0xfda   : > { %12397 = vmatpush3.bf16.msra.mxu1 %v12396_v27  ;;  %12367 = vmatprep.subr.bf16.mxu0 %v12366_v28  ;;  %v12386_v27 = vpack.c.bf16 %v8829_v23, %v8828_v20  ;;  %v8861_v28 = vld [vmem:[%s14349_s14 + $0x1f8] sm:$0xff]  ;;  %v9040_v20 = vld [vmem:[%s14350_s16 + $0x120] sm:$0xff] }
 0xfdb   : > { %12399 = vmatprep.subr.bf16.mxu1 %v12398_v8  ;;  %v12418_v30 = vpack.c.bf16 %v8861_v28, %v8860_v26  ;;  %v12388_v8 = vpack.c.bf16 %v8813_v1, %v8812_v4  ;;  %v9041_v26 = vld [vmem:[%s14350_s16 + $0x128] sm:$0xff]  ;;  %v9027_v28 = vld [vmem:[%s14350_s16 + $0xb8] sm:$0xff]  ;;  %v9058_v4 = vld [vmem:[%s14350_s16 + $0x1b0] sm:$0xff] }
 0xfdc   : > { %v9059_v1 = vld [vmem:[%s14350_s16 + $0x1b8] sm:$0xff] }
 0xfdd   : > { %12369 = vmatpush3.bf16.msra.mxu0 %v12368_v35  ;;  %v9052_v35 = vld [vmem:[%s14350_s16 + $0x180] sm:$0xff] }
 0xfde   : > { %12401 = vmatpush3.bf16.msra.mxu1 %v12400_v37  ;;  %12371 = vmatprep.subr.bf16.mxu0 %v12370_v44  ;;  %v12422_v37 = vpack.c.bf16 %v9021_v22, %v9020_v21  ;;  %v9053_v44 = vld [vmem:[%s14350_s16 + $0x188] sm:$0xff]  ;;  %v9042_v21 = vld [vmem:[%s14350_s16 + $0x130] sm:$0xff]  ;;  %v12466_v22 = vpack.c.bf16 %v9059_v1, %v9058_v4 }
 0xfdf   : > { %12403 = vmatprep.subr.bf16.mxu1 %v12402_v32  ;;  %v12454_v45 = vpack.c.bf16 %v9053_v44, %v9052_v35  ;;  %v8777_v32 = vrot.slane %v8764_v46, %v13684_v40  ;;  %v9043_v35 = vld [vmem:[%s14350_s16 + $0x138] sm:$0xff]  ;;  %v9029_v44 = vld [vmem:[%s14350_s16 + $0xc8] sm:$0xff] }
 0xfe0   : > { %v9061_v46 = vld [vmem:[%s14350_s16 + $0x1c8] sm:$0xff] }
 0xfe1   : > { %12373 = vmatpush3.bf16.msra.mxu0 %v12372_v48 }
 0xfe2   : > { %12405 = vmatpush3.bf16.msra.mxu1 %v12404_v49  ;;  %12375 = vmatprep.subr.bf16.mxu0 %v12374_v59 }
 0xfe3   : > { %12407 = vmatprep.subr.bf16.mxu1 %v12406_v3  ;;  %v9004_v3 = vld [vmem:[%s14350_s16] sm:$0xff] }
 0xfe5   : > { %12377 = vmatpush3.bf16.msra.mxu0 %v12376_v25  ;;  %v12424_v25 = vpack.c.bf16 %v9005_v39, %v9004_v3 }
 0xfe6   : > { %12409 = vmatpush3.bf16.msra.mxu1 %v12408_v9  ;;  %12379 = vmatprep.subr.bf16.mxu0 %v12378_v10  ;;  %v9054_v9 = vld [vmem:[%s14350_s16 + $0x190] sm:$0xff]  ;;  %v9055_v10 = vld [vmem:[%s14350_s16 + $0x198] sm:$0xff] }
 0xfe7   : > { %12411 = vmatprep.subr.bf16.mxu1 %v12410_v11  ;;  %v12456_v11 = vpack.c.bf16 %v9037_v24, %v9036_v43  ;;  %v12458_v2 = vpack.c.bf16 %v9055_v10, %v9054_v9  ;;  %v9046_v43 = vld [vmem:[%s14350_s16 + $0x150] sm:$0xff] }
 0xfe9   : > { %12381 = vmatpush3.bf16.msra.mxu0 %v12380_v12  ;;  %v9038_v12 = vld [vmem:[%s14350_s16 + $0x110] sm:$0xff] }
 0xfea   : > { %12413 = vmatpush3.bf16.msra.mxu1 %v12412_v13  ;;  %12383 = vmatprep.subr.bf16.mxu0 %v12382_v63  ;;  %v9025_v63 = vld [vmem:[%s14350_s16 + $0xa8] sm:$0xff]  ;;  %v12460_v18 = vpack.c.bf16 %v9039_v0, %v9038_v12  ;;  %v9034_v0 = vld [vmem:[%s14350_s16 + $0xf0] sm:$0xff] }
 0xfeb   : > { %12415 = vmatprep.subr.bf16.mxu1 %v12414_v16  ;;  %v9057_v16 = vld [vmem:[%s14350_s16 + $0x1a8] sm:$0xff]  ;;  %v12430_v19 = vpack.c.bf16 %v9025_v63, %v9024_v38  ;;  %v9035_v38 = vld [vmem:[%s14350_s16 + $0xf8] sm:$0xff]  ;;  %v9066_v63 = vld [vmem:[%s14350_s16 + $0x1f0] sm:$0xff] }
 0xfec   : > { %v12462_v23 = vpack.c.bf16 %v9057_v16, %v9056_v41 }
 0xfed   : > { %12385 = vmatpush3.bf16.msra.mxu0 %v12384_v55  ;;  %v9008_v55 = vld [vmem:[%s14350_s16 + $0x20] sm:$0xff] }
 0xfee   : > { %12417 = vmatpush3.bf16.msra.mxu1 %v12416_v47  ;;  %12387 = vmatprep.subr.bf16.mxu0 %v12386_v27  ;;  %v9009_v47 = vld [vmem:[%s14350_s16 + $0x28] sm:$0xff]  ;;  %v9026_v27 = vld [vmem:[%s14350_s16 + $0xb0] sm:$0xff] }
 0xfef   : > { %12419 = vmatprep.subr.bf16.mxu1 %v12418_v30  ;;  %v12432_v30 = vpack.c.bf16 %v9009_v47, %v9008_v55  ;;  %v12434_v31 = vpack.c.bf16 %v9027_v28, %v9026_v27  ;;  %v9050_v47 = vld [vmem:[%s14350_s16 + $0x170] sm:$0xff] }
 0xff1   : > { %12389 = vmatpush3.bf16.msra.mxu0 %v12388_v8  ;;  %v12464_v8 = vpack.c.bf16 %v9041_v26, %v9040_v20  ;;  %v9051_v20 = vld [vmem:[%s14350_s16 + $0x178] sm:$0xff] }
 0xff2   : > { %12421 = vmatpush3.bf16.msra.mxu1 %v12420_v34  ;;  %12423 = vmatprep.subr.bf16.mxu0 %v12422_v37  ;;  %v9011_v34 = vld [vmem:[%s14350_s16 + $0x38] sm:$0xff]  ;;  %v9028_v37 = vld [vmem:[%s14350_s16 + $0xc0] sm:$0xff]  ;;  %v12484_v26 = vpack.c.bf16 %v9051_v20, %v9050_v47 }
 0xff3   : > { %12455 = vmatprep.subr.bf16.mxu1 %v12454_v45  ;;  %v9060_v45 = vld [vmem:[%s14350_s16 + $0x1c0] sm:$0xff] }
0x10a7   : > { %v8617_v56 = vpop.f32.mrb[30].mxu0 }
0x10a8   : > { %v8786_v57 = vadd.f32 %v8769_v50, %v8617_v56  ;;  %v8759_v58 = vpop.f32.mrb[30].mxu1  ;;  %v8619_v48 = vpop.f32.mrb[31].mxu0  ;;  %v12436_v50 = vpack.c.bf16 %v9011_v34, %v9010_v33  ;;  %v9013_v56 = vld [vmem:[%s14350_s16 + $0x48] sm:$0xff] }
0x10a9   : > { %v8788_v49 = vadd.f32 %v8777_v32, %v8759_v58  ;;  %v8787_v59 = vadd.f32 %v8773_v36, %v8619_v48  ;;  %v8761_v29 = vpop.f32.mrb[31].mxu1  ;;  %v12468_v32 = vpack.c.bf16 %v9043_v35, %v9042_v21  ;;  %v12438_v36 = vpack.c.bf16 %v9029_v44, %v9028_v37  ;;  %v9045_v48 = vld [vmem:[%s14350_s16 + $0x148] sm:$0xff] }
0x10aa   : > { %v8790_v62 = vmul.f32 0.01, %v8786_v57  ;;  %v8789_v51 = vadd.f32 %v8781_v54, %v8761_v29  ;;  %v9012_v54 = vld [vmem:[%s14350_s16 + $0x40] sm:$0xff]  ;;  %v12470_v58 = vpack.c.bf16 %v9061_v46, %v9060_v45  ;;  %v9062_v29 = vld [vmem:[%s14350_s16 + $0x1d0] sm:$0xff] }
0x10ab   : > { %v8792_v40 = vmul.f32 0.01, %v8788_v49  ;;  %v8791_v42 = vmul.f32 0.01, %v8787_v59 }
0x10ac   : > { %v8793_v52 = vmul.f32 0.01, %v8789_v51  ;;  %v14120_v5 = vmax.f32 %v8786_v57, %v8790_v62  ;;  %v9044_v57 = vld [vmem:[%s14350_s16 + $0x140] sm:$0xff]  ;;  %v9063_v62 = vld [vmem:[%s14350_s16 + $0x1d8] sm:$0xff] }
0x10ad   : > { %v8795_v53 = vmax.f32 %v8787_v59, %v8791_v42  ;;  %v14131_v13 = vmax.f32 %v8788_v49, %v8792_v40  ;;  %v9030_v49 = vld [vmem:[%s14350_s16 + $0xd0] sm:$0xff]  ;;  %v9031_v59 = vld [vmem:[%s14350_s16 + $0xd8] sm:$0xff]  ;;  %v12472_v3 = vpack.c.bf16 %v9045_v48, %v9044_v57  ;;  %v12474_v24 = vpack.c.bf16 %v9063_v62, %v9062_v29 }
0x10ae   : > { %v8797_v60 = vmax.f32 %v8789_v51, %v8793_v52  ;;  %v12440_v51 = vpack.c.bf16 %v9013_v56, %v9012_v54  ;;  %v12442_v39 = vpack.c.bf16 %v9031_v59, %v9030_v49  ;;  %v9014_v40 = vld [vmem:[%s14350_s16 + $0x50] sm:$0xff]  ;;  %v9015_v42 = vld [vmem:[%s14350_s16 + $0x58] sm:$0xff] }
0x10af   : > { %8926 = vmatprep.mubr.f32.mxu0 %v8795_v53  ;;  %v9047_v52 = vld [vmem:[%s14350_s16 + $0x158] sm:$0xff]  ;;  %v12444_v9 = vpack.c.bf16 %v9015_v42, %v9014_v40 }
0x10b0   : > { %8996 = vmatprep.mubr.f32.mxu1 %v8797_v60  ;;  %8927 = vmatmul.mubr.f32.vlgmr.msra.gmra.mrb[32].mxu0 %v14120_v5  ;;  %v12476_v10 = vpack.c.bf16 %v9047_v52, %v9046_v43 }
0x10b1   : > { %8997 = vmatmul.mubr.f32.vlgmr.msra.gmra.mrb[32].mxu1 %v14131_v13  ;;  %12425 = vmatpush3.bf16.msra.mxu0 %v12424_v25  ;;  %v9065_v25 = vld [vmem:[%s14350_s16 + $0x1e8] sm:$0xff] }
0x10b2   : > { %12457 = vmatpush3.bf16.msra.mxu1 %v12456_v11  ;;  %9132 = vmatprep.mubr.f32.mxu0 %v8795_v53  ;;  %v9064_v53 = vld [vmem:[%s14350_s16 + $0x1e0] sm:$0xff] }
0x10b3   : > { %9202 = vmatprep.mubr.f32.mxu1 %v8797_v60  ;;  %12427 = vmatprep.subr.bf16.mxu0 %v12426_v14  ;;  %v12446_v60 = vpack.c.bf16 %v9033_v7, %v9032_v15  ;;  %v9016_v11 = vld [vmem:[%s14350_s16 + $0x60] sm:$0xff]  ;;  %v12478_v12 = vpack.c.bf16 %v9065_v25, %v9064_v53  ;;  %v9049_v14 = vld [vmem:[%s14350_s16 + $0x168] sm:$0xff] }
0x10b4   : > { %12459 = vmatprep.subr.bf16.mxu1 %v12458_v2  ;;  %v9067_v2 = vld [vmem:[%s14350_s16 + $0x1f8] sm:$0xff]  ;;  %v12448_v41 = vpack.c.bf16 %v9017_v61, %v9016_v11  ;;  %v12480_v16 = vpack.c.bf16 %v9049_v14, %v9048_v6 }
0x10b5   : > { %12429 = vmatpush3.bf16.msra.mxu0 %v12428_v17  ;;  %v12450_v17 = vpack.c.bf16 %v9035_v38, %v9034_v0  ;;  %v12482_v55 = vpack.c.bf16 %v9067_v2, %v9066_v63 }
0x10b6   : > { %12461 = vmatpush3.bf16.msra.mxu1 %v12460_v18  ;;  %12431 = vmatprep.subr.bf16.mxu0 %v12430_v19  ;;  %v9018_v18 = vld [vmem:[%s14350_s16 + $0x70] sm:$0xff]  ;;  %v9019_v19 = vld [vmem:[%s14350_s16 + $0x78] sm:$0xff] }
0x10b7   : > { %12463 = vmatprep.subr.bf16.mxu1 %v12462_v23  ;;  %v12452_v23 = vpack.c.bf16 %v9019_v19, %v9018_v18 }
0x10b9   : > { %12433 = vmatpush3.bf16.msra.mxu0 %v12432_v30 }
0x10ba   : > { %12465 = vmatpush3.bf16.msra.mxu1 %v12464_v8  ;;  %12435 = vmatprep.subr.bf16.mxu0 %v12434_v31 }
0x10bb   : > { %12467 = vmatprep.subr.bf16.mxu1 %v12466_v22 }
0x10bd   : > { %12437 = vmatpush3.bf16.msra.mxu0 %v12436_v50 }
0x10be   : > { %12469 = vmatpush3.bf16.msra.mxu1 %v12468_v32  ;;  %12439 = vmatprep.subr.bf16.mxu0 %v12438_v36 }
0x10bf   : > { %12471 = vmatprep.subr.bf16.mxu1 %v12470_v58 }
0x10c1   : > { %12441 = vmatpush3.bf16.msra.mxu0 %v12440_v51 }
0x10c2   : > { %12473 = vmatpush3.bf16.msra.mxu1 %v12472_v3  ;;  %12443 = vmatprep.subr.bf16.mxu0 %v12442_v39 }
0x10c3   : > { %12475 = vmatprep.subr.bf16.mxu1 %v12474_v24 }
0x10c5   : > { %12445 = vmatpush3.bf16.msra.mxu0 %v12444_v9 }
0x10c6   : > { %12477 = vmatpush3.bf16.msra.mxu1 %v12476_v10  ;;  %12447 = vmatprep.subr.bf16.mxu0 %v12446_v60 }
0x10c7   : > { %12479 = vmatprep.subr.bf16.mxu1 %v12478_v12 }
0x10c9   : > { %12449 = vmatpush3.bf16.msra.mxu0 %v12448_v41 }
0x10ca   : > { %12481 = vmatpush3.bf16.msra.mxu1 %v12480_v16  ;;  %12451 = vmatprep.subr.bf16.mxu0 %v12450_v17 }
0x10cb   : > { %12483 = vmatprep.subr.bf16.mxu1 %v12482_v55 }
0x10cd   : > { %12453 = vmatpush3.bf16.msra.mxu0 %v12452_v23 }
0x10ce   : > { %12485 = vmatpush3.bf16.msra.mxu1 %v12484_v26 }
0x10d0   : > { %9133 = vmatmul.mubr.f32.vlgmr.msra.gmra.mrb[34].mxu0 %v14120_v5 }
0x10d1   : > { %9203 = vmatmul.mubr.f32.vlgmr.msra.gmra.mrb[34].mxu1 %v14131_v13 }
0x1183   : > { %v9554_v27 = vpop.f32.mrb[32].mxu0 }
0x1184   : > { %v9589_v28 = vpop.f32.mrb[32].mxu1  ;;  %v9555_v4 = vpop.f32.mrb[33].mxu0 }
0x1185   : > { %v9556_v1 = vadd.f32 %v9555_v4, %v9554_v27  ;;  %v9590_v30 = vpop.f32.mrb[33].mxu1 }
0x1186   : > { %v9591_v8 = vadd.f32 %v9590_v30, %v9589_v28 }
0x1188   : > { %v8999_v31 = vadd.f32 %v9591_v8, %v9556_v1 }
0x118a   : > { %9003 = vst.msk [vmem:[%s752_s19] sm:$0x1] %vm9002_vm8, %v8999_v31 }
0x11a3   : > { %v9624_v33 = vpop.f32.mrb[34].mxu0 }
0x11a4   : > { %v9659_v34 = vpop.f32.mrb[34].mxu1  ;;  %v9625_v5 = vpop.f32.mrb[35].mxu0 }
0x11a5   : > { %v9626_v13 = vadd.f32 %v9625_v5, %v9624_v33  ;;  %v9660_v21 = vpop.f32.mrb[35].mxu1 }
0x11a6   : > { %v9661_v22 = vadd.f32 %v9660_v21, %v9659_v34 }
0x11a8   : > { %v9205_v35 = vadd.f32 %v9661_v22, %v9626_v13 }
0x11aa   : > { %9209 = vst.msk [vmem:[%s744_s29] sm:$0x1] %vm9208_vm9, %v9205_v35 }
0x11ab   : > { %13087 = shalt.err (!%p13084_p3)
}
0x11ac   : > { %s13088_s6 = scalar_lea.hbm %s14293_s2, 16  ;;  %s13092_s1 = scalar_lea.hbm %s14419_s8, 32 }
0x11ad   : > { %p13089_p4 = scmp.ne.s32.totalorder %s14293_s2, %s13088_s6  ;;  %p13093_p11 = scmp.lt.u32.totalorder %s14293_s2, %s14419_s8 }
0x11ae   : > { %p13094_p5 = scmp.lt.u32.totalorder %s13092_s1, %s13088_s6  ;;  %p13096_p0 = scmp.lt.u32.totalorder %s13088_s6, %s14293_s2 }
0x11af   : > { %p13090_p7 = pnand %p13089_p4, %p14420_p9 }
0x11b0   : > { %p13095_p6 = por %p13094_p5, %p13093_p11 }
0x11b1   : > { %p13091_p8 = pneg %p13090_p7 }
0x11b2   : > { %p13097_p10 = por %p13096_p0, %p13095_p6 }
0x11b4   : > { %p13098_p13 = pnand %p13097_p10, %p13091_p8 }
0x11b6   : > { %13101 = shalt.err (!%p13098_p13)
}
0x11b7   : > { %12614 = dma.vmem_to_hbm [thread:$0]  (%p14420_p9), %s14295_s30, 16, %s14293_s2, %s9214_s22  }
0x11b8 PF: > { %s14421_s0 = sld [smem:[#allocation35_spill]]  ;;  %s14422_s29 = sld [smem:[#allocation33_spill]] }
0x11b9   : > { %s14423_s25 = sld [smem:[#allocation39_spill]] }
0x11be   : > { %p12681_p12 = scmp.ge.s32.totalorder %s14421_s0, 2  ;;  %s9247_s23 = sand.u32 1, %s14422_s29  }
0x11bf   : > { %p14424_p1 = scmp.ne.s32.totalorder %s14423_s25, 0  ;;  %s9248_s13 = scalar_lea.sflag [#allocation6], %s9247_s23 }
0x11c1   : > { %p12654_p2 = pnand %p12681_p12, %p14424_p1 }
0x11c3   : > { %13147 = dma.done.wait (!%p12654_p2), %s9248_s13, 16  }
0x11c4   : > { %13149 = vsyncadd (!%p12654_p2), %s9248_s13, 4294967280  ;;  %s14425_s29 = sld [smem:[#allocation36_spill]]  ;;  %s14426_s20 = sld [smem:[#allocation34_spill]] }
0x11c5   : > { %s14427_s28 = sld [smem:[#allocation37_spill]]  ;;  %s14428_s13 = smov %s13156_s27 }
0x11ca   : > { %p40_p3 = scmp.ge.s32.totalorder %s14425_s29, 4   ;;  %s14429_s27 = smov %s14426_s20 }
0x11cc   :  { %42 = sbr.rel (!%p40_p3) target bundleno = 19 (0x13), region = 204 }
0x11d3   :  { %9252 = vsyncpa [#allocation5], 1 }
0x11d4   :  { %9254 = vsyncpa [#allocation5 + $0x1], 1 }
0x11d5   :  { %9255 = vsyncpa [#allocation8], 1 }
0x11d6   :  { %9256 = vsyncpa [#allocation11], 1 }
0x11d7   :  { %9257 = vsyncpa [#allocation14], 1 }
0x11d8   :  { %9258 = vsyncpa [#allocation17], 1 }
0x11d9   :  { %9259 = vsyncpa [#allocation20], 1 }
0x11da   :  { %9260 = vsyncpa [#allocation23], 1 }
0x11db   :  { %9261 = vsyncpa [#allocation6], 1 }
0x11dc   :  { %9263 = vsyncpa [#allocation6 + $0x1], 1 }

</bundles_post_ra>
